<compile_context>
chip_gen: v6e
topology: v6e:2x2x1
jax: 0.10.0
libtpu: 0.0.40
codegen_flags: <defaults>
</compile_context>

<pallas_src>
import functools

import jax
import jax.numpy as jnp
from jax import lax
from jax.experimental import pallas as pl
from jax.experimental.pallas import tpu as pltpu


def _round_up(x, m):
    return ((x + m - 1) // m) * m


# -----------------------------------------------------------------------------
# Kernel
# -----------------------------------------------------------------------------
def _lstm_tokcls_kernel(
    emb_ref,    # [T, Bt, E]    bf16  token embeddings (time-major, batch tile)
    mask_ref,   # [T, Bt, 1]    f32   1.0 valid token, 0.0 padding
    wihf_ref,   # [E, 4Hp]      bf16  fwd input->gates (gate-block padded, g x2)
    wihb_ref,   # [E, 4Hp]      bf16  bwd input->gates
    whhf_ref,   # [Hp, 4Hp]     bf16  fwd hidden->gates
    whhb_ref,   # [Hp, 4Hp]     bf16  bwd hidden->gates
    bf_ref,     # [1, 1, 4Hp]   f32   fwd b_ih + b_hh (g x2)
    bb_ref,     # [1, 1, 4Hp]   f32   bwd b_ih + b_hh
    wlf_ref,    # [Hp, 128]     bf16  classifier weight, fwd half (lane padded)
    wlb_ref,    # [Hp, 128]     bf16  classifier weight, bwd half
    blin_ref,   # [1, 1, 128]   f32   classifier bias (lane padded)
    h0_ref,     # [2, Bt, Hp]   f32   initial hidden (dir 0 = fwd, dir 1 = bwd)
    c0_ref,     # [2, Bt, Hp]   f32   initial cell
    out_ref,    # [T, Bt, 128]  f32   logits (cols 0:2 valid)
    gxf_ref,    # scratch [T, Bt, 4Hp] bf16  fwd input-gate pre-acts (+bias)
    gxb_ref,    # scratch [T, Bt, 4Hp] bf16  bwd input-gate pre-acts (+bias)
    outf_ref,   # scratch [T, Bt, Hp]  bf16  fwd hidden outputs
    outb_ref,   # scratch [T, Bt, Hp]  bf16  bwd hidden outputs
    mb_ref,     # scratch [T, Bt, Hp]  f32   mask pre-broadcast to lane width
    *,
    T: int,
    Hp: int,
    unroll,
):
    f32 = jnp.float32
    bf16 = jnp.bfloat16
    dn = (((2,), (0,)), ((), ()))

    # Hoisted input->gates projection with biases folded in: one large bf16 MXU
    # matmul per direction (f32 accumulate), stored as bf16 scratch. This is
    # entirely off the serial recurrence critical path.
    gxf_ref[...] = (
        lax.dot_general(emb_ref[...], wihf_ref[...], dn,
                        preferred_element_type=f32) + bf_ref[...]
    ).astype(bf16)
    gxb_ref[...] = (
        lax.dot_general(emb_ref[...], wihb_ref[...], dn,
                        preferred_element_type=f32) + bb_ref[...]
    ).astype(bf16)

    # Pre-broadcast the validity mask to full lane width once (off the chain),
    # so the per-step state update is a plain VMEM load instead of a broadcast.
    Tt, Bt, _ = mask_ref.shape
    mb_ref[...] = jnp.broadcast_to(mask_ref[...], (Tt, Bt, Hp))

    def one_dir(t, h, c, gx_ref, whh_ref, out_scr):
        m = mb_ref[t]                                   # [Bt, Hp] f32
        gates = gx_ref[t].astype(f32) + jnp.dot(
            h.astype(bf16), whh_ref[...], preferred_element_type=f32)
        # One EUP pass over all 4 gates; g-gate pre-activation was pre-scaled
        # by 2 in the wrapper so tanh(x) = 2*sigmoid(2x) - 1 applies.
        s = jax.nn.sigmoid(gates)                       # [Bt, 4Hp]
        i = s[:, 0 * Hp:1 * Hp]
        f = s[:, 1 * Hp:2 * Hp]
        g = 2.0 * s[:, 2 * Hp:3 * Hp] - 1.0
        o = s[:, 3 * Hp:4 * Hp]
        c_new = f * c + i * g
        h_new = o * jnp.tanh(c_new)
        # pad_packed_sequence pads outputs with zeros at invalid positions.
        out_scr[t] = (m * h_new).astype(bf16)
        # pack_padded semantics: only advance the state on valid tokens.
        h = h + m * (h_new - h)
        c = c + m * (c_new - c)
        return h, c

    # Fused forward/backward recurrence: the two directions are independent,
    # so one step runs both cells (2x ILP on the latency-bound chain).
    def step(s, carry):
        hf, cf, hb, cb = carry
        hf, cf = one_dir(s, hf, cf, gxf_ref, whhf_ref, outf_ref)
        hb, cb = one_dir(T - 1 - s, hb, cb, gxb_ref, whhb_ref, outb_ref)
        return hf, cf, hb, cb

    init = (h0_ref[0], c0_ref[0], h0_ref[1], c0_ref[1])
    lax.fori_loop(0, T, step, init, unroll=unroll)

    # TODO(synk): nn.Dropout() (train mode) not modeled; eval-mode identity used.

    # Classifier head: two [T*Bt,Hp]x[Hp,128] bf16 matmuls; 128-lane-dense store.
    out_ref[...] = (
        lax.dot_general(outf_ref[...], wlf_ref[...], dn,
                        preferred_element_type=f32)
        + lax.dot_general(outb_ref[...], wlb_ref[...], dn,
                          preferred_element_type=f32)
        + blin_ref[...]
    )


# -----------------------------------------------------------------------------
# Wrapper (JAX glue: embedding gather, padding, layout, pallas_call)
# -----------------------------------------------------------------------------
def lstm_token_classifier(x_ids, attention_mask, params, *, b_tile=None):
    """x_ids: [B, T] int32, attention_mask: [B, T] -> logits [B, T, 2] f32."""
    B, T = x_ids.shape
    H = params["hidden_dim"]
    E = params["embedding"].shape[1]
    Hp = _round_up(H, 128)            # gate slices on vreg/lane boundaries
    C_pad = 128                       # lane-dense output width
    SUB = 16                          # bf16 sublane packing quantum for scratch

    # ---- Batch-tile selection: big tiles amortize the serial recurrence ----
    try:
        vmem_cap = int(pltpu.get_tpu_info().vmem_capacity_bytes)
    except Exception:
        vmem_cap = 64 << 20           # conservative (v7x per-TC physical VMEM)
    budget = int(0.75 * vmem_cap)

    def _est_vmem_bytes(bt):
        # double-buffered per-tile I/O
        io = 2 * (T * bt * E * 2 + T * bt * 4 + 2 * 2 * bt * Hp * 4
                  + T * bt * C_pad * 4)
        # weights (default double-buffered)
        w = 2 * (2 * E * 4 * Hp * 2 + 2 * Hp * 4 * Hp * 2 + 2 * 4 * Hp * 4
                 + 2 * Hp * C_pad * 2 + C_pad * 4)
        # scratch (single-buffered)
        scr = 2 * T * bt * 4 * Hp * 2 + 2 * T * bt * Hp * 2 + T * bt * Hp * 4
        return io + w + scr

    if b_tile is None:
        b_tile = 128
    b_tile = max(SUB, min(_round_up(int(b_tile), SUB), _round_up(B, SUB)))
    # Shrink tile until scratch + I/O fit the per-core VMEM budget (v7x: 64 MiB).
    # TODO(synk): for very long T, chunk the hoisted gx projection over time
    # (double-buffered) instead of shrinking the batch tile.
    while b_tile > SUB and _est_vmem_bytes(b_tile) > budget:
        b_tile = max(SUB, _round_up(b_tile // 2, SUB))

    B_pad = _round_up(B, b_tile)
    nb = B_pad // b_tile
    # v7x has 2 TensorCores: keep >= 2 parallel batch tiles when batch allows.
    if nb < 2 and B > 2 * SUB:
        b_tile = _round_up((B + 1) // 2, SUB)
        B_pad = _round_up(B, b_tile)
        nb = B_pad // b_tile

    # ---- Inputs: embedding gather (glue), time-major layout, batch padding ----
    emb = params["embedding"][x_ids].astype(jnp.float32)            # [B, T, E]
    emb_t = jnp.transpose(emb, (1, 0, 2))                           # [T, B, E]
    emb_t = jnp.pad(emb_t, ((0, 0), (0, B_pad - B), (0, 0))).astype(jnp.bfloat16)
    mask_t = jnp.transpose(attention_mask.astype(jnp.float32), (1, 0))[:, :, None]
    mask_t = jnp.pad(mask_t, ((0, 0), (0, B_pad - B), (0, 0)))      # [T, B_pad, 1]

    # tanh(x) = 2*sigmoid(2x)-1: pre-scale the g-gate (index 2) pre-activation.
    gate_scale = jnp.array([1.0, 1.0, 2.0, 1.0], jnp.float32)

    def pad_gates(w_t, rows, rows_pad, dtype):
        # w_t: [rows, 4H] -> [rows_pad, 4Hp]; each gate block zero-padded so the
        # kernel's per-gate slices land on 128-lane boundaries; g block x2.
        w4 = w_t.reshape(rows, 4, H) * gate_scale[None, :, None]
        w4 = jnp.pad(w4, ((0, rows_pad - rows), (0, 0), (0, Hp - H)))
        return w4.reshape(rows_pad, 4 * Hp).astype(dtype)

    wihf = pad_gates(params["w_ih_f"].T, E, E, jnp.bfloat16)        # [E, 4Hp]
    wihb = pad_gates(params["w_ih_b"].T, E, E, jnp.bfloat16)
    whhf = pad_gates(params["w_hh_f"].T, H, Hp, jnp.bfloat16)       # [Hp, 4Hp]
    whhb = pad_gates(params["w_hh_b"].T, H, Hp, jnp.bfloat16)
    bf = pad_gates(params["b_f"].reshape(1, 4 * H), 1, 1,
                   jnp.float32).reshape(1, 1, 4 * Hp)               # [1,1,4Hp]
    bb = pad_gates(params["b_b"].reshape(1, 4 * H), 1, 1,
                   jnp.float32).reshape(1, 1, 4 * Hp)

    wlin_t = params["w_lin"].T.astype(jnp.float32)                  # [2H, 2]
    wlf = jnp.pad(wlin_t[:H], ((0, Hp - H), (0, C_pad - 2))).astype(jnp.bfloat16)
    wlb = jnp.pad(wlin_t[H:], ((0, Hp - H), (0, C_pad - 2))).astype(jnp.bfloat16)
    blin = jnp.pad(params["b_lin"].reshape(1, 1, 2),
                   ((0, 0), (0, 0), (0, C_pad - 2)))                # [1,1,128]

    h0 = jnp.pad(params["h0"], ((0, 0), (0, B_pad - B), (0, Hp - H)))
    c0 = jnp.pad(params["c0"], ((0, 0), (0, B_pad - B), (0, Hp - H)))

    # ---- VMEM limit: generation-aware, leave headroom for Mosaic internals ----
    est = _est_vmem_bytes(b_tile)
    vmem_limit = max(32 << 20, int(1.3 * est) + (4 << 20))
    vmem_limit = max(16 << 20, min(vmem_limit, int(0.85 * vmem_cap)))

    unroll = True if T <= 32 else 8

    kernel = functools.partial(_lstm_tokcls_kernel, T=T, Hp=Hp, unroll=unroll)

    out = pl.pallas_call(
        kernel,
        out_shape=jax.ShapeDtypeStruct((T, B_pad, C_pad), jnp.float32),
        grid_spec=pltpu.PrefetchScalarGridSpec(
            num_scalar_prefetch=0,
            grid=(nb,),
            in_specs=[
                pl.BlockSpec((T, b_tile, E), lambda b: (0, b, 0)),      # emb
                pl.BlockSpec((T, b_tile, 1), lambda b: (0, b, 0)),      # mask
                pl.BlockSpec((E, 4 * Hp), lambda b: (0, 0)),            # wihf
                pl.BlockSpec((E, 4 * Hp), lambda b: (0, 0)),            # wihb
                pl.BlockSpec((Hp, 4 * Hp), lambda b: (0, 0)),           # whhf
                pl.BlockSpec((Hp, 4 * Hp), lambda b: (0, 0)),           # whhb
                pl.BlockSpec((1, 1, 4 * Hp), lambda b: (0, 0, 0)),      # bf
                pl.BlockSpec((1, 1, 4 * Hp), lambda b: (0, 0, 0)),      # bb
                pl.BlockSpec((Hp, C_pad), lambda b: (0, 0)),            # wlf
                pl.BlockSpec((Hp, C_pad), lambda b: (0, 0)),            # wlb
                pl.BlockSpec((1, 1, C_pad), lambda b: (0, 0, 0)),       # blin
                pl.BlockSpec((2, b_tile, Hp), lambda b: (0, b, 0)),     # h0
                pl.BlockSpec((2, b_tile, Hp), lambda b: (0, b, 0)),     # c0
            ],
            out_specs=pl.BlockSpec((T, b_tile, C_pad), lambda b: (0, b, 0)),
            scratch_shapes=[
                pltpu.VMEM((T, b_tile, 4 * Hp), jnp.bfloat16),   # gxf
                pltpu.VMEM((T, b_tile, 4 * Hp), jnp.bfloat16),   # gxb
                pltpu.VMEM((T, b_tile, Hp), jnp.bfloat16),       # outf
                pltpu.VMEM((T, b_tile, Hp), jnp.bfloat16),       # outb
                pltpu.VMEM((T, b_tile, Hp), jnp.float32),        # mask bcast
            ],
        ),
        compiler_params=pltpu.CompilerParams(
            dimension_semantics=("parallel",),
            vmem_limit_bytes=vmem_limit,
        ),
    )(emb_t, mask_t, wihf, wihb, whhf, whhb, bf, bb, wlf, wlb, blin, h0, c0)

    # Drop lane padding and batch padding; back to batch-first.
    return jnp.transpose(out[:, :B, :2], (1, 0, 2))                 # [B, T, 2]


# -----------------------------------------------------------------------------
# Deterministic parameter construction (shapes per the module's __init__)
# -----------------------------------------------------------------------------
def make_params(vocab_size, embedding_dim, hidden_dim, batch_size, key):
    keys = jax.random.split(key, 16)
    H, E = hidden_dim, embedding_dim
    k_lstm = 1.0 / jnp.sqrt(H)
    k_lin = 1.0 / jnp.sqrt(2.0 * H)

    def u(k, shape, bound):
        return jax.random.uniform(k, shape, jnp.float32, -bound, bound)

    emb = jax.random.normal(keys[0], (vocab_size, E), jnp.float32)
    emb = emb.at[0].set(0.0)   # padding_idx=0 -> zero embedding row

    params = dict(
        hidden_dim=H,
        embedding=emb,
        w_ih_f=u(keys[1], (4 * H, E), k_lstm),
        w_hh_f=u(keys[2], (4 * H, H), k_lstm),
        b_f=u(keys[3], (4 * H,), k_lstm) + u(keys[4], (4 * H,), k_lstm),  # b_ih+b_hh
        w_ih_b=u(keys[5], (4 * H, E), k_lstm),
        w_hh_b=u(keys[6], (4 * H, H), k_lstm),
        b_b=u(keys[7], (4 * H,), k_lstm) + u(keys[8], (4 * H,), k_lstm),
        w_lin=u(keys[9], (2, 2 * H), k_lin),
        b_lin=u(keys[10], (2,), k_lin),
        # _init_hidden(): torch.randn per call -> deterministic normal stand-in.
        h0=jax.random.normal(keys[11], (2, batch_size, H), jnp.float32),
        c0=jax.random.normal(keys[12], (2, batch_size, H), jnp.float32),
    )
    return params


# -----------------------------------------------------------------------------
if __name__ == "__main__":
    VOCAB, E, H = 50, 16, 32
    B, T = 4, 8

    key = jax.random.PRNGKey(0)
    k_par, k_ids = jax.random.split(key)
    params = make_params(VOCAB, E, H, B, k_par)

    # Variable-length sequences with suffix padding (as pack_padded requires).
    lengths = jnp.array([8, 5, 3, 6], dtype=jnp.int32)
    attention_mask = (jnp.arange(T)[None, :] < lengths[:, None]).astype(jnp.float32)
    x_ids = jax.random.randint(k_ids, (B, T), 1, VOCAB, dtype=jnp.int32)
    x_ids = jnp.where(attention_mask > 0, x_ids, 0)        # pad token id = 0

    logits = lstm_token_classifier(x_ids, attention_mask, params)
    jax.block_until_ready(logits)

    assert logits.shape == (B, T, 2) and logits.dtype == jnp.float32
    print("KERNEL_OK")
</pallas_src>

<mosaic_0001>
module attributes {stable_mosaic.version = 11 : i64} {
  func.func @_lstm_tokcls_kernel(%arg0: i32, %arg1: memref<8x16x16xbf16, #tpu.memory_space<vmem>>, %arg2: memref<8x16x1xf32, #tpu.memory_space<vmem>>, %arg3: memref<16x512xbf16, #tpu.memory_space<vmem>>, %arg4: memref<16x512xbf16, #tpu.memory_space<vmem>>, %arg5: memref<128x512xbf16, #tpu.memory_space<vmem>>, %arg6: memref<128x512xbf16, #tpu.memory_space<vmem>>, %arg7: memref<1x1x512xf32, #tpu.memory_space<vmem>>, %arg8: memref<1x1x512xf32, #tpu.memory_space<vmem>>, %arg9: memref<128x128xbf16, #tpu.memory_space<vmem>>, %arg10: memref<128x128xbf16, #tpu.memory_space<vmem>>, %arg11: memref<1x1x128xf32, #tpu.memory_space<vmem>>, %arg12: memref<2x16x128xf32, #tpu.memory_space<vmem>>, %arg13: memref<2x16x128xf32, #tpu.memory_space<vmem>>, %arg14: memref<8x16x128xf32, #tpu.memory_space<vmem>>, %arg15: memref<8x16x512xbf16, #tpu.memory_space<vmem>>, %arg16: memref<8x16x512xbf16, #tpu.memory_space<vmem>>, %arg17: memref<8x16x128xbf16, #tpu.memory_space<vmem>>, %arg18: memref<8x16x128xbf16, #tpu.memory_space<vmem>>, %arg19: memref<8x16x128xf32, #tpu.memory_space<vmem>>) attributes {dimension_semantics = [#tpu.dimension_semantics<parallel>], iteration_bounds = array<i64: 1>, scalar_prefetch = 0 : i64, scratch_operands = 5 : i64, tpu.core_type = #tpu.core_type<tc>, window_params = [{transform_indices = @transform_0, window_bounds = array<i64: 8, 16, 16>}, {transform_indices = @transform_1, window_bounds = array<i64: 8, 16, 1>}, {pipeline_mode = #tpu.pipeline_mode<synchronous>, transform_indices = @transform_2, window_bounds = array<i64: 16, 512>}, {pipeline_mode = #tpu.pipeline_mode<synchronous>, transform_indices = @transform_3, window_bounds = array<i64: 16, 512>}, {pipeline_mode = #tpu.pipeline_mode<synchronous>, transform_indices = @transform_4, window_bounds = array<i64: 128, 512>}, {pipeline_mode = #tpu.pipeline_mode<synchronous>, transform_indices = @transform_5, window_bounds = array<i64: 128, 512>}, {pipeline_mode = #tpu.pipeline_mode<synchronous>, transform_indices = @transform_6, window_bounds = array<i64: 1, 1, 512>}, {pipeline_mode = #tpu.pipeline_mode<synchronous>, transform_indices = @transform_7, window_bounds = array<i64: 1, 1, 512>}, {pipeline_mode = #tpu.pipeline_mode<synchronous>, transform_indices = @transform_8, window_bounds = array<i64: 128, 128>}, {pipeline_mode = #tpu.pipeline_mode<synchronous>, transform_indices = @transform_9, window_bounds = array<i64: 128, 128>}, {pipeline_mode = #tpu.pipeline_mode<synchronous>, transform_indices = @transform_10, window_bounds = array<i64: 1, 1, 128>}, {transform_indices = @transform_11, window_bounds = array<i64: 2, 16, 128>}, {transform_indices = @transform_12, window_bounds = array<i64: 2, 16, 128>}, {transform_indices = @transform_13, window_bounds = array<i64: 8, 16, 128>}]} {
    %c0 = arith.constant 0 : index
    %c0_0 = arith.constant 0 : index
    %c0_1 = arith.constant 0 : index
    %0 = vector.load %arg1[%c0, %c0_0, %c0_1] : memref<8x16x16xbf16, #tpu.memory_space<vmem>>, vector<8x16x16xbf16>
    %c0_2 = arith.constant 0 : index
    %c0_3 = arith.constant 0 : index
    %1 = vector.load %arg3[%c0_2, %c0_3] : memref<16x512xbf16, #tpu.memory_space<vmem>>, vector<16x512xbf16>
    %cst = arith.constant dense<0.000000e+00> : vector<8x16x512xf32>
    %2 = tpu.matmul %0, %1, %cst {dimension_numbers = #tpu.dot_dimension_numbers<[2], [0], [0, 1], [1], [0, 0, 0, 1, 1, 1], [], []>} : vector<8x16x16xbf16>, vector<16x512xbf16>, vector<8x16x512xf32> -> vector<8x16x512xf32>
    %c0_4 = arith.constant 0 : index
    %c0_5 = arith.constant 0 : index
    %c0_6 = arith.constant 0 : index
    %3 = vector.load %arg7[%c0_4, %c0_5, %c0_6] : memref<1x1x512xf32, #tpu.memory_space<vmem>>, vector<1x1x512xf32>
    %4 = vector.broadcast %3 : vector<1x1x512xf32> to vector<8x16x512xf32>
    %5 = arith.addf %2, %4 : vector<8x16x512xf32>
    %6 = arith.truncf %5 : vector<8x16x512xf32> to vector<8x16x512xbf16>
    %c0_7 = arith.constant 0 : index
    %c0_8 = arith.constant 0 : index
    %c0_9 = arith.constant 0 : index
    %7 = vector.load %arg15[%c0_7, %c0_8, %c0_9] : memref<8x16x512xbf16, #tpu.memory_space<vmem>>, vector<8x16x512xbf16>
    tpu.vector_store %arg15[%c0_7, %c0_8, %c0_9], %6 {strides = array<i32>} : memref<8x16x512xbf16, #tpu.memory_space<vmem>>, vector<8x16x512xbf16>,
    %c0_10 = arith.constant 0 : index
    %c0_11 = arith.constant 0 : index
    %c0_12 = arith.constant 0 : index
    %8 = vector.load %arg1[%c0_10, %c0_11, %c0_12] : memref<8x16x16xbf16, #tpu.memory_space<vmem>>, vector<8x16x16xbf16>
    %c0_13 = arith.constant 0 : index
    %c0_14 = arith.constant 0 : index
    %9 = vector.load %arg4[%c0_13, %c0_14] : memref<16x512xbf16, #tpu.memory_space<vmem>>, vector<16x512xbf16>
    %cst_15 = arith.constant dense<0.000000e+00> : vector<8x16x512xf32>
    %10 = tpu.matmul %8, %9, %cst_15 {dimension_numbers = #tpu.dot_dimension_numbers<[2], [0], [0, 1], [1], [0, 0, 0, 1, 1, 1], [], []>} : vector<8x16x16xbf16>, vector<16x512xbf16>, vector<8x16x512xf32> -> vector<8x16x512xf32>
    %c0_16 = arith.constant 0 : index
    %c0_17 = arith.constant 0 : index
    %c0_18 = arith.constant 0 : index
    %11 = vector.load %arg8[%c0_16, %c0_17, %c0_18] : memref<1x1x512xf32, #tpu.memory_space<vmem>>, vector<1x1x512xf32>
    %12 = vector.broadcast %11 : vector<1x1x512xf32> to vector<8x16x512xf32>
    %13 = arith.addf %10, %12 : vector<8x16x512xf32>
    %14 = arith.truncf %13 : vector<8x16x512xf32> to vector<8x16x512xbf16>
    %c0_19 = arith.constant 0 : index
    %c0_20 = arith.constant 0 : index
    %c0_21 = arith.constant 0 : index
    %15 = vector.load %arg16[%c0_19, %c0_20, %c0_21] : memref<8x16x512xbf16, #tpu.memory_space<vmem>>, vector<8x16x512xbf16>
    tpu.vector_store %arg16[%c0_19, %c0_20, %c0_21], %14 {strides = array<i32>} : memref<8x16x512xbf16, #tpu.memory_space<vmem>>, vector<8x16x512xbf16>,
    %c0_22 = arith.constant 0 : index
    %c0_23 = arith.constant 0 : index
    %c0_24 = arith.constant 0 : index
    %16 = vector.load %arg2[%c0_22, %c0_23, %c0_24] : memref<8x16x1xf32, #tpu.memory_space<vmem>>, vector<8x16x1xf32>
    %17 = vector.shape_cast %16 : vector<8x16x1xf32> to vector<8x16x1xf32>
    %18 = vector.broadcast %17 : vector<8x16x1xf32> to vector<8x16x128xf32>
    %c0_25 = arith.constant 0 : index
    %c0_26 = arith.constant 0 : index
    %c0_27 = arith.constant 0 : index
    %19 = vector.load %arg19[%c0_25, %c0_26, %c0_27] : memref<8x16x128xf32, #tpu.memory_space<vmem>>, vector<8x16x128xf32>
    tpu.vector_store %arg19[%c0_25, %c0_26, %c0_27], %18 {strides = array<i32>} : memref<8x16x128xf32, #tpu.memory_space<vmem>>, vector<8x16x128xf32>,
    %c0_28 = arith.constant 0 : index
    %c0_29 = arith.constant 0 : index
    %c0_30 = arith.constant 0 : index
    %20 = vector.load %arg12[%c0_28, %c0_29, %c0_30] : memref<2x16x128xf32, #tpu.memory_space<vmem>>, vector<1x16x128xf32>
    %21 = vector.shape_cast %20 : vector<1x16x128xf32> to vector<16x128xf32>
    %c0_31 = arith.constant 0 : index
    %c0_32 = arith.constant 0 : index
    %c0_33 = arith.constant 0 : index
    %22 = vector.load %arg13[%c0_31, %c0_32, %c0_33] : memref<2x16x128xf32, #tpu.memory_space<vmem>>, vector<1x16x128xf32>
    %23 = vector.shape_cast %22 : vector<1x16x128xf32> to vector<16x128xf32>
    %c1 = arith.constant 1 : index
    %c0_34 = arith.constant 0 : index
    %c0_35 = arith.constant 0 : index
    %24 = vector.load %arg12[%c1, %c0_34, %c0_35] : memref<2x16x128xf32, #tpu.memory_space<vmem>>, vector<1x16x128xf32>
    %25 = vector.shape_cast %24 : vector<1x16x128xf32> to vector<16x128xf32>
    %c1_36 = arith.constant 1 : index
    %c0_37 = arith.constant 0 : index
    %c0_38 = arith.constant 0 : index
    %26 = vector.load %arg13[%c1_36, %c0_37, %c0_38] : memref<2x16x128xf32, #tpu.memory_space<vmem>>, vector<1x16x128xf32>
    %27 = vector.shape_cast %26 : vector<1x16x128xf32> to vector<16x128xf32>
    %c0_i32 = arith.constant 0 : i32
    %28 = arith.index_cast %c0_i32 : i32 to index
    %c0_39 = arith.constant 0 : index
    %c0_40 = arith.constant 0 : index
    %29 = vector.load %arg19[%28, %c0_39, %c0_40] : memref<8x16x128xf32, #tpu.memory_space<vmem>>, vector<1x16x128xf32>
    %30 = vector.shape_cast %29 : vector<1x16x128xf32> to vector<16x128xf32>
    %31 = arith.index_cast %c0_i32 : i32 to index
    %c0_41 = arith.constant 0 : index
    %c0_42 = arith.constant 0 : index
    %32 = vector.load %arg15[%31, %c0_41, %c0_42] : memref<8x16x512xbf16, #tpu.memory_space<vmem>>, vector<1x16x512xbf16>
    %33 = vector.shape_cast %32 : vector<1x16x512xbf16> to vector<16x512xbf16>
    %34 = arith.extf %33 : vector<16x512xbf16> to vector<16x512xf32>
    %35 = arith.truncf %21 : vector<16x128xf32> to vector<16x128xbf16>
    %c0_43 = arith.constant 0 : index
    %c0_44 = arith.constant 0 : index
    %36 = vector.load %arg5[%c0_43, %c0_44] : memref<128x512xbf16, #tpu.memory_space<vmem>>, vector<128x512xbf16>
    %cst_45 = arith.constant dense<0.000000e+00> : vector<16x512xf32>
    %37 = tpu.matmul %35, %36, %cst_45 {dimension_numbers = #tpu.dot_dimension_numbers<[1], [0], [0], [1], [0, 0, 1, 1], [], []>} : vector<16x128xbf16>, vector<128x512xbf16>, vector<16x512xf32> -> vector<16x512xf32>
    %38 = arith.addf %34, %37 : vector<16x512xf32>
    %39 = arith.negf %38 : vector<16x512xf32>
    %40 = math.exp %39 : vector<16x512xf32>
    %cst_46 = arith.constant 1.000000e+00 : f32
    %41 = vector.broadcast %cst_46 : f32 to vector<16x512xf32>
    %42 = arith.addf %41, %40 : vector<16x512xf32>
    %43 = arith.divf %41, %42 : vector<16x512xf32>
    %44 = vector.extract_strided_slice %43 {offsets = [0, 0], sizes = [16, 128], strides = [1, 1]} : vector<16x512xf32> to vector<16x128xf32>
    %45 = vector.extract_strided_slice %43 {offsets = [0, 128], sizes = [16, 128], strides = [1, 1]} : vector<16x512xf32> to vector<16x128xf32>
    %46 = vector.extract_strided_slice %43 {offsets = [0, 256], sizes = [16, 128], strides = [1, 1]} : vector<16x512xf32> to vector<16x128xf32>
    %cst_47 = arith.constant 2.000000e+00 : f32
    %47 = vector.broadcast %cst_47 : f32 to vector<16x128xf32>
    %48 = arith.mulf %47, %46 : vector<16x128xf32>
    %cst_48 = arith.constant 1.000000e+00 : f32
    %49 = vector.broadcast %cst_48 : f32 to vector<16x128xf32>
    %50 = arith.subf %48, %49 : vector<16x128xf32>
    %51 = vector.extract_strided_slice %43 {offsets = [0, 384], sizes = [16, 128], strides = [1, 1]} : vector<16x512xf32> to vector<16x128xf32>
    %52 = arith.mulf %45, %23 : vector<16x128xf32>
    %53 = arith.mulf %44, %50 : vector<16x128xf32>
    %54 = arith.addf %52, %53 : vector<16x128xf32>
    %55 = math.tanh %54 : vector<16x128xf32>
    %56 = arith.mulf %51, %55 : vector<16x128xf32>
    %57 = arith.mulf %30, %56 : vector<16x128xf32>
    %58 = arith.truncf %57 : vector<16x128xf32> to vector<16x128xbf16>
    %59 = arith.index_cast %c0_i32 : i32 to index
    %c0_49 = arith.constant 0 : index
    %c0_50 = arith.constant 0 : index
    %60 = vector.load %arg17[%59, %c0_49, %c0_50] : memref<8x16x128xbf16, #tpu.memory_space<vmem>>, vector<1x16x128xbf16>
    %61 = vector.shape_cast %60 : vector<1x16x128xbf16> to vector<16x128xbf16>
    %62 = vector.shape_cast %58 : vector<16x128xbf16> to vector<1x16x128xbf16>
    tpu.vector_store %arg17[%59, %c0_49, %c0_50], %62 {strides = array<i32>} : memref<8x16x128xbf16, #tpu.memory_space<vmem>>, vector<1x16x128xbf16>,
    %63 = arith.subf %56, %21 : vector<16x128xf32>
    %64 = arith.mulf %30, %63 : vector<16x128xf32>
    %65 = arith.addf %21, %64 : vector<16x128xf32>
    %66 = arith.subf %54, %23 : vector<16x128xf32>
    %67 = arith.mulf %30, %66 : vector<16x128xf32>
    %68 = arith.addf %23, %67 : vector<16x128xf32>
    %c7_i32 = arith.constant 7 : i32
    %69 = arith.subi %c7_i32, %c0_i32 : i32
    %70 = arith.index_cast %69 : i32 to index
    %c0_51 = arith.constant 0 : index
    %c0_52 = arith.constant 0 : index
    %71 = vector.load %arg19[%70, %c0_51, %c0_52] : memref<8x16x128xf32, #tpu.memory_space<vmem>>, vector<1x16x128xf32>
    %72 = vector.shape_cast %71 : vector<1x16x128xf32> to vector<16x128xf32>
    %73 = arith.index_cast %69 : i32 to index
    %c0_53 = arith.constant 0 : index
    %c0_54 = arith.constant 0 : index
    %74 = vector.load %arg16[%73, %c0_53, %c0_54] : memref<8x16x512xbf16, #tpu.memory_space<vmem>>, vector<1x16x512xbf16>
    %75 = vector.shape_cast %74 : vector<1x16x512xbf16> to vector<16x512xbf16>
    %76 = arith.extf %75 : vector<16x512xbf16> to vector<16x512xf32>
    %77 = arith.truncf %25 : vector<16x128xf32> to vector<16x128xbf16>
    %c0_55 = arith.constant 0 : index
    %c0_56 = arith.constant 0 : index
    %78 = vector.load %arg6[%c0_55, %c0_56] : memref<128x512xbf16, #tpu.memory_space<vmem>>, vector<128x512xbf16>
    %cst_57 = arith.constant dense<0.000000e+00> : vector<16x512xf32>
    %79 = tpu.matmul %77, %78, %cst_57 {dimension_numbers = #tpu.dot_dimension_numbers<[1], [0], [0], [1], [0, 0, 1, 1], [], []>} : vector<16x128xbf16>, vector<128x512xbf16>, vector<16x512xf32> -> vector<16x512xf32>
    %80 = arith.addf %76, %79 : vector<16x512xf32>
    %81 = arith.negf %80 : vector<16x512xf32>
    %82 = math.exp %81 : vector<16x512xf32>
    %cst_58 = arith.constant 1.000000e+00 : f32
    %83 = vector.broadcast %cst_58 : f32 to vector<16x512xf32>
    %84 = arith.addf %83, %82 : vector<16x512xf32>
    %85 = arith.divf %83, %84 : vector<16x512xf32>
    %86 = vector.extract_strided_slice %85 {offsets = [0, 0], sizes = [16, 128], strides = [1, 1]} : vector<16x512xf32> to vector<16x128xf32>
    %87 = vector.extract_strided_slice %85 {offsets = [0, 128], sizes = [16, 128], strides = [1, 1]} : vector<16x512xf32> to vector<16x128xf32>
    %88 = vector.extract_strided_slice %85 {offsets = [0, 256], sizes = [16, 128], strides = [1, 1]} : vector<16x512xf32> to vector<16x128xf32>
    %cst_59 = arith.constant 2.000000e+00 : f32
    %89 = vector.broadcast %cst_59 : f32 to vector<16x128xf32>
    %90 = arith.mulf %89, %88 : vector<16x128xf32>
    %cst_60 = arith.constant 1.000000e+00 : f32
    %91 = vector.broadcast %cst_60 : f32 to vector<16x128xf32>
    %92 = arith.subf %90, %91 : vector<16x128xf32>
    %93 = vector.extract_strided_slice %85 {offsets = [0, 384], sizes = [16, 128], strides = [1, 1]} : vector<16x512xf32> to vector<16x128xf32>
    %94 = arith.mulf %87, %27 : vector<16x128xf32>
    %95 = arith.mulf %86, %92 : vector<16x128xf32>
    %96 = arith.addf %94, %95 : vector<16x128xf32>
    %97 = math.tanh %96 : vector<16x128xf32>
    %98 = arith.mulf %93, %97 : vector<16x128xf32>
    %99 = arith.mulf %72, %98 : vector<16x128xf32>
    %100 = arith.truncf %99 : vector<16x128xf32> to vector<16x128xbf16>
    %101 = arith.index_cast %69 : i32 to index
    %c0_61 = arith.constant 0 : index
    %c0_62 = arith.constant 0 : index
    %102 = vector.load %arg18[%101, %c0_61, %c0_62] : memref<8x16x128xbf16, #tpu.memory_space<vmem>>, vector<1x16x128xbf16>
    %103 = vector.shape_cast %102 : vector<1x16x128xbf16> to vector<16x128xbf16>
    %104 = vector.shape_cast %100 : vector<16x128xbf16> to vector<1x16x128xbf16>
    tpu.vector_store %arg18[%101, %c0_61, %c0_62], %104 {strides = array<i32>} : memref<8x16x128xbf16, #tpu.memory_space<vmem>>, vector<1x16x128xbf16>,
    %105 = arith.subf %98, %25 : vector<16x128xf32>
    %106 = arith.mulf %72, %105 : vector<16x128xf32>
    %107 = arith.addf %25, %106 : vector<16x128xf32>
    %108 = arith.subf %96, %27 : vector<16x128xf32>
    %109 = arith.mulf %72, %108 : vector<16x128xf32>
    %110 = arith.addf %27, %109 : vector<16x128xf32>
    %c1_i32 = arith.constant 1 : i32
    %111 = arith.index_cast %c1_i32 : i32 to index
    %c0_63 = arith.constant 0 : index
    %c0_64 = arith.constant 0 : index
    %112 = vector.load %arg19[%111, %c0_63, %c0_64] : memref<8x16x128xf32, #tpu.memory_space<vmem>>, vector<1x16x128xf32>
    %113 = vector.shape_cast %112 : vector<1x16x128xf32> to vector<16x128xf32>
    %114 = arith.index_cast %c1_i32 : i32 to index
    %c0_65 = arith.constant 0 : index
    %c0_66 = arith.constant 0 : index
    %115 = vector.load %arg15[%114, %c0_65, %c0_66] : memref<8x16x512xbf16, #tpu.memory_space<vmem>>, vector<1x16x512xbf16>
    %116 = vector.shape_cast %115 : vector<1x16x512xbf16> to vector<16x512xbf16>
    %117 = arith.extf %116 : vector<16x512xbf16> to vector<16x512xf32>
    %118 = arith.truncf %65 : vector<16x128xf32> to vector<16x128xbf16>
    %c0_67 = arith.constant 0 : index
    %c0_68 = arith.constant 0 : index
    %119 = vector.load %arg5[%c0_67, %c0_68] : memref<128x512xbf16, #tpu.memory_space<vmem>>, vector<128x512xbf16>
    %cst_69 = arith.constant dense<0.000000e+00> : vector<16x512xf32>
    %120 = tpu.matmul %118, %119, %cst_69 {dimension_numbers = #tpu.dot_dimension_numbers<[1], [0], [0], [1], [0, 0, 1, 1], [], []>} : vector<16x128xbf16>, vector<128x512xbf16>, vector<16x512xf32> -> vector<16x512xf32>
    %121 = arith.addf %117, %120 : vector<16x512xf32>
    %122 = arith.negf %121 : vector<16x512xf32>
    %123 = math.exp %122 : vector<16x512xf32>
    %cst_70 = arith.constant 1.000000e+00 : f32
    %124 = vector.broadcast %cst_70 : f32 to vector<16x512xf32>
    %125 = arith.addf %124, %123 : vector<16x512xf32>
    %126 = arith.divf %124, %125 : vector<16x512xf32>
    %127 = vector.extract_strided_slice %126 {offsets = [0, 0], sizes = [16, 128], strides = [1, 1]} : vector<16x512xf32> to vector<16x128xf32>
    %128 = vector.extract_strided_slice %126 {offsets = [0, 128], sizes = [16, 128], strides = [1, 1]} : vector<16x512xf32> to vector<16x128xf32>
    %129 = vector.extract_strided_slice %126 {offsets = [0, 256], sizes = [16, 128], strides = [1, 1]} : vector<16x512xf32> to vector<16x128xf32>
    %cst_71 = arith.constant 2.000000e+00 : f32
    %130 = vector.broadcast %cst_71 : f32 to vector<16x128xf32>
    %131 = arith.mulf %130, %129 : vector<16x128xf32>
    %cst_72 = arith.constant 1.000000e+00 : f32
    %132 = vector.broadcast %cst_72 : f32 to vector<16x128xf32>
    %133 = arith.subf %131, %132 : vector<16x128xf32>
    %134 = vector.extract_strided_slice %126 {offsets = [0, 384], sizes = [16, 128], strides = [1, 1]} : vector<16x512xf32> to vector<16x128xf32>
    %135 = arith.mulf %128, %68 : vector<16x128xf32>
    %136 = arith.mulf %127, %133 : vector<16x128xf32>
    %137 = arith.addf %135, %136 : vector<16x128xf32>
    %138 = math.tanh %137 : vector<16x128xf32>
    %139 = arith.mulf %134, %138 : vector<16x128xf32>
    %140 = arith.mulf %113, %139 : vector<16x128xf32>
    %141 = arith.truncf %140 : vector<16x128xf32> to vector<16x128xbf16>
    %142 = arith.index_cast %c1_i32 : i32 to index
    %c0_73 = arith.constant 0 : index
    %c0_74 = arith.constant 0 : index
    %143 = vector.load %arg17[%142, %c0_73, %c0_74] : memref<8x16x128xbf16, #tpu.memory_space<vmem>>, vector<1x16x128xbf16>
    %144 = vector.shape_cast %143 : vector<1x16x128xbf16> to vector<16x128xbf16>
    %145 = vector.shape_cast %141 : vector<16x128xbf16> to vector<1x16x128xbf16>
    tpu.vector_store %arg17[%142, %c0_73, %c0_74], %145 {strides = array<i32>} : memref<8x16x128xbf16, #tpu.memory_space<vmem>>, vector<1x16x128xbf16>,
    %146 = arith.subf %139, %65 : vector<16x128xf32>
    %147 = arith.mulf %113, %146 : vector<16x128xf32>
    %148 = arith.addf %65, %147 : vector<16x128xf32>
    %149 = arith.subf %137, %68 : vector<16x128xf32>
    %150 = arith.mulf %113, %149 : vector<16x128xf32>
    %151 = arith.addf %68, %150 : vector<16x128xf32>
    %c7_i32_75 = arith.constant 7 : i32
    %152 = arith.subi %c7_i32_75, %c1_i32 : i32
    %153 = arith.index_cast %152 : i32 to index
    %c0_76 = arith.constant 0 : index
    %c0_77 = arith.constant 0 : index
    %154 = vector.load %arg19[%153, %c0_76, %c0_77] : memref<8x16x128xf32, #tpu.memory_space<vmem>>, vector<1x16x128xf32>
    %155 = vector.shape_cast %154 : vector<1x16x128xf32> to vector<16x128xf32>
    %156 = arith.index_cast %152 : i32 to index
    %c0_78 = arith.constant 0 : index
    %c0_79 = arith.constant 0 : index
    %157 = vector.load %arg16[%156, %c0_78, %c0_79] : memref<8x16x512xbf16, #tpu.memory_space<vmem>>, vector<1x16x512xbf16>
    %158 = vector.shape_cast %157 : vector<1x16x512xbf16> to vector<16x512xbf16>
    %159 = arith.extf %158 : vector<16x512xbf16> to vector<16x512xf32>
    %160 = arith.truncf %107 : vector<16x128xf32> to vector<16x128xbf16>
    %c0_80 = arith.constant 0 : index
    %c0_81 = arith.constant 0 : index
    %161 = vector.load %arg6[%c0_80, %c0_81] : memref<128x512xbf16, #tpu.memory_space<vmem>>, vector<128x512xbf16>
    %cst_82 = arith.constant dense<0.000000e+00> : vector<16x512xf32>
    %162 = tpu.matmul %160, %161, %cst_82 {dimension_numbers = #tpu.dot_dimension_numbers<[1], [0], [0], [1], [0, 0, 1, 1], [], []>} : vector<16x128xbf16>, vector<128x512xbf16>, vector<16x512xf32> -> vector<16x512xf32>
    %163 = arith.addf %159, %162 : vector<16x512xf32>
    %164 = arith.negf %163 : vector<16x512xf32>
    %165 = math.exp %164 : vector<16x512xf32>
    %cst_83 = arith.constant 1.000000e+00 : f32
    %166 = vector.broadcast %cst_83 : f32 to vector<16x512xf32>
    %167 = arith.addf %166, %165 : vector<16x512xf32>
    %168 = arith.divf %166, %167 : vector<16x512xf32>
    %169 = vector.extract_strided_slice %168 {offsets = [0, 0], sizes = [16, 128], strides = [1, 1]} : vector<16x512xf32> to vector<16x128xf32>
    %170 = vector.extract_strided_slice %168 {offsets = [0, 128], sizes = [16, 128], strides = [1, 1]} : vector<16x512xf32> to vector<16x128xf32>
    %171 = vector.extract_strided_slice %168 {offsets = [0, 256], sizes = [16, 128], strides = [1, 1]} : vector<16x512xf32> to vector<16x128xf32>
    %cst_84 = arith.constant 2.000000e+00 : f32
    %172 = vector.broadcast %cst_84 : f32 to vector<16x128xf32>
    %173 = arith.mulf %172, %171 : vector<16x128xf32>
    %cst_85 = arith.constant 1.000000e+00 : f32
    %174 = vector.broadcast %cst_85 : f32 to vector<16x128xf32>
    %175 = arith.subf %173, %174 : vector<16x128xf32>
    %176 = vector.extract_strided_slice %168 {offsets = [0, 384], sizes = [16, 128], strides = [1, 1]} : vector<16x512xf32> to vector<16x128xf32>
    %177 = arith.mulf %170, %110 : vector<16x128xf32>
    %178 = arith.mulf %169, %175 : vector<16x128xf32>
    %179 = arith.addf %177, %178 : vector<16x128xf32>
    %180 = math.tanh %179 : vector<16x128xf32>
    %181 = arith.mulf %176, %180 : vector<16x128xf32>
    %182 = arith.mulf %155, %181 : vector<16x128xf32>
    %183 = arith.truncf %182 : vector<16x128xf32> to vector<16x128xbf16>
    %184 = arith.index_cast %152 : i32 to index
    %c0_86 = arith.constant 0 : index
    %c0_87 = arith.constant 0 : index
    %185 = vector.load %arg18[%184, %c0_86, %c0_87] : memref<8x16x128xbf16, #tpu.memory_space<vmem>>, vector<1x16x128xbf16>
    %186 = vector.shape_cast %185 : vector<1x16x128xbf16> to vector<16x128xbf16>
    %187 = vector.shape_cast %183 : vector<16x128xbf16> to vector<1x16x128xbf16>
    tpu.vector_store %arg18[%184, %c0_86, %c0_87], %187 {strides = array<i32>} : memref<8x16x128xbf16, #tpu.memory_space<vmem>>, vector<1x16x128xbf16>,
    %188 = arith.subf %181, %107 : vector<16x128xf32>
    %189 = arith.mulf %155, %188 : vector<16x128xf32>
    %190 = arith.addf %107, %189 : vector<16x128xf32>
    %191 = arith.subf %179, %110 : vector<16x128xf32>
    %192 = arith.mulf %155, %191 : vector<16x128xf32>
    %193 = arith.addf %110, %192 : vector<16x128xf32>
    %c2_i32 = arith.constant 2 : i32
    %194 = arith.index_cast %c2_i32 : i32 to index
    %c0_88 = arith.constant 0 : index
    %c0_89 = arith.constant 0 : index
    %195 = vector.load %arg19[%194, %c0_88, %c0_89] : memref<8x16x128xf32, #tpu.memory_space<vmem>>, vector<1x16x128xf32>
    %196 = vector.shape_cast %195 : vector<1x16x128xf32> to vector<16x128xf32>
    %197 = arith.index_cast %c2_i32 : i32 to index
    %c0_90 = arith.constant 0 : index
    %c0_91 = arith.constant 0 : index
    %198 = vector.load %arg15[%197, %c0_90, %c0_91] : memref<8x16x512xbf16, #tpu.memory_space<vmem>>, vector<1x16x512xbf16>
    %199 = vector.shape_cast %198 : vector<1x16x512xbf16> to vector<16x512xbf16>
    %200 = arith.extf %199 : vector<16x512xbf16> to vector<16x512xf32>
    %201 = arith.truncf %148 : vector<16x128xf32> to vector<16x128xbf16>
    %c0_92 = arith.constant 0 : index
    %c0_93 = arith.constant 0 : index
    %202 = vector.load %arg5[%c0_92, %c0_93] : memref<128x512xbf16, #tpu.memory_space<vmem>>, vector<128x512xbf16>
    %cst_94 = arith.constant dense<0.000000e+00> : vector<16x512xf32>
    %203 = tpu.matmul %201, %202, %cst_94 {dimension_numbers = #tpu.dot_dimension_numbers<[1], [0], [0], [1], [0, 0, 1, 1], [], []>} : vector<16x128xbf16>, vector<128x512xbf16>, vector<16x512xf32> -> vector<16x512xf32>
    %204 = arith.addf %200, %203 : vector<16x512xf32>
    %205 = arith.negf %204 : vector<16x512xf32>
    %206 = math.exp %205 : vector<16x512xf32>
    %cst_95 = arith.constant 1.000000e+00 : f32
    %207 = vector.broadcast %cst_95 : f32 to vector<16x512xf32>
    %208 = arith.addf %207, %206 : vector<16x512xf32>
    %209 = arith.divf %207, %208 : vector<16x512xf32>
    %210 = vector.extract_strided_slice %209 {offsets = [0, 0], sizes = [16, 128], strides = [1, 1]} : vector<16x512xf32> to vector<16x128xf32>
    %211 = vector.extract_strided_slice %209 {offsets = [0, 128], sizes = [16, 128], strides = [1, 1]} : vector<16x512xf32> to vector<16x128xf32>
    %212 = vector.extract_strided_slice %209 {offsets = [0, 256], sizes = [16, 128], strides = [1, 1]} : vector<16x512xf32> to vector<16x128xf32>
    %cst_96 = arith.constant 2.000000e+00 : f32
    %213 = vector.broadcast %cst_96 : f32 to vector<16x128xf32>
    %214 = arith.mulf %213, %212 : vector<16x128xf32>
    %cst_97 = arith.constant 1.000000e+00 : f32
    %215 = vector.broadcast %cst_97 : f32 to vector<16x128xf32>
    %216 = arith.subf %214, %215 : vector<16x128xf32>
    %217 = vector.extract_strided_slice %209 {offsets = [0, 384], sizes = [16, 128], strides = [1, 1]} : vector<16x512xf32> to vector<16x128xf32>
    %218 = arith.mulf %211, %151 : vector<16x128xf32>
    %219 = arith.mulf %210, %216 : vector<16x128xf32>
    %220 = arith.addf %218, %219 : vector<16x128xf32>
    %221 = math.tanh %220 : vector<16x128xf32>
    %222 = arith.mulf %217, %221 : vector<16x128xf32>
    %223 = arith.mulf %196, %222 : vector<16x128xf32>
    %224 = arith.truncf %223 : vector<16x128xf32> to vector<16x128xbf16>
    %225 = arith.index_cast %c2_i32 : i32 to index
    %c0_98 = arith.constant 0 : index
    %c0_99 = arith.constant 0 : index
    %226 = vector.load %arg17[%225, %c0_98, %c0_99] : memref<8x16x128xbf16, #tpu.memory_space<vmem>>, vector<1x16x128xbf16>
    %227 = vector.shape_cast %226 : vector<1x16x128xbf16> to vector<16x128xbf16>
    %228 = vector.shape_cast %224 : vector<16x128xbf16> to vector<1x16x128xbf16>
    tpu.vector_store %arg17[%225, %c0_98, %c0_99], %228 {strides = array<i32>} : memref<8x16x128xbf16, #tpu.memory_space<vmem>>, vector<1x16x128xbf16>,
    %229 = arith.subf %222, %148 : vector<16x128xf32>
    %230 = arith.mulf %196, %229 : vector<16x128xf32>
    %231 = arith.addf %148, %230 : vector<16x128xf32>
    %232 = arith.subf %220, %151 : vector<16x128xf32>
    %233 = arith.mulf %196, %232 : vector<16x128xf32>
    %234 = arith.addf %151, %233 : vector<16x128xf32>
    %c7_i32_100 = arith.constant 7 : i32
    %235 = arith.subi %c7_i32_100, %c2_i32 : i32
    %236 = arith.index_cast %235 : i32 to index
    %c0_101 = arith.constant 0 : index
    %c0_102 = arith.constant 0 : index
    %237 = vector.load %arg19[%236, %c0_101, %c0_102] : memref<8x16x128xf32, #tpu.memory_space<vmem>>, vector<1x16x128xf32>
    %238 = vector.shape_cast %237 : vector<1x16x128xf32> to vector<16x128xf32>
    %239 = arith.index_cast %235 : i32 to index
    %c0_103 = arith.constant 0 : index
    %c0_104 = arith.constant 0 : index
    %240 = vector.load %arg16[%239, %c0_103, %c0_104] : memref<8x16x512xbf16, #tpu.memory_space<vmem>>, vector<1x16x512xbf16>
    %241 = vector.shape_cast %240 : vector<1x16x512xbf16> to vector<16x512xbf16>
    %242 = arith.extf %241 : vector<16x512xbf16> to vector<16x512xf32>
    %243 = arith.truncf %190 : vector<16x128xf32> to vector<16x128xbf16>
    %c0_105 = arith.constant 0 : index
    %c0_106 = arith.constant 0 : index
    %244 = vector.load %arg6[%c0_105, %c0_106] : memref<128x512xbf16, #tpu.memory_space<vmem>>, vector<128x512xbf16>
    %cst_107 = arith.constant dense<0.000000e+00> : vector<16x512xf32>
    %245 = tpu.matmul %243, %244, %cst_107 {dimension_numbers = #tpu.dot_dimension_numbers<[1], [0], [0], [1], [0, 0, 1, 1], [], []>} : vector<16x128xbf16>, vector<128x512xbf16>, vector<16x512xf32> -> vector<16x512xf32>
    %246 = arith.addf %242, %245 : vector<16x512xf32>
    %247 = arith.negf %246 : vector<16x512xf32>
    %248 = math.exp %247 : vector<16x512xf32>
    %cst_108 = arith.constant 1.000000e+00 : f32
    %249 = vector.broadcast %cst_108 : f32 to vector<16x512xf32>
    %250 = arith.addf %249, %248 : vector<16x512xf32>
    %251 = arith.divf %249, %250 : vector<16x512xf32>
    %252 = vector.extract_strided_slice %251 {offsets = [0, 0], sizes = [16, 128], strides = [1, 1]} : vector<16x512xf32> to vector<16x128xf32>
    %253 = vector.extract_strided_slice %251 {offsets = [0, 128], sizes = [16, 128], strides = [1, 1]} : vector<16x512xf32> to vector<16x128xf32>
    %254 = vector.extract_strided_slice %251 {offsets = [0, 256], sizes = [16, 128], strides = [1, 1]} : vector<16x512xf32> to vector<16x128xf32>
    %cst_109 = arith.constant 2.000000e+00 : f32
    %255 = vector.broadcast %cst_109 : f32 to vector<16x128xf32>
    %256 = arith.mulf %255, %254 : vector<16x128xf32>
    %cst_110 = arith.constant 1.000000e+00 : f32
    %257 = vector.broadcast %cst_110 : f32 to vector<16x128xf32>
    %258 = arith.subf %256, %257 : vector<16x128xf32>
    %259 = vector.extract_strided_slice %251 {offsets = [0, 384], sizes = [16, 128], strides = [1, 1]} : vector<16x512xf32> to vector<16x128xf32>
    %260 = arith.mulf %253, %193 : vector<16x128xf32>
    %261 = arith.mulf %252, %258 : vector<16x128xf32>
    %262 = arith.addf %260, %261 : vector<16x128xf32>
    %263 = math.tanh %262 : vector<16x128xf32>
    %264 = arith.mulf %259, %263 : vector<16x128xf32>
    %265 = arith.mulf %238, %264 : vector<16x128xf32>
    %266 = arith.truncf %265 : vector<16x128xf32> to vector<16x128xbf16>
    %267 = arith.index_cast %235 : i32 to index
    %c0_111 = arith.constant 0 : index
    %c0_112 = arith.constant 0 : index
    %268 = vector.load %arg18[%267, %c0_111, %c0_112] : memref<8x16x128xbf16, #tpu.memory_space<vmem>>, vector<1x16x128xbf16>
    %269 = vector.shape_cast %268 : vector<1x16x128xbf16> to vector<16x128xbf16>
    %270 = vector.shape_cast %266 : vector<16x128xbf16> to vector<1x16x128xbf16>
    tpu.vector_store %arg18[%267, %c0_111, %c0_112], %270 {strides = array<i32>} : memref<8x16x128xbf16, #tpu.memory_space<vmem>>, vector<1x16x128xbf16>,
    %271 = arith.subf %264, %190 : vector<16x128xf32>
    %272 = arith.mulf %238, %271 : vector<16x128xf32>
    %273 = arith.addf %190, %272 : vector<16x128xf32>
    %274 = arith.subf %262, %193 : vector<16x128xf32>
    %275 = arith.mulf %238, %274 : vector<16x128xf32>
    %276 = arith.addf %193, %275 : vector<16x128xf32>
    %c3_i32 = arith.constant 3 : i32
    %277 = arith.index_cast %c3_i32 : i32 to index
    %c0_113 = arith.constant 0 : index
    %c0_114 = arith.constant 0 : index
    %278 = vector.load %arg19[%277, %c0_113, %c0_114] : memref<8x16x128xf32, #tpu.memory_space<vmem>>, vector<1x16x128xf32>
    %279 = vector.shape_cast %278 : vector<1x16x128xf32> to vector<16x128xf32>
    %280 = arith.index_cast %c3_i32 : i32 to index
    %c0_115 = arith.constant 0 : index
    %c0_116 = arith.constant 0 : index
    %281 = vector.load %arg15[%280, %c0_115, %c0_116] : memref<8x16x512xbf16, #tpu.memory_space<vmem>>, vector<1x16x512xbf16>
    %282 = vector.shape_cast %281 : vector<1x16x512xbf16> to vector<16x512xbf16>
    %283 = arith.extf %282 : vector<16x512xbf16> to vector<16x512xf32>
    %284 = arith.truncf %231 : vector<16x128xf32> to vector<16x128xbf16>
    %c0_117 = arith.constant 0 : index
    %c0_118 = arith.constant 0 : index
    %285 = vector.load %arg5[%c0_117, %c0_118] : memref<128x512xbf16, #tpu.memory_space<vmem>>, vector<128x512xbf16>
    %cst_119 = arith.constant dense<0.000000e+00> : vector<16x512xf32>
    %286 = tpu.matmul %284, %285, %cst_119 {dimension_numbers = #tpu.dot_dimension_numbers<[1], [0], [0], [1], [0, 0, 1, 1], [], []>} : vector<16x128xbf16>, vector<128x512xbf16>, vector<16x512xf32> -> vector<16x512xf32>
    %287 = arith.addf %283, %286 : vector<16x512xf32>
    %288 = arith.negf %287 : vector<16x512xf32>
    %289 = math.exp %288 : vector<16x512xf32>
    %cst_120 = arith.constant 1.000000e+00 : f32
    %290 = vector.broadcast %cst_120 : f32 to vector<16x512xf32>
    %291 = arith.addf %290, %289 : vector<16x512xf32>
    %292 = arith.divf %290, %291 : vector<16x512xf32>
    %293 = vector.extract_strided_slice %292 {offsets = [0, 0], sizes = [16, 128], strides = [1, 1]} : vector<16x512xf32> to vector<16x128xf32>
    %294 = vector.extract_strided_slice %292 {offsets = [0, 128], sizes = [16, 128], strides = [1, 1]} : vector<16x512xf32> to vector<16x128xf32>
    %295 = vector.extract_strided_slice %292 {offsets = [0, 256], sizes = [16, 128], strides = [1, 1]} : vector<16x512xf32> to vector<16x128xf32>
    %cst_121 = arith.constant 2.000000e+00 : f32
    %296 = vector.broadcast %cst_121 : f32 to vector<16x128xf32>
    %297 = arith.mulf %296, %295 : vector<16x128xf32>
    %cst_122 = arith.constant 1.000000e+00 : f32
    %298 = vector.broadcast %cst_122 : f32 to vector<16x128xf32>
    %299 = arith.subf %297, %298 : vector<16x128xf32>
    %300 = vector.extract_strided_slice %292 {offsets = [0, 384], sizes = [16, 128], strides = [1, 1]} : vector<16x512xf32> to vector<16x128xf32>
    %301 = arith.mulf %294, %234 : vector<16x128xf32>
    %302 = arith.mulf %293, %299 : vector<16x128xf32>
    %303 = arith.addf %301, %302 : vector<16x128xf32>
    %304 = math.tanh %303 : vector<16x128xf32>
    %305 = arith.mulf %300, %304 : vector<16x128xf32>
    %306 = arith.mulf %279, %305 : vector<16x128xf32>
    %307 = arith.truncf %306 : vector<16x128xf32> to vector<16x128xbf16>
    %308 = arith.index_cast %c3_i32 : i32 to index
    %c0_123 = arith.constant 0 : index
    %c0_124 = arith.constant 0 : index
    %309 = vector.load %arg17[%308, %c0_123, %c0_124] : memref<8x16x128xbf16, #tpu.memory_space<vmem>>, vector<1x16x128xbf16>
    %310 = vector.shape_cast %309 : vector<1x16x128xbf16> to vector<16x128xbf16>
    %311 = vector.shape_cast %307 : vector<16x128xbf16> to vector<1x16x128xbf16>
    tpu.vector_store %arg17[%308, %c0_123, %c0_124], %311 {strides = array<i32>} : memref<8x16x128xbf16, #tpu.memory_space<vmem>>, vector<1x16x128xbf16>,
    %312 = arith.subf %305, %231 : vector<16x128xf32>
    %313 = arith.mulf %279, %312 : vector<16x128xf32>
    %314 = arith.addf %231, %313 : vector<16x128xf32>
    %315 = arith.subf %303, %234 : vector<16x128xf32>
    %316 = arith.mulf %279, %315 : vector<16x128xf32>
    %317 = arith.addf %234, %316 : vector<16x128xf32>
    %c7_i32_125 = arith.constant 7 : i32
    %318 = arith.subi %c7_i32_125, %c3_i32 : i32
    %319 = arith.index_cast %318 : i32 to index
    %c0_126 = arith.constant 0 : index
    %c0_127 = arith.constant 0 : index
    %320 = vector.load %arg19[%319, %c0_126, %c0_127] : memref<8x16x128xf32, #tpu.memory_space<vmem>>, vector<1x16x128xf32>
    %321 = vector.shape_cast %320 : vector<1x16x128xf32> to vector<16x128xf32>
    %322 = arith.index_cast %318 : i32 to index
    %c0_128 = arith.constant 0 : index
    %c0_129 = arith.constant 0 : index
    %323 = vector.load %arg16[%322, %c0_128, %c0_129] : memref<8x16x512xbf16, #tpu.memory_space<vmem>>, vector<1x16x512xbf16>
    %324 = vector.shape_cast %323 : vector<1x16x512xbf16> to vector<16x512xbf16>
    %325 = arith.extf %324 : vector<16x512xbf16> to vector<16x512xf32>
    %326 = arith.truncf %273 : vector<16x128xf32> to vector<16x128xbf16>
    %c0_130 = arith.constant 0 : index
    %c0_131 = arith.constant 0 : index
    %327 = vector.load %arg6[%c0_130, %c0_131] : memref<128x512xbf16, #tpu.memory_space<vmem>>, vector<128x512xbf16>
    %cst_132 = arith.constant dense<0.000000e+00> : vector<16x512xf32>
    %328 = tpu.matmul %326, %327, %cst_132 {dimension_numbers = #tpu.dot_dimension_numbers<[1], [0], [0], [1], [0, 0, 1, 1], [], []>} : vector<16x128xbf16>, vector<128x512xbf16>, vector<16x512xf32> -> vector<16x512xf32>
    %329 = arith.addf %325, %328 : vector<16x512xf32>
    %330 = arith.negf %329 : vector<16x512xf32>
    %331 = math.exp %330 : vector<16x512xf32>
    %cst_133 = arith.constant 1.000000e+00 : f32
    %332 = vector.broadcast %cst_133 : f32 to vector<16x512xf32>
    %333 = arith.addf %332, %331 : vector<16x512xf32>
    %334 = arith.divf %332, %333 : vector<16x512xf32>
    %335 = vector.extract_strided_slice %334 {offsets = [0, 0], sizes = [16, 128], strides = [1, 1]} : vector<16x512xf32> to vector<16x128xf32>
    %336 = vector.extract_strided_slice %334 {offsets = [0, 128], sizes = [16, 128], strides = [1, 1]} : vector<16x512xf32> to vector<16x128xf32>
    %337 = vector.extract_strided_slice %334 {offsets = [0, 256], sizes = [16, 128], strides = [1, 1]} : vector<16x512xf32> to vector<16x128xf32>
    %cst_134 = arith.constant 2.000000e+00 : f32
    %338 = vector.broadcast %cst_134 : f32 to vector<16x128xf32>
    %339 = arith.mulf %338, %337 : vector<16x128xf32>
    %cst_135 = arith.constant 1.000000e+00 : f32
    %340 = vector.broadcast %cst_135 : f32 to vector<16x128xf32>
    %341 = arith.subf %339, %340 : vector<16x128xf32>
    %342 = vector.extract_strided_slice %334 {offsets = [0, 384], sizes = [16, 128], strides = [1, 1]} : vector<16x512xf32> to vector<16x128xf32>
    %343 = arith.mulf %336, %276 : vector<16x128xf32>
    %344 = arith.mulf %335, %341 : vector<16x128xf32>
    %345 = arith.addf %343, %344 : vector<16x128xf32>
    %346 = math.tanh %345 : vector<16x128xf32>
    %347 = arith.mulf %342, %346 : vector<16x128xf32>
    %348 = arith.mulf %321, %347 : vector<16x128xf32>
    %349 = arith.truncf %348 : vector<16x128xf32> to vector<16x128xbf16>
    %350 = arith.index_cast %318 : i32 to index
    %c0_136 = arith.constant 0 : index
    %c0_137 = arith.constant 0 : index
    %351 = vector.load %arg18[%350, %c0_136, %c0_137] : memref<8x16x128xbf16, #tpu.memory_space<vmem>>, vector<1x16x128xbf16>
    %352 = vector.shape_cast %351 : vector<1x16x128xbf16> to vector<16x128xbf16>
    %353 = vector.shape_cast %349 : vector<16x128xbf16> to vector<1x16x128xbf16>
    tpu.vector_store %arg18[%350, %c0_136, %c0_137], %353 {strides = array<i32>} : memref<8x16x128xbf16, #tpu.memory_space<vmem>>, vector<1x16x128xbf16>,
    %354 = arith.subf %347, %273 : vector<16x128xf32>
    %355 = arith.mulf %321, %354 : vector<16x128xf32>
    %356 = arith.addf %273, %355 : vector<16x128xf32>
    %357 = arith.subf %345, %276 : vector<16x128xf32>
    %358 = arith.mulf %321, %357 : vector<16x128xf32>
    %359 = arith.addf %276, %358 : vector<16x128xf32>
    %c4_i32 = arith.constant 4 : i32
    %360 = arith.index_cast %c4_i32 : i32 to index
    %c0_138 = arith.constant 0 : index
    %c0_139 = arith.constant 0 : index
    %361 = vector.load %arg19[%360, %c0_138, %c0_139] : memref<8x16x128xf32, #tpu.memory_space<vmem>>, vector<1x16x128xf32>
    %362 = vector.shape_cast %361 : vector<1x16x128xf32> to vector<16x128xf32>
    %363 = arith.index_cast %c4_i32 : i32 to index
    %c0_140 = arith.constant 0 : index
    %c0_141 = arith.constant 0 : index
    %364 = vector.load %arg15[%363, %c0_140, %c0_141] : memref<8x16x512xbf16, #tpu.memory_space<vmem>>, vector<1x16x512xbf16>
    %365 = vector.shape_cast %364 : vector<1x16x512xbf16> to vector<16x512xbf16>
    %366 = arith.extf %365 : vector<16x512xbf16> to vector<16x512xf32>
    %367 = arith.truncf %314 : vector<16x128xf32> to vector<16x128xbf16>
    %c0_142 = arith.constant 0 : index
    %c0_143 = arith.constant 0 : index
    %368 = vector.load %arg5[%c0_142, %c0_143] : memref<128x512xbf16, #tpu.memory_space<vmem>>, vector<128x512xbf16>
    %cst_144 = arith.constant dense<0.000000e+00> : vector<16x512xf32>
    %369 = tpu.matmul %367, %368, %cst_144 {dimension_numbers = #tpu.dot_dimension_numbers<[1], [0], [0], [1], [0, 0, 1, 1], [], []>} : vector<16x128xbf16>, vector<128x512xbf16>, vector<16x512xf32> -> vector<16x512xf32>
    %370 = arith.addf %366, %369 : vector<16x512xf32>
    %371 = arith.negf %370 : vector<16x512xf32>
    %372 = math.exp %371 : vector<16x512xf32>
    %cst_145 = arith.constant 1.000000e+00 : f32
    %373 = vector.broadcast %cst_145 : f32 to vector<16x512xf32>
    %374 = arith.addf %373, %372 : vector<16x512xf32>
    %375 = arith.divf %373, %374 : vector<16x512xf32>
    %376 = vector.extract_strided_slice %375 {offsets = [0, 0], sizes = [16, 128], strides = [1, 1]} : vector<16x512xf32> to vector<16x128xf32>
    %377 = vector.extract_strided_slice %375 {offsets = [0, 128], sizes = [16, 128], strides = [1, 1]} : vector<16x512xf32> to vector<16x128xf32>
    %378 = vector.extract_strided_slice %375 {offsets = [0, 256], sizes = [16, 128], strides = [1, 1]} : vector<16x512xf32> to vector<16x128xf32>
    %cst_146 = arith.constant 2.000000e+00 : f32
    %379 = vector.broadcast %cst_146 : f32 to vector<16x128xf32>
    %380 = arith.mulf %379, %378 : vector<16x128xf32>
    %cst_147 = arith.constant 1.000000e+00 : f32
    %381 = vector.broadcast %cst_147 : f32 to vector<16x128xf32>
    %382 = arith.subf %380, %381 : vector<16x128xf32>
    %383 = vector.extract_strided_slice %375 {offsets = [0, 384], sizes = [16, 128], strides = [1, 1]} : vector<16x512xf32> to vector<16x128xf32>
    %384 = arith.mulf %377, %317 : vector<16x128xf32>
    %385 = arith.mulf %376, %382 : vector<16x128xf32>
    %386 = arith.addf %384, %385 : vector<16x128xf32>
    %387 = math.tanh %386 : vector<16x128xf32>
    %388 = arith.mulf %383, %387 : vector<16x128xf32>
    %389 = arith.mulf %362, %388 : vector<16x128xf32>
    %390 = arith.truncf %389 : vector<16x128xf32> to vector<16x128xbf16>
    %391 = arith.index_cast %c4_i32 : i32 to index
    %c0_148 = arith.constant 0 : index
    %c0_149 = arith.constant 0 : index
    %392 = vector.load %arg17[%391, %c0_148, %c0_149] : memref<8x16x128xbf16, #tpu.memory_space<vmem>>, vector<1x16x128xbf16>
    %393 = vector.shape_cast %392 : vector<1x16x128xbf16> to vector<16x128xbf16>
    %394 = vector.shape_cast %390 : vector<16x128xbf16> to vector<1x16x128xbf16>
    tpu.vector_store %arg17[%391, %c0_148, %c0_149], %394 {strides = array<i32>} : memref<8x16x128xbf16, #tpu.memory_space<vmem>>, vector<1x16x128xbf16>,
    %395 = arith.subf %388, %314 : vector<16x128xf32>
    %396 = arith.mulf %362, %395 : vector<16x128xf32>
    %397 = arith.addf %314, %396 : vector<16x128xf32>
    %398 = arith.subf %386, %317 : vector<16x128xf32>
    %399 = arith.mulf %362, %398 : vector<16x128xf32>
    %400 = arith.addf %317, %399 : vector<16x128xf32>
    %c7_i32_150 = arith.constant 7 : i32
    %401 = arith.subi %c7_i32_150, %c4_i32 : i32
    %402 = arith.index_cast %401 : i32 to index
    %c0_151 = arith.constant 0 : index
    %c0_152 = arith.constant 0 : index
    %403 = vector.load %arg19[%402, %c0_151, %c0_152] : memref<8x16x128xf32, #tpu.memory_space<vmem>>, vector<1x16x128xf32>
    %404 = vector.shape_cast %403 : vector<1x16x128xf32> to vector<16x128xf32>
    %405 = arith.index_cast %401 : i32 to index
    %c0_153 = arith.constant 0 : index
    %c0_154 = arith.constant 0 : index
    %406 = vector.load %arg16[%405, %c0_153, %c0_154] : memref<8x16x512xbf16, #tpu.memory_space<vmem>>, vector<1x16x512xbf16>
    %407 = vector.shape_cast %406 : vector<1x16x512xbf16> to vector<16x512xbf16>
    %408 = arith.extf %407 : vector<16x512xbf16> to vector<16x512xf32>
    %409 = arith.truncf %356 : vector<16x128xf32> to vector<16x128xbf16>
    %c0_155 = arith.constant 0 : index
    %c0_156 = arith.constant 0 : index
    %410 = vector.load %arg6[%c0_155, %c0_156] : memref<128x512xbf16, #tpu.memory_space<vmem>>, vector<128x512xbf16>
    %cst_157 = arith.constant dense<0.000000e+00> : vector<16x512xf32>
    %411 = tpu.matmul %409, %410, %cst_157 {dimension_numbers = #tpu.dot_dimension_numbers<[1], [0], [0], [1], [0, 0, 1, 1], [], []>} : vector<16x128xbf16>, vector<128x512xbf16>, vector<16x512xf32> -> vector<16x512xf32>
    %412 = arith.addf %408, %411 : vector<16x512xf32>
    %413 = arith.negf %412 : vector<16x512xf32>
    %414 = math.exp %413 : vector<16x512xf32>
    %cst_158 = arith.constant 1.000000e+00 : f32
    %415 = vector.broadcast %cst_158 : f32 to vector<16x512xf32>
    %416 = arith.addf %415, %414 : vector<16x512xf32>
    %417 = arith.divf %415, %416 : vector<16x512xf32>
    %418 = vector.extract_strided_slice %417 {offsets = [0, 0], sizes = [16, 128], strides = [1, 1]} : vector<16x512xf32> to vector<16x128xf32>
    %419 = vector.extract_strided_slice %417 {offsets = [0, 128], sizes = [16, 128], strides = [1, 1]} : vector<16x512xf32> to vector<16x128xf32>
    %420 = vector.extract_strided_slice %417 {offsets = [0, 256], sizes = [16, 128], strides = [1, 1]} : vector<16x512xf32> to vector<16x128xf32>
    %cst_159 = arith.constant 2.000000e+00 : f32
    %421 = vector.broadcast %cst_159 : f32 to vector<16x128xf32>
    %422 = arith.mulf %421, %420 : vector<16x128xf32>
    %cst_160 = arith.constant 1.000000e+00 : f32
    %423 = vector.broadcast %cst_160 : f32 to vector<16x128xf32>
    %424 = arith.subf %422, %423 : vector<16x128xf32>
    %425 = vector.extract_strided_slice %417 {offsets = [0, 384], sizes = [16, 128], strides = [1, 1]} : vector<16x512xf32> to vector<16x128xf32>
    %426 = arith.mulf %419, %359 : vector<16x128xf32>
    %427 = arith.mulf %418, %424 : vector<16x128xf32>
    %428 = arith.addf %426, %427 : vector<16x128xf32>
    %429 = math.tanh %428 : vector<16x128xf32>
    %430 = arith.mulf %425, %429 : vector<16x128xf32>
    %431 = arith.mulf %404, %430 : vector<16x128xf32>
    %432 = arith.truncf %431 : vector<16x128xf32> to vector<16x128xbf16>
    %433 = arith.index_cast %401 : i32 to index
    %c0_161 = arith.constant 0 : index
    %c0_162 = arith.constant 0 : index
    %434 = vector.load %arg18[%433, %c0_161, %c0_162] : memref<8x16x128xbf16, #tpu.memory_space<vmem>>, vector<1x16x128xbf16>
    %435 = vector.shape_cast %434 : vector<1x16x128xbf16> to vector<16x128xbf16>
    %436 = vector.shape_cast %432 : vector<16x128xbf16> to vector<1x16x128xbf16>
    tpu.vector_store %arg18[%433, %c0_161, %c0_162], %436 {strides = array<i32>} : memref<8x16x128xbf16, #tpu.memory_space<vmem>>, vector<1x16x128xbf16>,
    %437 = arith.subf %430, %356 : vector<16x128xf32>
    %438 = arith.mulf %404, %437 : vector<16x128xf32>
    %439 = arith.addf %356, %438 : vector<16x128xf32>
    %440 = arith.subf %428, %359 : vector<16x128xf32>
    %441 = arith.mulf %404, %440 : vector<16x128xf32>
    %442 = arith.addf %359, %441 : vector<16x128xf32>
    %c5_i32 = arith.constant 5 : i32
    %443 = arith.index_cast %c5_i32 : i32 to index
    %c0_163 = arith.constant 0 : index
    %c0_164 = arith.constant 0 : index
    %444 = vector.load %arg19[%443, %c0_163, %c0_164] : memref<8x16x128xf32, #tpu.memory_space<vmem>>, vector<1x16x128xf32>
    %445 = vector.shape_cast %444 : vector<1x16x128xf32> to vector<16x128xf32>
    %446 = arith.index_cast %c5_i32 : i32 to index
    %c0_165 = arith.constant 0 : index
    %c0_166 = arith.constant 0 : index
    %447 = vector.load %arg15[%446, %c0_165, %c0_166] : memref<8x16x512xbf16, #tpu.memory_space<vmem>>, vector<1x16x512xbf16>
    %448 = vector.shape_cast %447 : vector<1x16x512xbf16> to vector<16x512xbf16>
    %449 = arith.extf %448 : vector<16x512xbf16> to vector<16x512xf32>
    %450 = arith.truncf %397 : vector<16x128xf32> to vector<16x128xbf16>
    %c0_167 = arith.constant 0 : index
    %c0_168 = arith.constant 0 : index
    %451 = vector.load %arg5[%c0_167, %c0_168] : memref<128x512xbf16, #tpu.memory_space<vmem>>, vector<128x512xbf16>
    %cst_169 = arith.constant dense<0.000000e+00> : vector<16x512xf32>
    %452 = tpu.matmul %450, %451, %cst_169 {dimension_numbers = #tpu.dot_dimension_numbers<[1], [0], [0], [1], [0, 0, 1, 1], [], []>} : vector<16x128xbf16>, vector<128x512xbf16>, vector<16x512xf32> -> vector<16x512xf32>
    %453 = arith.addf %449, %452 : vector<16x512xf32>
    %454 = arith.negf %453 : vector<16x512xf32>
    %455 = math.exp %454 : vector<16x512xf32>
    %cst_170 = arith.constant 1.000000e+00 : f32
    %456 = vector.broadcast %cst_170 : f32 to vector<16x512xf32>
    %457 = arith.addf %456, %455 : vector<16x512xf32>
    %458 = arith.divf %456, %457 : vector<16x512xf32>
    %459 = vector.extract_strided_slice %458 {offsets = [0, 0], sizes = [16, 128], strides = [1, 1]} : vector<16x512xf32> to vector<16x128xf32>
    %460 = vector.extract_strided_slice %458 {offsets = [0, 128], sizes = [16, 128], strides = [1, 1]} : vector<16x512xf32> to vector<16x128xf32>
    %461 = vector.extract_strided_slice %458 {offsets = [0, 256], sizes = [16, 128], strides = [1, 1]} : vector<16x512xf32> to vector<16x128xf32>
    %cst_171 = arith.constant 2.000000e+00 : f32
    %462 = vector.broadcast %cst_171 : f32 to vector<16x128xf32>
    %463 = arith.mulf %462, %461 : vector<16x128xf32>
    %cst_172 = arith.constant 1.000000e+00 : f32
    %464 = vector.broadcast %cst_172 : f32 to vector<16x128xf32>
    %465 = arith.subf %463, %464 : vector<16x128xf32>
    %466 = vector.extract_strided_slice %458 {offsets = [0, 384], sizes = [16, 128], strides = [1, 1]} : vector<16x512xf32> to vector<16x128xf32>
    %467 = arith.mulf %460, %400 : vector<16x128xf32>
    %468 = arith.mulf %459, %465 : vector<16x128xf32>
    %469 = arith.addf %467, %468 : vector<16x128xf32>
    %470 = math.tanh %469 : vector<16x128xf32>
    %471 = arith.mulf %466, %470 : vector<16x128xf32>
    %472 = arith.mulf %445, %471 : vector<16x128xf32>
    %473 = arith.truncf %472 : vector<16x128xf32> to vector<16x128xbf16>
    %474 = arith.index_cast %c5_i32 : i32 to index
    %c0_173 = arith.constant 0 : index
    %c0_174 = arith.constant 0 : index
    %475 = vector.load %arg17[%474, %c0_173, %c0_174] : memref<8x16x128xbf16, #tpu.memory_space<vmem>>, vector<1x16x128xbf16>
    %476 = vector.shape_cast %475 : vector<1x16x128xbf16> to vector<16x128xbf16>
    %477 = vector.shape_cast %473 : vector<16x128xbf16> to vector<1x16x128xbf16>
    tpu.vector_store %arg17[%474, %c0_173, %c0_174], %477 {strides = array<i32>} : memref<8x16x128xbf16, #tpu.memory_space<vmem>>, vector<1x16x128xbf16>,
    %478 = arith.subf %471, %397 : vector<16x128xf32>
    %479 = arith.mulf %445, %478 : vector<16x128xf32>
    %480 = arith.addf %397, %479 : vector<16x128xf32>
    %481 = arith.subf %469, %400 : vector<16x128xf32>
    %482 = arith.mulf %445, %481 : vector<16x128xf32>
    %483 = arith.addf %400, %482 : vector<16x128xf32>
    %c7_i32_175 = arith.constant 7 : i32
    %484 = arith.subi %c7_i32_175, %c5_i32 : i32
    %485 = arith.index_cast %484 : i32 to index
    %c0_176 = arith.constant 0 : index
    %c0_177 = arith.constant 0 : index
    %486 = vector.load %arg19[%485, %c0_176, %c0_177] : memref<8x16x128xf32, #tpu.memory_space<vmem>>, vector<1x16x128xf32>
    %487 = vector.shape_cast %486 : vector<1x16x128xf32> to vector<16x128xf32>
    %488 = arith.index_cast %484 : i32 to index
    %c0_178 = arith.constant 0 : index
    %c0_179 = arith.constant 0 : index
    %489 = vector.load %arg16[%488, %c0_178, %c0_179] : memref<8x16x512xbf16, #tpu.memory_space<vmem>>, vector<1x16x512xbf16>
    %490 = vector.shape_cast %489 : vector<1x16x512xbf16> to vector<16x512xbf16>
    %491 = arith.extf %490 : vector<16x512xbf16> to vector<16x512xf32>
    %492 = arith.truncf %439 : vector<16x128xf32> to vector<16x128xbf16>
    %c0_180 = arith.constant 0 : index
    %c0_181 = arith.constant 0 : index
    %493 = vector.load %arg6[%c0_180, %c0_181] : memref<128x512xbf16, #tpu.memory_space<vmem>>, vector<128x512xbf16>
    %cst_182 = arith.constant dense<0.000000e+00> : vector<16x512xf32>
    %494 = tpu.matmul %492, %493, %cst_182 {dimension_numbers = #tpu.dot_dimension_numbers<[1], [0], [0], [1], [0, 0, 1, 1], [], []>} : vector<16x128xbf16>, vector<128x512xbf16>, vector<16x512xf32> -> vector<16x512xf32>
    %495 = arith.addf %491, %494 : vector<16x512xf32>
    %496 = arith.negf %495 : vector<16x512xf32>
    %497 = math.exp %496 : vector<16x512xf32>
    %cst_183 = arith.constant 1.000000e+00 : f32
    %498 = vector.broadcast %cst_183 : f32 to vector<16x512xf32>
    %499 = arith.addf %498, %497 : vector<16x512xf32>
    %500 = arith.divf %498, %499 : vector<16x512xf32>
    %501 = vector.extract_strided_slice %500 {offsets = [0, 0], sizes = [16, 128], strides = [1, 1]} : vector<16x512xf32> to vector<16x128xf32>
    %502 = vector.extract_strided_slice %500 {offsets = [0, 128], sizes = [16, 128], strides = [1, 1]} : vector<16x512xf32> to vector<16x128xf32>
    %503 = vector.extract_strided_slice %500 {offsets = [0, 256], sizes = [16, 128], strides = [1, 1]} : vector<16x512xf32> to vector<16x128xf32>
    %cst_184 = arith.constant 2.000000e+00 : f32
    %504 = vector.broadcast %cst_184 : f32 to vector<16x128xf32>
    %505 = arith.mulf %504, %503 : vector<16x128xf32>
    %cst_185 = arith.constant 1.000000e+00 : f32
    %506 = vector.broadcast %cst_185 : f32 to vector<16x128xf32>
    %507 = arith.subf %505, %506 : vector<16x128xf32>
    %508 = vector.extract_strided_slice %500 {offsets = [0, 384], sizes = [16, 128], strides = [1, 1]} : vector<16x512xf32> to vector<16x128xf32>
    %509 = arith.mulf %502, %442 : vector<16x128xf32>
    %510 = arith.mulf %501, %507 : vector<16x128xf32>
    %511 = arith.addf %509, %510 : vector<16x128xf32>
    %512 = math.tanh %511 : vector<16x128xf32>
    %513 = arith.mulf %508, %512 : vector<16x128xf32>
    %514 = arith.mulf %487, %513 : vector<16x128xf32>
    %515 = arith.truncf %514 : vector<16x128xf32> to vector<16x128xbf16>
    %516 = arith.index_cast %484 : i32 to index
    %c0_186 = arith.constant 0 : index
    %c0_187 = arith.constant 0 : index
    %517 = vector.load %arg18[%516, %c0_186, %c0_187] : memref<8x16x128xbf16, #tpu.memory_space<vmem>>, vector<1x16x128xbf16>
    %518 = vector.shape_cast %517 : vector<1x16x128xbf16> to vector<16x128xbf16>
    %519 = vector.shape_cast %515 : vector<16x128xbf16> to vector<1x16x128xbf16>
    tpu.vector_store %arg18[%516, %c0_186, %c0_187], %519 {strides = array<i32>} : memref<8x16x128xbf16, #tpu.memory_space<vmem>>, vector<1x16x128xbf16>,
    %520 = arith.subf %513, %439 : vector<16x128xf32>
    %521 = arith.mulf %487, %520 : vector<16x128xf32>
    %522 = arith.addf %439, %521 : vector<16x128xf32>
    %523 = arith.subf %511, %442 : vector<16x128xf32>
    %524 = arith.mulf %487, %523 : vector<16x128xf32>
    %525 = arith.addf %442, %524 : vector<16x128xf32>
    %c6_i32 = arith.constant 6 : i32
    %526 = arith.index_cast %c6_i32 : i32 to index
    %c0_188 = arith.constant 0 : index
    %c0_189 = arith.constant 0 : index
    %527 = vector.load %arg19[%526, %c0_188, %c0_189] : memref<8x16x128xf32, #tpu.memory_space<vmem>>, vector<1x16x128xf32>
    %528 = vector.shape_cast %527 : vector<1x16x128xf32> to vector<16x128xf32>
    %529 = arith.index_cast %c6_i32 : i32 to index
    %c0_190 = arith.constant 0 : index
    %c0_191 = arith.constant 0 : index
    %530 = vector.load %arg15[%529, %c0_190, %c0_191] : memref<8x16x512xbf16, #tpu.memory_space<vmem>>, vector<1x16x512xbf16>
    %531 = vector.shape_cast %530 : vector<1x16x512xbf16> to vector<16x512xbf16>
    %532 = arith.extf %531 : vector<16x512xbf16> to vector<16x512xf32>
    %533 = arith.truncf %480 : vector<16x128xf32> to vector<16x128xbf16>
    %c0_192 = arith.constant 0 : index
    %c0_193 = arith.constant 0 : index
    %534 = vector.load %arg5[%c0_192, %c0_193] : memref<128x512xbf16, #tpu.memory_space<vmem>>, vector<128x512xbf16>
    %cst_194 = arith.constant dense<0.000000e+00> : vector<16x512xf32>
    %535 = tpu.matmul %533, %534, %cst_194 {dimension_numbers = #tpu.dot_dimension_numbers<[1], [0], [0], [1], [0, 0, 1, 1], [], []>} : vector<16x128xbf16>, vector<128x512xbf16>, vector<16x512xf32> -> vector<16x512xf32>
    %536 = arith.addf %532, %535 : vector<16x512xf32>
    %537 = arith.negf %536 : vector<16x512xf32>
    %538 = math.exp %537 : vector<16x512xf32>
    %cst_195 = arith.constant 1.000000e+00 : f32
    %539 = vector.broadcast %cst_195 : f32 to vector<16x512xf32>
    %540 = arith.addf %539, %538 : vector<16x512xf32>
    %541 = arith.divf %539, %540 : vector<16x512xf32>
    %542 = vector.extract_strided_slice %541 {offsets = [0, 0], sizes = [16, 128], strides = [1, 1]} : vector<16x512xf32> to vector<16x128xf32>
    %543 = vector.extract_strided_slice %541 {offsets = [0, 128], sizes = [16, 128], strides = [1, 1]} : vector<16x512xf32> to vector<16x128xf32>
    %544 = vector.extract_strided_slice %541 {offsets = [0, 256], sizes = [16, 128], strides = [1, 1]} : vector<16x512xf32> to vector<16x128xf32>
    %cst_196 = arith.constant 2.000000e+00 : f32
    %545 = vector.broadcast %cst_196 : f32 to vector<16x128xf32>
    %546 = arith.mulf %545, %544 : vector<16x128xf32>
    %cst_197 = arith.constant 1.000000e+00 : f32
    %547 = vector.broadcast %cst_197 : f32 to vector<16x128xf32>
    %548 = arith.subf %546, %547 : vector<16x128xf32>
    %549 = vector.extract_strided_slice %541 {offsets = [0, 384], sizes = [16, 128], strides = [1, 1]} : vector<16x512xf32> to vector<16x128xf32>
    %550 = arith.mulf %543, %483 : vector<16x128xf32>
    %551 = arith.mulf %542, %548 : vector<16x128xf32>
    %552 = arith.addf %550, %551 : vector<16x128xf32>
    %553 = math.tanh %552 : vector<16x128xf32>
    %554 = arith.mulf %549, %553 : vector<16x128xf32>
    %555 = arith.mulf %528, %554 : vector<16x128xf32>
    %556 = arith.truncf %555 : vector<16x128xf32> to vector<16x128xbf16>
    %557 = arith.index_cast %c6_i32 : i32 to index
    %c0_198 = arith.constant 0 : index
    %c0_199 = arith.constant 0 : index
    %558 = vector.load %arg17[%557, %c0_198, %c0_199] : memref<8x16x128xbf16, #tpu.memory_space<vmem>>, vector<1x16x128xbf16>
    %559 = vector.shape_cast %558 : vector<1x16x128xbf16> to vector<16x128xbf16>
    %560 = vector.shape_cast %556 : vector<16x128xbf16> to vector<1x16x128xbf16>
    tpu.vector_store %arg17[%557, %c0_198, %c0_199], %560 {strides = array<i32>} : memref<8x16x128xbf16, #tpu.memory_space<vmem>>, vector<1x16x128xbf16>,
    %561 = arith.subf %554, %480 : vector<16x128xf32>
    %562 = arith.mulf %528, %561 : vector<16x128xf32>
    %563 = arith.addf %480, %562 : vector<16x128xf32>
    %564 = arith.subf %552, %483 : vector<16x128xf32>
    %565 = arith.mulf %528, %564 : vector<16x128xf32>
    %566 = arith.addf %483, %565 : vector<16x128xf32>
    %c7_i32_200 = arith.constant 7 : i32
    %567 = arith.subi %c7_i32_200, %c6_i32 : i32
    %568 = arith.index_cast %567 : i32 to index
    %c0_201 = arith.constant 0 : index
    %c0_202 = arith.constant 0 : index
    %569 = vector.load %arg19[%568, %c0_201, %c0_202] : memref<8x16x128xf32, #tpu.memory_space<vmem>>, vector<1x16x128xf32>
    %570 = vector.shape_cast %569 : vector<1x16x128xf32> to vector<16x128xf32>
    %571 = arith.index_cast %567 : i32 to index
    %c0_203 = arith.constant 0 : index
    %c0_204 = arith.constant 0 : index
    %572 = vector.load %arg16[%571, %c0_203, %c0_204] : memref<8x16x512xbf16, #tpu.memory_space<vmem>>, vector<1x16x512xbf16>
    %573 = vector.shape_cast %572 : vector<1x16x512xbf16> to vector<16x512xbf16>
    %574 = arith.extf %573 : vector<16x512xbf16> to vector<16x512xf32>
    %575 = arith.truncf %522 : vector<16x128xf32> to vector<16x128xbf16>
    %c0_205 = arith.constant 0 : index
    %c0_206 = arith.constant 0 : index
    %576 = vector.load %arg6[%c0_205, %c0_206] : memref<128x512xbf16, #tpu.memory_space<vmem>>, vector<128x512xbf16>
    %cst_207 = arith.constant dense<0.000000e+00> : vector<16x512xf32>
    %577 = tpu.matmul %575, %576, %cst_207 {dimension_numbers = #tpu.dot_dimension_numbers<[1], [0], [0], [1], [0, 0, 1, 1], [], []>} : vector<16x128xbf16>, vector<128x512xbf16>, vector<16x512xf32> -> vector<16x512xf32>
    %578 = arith.addf %574, %577 : vector<16x512xf32>
    %579 = arith.negf %578 : vector<16x512xf32>
    %580 = math.exp %579 : vector<16x512xf32>
    %cst_208 = arith.constant 1.000000e+00 : f32
    %581 = vector.broadcast %cst_208 : f32 to vector<16x512xf32>
    %582 = arith.addf %581, %580 : vector<16x512xf32>
    %583 = arith.divf %581, %582 : vector<16x512xf32>
    %584 = vector.extract_strided_slice %583 {offsets = [0, 0], sizes = [16, 128], strides = [1, 1]} : vector<16x512xf32> to vector<16x128xf32>
    %585 = vector.extract_strided_slice %583 {offsets = [0, 128], sizes = [16, 128], strides = [1, 1]} : vector<16x512xf32> to vector<16x128xf32>
    %586 = vector.extract_strided_slice %583 {offsets = [0, 256], sizes = [16, 128], strides = [1, 1]} : vector<16x512xf32> to vector<16x128xf32>
    %cst_209 = arith.constant 2.000000e+00 : f32
    %587 = vector.broadcast %cst_209 : f32 to vector<16x128xf32>
    %588 = arith.mulf %587, %586 : vector<16x128xf32>
    %cst_210 = arith.constant 1.000000e+00 : f32
    %589 = vector.broadcast %cst_210 : f32 to vector<16x128xf32>
    %590 = arith.subf %588, %589 : vector<16x128xf32>
    %591 = vector.extract_strided_slice %583 {offsets = [0, 384], sizes = [16, 128], strides = [1, 1]} : vector<16x512xf32> to vector<16x128xf32>
    %592 = arith.mulf %585, %525 : vector<16x128xf32>
    %593 = arith.mulf %584, %590 : vector<16x128xf32>
    %594 = arith.addf %592, %593 : vector<16x128xf32>
    %595 = math.tanh %594 : vector<16x128xf32>
    %596 = arith.mulf %591, %595 : vector<16x128xf32>
    %597 = arith.mulf %570, %596 : vector<16x128xf32>
    %598 = arith.truncf %597 : vector<16x128xf32> to vector<16x128xbf16>
    %599 = arith.index_cast %567 : i32 to index
    %c0_211 = arith.constant 0 : index
    %c0_212 = arith.constant 0 : index
    %600 = vector.load %arg18[%599, %c0_211, %c0_212] : memref<8x16x128xbf16, #tpu.memory_space<vmem>>, vector<1x16x128xbf16>
    %601 = vector.shape_cast %600 : vector<1x16x128xbf16> to vector<16x128xbf16>
    %602 = vector.shape_cast %598 : vector<16x128xbf16> to vector<1x16x128xbf16>
    tpu.vector_store %arg18[%599, %c0_211, %c0_212], %602 {strides = array<i32>} : memref<8x16x128xbf16, #tpu.memory_space<vmem>>, vector<1x16x128xbf16>,
    %603 = arith.subf %596, %522 : vector<16x128xf32>
    %604 = arith.mulf %570, %603 : vector<16x128xf32>
    %605 = arith.addf %522, %604 : vector<16x128xf32>
    %606 = arith.subf %594, %525 : vector<16x128xf32>
    %607 = arith.mulf %570, %606 : vector<16x128xf32>
    %608 = arith.addf %525, %607 : vector<16x128xf32>
    %c7_i32_213 = arith.constant 7 : i32
    %609 = arith.index_cast %c7_i32_213 : i32 to index
    %c0_214 = arith.constant 0 : index
    %c0_215 = arith.constant 0 : index
    %610 = vector.load %arg19[%609, %c0_214, %c0_215] : memref<8x16x128xf32, #tpu.memory_space<vmem>>, vector<1x16x128xf32>
    %611 = vector.shape_cast %610 : vector<1x16x128xf32> to vector<16x128xf32>
    %612 = arith.index_cast %c7_i32_213 : i32 to index
    %c0_216 = arith.constant 0 : index
    %c0_217 = arith.constant 0 : index
    %613 = vector.load %arg15[%612, %c0_216, %c0_217] : memref<8x16x512xbf16, #tpu.memory_space<vmem>>, vector<1x16x512xbf16>
    %614 = vector.shape_cast %613 : vector<1x16x512xbf16> to vector<16x512xbf16>
    %615 = arith.extf %614 : vector<16x512xbf16> to vector<16x512xf32>
    %616 = arith.truncf %563 : vector<16x128xf32> to vector<16x128xbf16>
    %c0_218 = arith.constant 0 : index
    %c0_219 = arith.constant 0 : index
    %617 = vector.load %arg5[%c0_218, %c0_219] : memref<128x512xbf16, #tpu.memory_space<vmem>>, vector<128x512xbf16>
    %cst_220 = arith.constant dense<0.000000e+00> : vector<16x512xf32>
    %618 = tpu.matmul %616, %617, %cst_220 {dimension_numbers = #tpu.dot_dimension_numbers<[1], [0], [0], [1], [0, 0, 1, 1], [], []>} : vector<16x128xbf16>, vector<128x512xbf16>, vector<16x512xf32> -> vector<16x512xf32>
    %619 = arith.addf %615, %618 : vector<16x512xf32>
    %620 = arith.negf %619 : vector<16x512xf32>
    %621 = math.exp %620 : vector<16x512xf32>
    %cst_221 = arith.constant 1.000000e+00 : f32
    %622 = vector.broadcast %cst_221 : f32 to vector<16x512xf32>
    %623 = arith.addf %622, %621 : vector<16x512xf32>
    %624 = arith.divf %622, %623 : vector<16x512xf32>
    %625 = vector.extract_strided_slice %624 {offsets = [0, 0], sizes = [16, 128], strides = [1, 1]} : vector<16x512xf32> to vector<16x128xf32>
    %626 = vector.extract_strided_slice %624 {offsets = [0, 128], sizes = [16, 128], strides = [1, 1]} : vector<16x512xf32> to vector<16x128xf32>
    %627 = vector.extract_strided_slice %624 {offsets = [0, 256], sizes = [16, 128], strides = [1, 1]} : vector<16x512xf32> to vector<16x128xf32>
    %cst_222 = arith.constant 2.000000e+00 : f32
    %628 = vector.broadcast %cst_222 : f32 to vector<16x128xf32>
    %629 = arith.mulf %628, %627 : vector<16x128xf32>
    %cst_223 = arith.constant 1.000000e+00 : f32
    %630 = vector.broadcast %cst_223 : f32 to vector<16x128xf32>
    %631 = arith.subf %629, %630 : vector<16x128xf32>
    %632 = vector.extract_strided_slice %624 {offsets = [0, 384], sizes = [16, 128], strides = [1, 1]} : vector<16x512xf32> to vector<16x128xf32>
    %633 = arith.mulf %626, %566 : vector<16x128xf32>
    %634 = arith.mulf %625, %631 : vector<16x128xf32>
    %635 = arith.addf %633, %634 : vector<16x128xf32>
    %636 = math.tanh %635 : vector<16x128xf32>
    %637 = arith.mulf %632, %636 : vector<16x128xf32>
    %638 = arith.mulf %611, %637 : vector<16x128xf32>
    %639 = arith.truncf %638 : vector<16x128xf32> to vector<16x128xbf16>
    %640 = arith.index_cast %c7_i32_213 : i32 to index
    %c0_224 = arith.constant 0 : index
    %c0_225 = arith.constant 0 : index
    %641 = vector.load %arg17[%640, %c0_224, %c0_225] : memref<8x16x128xbf16, #tpu.memory_space<vmem>>, vector<1x16x128xbf16>
    %642 = vector.shape_cast %641 : vector<1x16x128xbf16> to vector<16x128xbf16>
    %643 = vector.shape_cast %639 : vector<16x128xbf16> to vector<1x16x128xbf16>
    tpu.vector_store %arg17[%640, %c0_224, %c0_225], %643 {strides = array<i32>} : memref<8x16x128xbf16, #tpu.memory_space<vmem>>, vector<1x16x128xbf16>,
    %644 = arith.subf %637, %563 : vector<16x128xf32>
    %645 = arith.mulf %611, %644 : vector<16x128xf32>
    %646 = arith.addf %563, %645 : vector<16x128xf32>
    %647 = arith.subf %635, %566 : vector<16x128xf32>
    %648 = arith.mulf %611, %647 : vector<16x128xf32>
    %649 = arith.addf %566, %648 : vector<16x128xf32>
    %c7_i32_226 = arith.constant 7 : i32
    %650 = arith.subi %c7_i32_226, %c7_i32_213 : i32
    %651 = arith.index_cast %650 : i32 to index
    %c0_227 = arith.constant 0 : index
    %c0_228 = arith.constant 0 : index
    %652 = vector.load %arg19[%651, %c0_227, %c0_228] : memref<8x16x128xf32, #tpu.memory_space<vmem>>, vector<1x16x128xf32>
    %653 = vector.shape_cast %652 : vector<1x16x128xf32> to vector<16x128xf32>
    %654 = arith.index_cast %650 : i32 to index
    %c0_229 = arith.constant 0 : index
    %c0_230 = arith.constant 0 : index
    %655 = vector.load %arg16[%654, %c0_229, %c0_230] : memref<8x16x512xbf16, #tpu.memory_space<vmem>>, vector<1x16x512xbf16>
    %656 = vector.shape_cast %655 : vector<1x16x512xbf16> to vector<16x512xbf16>
    %657 = arith.extf %656 : vector<16x512xbf16> to vector<16x512xf32>
    %658 = arith.truncf %605 : vector<16x128xf32> to vector<16x128xbf16>
    %c0_231 = arith.constant 0 : index
    %c0_232 = arith.constant 0 : index
    %659 = vector.load %arg6[%c0_231, %c0_232] : memref<128x512xbf16, #tpu.memory_space<vmem>>, vector<128x512xbf16>
    %cst_233 = arith.constant dense<0.000000e+00> : vector<16x512xf32>
    %660 = tpu.matmul %658, %659, %cst_233 {dimension_numbers = #tpu.dot_dimension_numbers<[1], [0], [0], [1], [0, 0, 1, 1], [], []>} : vector<16x128xbf16>, vector<128x512xbf16>, vector<16x512xf32> -> vector<16x512xf32>
    %661 = arith.addf %657, %660 : vector<16x512xf32>
    %662 = arith.negf %661 : vector<16x512xf32>
    %663 = math.exp %662 : vector<16x512xf32>
    %cst_234 = arith.constant 1.000000e+00 : f32
    %664 = vector.broadcast %cst_234 : f32 to vector<16x512xf32>
    %665 = arith.addf %664, %663 : vector<16x512xf32>
    %666 = arith.divf %664, %665 : vector<16x512xf32>
    %667 = vector.extract_strided_slice %666 {offsets = [0, 0], sizes = [16, 128], strides = [1, 1]} : vector<16x512xf32> to vector<16x128xf32>
    %668 = vector.extract_strided_slice %666 {offsets = [0, 128], sizes = [16, 128], strides = [1, 1]} : vector<16x512xf32> to vector<16x128xf32>
    %669 = vector.extract_strided_slice %666 {offsets = [0, 256], sizes = [16, 128], strides = [1, 1]} : vector<16x512xf32> to vector<16x128xf32>
    %cst_235 = arith.constant 2.000000e+00 : f32
    %670 = vector.broadcast %cst_235 : f32 to vector<16x128xf32>
    %671 = arith.mulf %670, %669 : vector<16x128xf32>
    %cst_236 = arith.constant 1.000000e+00 : f32
    %672 = vector.broadcast %cst_236 : f32 to vector<16x128xf32>
    %673 = arith.subf %671, %672 : vector<16x128xf32>
    %674 = vector.extract_strided_slice %666 {offsets = [0, 384], sizes = [16, 128], strides = [1, 1]} : vector<16x512xf32> to vector<16x128xf32>
    %675 = arith.mulf %668, %608 : vector<16x128xf32>
    %676 = arith.mulf %667, %673 : vector<16x128xf32>
    %677 = arith.addf %675, %676 : vector<16x128xf32>
    %678 = math.tanh %677 : vector<16x128xf32>
    %679 = arith.mulf %674, %678 : vector<16x128xf32>
    %680 = arith.mulf %653, %679 : vector<16x128xf32>
    %681 = arith.truncf %680 : vector<16x128xf32> to vector<16x128xbf16>
    %682 = arith.index_cast %650 : i32 to index
    %c0_237 = arith.constant 0 : index
    %c0_238 = arith.constant 0 : index
    %683 = vector.load %arg18[%682, %c0_237, %c0_238] : memref<8x16x128xbf16, #tpu.memory_space<vmem>>, vector<1x16x128xbf16>
    %684 = vector.shape_cast %683 : vector<1x16x128xbf16> to vector<16x128xbf16>
    %685 = vector.shape_cast %681 : vector<16x128xbf16> to vector<1x16x128xbf16>
    tpu.vector_store %arg18[%682, %c0_237, %c0_238], %685 {strides = array<i32>} : memref<8x16x128xbf16, #tpu.memory_space<vmem>>, vector<1x16x128xbf16>,
    %686 = arith.subf %679, %605 : vector<16x128xf32>
    %687 = arith.mulf %653, %686 : vector<16x128xf32>
    %688 = arith.addf %605, %687 : vector<16x128xf32>
    %689 = arith.subf %677, %608 : vector<16x128xf32>
    %690 = arith.mulf %653, %689 : vector<16x128xf32>
    %691 = arith.addf %608, %690 : vector<16x128xf32>
    %c8_i32 = arith.constant 8 : i32
    %c0_239 = arith.constant 0 : index
    %c0_240 = arith.constant 0 : index
    %c0_241 = arith.constant 0 : index
    %692 = vector.load %arg17[%c0_239, %c0_240, %c0_241] : memref<8x16x128xbf16, #tpu.memory_space<vmem>>, vector<8x16x128xbf16>
    %c0_242 = arith.constant 0 : index
    %c0_243 = arith.constant 0 : index
    %693 = vector.load %arg9[%c0_242, %c0_243] : memref<128x128xbf16, #tpu.memory_space<vmem>>, vector<128x128xbf16>
    %cst_244 = arith.constant dense<0.000000e+00> : vector<8x16x128xf32>
    %694 = tpu.matmul %692, %693, %cst_244 {dimension_numbers = #tpu.dot_dimension_numbers<[2], [0], [0, 1], [1], [0, 0, 0, 1, 1, 1], [], []>} : vector<8x16x128xbf16>, vector<128x128xbf16>, vector<8x16x128xf32> -> vector<8x16x128xf32>
    %c0_245 = arith.constant 0 : index
    %c0_246 = arith.constant 0 : index
    %c0_247 = arith.constant 0 : index
    %695 = vector.load %arg18[%c0_245, %c0_246, %c0_247] : memref<8x16x128xbf16, #tpu.memory_space<vmem>>, vector<8x16x128xbf16>
    %c0_248 = arith.constant 0 : index
    %c0_249 = arith.constant 0 : index
    %696 = vector.load %arg10[%c0_248, %c0_249] : memref<128x128xbf16, #tpu.memory_space<vmem>>, vector<128x128xbf16>
    %cst_250 = arith.constant dense<0.000000e+00> : vector<8x16x128xf32>
    %697 = tpu.matmul %695, %696, %cst_250 {dimension_numbers = #tpu.dot_dimension_numbers<[2], [0], [0, 1], [1], [0, 0, 0, 1, 1, 1], [], []>} : vector<8x16x128xbf16>, vector<128x128xbf16>, vector<8x16x128xf32> -> vector<8x16x128xf32>
    %698 = arith.addf %694, %697 : vector<8x16x128xf32>
    %c0_251 = arith.constant 0 : index
    %c0_252 = arith.constant 0 : index
    %c0_253 = arith.constant 0 : index
    %699 = vector.load %arg11[%c0_251, %c0_252, %c0_253] : memref<1x1x128xf32, #tpu.memory_space<vmem>>, vector<1x1x128xf32>
    %700 = vector.broadcast %699 : vector<1x1x128xf32> to vector<8x16x128xf32>
    %701 = arith.addf %698, %700 : vector<8x16x128xf32>
    %c0_254 = arith.constant 0 : index
    %c0_255 = arith.constant 0 : index
    %c0_256 = arith.constant 0 : index
    %702 = vector.load %arg14[%c0_254, %c0_255, %c0_256] : memref<8x16x128xf32, #tpu.memory_space<vmem>>, vector<8x16x128xf32>
    tpu.vector_store %arg14[%c0_254, %c0_255, %c0_256], %701 {strides = array<i32>} : memref<8x16x128xf32, #tpu.memory_space<vmem>>, vector<8x16x128xf32>,
    return
  }
  func.func @transform_0(%arg0: i32) -> (i32, i32, i32) {
    %c0_i32 = arith.constant 0 : i32
    %c0_i32_0 = arith.constant 0 : i32
    %c0_i32_1 = arith.constant 0 : i32
    return %c0_i32, %arg0, %c0_i32_0 : i32, i32, i32
  }
  func.func @transform_1(%arg0: i32) -> (i32, i32, i32) {
    %c0_i32 = arith.constant 0 : i32
    %c0_i32_0 = arith.constant 0 : i32
    %c0_i32_1 = arith.constant 0 : i32
    return %c0_i32, %arg0, %c0_i32_0 : i32, i32, i32
  }
  func.func @transform_2(%arg0: i32) -> (i32, i32) {
    %c0_i32 = arith.constant 0 : i32
    %c0_i32_0 = arith.constant 0 : i32
    %c0_i32_1 = arith.constant 0 : i32
    return %c0_i32, %c0_i32_0 : i32, i32
  }
  func.func @transform_3(%arg0: i32) -> (i32, i32) {
    %c0_i32 = arith.constant 0 : i32
    %c0_i32_0 = arith.constant 0 : i32
    %c0_i32_1 = arith.constant 0 : i32
    return %c0_i32, %c0_i32_0 : i32, i32
  }
  func.func @transform_4(%arg0: i32) -> (i32, i32) {
    %c0_i32 = arith.constant 0 : i32
    %c0_i32_0 = arith.constant 0 : i32
    %c0_i32_1 = arith.constant 0 : i32
    return %c0_i32, %c0_i32_0 : i32, i32
  }
  func.func @transform_5(%arg0: i32) -> (i32, i32) {
    %c0_i32 = arith.constant 0 : i32
    %c0_i32_0 = arith.constant 0 : i32
    %c0_i32_1 = arith.constant 0 : i32
    return %c0_i32, %c0_i32_0 : i32, i32
  }
  func.func @transform_6(%arg0: i32) -> (i32, i32, i32) {
    %c0_i32 = arith.constant 0 : i32
    %c0_i32_0 = arith.constant 0 : i32
    %c0_i32_1 = arith.constant 0 : i32
    %c0_i32_2 = arith.constant 0 : i32
    return %c0_i32, %c0_i32_0, %c0_i32_1 : i32, i32, i32
  }
  func.func @transform_7(%arg0: i32) -> (i32, i32, i32) {
    %c0_i32 = arith.constant 0 : i32
    %c0_i32_0 = arith.constant 0 : i32
    %c0_i32_1 = arith.constant 0 : i32
    %c0_i32_2 = arith.constant 0 : i32
    return %c0_i32, %c0_i32_0, %c0_i32_1 : i32, i32, i32
  }
  func.func @transform_8(%arg0: i32) -> (i32, i32) {
    %c0_i32 = arith.constant 0 : i32
    %c0_i32_0 = arith.constant 0 : i32
    %c0_i32_1 = arith.constant 0 : i32
    return %c0_i32, %c0_i32_0 : i32, i32
  }
  func.func @transform_9(%arg0: i32) -> (i32, i32) {
    %c0_i32 = arith.constant 0 : i32
    %c0_i32_0 = arith.constant 0 : i32
    %c0_i32_1 = arith.constant 0 : i32
    return %c0_i32, %c0_i32_0 : i32, i32
  }
  func.func @transform_10(%arg0: i32) -> (i32, i32, i32) {
    %c0_i32 = arith.constant 0 : i32
    %c0_i32_0 = arith.constant 0 : i32
    %c0_i32_1 = arith.constant 0 : i32
    %c0_i32_2 = arith.constant 0 : i32
    return %c0_i32, %c0_i32_0, %c0_i32_1 : i32, i32, i32
  }
  func.func @transform_11(%arg0: i32) -> (i32, i32, i32) {
    %c0_i32 = arith.constant 0 : i32
    %c0_i32_0 = arith.constant 0 : i32
    %c0_i32_1 = arith.constant 0 : i32
    return %c0_i32, %arg0, %c0_i32_0 : i32, i32, i32
  }
  func.func @transform_12(%arg0: i32) -> (i32, i32, i32) {
    %c0_i32 = arith.constant 0 : i32
    %c0_i32_0 = arith.constant 0 : i32
    %c0_i32_1 = arith.constant 0 : i32
    return %c0_i32, %arg0, %c0_i32_0 : i32, i32, i32
  }
  func.func @transform_13(%arg0: i32) -> (i32, i32, i32) {
    %c0_i32 = arith.constant 0 : i32
    %c0_i32_0 = arith.constant 0 : i32
    %c0_i32_1 = arith.constant 0 : i32
    return %c0_i32, %arg0, %c0_i32_0 : i32, i32, i32
  }
}

</mosaic_0001>

<bundles_post_ra>
// kernel: tpu_custom_call.1
= control target key start
LH: loop header
LB: loop body
LE: loop exit
PB: predicated region body
PF: predicated region fallthrough
CT: control target
= control target key end

     0   :  { %18 = vsyncpa [#allocation8], 0  ;;  %s12443_s0 = inlined_call_operand.vmem [shape: bf16[8,16,16], index: 0, kind: input, shape index: {}]   ;;  %s12444_s1 = inlined_call_operand.vmem [shape: f32[8,16,1], index: 1, kind: input, shape index: {}]   ;;  %s12445_s2 = inlined_call_operand.hbm [shape: bf16[16,512], index: 2, kind: input, shape index: {}]   ;;  %s12446_s3 = inlined_call_operand.hbm [shape: bf16[16,512], index: 3, kind: input, shape index: {}]   ;;  %s12447_s4 = inlined_call_operand.hbm [shape: bf16[128,512], index: 4, kind: input, shape index: {}]   ;;  %s12448_s5 = inlined_call_operand.hbm [shape: bf16[128,512], index: 5, kind: input, shape index: {}]   ;;  %s12449_s6 = inlined_call_operand.vmem [shape: f32[1,1,512], index: 6, kind: input, shape index: {}]   ;;  %s12450_s7 = inlined_call_operand.vmem [shape: f32[1,1,512], index: 7, kind: input, shape index: {}]   ;;  %s12451_s8 = inlined_call_operand.vmem [shape: bf16[128,128], index: 8, kind: input, shape index: {}]   ;;  %s12452_s9 = inlined_call_operand.hbm [shape: bf16[128,128], index: 9, kind: input, shape index: {}]   ;;  %s12453_s10 = inlined_call_operand.vmem [shape: f32[1,1,128], index: 10, kind: input, shape index: {}]   ;;  %s12454_s11 = inlined_call_operand.hbm [shape: f32[2,16,128], index: 11, kind: input, shape index: {}]   ;;  %s12455_s12 = inlined_call_operand.hbm [shape: f32[2,16,128], index: 12, kind: input, shape index: {}]   ;;  %s12456_s13 = inlined_call_operand.hbm [shape: f32[8,16,128], index: 13, kind: output, shape index: {}]  }
   0x1   :  { %19 = vsyncpa [#allocation11], 0 }
   0x2   :  { %20 = vsyncpa [#allocation14], 0 }
   0x3   :  { %21 = vsyncpa [#allocation17], 0 }
   0x4   :  { %22 = vsyncpa [#allocation9], 0  ;;  %s10588_s25 = smov [#allocation10]   ;;  %s10589_s27 = smov [#allocation13]  }
   0x5   :  { %s44_s26 = sshll.u32 %s10588_s25, 4  ;;  %s68_s28 = sshll.u32 %s10589_s27, 4  ;;  %s45_s26 = int_to_ptr.vmem [resolvable:$true] %s44_s26  ;;  %s69_s28 = int_to_ptr.vmem [resolvable:$true] %s68_s28 }
   0x6   :  { %s10426_s29 = scalar_lea.vmem %s45_s26, 512  ;;  %p10431_p1 = scmp.lt.s32.totalorder %s45_s26, %s45_s26 }
   0x7   :  { %p10427_p0 = scmp.ne.s32.totalorder %s45_s26, %s10426_s29  ;;  %p10432_p2 = scmp.lt.s32.totalorder %s10426_s29, %s10426_s29 }
   0x9   :  { %p10433_p3 = por %p10432_p2, %p10431_p1 }
   0xb   :  { %p10434_p4 = pnand %p10433_p3, %p10427_p0 }
   0xd   :  { %10437 = shalt.err (!%p10434_p4)
}
   0xe   :  { %s10590_s30 = smov 256   ;;  %s10591_s14 = smov 16  }
   0xf   :  { %50 = dma.hbm_to_vmem [thread:$0]  %s12446_s3, 512, %s45_s26, [#allocation11], %s10590_s30, %s10590_s30, %s10591_s14  }
  0x10   :  { %s10446_s17 = scalar_lea.vmem %s69_s28, 4096  ;;  %p10451_p6 = scmp.lt.s32.totalorder %s69_s28, %s69_s28 }
  0x11   :  { %p10447_p5 = scmp.ne.s32.totalorder %s69_s28, %s10446_s17  ;;  %p10452_p7 = scmp.lt.s32.totalorder %s10446_s17, %s10446_s17 }
  0x13   :  { %p10453_p8 = por %p10452_p7, %p10451_p6 }
  0x15   :  { %p10454_p9 = pnand %p10453_p8, %p10447_p5 }
  0x17   :  { %10457 = shalt.err (!%p10454_p9)
}
  0x18   :  { %74 = dma.hbm_to_vmem [thread:$0]  %s12448_s5, 4096, %s69_s28, [#allocation14], %s10590_s30, %s10590_s30, %s10591_s14  }
  0x19   :  { %s10592_s20 = smov [#allocation16]  }
  0x1a   :  { %s100_s21 = sshll.u32 %s10592_s20, 4  ;;  %s101_s21 = int_to_ptr.vmem [resolvable:$true] %s100_s21 }
  0x1b   :  { %s10466_s22 = scalar_lea.vmem %s101_s21, 512  ;;  %p10471_p11 = scmp.lt.s32.totalorder %s101_s21, %s101_s21 }
  0x1c   :  { %p10467_p10 = scmp.ne.s32.totalorder %s101_s21, %s10466_s22  ;;  %p10472_p12 = scmp.lt.s32.totalorder %s10466_s22, %s10466_s22 }
  0x1e   :  { %p10473_p13 = por %p10472_p12, %p10471_p11 }
  0x20   :  { %p10474_p0 = pnand %p10473_p13, %p10467_p10 }
  0x22   :  { %10477 = shalt.err (!%p10474_p0)
}
  0x23   :  { %s10593_s3 = smov 128   ;;  %s10594_s23 = smov 8  }
  0x24   :  { %106 = dma.hbm_to_vmem [thread:$0]  %s12454_s11, 512, %s101_s21, [#allocation17], %s10593_s3, %s10593_s3, %s10594_s23  }
  0x25   :  { %s10595_s5 = smov [#allocation7]   ;;  %s10596_s27 = smov [#allocation12]  }
  0x26   :  { %s32_s26 = sshll.u32 %s10595_s5, 4  ;;  %s56_s28 = sshll.u32 %s10596_s27, 4  ;;  %s33_s26 = int_to_ptr.vmem [resolvable:$true] %s32_s26  ;;  %s57_s28 = int_to_ptr.vmem [resolvable:$true] %s56_s28 }
  0x27   :  { %s10486_s29 = scalar_lea.vmem %s33_s26, 512  ;;  %p10491_p2 = scmp.lt.s32.totalorder %s33_s26, %s33_s26 }
  0x28   :  { %p10487_p1 = scmp.ne.s32.totalorder %s33_s26, %s10486_s29  ;;  %p10492_p3 = scmp.lt.s32.totalorder %s10486_s29, %s10486_s29 }
  0x2a   :  { %p10493_p4 = por %p10492_p3, %p10491_p2 }
  0x2c   :  { %p10494_p5 = pnand %p10493_p4, %p10487_p1 }
  0x2e   :  { %10497 = shalt.err (!%p10494_p5)
}
  0x2f   :  { %38 = dma.hbm_to_vmem [thread:$0]  %s12445_s2, 512, %s33_s26, [#allocation8], %s10590_s30, %s10590_s30, %s10591_s14  }
  0x30   :  { %s10506_s11 = scalar_lea.vmem %s57_s28, 4096  ;;  %p10511_p7 = scmp.lt.s32.totalorder %s57_s28, %s57_s28 }
  0x31   :  { %p10507_p6 = scmp.ne.s32.totalorder %s57_s28, %s10506_s11  ;;  %p10512_p8 = scmp.lt.s32.totalorder %s10506_s11, %s10506_s11 }
  0x33   :  { %p10513_p9 = por %p10512_p8, %p10511_p7 }
  0x35   :  { %p10514_p10 = pnand %p10513_p9, %p10507_p6 }
  0x37   :  { %10517 = shalt.err (!%p10514_p10)
}
  0x38   :  { %62 = dma.hbm_to_vmem [thread:$0]  %s12447_s4, 4096, %s57_s28, [#allocation11], %s10590_s30, %s10590_s30, %s10591_s14  }
  0x39   :  { %s10597_s19 = smov [#allocation15]  }
  0x3a   :  { %s86_s20 = sshll.u32 %s10597_s19, 4  ;;  %s87_s20 = int_to_ptr.vmem [resolvable:$true] %s86_s20 }
  0x3b   :  { %s10526_s21 = scalar_lea.vmem %s87_s20, 1024  ;;  %p10531_p12 = scmp.lt.s32.totalorder %s87_s20, %s87_s20 }
  0x3c   :  { %p10527_p11 = scmp.ne.s32.totalorder %s87_s20, %s10526_s21  ;;  %p10532_p13 = scmp.lt.s32.totalorder %s10526_s21, %s10526_s21 }
  0x3e   :  { %p10533_p0 = por %p10532_p13, %p10531_p12 }
  0x40   :  { %p10534_p1 = pnand %p10533_p0, %p10527_p11 }
  0x42   :  { %10537 = shalt.err (!%p10534_p1)
}
  0x43   :  { %s10598_s2 = smov 64   ;;  %s10599_s22 = smov 4  }
  0x44   :  { %92 = dma.hbm_to_vmem [thread:$0]  %s12452_s9, 1024, %s87_s20, [#allocation14], %s10598_s2, %s10598_s2, %s10599_s22  }
  0x45   :  { %s10600_s5 = smov [#allocation18]  }
  0x46   :  { %s112_s26 = sshll.u32 %s10600_s5, 4  ;;  %s113_s26 = int_to_ptr.vmem [resolvable:$true] %s112_s26 }
  0x47   :  { %s10546_s4 = scalar_lea.vmem %s113_s26, 512  ;;  %p10551_p3 = scmp.lt.s32.totalorder %s113_s26, %s113_s26 }
  0x48   :  { %p10547_p2 = scmp.ne.s32.totalorder %s113_s26, %s10546_s4  ;;  %p10552_p4 = scmp.lt.s32.totalorder %s10546_s4, %s10546_s4 }
  0x4a   :  { %p10553_p5 = por %p10552_p4, %p10551_p3 }
  0x4c   :  { %p10554_p6 = pnand %p10553_p5, %p10547_p2 }
  0x4e   :  { %10557 = shalt.err (!%p10554_p6)
}
  0x4f   :  { %118 = dma.hbm_to_vmem [thread:$0]  %s12455_s12, 512, %s113_s26, [#allocation17], %s10593_s3, %s10593_s3, %s10594_s23  }
  0x50   :  { %10578 = dma.done.wait [#allocation8], 512  }
  0x51   :  { %10579 = vsyncadd [#allocation8], 4294966784 }
  0x52   :  { %10580 = dma.done.wait [#allocation11], 4608  }
  0x53   :  { %10581 = vsyncadd [#allocation11], 4294962688 }
  0x54   :  { %10582 = dma.done.wait [#allocation14], 5120  }
  0x55   :  { %10583 = vsyncadd [#allocation14], 4294962176 }
  0x56   :  { %10584 = dma.done.wait [#allocation17], 1024  }
  0x57   :  { %10585 = vsyncadd [#allocation17], 4294966272  ;;  %v12457_v0 = vmov 0   ;;  %v9274_v1 = vld [vmem:[#allocation7 + $0x4] ss:$16 sps:$4 sm:$0xff]   ;;  %vm243_vm0 = vcmask 130048  }
  0x58   :  { %300 = vmatprep.mubr.bf16.mxu0 %v12457_v0  ;;  %413 = vmatprep.mubr.bf16.mxu1 %v12457_v0  ;;  %v9276_v2 = vld [vmem:[#allocation7 + $0xc] ss:$16 sps:$4 sm:$0xff]   ;;  %v9278_v3 = vld [vmem:[#allocation7] ss:$16 sps:$4 sm:$0xff]   ;;  %v9279_v4 = vld [vmem:[#allocation7 + $0x8] ss:$16 sps:$4 sm:$0xff]  }
  0x59   :  { %9272 = vset.pattern.permute.xlu0 %v12457_v0  ;;  %9273 = vset.pattern.permute.xlu1 %v12457_v0  ;;  %v9280_v5 = vld [vmem:[%s12443_s0] sm:$0xff]   ;;  %v9281_v6 = vld [vmem:[#allocation10 + $0x8] ss:$16 sps:$4 sm:$0xff]   ;;  %v9283_v7 = vld [vmem:[#allocation10 + $0xc] ss:$16 sps:$4 sm:$0xff]  }
  0x5a   :  { %282 = vmatprep.subr.bf16.mxu0 %v9274_v1  ;;  %395 = vmatprep.subr.bf16.mxu1 %v9276_v2  ;;  %v9284_v8 = vld [vmem:[#allocation10] ss:$16 sps:$4 sm:$0xff]   ;;  %v9286_v9 = vld [vmem:[#allocation10 + $0x4] ss:$16 sps:$4 sm:$0xff]   ;;  %v9287_v10 = vld [vmem:[%s12443_s0 + $0x8] sm:$0xff]  }
  0x5b   :  { %283 = vmatpush1.bf16.msra.mxu0 %v9278_v3  ;;  %396 = vmatpush1.bf16.msra.mxu1 %v9279_v4  ;;  %v9297_v11 = vld [vmem:[#allocation12 + $0xec] ss:$16 sps:$4 sm:$0xff]   ;;  %v9300_v12 = vld [vmem:[#allocation12 + $0xe4] ss:$16 sps:$4 sm:$0xff]   ;;  %v9295_v20 = vld [vmem:[#allocation12 + $0xe8] ss:$16 sps:$4 sm:$0xff]  }
  0x5c   :  { %971 = vmatprep.subr.bf16.mxu1 %v9283_v7  ;;  %858 = vmatprep.subr.bf16.mxu0 %v9286_v9  ;;  %v9288_v13 = vld [vmem:[%s12443_s0 + $0x10] sm:$0xff]   ;;  %v9289_v14 = vld [vmem:[%s12443_s0 + $0x18] sm:$0xff]   ;;  %v9290_v15 = vld [vmem:[%s12443_s0 + $0x20] sm:$0xff]  }
  0x5d   :  { %v9291_v16 = vld [vmem:[%s12443_s0 + $0x28] sm:$0xff]   ;;  %v9292_v17 = vld [vmem:[%s12443_s0 + $0x30] sm:$0xff]   ;;  %v9293_v18 = vld [vmem:[%s12443_s0 + $0x38] sm:$0xff]  }
  0x5e   :  { %8140 = vmatmul.mubr.msk.bf16.vlgmr.msra.gmra.mxu0 %vm243_vm0, %v9280_v5  ;;  %8148 = vmatmul.mubr.msk.bf16.vlgmr.msra.gmra.mxu1 %vm243_vm0, %v9280_v5  ;;  %v9294_v19 = vld [vmem:[%s12443_s0] sm:$0xff]   ;;  %v9304_v22 = vld [vmem:[#allocation12 + $0xcc] ss:$16 sps:$4 sm:$0xff]   ;;  %v9302_v24 = vld [vmem:[#allocation12 + $0xc8] ss:$16 sps:$4 sm:$0xff]  }
  0x5f   :  { %972 = vmatpush1.bf16.msra.mxu1 %v9281_v6  ;;  %859 = vmatpush1.bf16.msra.mxu0 %v9284_v8  ;;  %v9298_v21 = vld [vmem:[#allocation12 + $0xe0] ss:$16 sps:$4 sm:$0xff]   ;;  %v9307_v23 = vld [vmem:[#allocation12 + $0xc4] ss:$16 sps:$4 sm:$0xff]   ;;  %v9311_v26 = vld [vmem:[#allocation12 + $0xac] ss:$16 sps:$4 sm:$0xff]  }
  0x60   :  { %310 = vmatprep.mubr.bf16.mxu0 %v12457_v0  ;;  %423 = vmatprep.mubr.bf16.mxu1 %v12457_v0  ;;  %v9305_v25 = vld [vmem:[#allocation12 + $0xc0] ss:$16 sps:$4 sm:$0xff]   ;;  %v9314_v27 = vld [vmem:[#allocation12 + $0xa4] ss:$16 sps:$4 sm:$0xff]   ;;  %v9301_v28 = vld [vmem:[%s12443_s0 + $0x8] sm:$0xff]  }
  0x61   :  { %1666 = vmatprep.subr.bf16.mxu1 %v9297_v11  ;;  %1623 = vmatprep.subr.bf16.mxu0 %v9300_v12  ;;  %v9309_v29 = vld [vmem:[#allocation12 + $0xa8] ss:$16 sps:$4 sm:$0xff]   ;;  %v9312_v30 = vld [vmem:[#allocation12 + $0xa0] ss:$16 sps:$4 sm:$0xff]   ;;  %v9318_v31 = vld [vmem:[#allocation12 + $0x8c] ss:$16 sps:$4 sm:$0xff]  }
  0x62   :  { %v9321_v32 = vld [vmem:[#allocation12 + $0x84] ss:$16 sps:$4 sm:$0xff]   ;;  %v9316_v33 = vld [vmem:[#allocation12 + $0x88] ss:$16 sps:$4 sm:$0xff]   ;;  %v9319_v34 = vld [vmem:[#allocation12 + $0x80] ss:$16 sps:$4 sm:$0xff]  }
  0x63   :  { %v9325_v35 = vld [vmem:[#allocation12 + $0x6c] ss:$16 sps:$4 sm:$0xff]   ;;  %v9328_v36 = vld [vmem:[#allocation12 + $0x64] ss:$16 sps:$4 sm:$0xff]   ;;  %v9323_v38 = vld [vmem:[#allocation12 + $0x68] ss:$16 sps:$4 sm:$0xff]  }
  0x64   :  { %v9308_v37 = vld [vmem:[%s12443_s0 + $0x10] sm:$0xff]   ;;  %v9332_v40 = vld [vmem:[#allocation12 + $0x4c] ss:$16 sps:$4 sm:$0xff]   ;;  %v9330_v42 = vld [vmem:[#allocation12 + $0x48] ss:$16 sps:$4 sm:$0xff]  }
  0x65   :  { %v9326_v39 = vld [vmem:[#allocation12 + $0x60] ss:$16 sps:$4 sm:$0xff]   ;;  %v9335_v41 = vld [vmem:[#allocation12 + $0x44] ss:$16 sps:$4 sm:$0xff]   ;;  %v9339_v44 = vld [vmem:[#allocation12 + $0x2c] ss:$16 sps:$4 sm:$0xff]  }
  0x66   :  { %8141 = vmatmul.mubr.msk.bf16.gmra.mxu0 %vm243_vm0, %v9287_v10  ;;  %8149 = vmatmul.mubr.msk.bf16.gmra.mxu1 %vm243_vm0, %v9287_v10  ;;  %v9333_v43 = vld [vmem:[#allocation12 + $0x40] ss:$16 sps:$4 sm:$0xff]   ;;  %v9342_v45 = vld [vmem:[#allocation12 + $0x24] ss:$16 sps:$4 sm:$0xff]   ;;  %v9315_v46 = vld [vmem:[%s12443_s0 + $0x18] sm:$0xff]  }
  0x67   :  { %320 = vmatprep.mubr.bf16.mxu0 %v12457_v0  ;;  %433 = vmatprep.mubr.bf16.mxu1 %v12457_v0  ;;  %v9337_v47 = vld [vmem:[#allocation12 + $0x28] ss:$16 sps:$4 sm:$0xff]   ;;  %v9340_v48 = vld [vmem:[#allocation12 + $0x20] ss:$16 sps:$4 sm:$0xff]   ;;  %v9346_v49 = vld [vmem:[#allocation12 + $0xc] ss:$16 sps:$4 sm:$0xff]  }
  0x68   :  { %v9349_v50 = vld [vmem:[#allocation12 + $0x4] ss:$16 sps:$4 sm:$0xff]   ;;  %v9344_v51 = vld [vmem:[#allocation12 + $0x8] ss:$16 sps:$4 sm:$0xff]   ;;  %v9347_v52 = vld [vmem:[#allocation12] ss:$16 sps:$4 sm:$0xff]  }
  0x69   :  { %v9352_v53 = vld [vmem:[#allocation13 + $0xe4] ss:$16 sps:$4 sm:$0xff]   ;;  %v9355_v54 = vld [vmem:[#allocation13 + $0xec] ss:$16 sps:$4 sm:$0xff]   ;;  %v9350_v4 = vld [vmem:[#allocation13 + $0xe0] ss:$16 sps:$4 sm:$0xff]  }
  0x6a   :  { %v9322_v55 = vld [vmem:[%s12443_s0 + $0x20] sm:$0xff]   ;;  %v9329_v56 = vld [vmem:[%s12443_s0 + $0x28] sm:$0xff]   ;;  %v9336_v59 = vld [vmem:[%s12443_s0 + $0x30] sm:$0xff]  }
  0x6b   :  { %v1294_v57 = vld [vmem:[%s12444_s1] sm:$0xff]  ;;  %v1295_v58 = vld [vmem:[%s12444_s1 + $0x8] sm:$0xff]  ;;  %v1296_v60 = vld [vmem:[%s12444_s1 + $0x10] sm:$0xff] }
  0x6c   :  { %1312 = vperm.xlu0 %9272, %v1294_v57   ;;  %v1306_v61 = vld [vmem:[%s12444_s1 + $0x60] sm:$0xff]  ;;  %v9343_v62 = vld [vmem:[%s12443_s0 + $0x38] sm:$0xff]   ;;  %v1407_v2 = vld [vmem:[#allocation16 + $0x8] sm:$0xff] }
  0x6d   :  { %v1298_v63 = vld [vmem:[%s12444_s1 + $0x20] sm:$0xff]  ;;  %v1304_v3 = vld [vmem:[%s12444_s1 + $0x50] sm:$0xff]  ;;  %v9353_v5 = vld [vmem:[#allocation13 + $0xe8] ss:$16 sps:$4 sm:$0xff]  }
  0x6e   :  { %8142 = vmatmul.mubr.msk.bf16.gmra.mxu0 %vm243_vm0, %v9288_v13  ;;  %8150 = vmatmul.mubr.msk.bf16.gmra.mxu1 %vm243_vm0, %v9288_v13  ;;  %v1406_v1 = vld [vmem:[#allocation16] sm:$0xff]  ;;  %v9361_v8 = vld [vmem:[#allocation13 + $0xcc] ss:$16 sps:$4 sm:$0xff]   ;;  %v1300_v9 = vld [vmem:[%s12444_s1 + $0x30] sm:$0xff] }
  0x6f   :  { %330 = vmatprep.mubr.bf16.mxu0 %v12457_v0  ;;  %443 = vmatprep.mubr.bf16.mxu1 %v12457_v0  ;;  %v1430_v6 = vpack.c.bf16 %v1407_v2, %v1406_v1  ;;  %v9358_v7 = vld [vmem:[#allocation13 + $0xc4] ss:$16 sps:$4 sm:$0xff]   ;;  %v9356_v10 = vld [vmem:[#allocation13 + $0xc0] ss:$16 sps:$4 sm:$0xff]   ;;  %v9359_v11 = vld [vmem:[#allocation13 + $0xc8] ss:$16 sps:$4 sm:$0xff]  }
  0x70   :  { %1317 = vperm.xlu0 %9272, %v1295_v58   ;;  %v9364_v12 = vld [vmem:[#allocation13 + $0xa4] ss:$16 sps:$4 sm:$0xff]   ;;  %v9367_v13 = vld [vmem:[#allocation13 + $0xac] ss:$16 sps:$4 sm:$0xff]  }
  0x74   :  { %1322 = vperm.xlu0 %9272, %v1296_v60  }
  0x76   :  { %8143 = vmatmul.mubr.msk.bf16.gmra.mxu0 %vm243_vm0, %v9289_v14  ;;  %8151 = vmatmul.mubr.msk.bf16.gmra.mxu1 %vm243_vm0, %v9289_v14  ;;  %v1302_v14 = vld [vmem:[%s12444_s1 + $0x40] sm:$0xff] }
  0x77   :  { %340 = vmatprep.mubr.bf16.mxu0 %v12457_v0  ;;  %453 = vmatprep.mubr.bf16.mxu1 %v12457_v0 }
  0x78   :  { %1372 = vperm.xlu0 %9272, %v1306_v61  }
  0x7c   :  { %1332 = vperm.xlu0 %9272, %v1298_v63  }
  0x7e   :  { %8144 = vmatmul.mubr.msk.bf16.gmra.mxu0 %vm243_vm0, %v9290_v15  ;;  %8152 = vmatmul.mubr.msk.bf16.gmra.mxu1 %vm243_vm0, %v9290_v15  ;;  %v9362_v15 = vld [vmem:[#allocation13 + $0xa0] ss:$16 sps:$4 sm:$0xff]  }
  0x7f   :  { %350 = vmatprep.mubr.bf16.mxu0 %v12457_v0  ;;  %463 = vmatprep.mubr.bf16.mxu1 %v12457_v0 }
  0x80   :  { %1362 = vperm.xlu0 %9272, %v1304_v3  }
  0x84   :  { %1342 = vperm.xlu0 %9272, %v1300_v9  }
  0x86   :  { %8145 = vmatmul.mubr.msk.bf16.gmra.mxu0 %vm243_vm0, %v9291_v16  ;;  %8153 = vmatmul.mubr.msk.bf16.gmra.mxu1 %vm243_vm0, %v9291_v16  ;;  %v9365_v16 = vld [vmem:[#allocation13 + $0xa8] ss:$16 sps:$4 sm:$0xff]  }
  0x87   :  { %360 = vmatprep.mubr.bf16.mxu0 %v12457_v0  ;;  %473 = vmatprep.mubr.bf16.mxu1 %v12457_v0 }
  0x88   :  { %1352 = vperm.xlu0 %9272, %v1302_v14  }
  0x8e   :  { %8146 = vmatmul.mubr.msk.bf16.gmra.mxu0 %vm243_vm0, %v9292_v17  ;;  %8154 = vmatmul.mubr.msk.bf16.gmra.mxu1 %vm243_vm0, %v9292_v17  ;;  %v9370_v17 = vld [vmem:[#allocation13 + $0x84] ss:$16 sps:$4 sm:$0xff]  }
  0x8f   :  { %370 = vmatprep.mubr.bf16.mxu0 %v12457_v0  ;;  %483 = vmatprep.mubr.bf16.mxu1 %v12457_v0 }
  0x96   :  { %8147 = vmatmul.mubr.msk.bf16.gmra.mxu0 %vm243_vm0, %v9293_v18  ;;  %8155 = vmatmul.mubr.msk.bf16.gmra.mxu1 %vm243_vm0, %v9293_v18  ;;  %v9373_v18 = vld [vmem:[#allocation13 + $0x8c] ss:$16 sps:$4 sm:$0xff]  }
  0x97   :  { %876 = vmatprep.mubr.bf16.mxu0 %v12457_v0  ;;  %989 = vmatprep.mubr.bf16.mxu1 %v12457_v0 }
  0x9e   :  { %8200 = vmatmul.mubr.msk.bf16.vlgmr.msra.gmra.mxu0 %vm243_vm0, %v9294_v19  ;;  %8208 = vmatmul.mubr.msk.bf16.vlgmr.msra.gmra.mxu1 %vm243_vm0, %v9294_v19  ;;  %v1308_v19 = vld [vmem:[%s12444_s1 + $0x70] sm:$0xff] }
  0x9f   :  { %1667 = vmatpush1.bf16.msra.mxu1 %v9295_v20  ;;  %1624 = vmatpush1.bf16.msra.mxu0 %v9298_v21  ;;  %v9368_v20 = vld [vmem:[#allocation13 + $0x80] ss:$16 sps:$4 sm:$0xff]   ;;  %v9371_v21 = vld [vmem:[#allocation13 + $0x88] ss:$16 sps:$4 sm:$0xff]  }
  0xa0   :  { %886 = vmatprep.mubr.bf16.mxu0 %v12457_v0  ;;  %999 = vmatprep.mubr.bf16.mxu1 %v12457_v0 }
  0xa1   :  { %1668 = vmatprep.subr.bf16.mxu1 %v9304_v22  ;;  %1625 = vmatprep.subr.bf16.mxu0 %v9307_v23  ;;  %v9376_v22 = vld [vmem:[#allocation13 + $0x64] ss:$16 sps:$4 sm:$0xff]   ;;  %v9379_v23 = vld [vmem:[#allocation13 + $0x6c] ss:$16 sps:$4 sm:$0xff]  }
  0xa2   :  { %1382 = vperm.xlu1 %9273, %v1308_v19  }
  0xa3   :  { %1669 = vmatpush1.bf16.msra.mxu1 %v9302_v24  ;;  %1626 = vmatpush1.bf16.msra.mxu0 %v9305_v25  ;;  %v1309_v24 = vld [vmem:[%s12444_s1 + $0x78] sm:$0xff]  ;;  %v9374_v25 = vld [vmem:[#allocation13 + $0x60] ss:$16 sps:$4 sm:$0xff]  }
  0xa4   :  { %1670 = vmatprep.subr.bf16.mxu1 %v9311_v26  ;;  %1627 = vmatprep.subr.bf16.mxu0 %v9314_v27  ;;  %v9377_v26 = vld [vmem:[#allocation13 + $0x68] ss:$16 sps:$4 sm:$0xff]   ;;  %v9382_v27 = vld [vmem:[#allocation13 + $0x44] ss:$16 sps:$4 sm:$0xff]  }
  0xa6   :  { %8201 = vmatmul.mubr.msk.bf16.gmra.mxu0 %vm243_vm0, %v9301_v28  ;;  %8209 = vmatmul.mubr.msk.bf16.gmra.mxu1 %vm243_vm0, %v9301_v28  ;;  %v9385_v28 = vld [vmem:[#allocation13 + $0x4c] ss:$16 sps:$4 sm:$0xff]  }
  0xa7   :  { %896 = vmatprep.mubr.bf16.mxu0 %v12457_v0  ;;  %1009 = vmatprep.mubr.bf16.mxu1 %v12457_v0 }
  0xa8   :  { %1671 = vmatpush1.bf16.msra.mxu1 %v9309_v29  ;;  %1628 = vmatpush1.bf16.msra.mxu0 %v9312_v30  ;;  %v1297_v29 = vld [vmem:[%s12444_s1 + $0x18] sm:$0xff]  ;;  %v9380_v30 = vld [vmem:[#allocation13 + $0x40] ss:$16 sps:$4 sm:$0xff]  }
  0xa9   :  { %1672 = vmatprep.subr.bf16.mxu1 %v9318_v31  ;;  %1629 = vmatprep.subr.bf16.mxu0 %v9321_v32  ;;  %v9383_v31 = vld [vmem:[#allocation13 + $0x48] ss:$16 sps:$4 sm:$0xff]   ;;  %v9388_v32 = vld [vmem:[#allocation13 + $0x24] ss:$16 sps:$4 sm:$0xff]  }
  0xaa   :  { %1387 = vperm.xlu1 %9273, %v1309_v24  }
  0xac   :  { %1673 = vmatpush1.bf16.msra.mxu1 %v9316_v33  ;;  %1630 = vmatpush1.bf16.msra.mxu0 %v9319_v34  ;;  %v9391_v33 = vld [vmem:[#allocation13 + $0x2c] ss:$16 sps:$4 sm:$0xff]  }
  0xad   :  { %1674 = vmatprep.subr.bf16.mxu1 %v9325_v35  ;;  %1631 = vmatprep.subr.bf16.mxu0 %v9328_v36  ;;  %v1307_v34 = vld [vmem:[%s12444_s1 + $0x68] sm:$0xff]  ;;  %v9386_v35 = vld [vmem:[#allocation13 + $0x20] ss:$16 sps:$4 sm:$0xff]  }
  0xae   :  { %8202 = vmatmul.mubr.msk.bf16.gmra.mxu0 %vm243_vm0, %v9308_v37  ;;  %8210 = vmatmul.mubr.msk.bf16.gmra.mxu1 %vm243_vm0, %v9308_v37  ;;  %v9389_v36 = vld [vmem:[#allocation13 + $0x28] ss:$16 sps:$4 sm:$0xff]   ;;  %v9394_v37 = vld [vmem:[#allocation13 + $0x4] ss:$16 sps:$4 sm:$0xff]  }
  0xaf   :  { %906 = vmatprep.mubr.bf16.mxu0 %v12457_v0  ;;  %1019 = vmatprep.mubr.bf16.mxu1 %v12457_v0 }
  0xb0   :  { %1675 = vmatpush1.bf16.msra.mxu1 %v9323_v38  ;;  %1632 = vmatpush1.bf16.msra.mxu0 %v9326_v39  ;;  %v9397_v38 = vld [vmem:[#allocation13 + $0xc] ss:$16 sps:$4 sm:$0xff]  }
  0xb1   :  { %1676 = vmatprep.subr.bf16.mxu1 %v9332_v40  ;;  %1633 = vmatprep.subr.bf16.mxu0 %v9335_v41  ;;  %v1299_v39 = vld [vmem:[%s12444_s1 + $0x28] sm:$0xff]  ;;  %v9392_v40 = vld [vmem:[#allocation13] ss:$16 sps:$4 sm:$0xff]  }
  0xb2   :  { %1327 = vperm.xlu1 %9273, %v1297_v29   ;;  %v9395_v41 = vld [vmem:[#allocation13 + $0x8] ss:$16 sps:$4 sm:$0xff]  }
  0xb4   :  { %1677 = vmatpush1.bf16.msra.mxu1 %v9330_v42  ;;  %1634 = vmatpush1.bf16.msra.mxu0 %v9333_v43  ;;  %v1411_v42 = vld [vmem:[#allocation16 + $0x10] sm:$0xff]  ;;  %v1412_v43 = vld [vmem:[#allocation16 + $0x18] sm:$0xff] }
  0xb5   :  { %1678 = vmatprep.subr.bf16.mxu1 %v9339_v44  ;;  %1635 = vmatprep.subr.bf16.mxu0 %v9342_v45  ;;  %v1305_v44 = vld [vmem:[%s12444_s1 + $0x58] sm:$0xff]  ;;  %v1819_v45 = vpack.c.bf16 %v1412_v43, %v1411_v42 }
  0xb6   :  { %8203 = vmatmul.mubr.msk.bf16.gmra.mxu0 %vm243_vm0, %v9315_v46  ;;  %8211 = vmatmul.mubr.msk.bf16.gmra.mxu1 %vm243_vm0, %v9315_v46  ;;  %v1301_v46 = vld [vmem:[%s12444_s1 + $0x38] sm:$0xff] }
  0xb7   :  { %916 = vmatprep.mubr.bf16.mxu0 %v12457_v0  ;;  %1029 = vmatprep.mubr.bf16.mxu1 %v12457_v0 }
  0xb8   :  { %1679 = vmatpush1.bf16.msra.mxu1 %v9337_v47  ;;  %1636 = vmatpush1.bf16.msra.mxu0 %v9340_v48  ;;  %v1303_v47 = vld [vmem:[%s12444_s1 + $0x48] sm:$0xff]  ;;  %v163_v48 = vlaneseq }
  0xb9   :  { %1680 = vmatprep.subr.bf16.mxu1 %v9346_v49  ;;  %1637 = vmatprep.subr.bf16.mxu0 %v9349_v50 }
  0xba   :  { %1377 = vperm.xlu1 %9273, %v1307_v34   ;;  %v10880_v49 = vshrl.u32 %v163_v48, 7 }
  0xbc   :  { %1681 = vmatpush1.bf16.msra.mxu1 %v9344_v51  ;;  %1638 = vmatpush1.bf16.msra.mxu0 %v9347_v52  ;;  %v165_v50 = vsub.s32 0, %v10880_v49  ;;  %v173_v51 = vsub.s32 2, %v10880_v49  ;;  %v169_v52 = vsub.s32 1, %v10880_v49 }
  0xbd   :  { %2012 = vmatprep.subr.bf16.mxu0 %v9352_v53  ;;  %2055 = vmatprep.subr.bf16.mxu1 %v9355_v54  ;;  %v177_v53 = vsub.s32 3, %v10880_v49  ;;  %v161_v54 = vld [vmem:[%s12449_s6] sm:$0xf]  ;;  %v11060_v49 = vld [vmem:[#allocation12 + $0x28] ss:$16 sps:$4 sm:$0xff]  }
  0xbe   :  { %8204 = vmatmul.mubr.msk.bf16.gmra.mxu0 %vm243_vm0, %v9322_v55  ;;  %8212 = vmatmul.mubr.msk.bf16.gmra.mxu1 %vm243_vm0, %v9322_v55  ;;  %v10891_v55 = vrot.slane %v161_v54, %v165_v50  ;;  %v10899_v57 = vrot.slane %v161_v54, %v169_v52 }
  0xbf   :  { %926 = vmatprep.mubr.bf16.mxu0 %v12457_v0  ;;  %1039 = vmatprep.mubr.bf16.mxu1 %v12457_v0  ;;  %v10903_v58 = vrot.slane %v161_v54, %v177_v53 }
  0xc0   :  { %1337 = vperm.xlu1 %9273, %v1299_v39  }
  0xc4   :  { %1367 = vperm.xlu1 %9273, %v1305_v44  }
  0xc6   :  { %8205 = vmatmul.mubr.msk.bf16.gmra.mxu0 %vm243_vm0, %v9329_v56  ;;  %8213 = vmatmul.mubr.msk.bf16.gmra.mxu1 %vm243_vm0, %v9329_v56  ;;  %v10895_v56 = vrot.slane %v161_v54, %v173_v51 }
  0xc7   :  { %936 = vmatprep.mubr.bf16.mxu0 %v12457_v0  ;;  %1049 = vmatprep.mubr.bf16.mxu1 %v12457_v0 }
  0xc8   :  { %1347 = vperm.xlu1 %9273, %v1301_v46  }
  0xcc   :  { %1357 = vperm.xlu1 %9273, %v1303_v47  }
  0xce   :  { %8206 = vmatmul.mubr.msk.bf16.gmra.mxu0 %vm243_vm0, %v9336_v59  ;;  %8214 = vmatmul.mubr.msk.bf16.gmra.mxu1 %vm243_vm0, %v9336_v59 }
  0xcf   :  { %946 = vmatprep.mubr.bf16.mxu0 %v12457_v0  ;;  %1059 = vmatprep.mubr.bf16.mxu1 %v12457_v0 }
  0xd6   :  { %8207 = vmatmul.mubr.msk.bf16.gmra.mxu0 %vm243_vm0, %v9343_v62  ;;  %8215 = vmatmul.mubr.msk.bf16.gmra.mxu1 %vm243_vm0, %v9343_v62 }
  0xd7   :  { %1655 = vmatprep.mubr.bf16.mxu0 %v12457_v0  ;;  %1698 = vmatprep.mubr.bf16.mxu1 %v12457_v0 }
  0xde   :  { %1656 = vmatmul.mubr.bf16.vlgmr.msra.gmra.mxu0 %v1430_v6  ;;  %1699 = vmatmul.mubr.bf16.vlgmr.msra.gmra.mxu1 %v1430_v6 }
  0xdf   :  { %2013 = vmatpush1.bf16.msra.mxu0 %v9350_v4  ;;  %2056 = vmatpush1.bf16.msra.mxu1 %v9353_v5 }
  0xe0   :  { %2014 = vmatprep.subr.bf16.mxu0 %v9358_v7  ;;  %2057 = vmatprep.subr.bf16.mxu1 %v9361_v8 }
  0xe1   :  { %2044 = vmatprep.mubr.bf16.mxu0 %v12457_v0  ;;  %2087 = vmatprep.mubr.bf16.mxu1 %v12457_v0 }
  0xe3   :  { %2015 = vmatpush1.bf16.msra.mxu0 %v9356_v10  ;;  %2058 = vmatpush1.bf16.msra.mxu1 %v9359_v11 }
  0xe4   :  { %2016 = vmatprep.subr.bf16.mxu0 %v9364_v12  ;;  %2059 = vmatprep.subr.bf16.mxu1 %v9367_v13 }
  0xe7   :  { %2017 = vmatpush1.bf16.msra.mxu0 %v9362_v15  ;;  %2060 = vmatpush1.bf16.msra.mxu1 %v9365_v16 }
  0xe8   :  { %2018 = vmatprep.subr.bf16.mxu0 %v9370_v17  ;;  %2061 = vmatprep.subr.bf16.mxu1 %v9373_v18 }
  0xeb   :  { %2019 = vmatpush1.bf16.msra.mxu0 %v9368_v20  ;;  %2062 = vmatpush1.bf16.msra.mxu1 %v9371_v21 }
  0xec   :  { %2020 = vmatprep.subr.bf16.mxu0 %v9376_v22  ;;  %2063 = vmatprep.subr.bf16.mxu1 %v9379_v23 }
  0xef   :  { %2021 = vmatpush1.bf16.msra.mxu0 %v9374_v25  ;;  %2064 = vmatpush1.bf16.msra.mxu1 %v9377_v26 }
  0xf0   :  { %2022 = vmatprep.subr.bf16.mxu0 %v9382_v27  ;;  %2065 = vmatprep.subr.bf16.mxu1 %v9385_v28 }
  0xf3   :  { %2023 = vmatpush1.bf16.msra.mxu0 %v9380_v30  ;;  %2066 = vmatpush1.bf16.msra.mxu1 %v9383_v31 }
  0xf4   :  { %2024 = vmatprep.subr.bf16.mxu0 %v9388_v32  ;;  %2067 = vmatprep.subr.bf16.mxu1 %v9391_v33 }
  0xf7   :  { %2025 = vmatpush1.bf16.msra.mxu0 %v9386_v35  ;;  %2068 = vmatpush1.bf16.msra.mxu1 %v9389_v36 }
  0xf8   :  { %2026 = vmatprep.subr.bf16.mxu0 %v9394_v37  ;;  %2069 = vmatprep.subr.bf16.mxu1 %v9397_v38 }
  0xfb   :  { %2027 = vmatpush1.bf16.msra.mxu0 %v9392_v40  ;;  %2070 = vmatpush1.bf16.msra.mxu1 %v9395_v41 }
  0xfe   :  { %2045 = vmatmul.mubr.bf16.vlgmr.msra.gmra.mxu0 %v1819_v45  ;;  %2088 = vmatmul.mubr.bf16.vlgmr.msra.gmra.mxu1 %v1819_v45 }
  0xff   :  { %2434 = vmatprep.mubr.bf16.mxu0 %v12457_v0  ;;  %2477 = vmatprep.mubr.bf16.mxu1 %v12457_v0 }
 0x11e   :  { %v302_v59 = vpop.f32.mrf.mxu0  ;;  %v415_v60 = vpop.f32.mrf.mxu1 }
 0x11f   :  { %v303_v61 = vadd.f32 %v302_v59, %v10891_v55  ;;  %v416_v1 = vadd.f32 %v415_v60, %v10895_v56 }
 0x120   :  { %v304_v62 = vpop.f32.mrf.mxu0  ;;  %v417_v63 = vpop.f32.mrf.mxu1 }
 0x121   :  { %v305_v2 = vadd.f32 %v304_v62, %v10899_v57  ;;  %v418_v3 = vadd.f32 %v417_v63, %v10903_v58 }
 0x122   :  { %v10909_v4 = vpop.f32.mrf.mxu0  ;;  %v10911_v5 = vpop.f32.mrf.mxu1 }
 0x123   :  { %v10913_v6 = vpack.c.bf16 %v305_v2, %v303_v61  ;;  %v10915_v7 = vpack.c.bf16 %v418_v3, %v416_v1 }
 0x124   :  { %v10917_v8 = vpop.f32.mrf.mxu0  ;;  %v10919_v9 = vpop.f32.mrf.mxu1 }
 0x126   :  { %v312_v10 = vpop.f32.mrf.mxu0  ;;  %v425_v11 = vpop.f32.mrf.mxu1 }
 0x127   :  { %v313_v12 = vadd.f32 %v312_v10, %v10891_v55  ;;  %v426_v13 = vadd.f32 %v425_v11, %v10895_v56 }
 0x128   :  { %v314_v14 = vpop.f32.mrf.mxu0  ;;  %v427_v15 = vpop.f32.mrf.mxu1 }
 0x129   :  { %v315_v16 = vadd.f32 %v314_v14, %v10899_v57  ;;  %v428_v17 = vadd.f32 %v427_v15, %v10903_v58 }
 0x12a   :  { %v316_v18 = vpop.f32.mrf.mxu0  ;;  %v429_v19 = vpop.f32.mrf.mxu1 }
 0x12b   :  { %v10925_v20 = vpack.c.bf16 %v315_v16, %v313_v12  ;;  %v10927_v21 = vpack.c.bf16 %v428_v17, %v426_v13  ;;  %v317_v22 = vadd.f32 %v316_v18, %v10891_v55  ;;  %v430_v23 = vadd.f32 %v429_v19, %v10895_v56 }
 0x12c   :  { %v318_v24 = vpop.f32.mrf.mxu0  ;;  %v431_v25 = vpop.f32.mrf.mxu1 }
 0x12d   :  { %v319_v26 = vadd.f32 %v318_v24, %v10899_v57  ;;  %v432_v27 = vadd.f32 %v431_v25, %v10903_v58 }
 0x12e   :  { %v322_v28 = vpop.f32.mrf.mxu0  ;;  %v435_v29 = vpop.f32.mrf.mxu1 }
 0x12f   :  { %v10933_v30 = vpack.c.bf16 %v319_v26, %v317_v22  ;;  %v10935_v31 = vpack.c.bf16 %v432_v27, %v430_v23  ;;  %v323_v32 = vadd.f32 %v322_v28, %v10891_v55  ;;  %v436_v33 = vadd.f32 %v435_v29, %v10895_v56 }
 0x130   :  { %v324_v34 = vpop.f32.mrf.mxu0  ;;  %v437_v35 = vpop.f32.mrf.mxu1 }
 0x131   :  { %v325_v36 = vadd.f32 %v324_v34, %v10899_v57  ;;  %v438_v37 = vadd.f32 %v437_v35, %v10903_v58 }
 0x132   :  { %v326_v38 = vpop.f32.mrf.mxu0  ;;  %v439_v39 = vpop.f32.mrf.mxu1 }
 0x133   :  { %v10941_v40 = vpack.c.bf16 %v325_v36, %v323_v32  ;;  %v10943_v41 = vpack.c.bf16 %v438_v37, %v436_v33  ;;  %v327_v42 = vadd.f32 %v326_v38, %v10891_v55  ;;  %v440_v43 = vadd.f32 %v439_v39, %v10895_v56 }
 0x134   :  { %v328_v44 = vpop.f32.mrf.mxu0  ;;  %v441_v45 = vpop.f32.mrf.mxu1 }
 0x135   :  { %12574 = vst [vmem:[#allocation25_spill] sm:$0xff] %v10941_v40  ;;  %12575 = vst [vmem:[#allocation26_spill] sm:$0xff] %v10943_v41  ;;  %v329_v46 = vadd.f32 %v328_v44, %v10899_v57  ;;  %v442_v47 = vadd.f32 %v441_v45, %v10903_v58 }
 0x136   :  { %v332_v48 = vpop.f32.mrf.mxu0  ;;  %v445_v54 = vpop.f32.mrf.mxu1 }
 0x137   :  { %v10949_v59 = vpack.c.bf16 %v329_v46, %v327_v42  ;;  %v10951_v60 = vpack.c.bf16 %v442_v47, %v440_v43  ;;  %v333_v61 = vadd.f32 %v332_v48, %v10891_v55  ;;  %v446_v62 = vadd.f32 %v445_v54, %v10895_v56  ;;  %v9400_v48 = vld [vmem:[#allocation12 + $0xe4] ss:$16 sps:$4 sm:$0xff]   ;;  %v9403_v54 = vld [vmem:[#allocation12 + $0xec] ss:$16 sps:$4 sm:$0xff]  }
 0x138   :  { %v334_v63 = vpop.f32.mrf.mxu0  ;;  %v447_v1 = vpop.f32.mrf.mxu1  ;;  %2402 = vmatprep.subr.bf16.mxu0 %v9400_v48  ;;  %2445 = vmatprep.subr.bf16.mxu1 %v9403_v54  ;;  %v9410_v48 = vld [vmem:[#allocation12 + $0xa0] ss:$16 sps:$4 sm:$0xff]   ;;  %v9413_v54 = vld [vmem:[#allocation12 + $0xa8] ss:$16 sps:$4 sm:$0xff]  }
 0x139   :  { %12576 = vst [vmem:[#allocation27_spill] sm:$0xff] %v10949_v59  ;;  %12577 = vst [vmem:[#allocation28_spill] sm:$0xff] %v10951_v60  ;;  %v335_v2 = vadd.f32 %v334_v63, %v10899_v57  ;;  %v448_v3 = vadd.f32 %v447_v1, %v10903_v58 }
 0x13a   :  { %v336_v10 = vpop.f32.mrf.mxu0  ;;  %v449_v11 = vpop.f32.mrf.mxu1 }
 0x13b   :  { %v10957_v12 = vpack.c.bf16 %v335_v2, %v333_v61  ;;  %v10959_v13 = vpack.c.bf16 %v448_v3, %v446_v62  ;;  %v337_v14 = vadd.f32 %v336_v10, %v10891_v55  ;;  %v450_v15 = vadd.f32 %v449_v11, %v10895_v56  ;;  %v9398_v2 = vld [vmem:[#allocation12 + $0xe0] ss:$16 sps:$4 sm:$0xff]   ;;  %v9401_v3 = vld [vmem:[#allocation12 + $0xe8] ss:$16 sps:$4 sm:$0xff]  }
 0x13c   :  { %v338_v16 = vpop.f32.mrf.mxu0  ;;  %v451_v17 = vpop.f32.mrf.mxu1  ;;  %2403 = vmatpush1.bf16.msra.mxu0 %v9398_v2  ;;  %2446 = vmatpush1.bf16.msra.mxu1 %v9401_v3 }
 0x13d   :  { %12578 = vst [vmem:[#allocation29_spill] sm:$0xff] %v10957_v12  ;;  %12579 = vst [vmem:[#allocation30_spill] sm:$0xff] %v10959_v13  ;;  %v339_v18 = vadd.f32 %v338_v16, %v10899_v57  ;;  %v452_v19 = vadd.f32 %v451_v17, %v10903_v58  ;;  %v10392_v12 = vld [vmem:[#allocation16 + $0x10] sm:$0xff] }
 0x13e   :  { %v342_v22 = vpop.f32.mrf.mxu0  ;;  %v455_v23 = vpop.f32.mrf.mxu1 }
 0x13f   :  { %v10965_v24 = vpack.c.bf16 %v339_v18, %v337_v14  ;;  %v10967_v25 = vpack.c.bf16 %v452_v19, %v450_v15  ;;  %v343_v26 = vadd.f32 %v342_v22, %v10891_v55  ;;  %v456_v27 = vadd.f32 %v455_v23, %v10895_v56  ;;  %v9406_v18 = vld [vmem:[#allocation12 + $0xc4] ss:$16 sps:$4 sm:$0xff]   ;;  %v9409_v19 = vld [vmem:[#allocation12 + $0xcc] ss:$16 sps:$4 sm:$0xff]  }
 0x140   :  { %v344_v28 = vpop.f32.mrf.mxu0  ;;  %v457_v29 = vpop.f32.mrf.mxu1  ;;  %2404 = vmatprep.subr.bf16.mxu0 %v9406_v18  ;;  %2447 = vmatprep.subr.bf16.mxu1 %v9409_v19 }
 0x141   :  { %12580 = vst [vmem:[#allocation31_spill] sm:$0xff] %v10965_v24  ;;  %12581 = vst [vmem:[#allocation32_spill] sm:$0xff] %v10967_v25  ;;  %v345_v32 = vadd.f32 %v344_v28, %v10899_v57  ;;  %v458_v33 = vadd.f32 %v457_v29, %v10903_v58  ;;  %v9404_v28 = vld [vmem:[#allocation12 + $0xc0] ss:$16 sps:$4 sm:$0xff]   ;;  %v9407_v29 = vld [vmem:[#allocation12 + $0xc8] ss:$16 sps:$4 sm:$0xff]  }
 0x142   :  { %v346_v34 = vpop.f32.mrf.mxu0  ;;  %v459_v35 = vpop.f32.mrf.mxu1  ;;  %2405 = vmatpush1.bf16.msra.mxu0 %v9404_v28  ;;  %2448 = vmatpush1.bf16.msra.mxu1 %v9407_v29 }
 0x143   :  { %v10973_v36 = vpack.c.bf16 %v345_v32, %v343_v26  ;;  %v10975_v37 = vpack.c.bf16 %v458_v33, %v456_v27  ;;  %v347_v38 = vadd.f32 %v346_v34, %v10891_v55  ;;  %v460_v39 = vadd.f32 %v459_v35, %v10895_v56 }
 0x144   :  { %v348_v42 = vpop.f32.mrf.mxu0  ;;  %v461_v43 = vpop.f32.mrf.mxu1 }
 0x145   :  { %12582 = vst [vmem:[#allocation33_spill] sm:$0xff] %v10973_v36  ;;  %12583 = vst [vmem:[#allocation34_spill] sm:$0xff] %v10975_v37  ;;  %v349_v44 = vadd.f32 %v348_v42, %v10899_v57  ;;  %v462_v45 = vadd.f32 %v461_v43, %v10903_v58  ;;  %v9412_v42 = vld [vmem:[#allocation12 + $0xa4] ss:$16 sps:$4 sm:$0xff]   ;;  %v9415_v43 = vld [vmem:[#allocation12 + $0xac] ss:$16 sps:$4 sm:$0xff]  }
 0x146   :  { %v352_v46 = vpop.f32.mrf.mxu0  ;;  %v465_v47 = vpop.f32.mrf.mxu1  ;;  %2406 = vmatprep.subr.bf16.mxu0 %v9412_v42  ;;  %2449 = vmatprep.subr.bf16.mxu1 %v9415_v43 }
 0x147   :  { %v10981_v61 = vpack.c.bf16 %v349_v44, %v347_v38  ;;  %v10983_v62 = vpack.c.bf16 %v462_v45, %v460_v39  ;;  %v353_v63 = vadd.f32 %v352_v46, %v10891_v55  ;;  %v466_v1 = vadd.f32 %v465_v47, %v10895_v56  ;;  %2407 = vmatpush1.bf16.msra.mxu0 %v9410_v48  ;;  %v738_v48 = vld [vmem:[%s12450_s7] sm:$0xf] }
 0x148   :  { %v354_v10 = vpop.f32.mrf.mxu0  ;;  %v467_v11 = vpop.f32.mrf.mxu1  ;;  %2450 = vmatpush1.bf16.msra.mxu1 %v9413_v54  ;;  %v9422_v54 = vld [vmem:[#allocation12 + $0x60] ss:$16 sps:$4 sm:$0xff]  }
 0x149   :  { %12584 = vst [vmem:[#allocation35_spill] sm:$0xff] %v10981_v61  ;;  %12585 = vst [vmem:[#allocation36_spill] sm:$0xff] %v10983_v62  ;;  %v355_v14 = vadd.f32 %v354_v10, %v10899_v57  ;;  %v468_v15 = vadd.f32 %v467_v11, %v10903_v58 }
 0x14a   :  { %v356_v16 = vpop.f32.mrf.mxu0  ;;  %v469_v17 = vpop.f32.mrf.mxu1 }
 0x14b   :  { %v10989_v22 = vpack.c.bf16 %v355_v14, %v353_v63  ;;  %v10991_v23 = vpack.c.bf16 %v468_v15, %v466_v1  ;;  %v357_v26 = vadd.f32 %v356_v16, %v10891_v55  ;;  %v470_v27 = vadd.f32 %v469_v17, %v10895_v56  ;;  %v9418_v14 = vld [vmem:[#allocation12 + $0x84] ss:$16 sps:$4 sm:$0xff]   ;;  %v9421_v15 = vld [vmem:[#allocation12 + $0x8c] ss:$16 sps:$4 sm:$0xff]  }
 0x14c   :  { %v358_v32 = vpop.f32.mrf.mxu0  ;;  %v471_v33 = vpop.f32.mrf.mxu1  ;;  %2408 = vmatprep.subr.bf16.mxu0 %v9418_v14  ;;  %2451 = vmatprep.subr.bf16.mxu1 %v9421_v15  ;;  %v11026_v15 = vrot.slane %v738_v48, %v165_v50  ;;  %v11040_v50 = vrot.slane %v738_v48, %v169_v52 }
 0x14d   :  { %12586 = vst [vmem:[#allocation37_spill] sm:$0xff] %v10989_v22  ;;  %12587 = vst [vmem:[#allocation38_spill] sm:$0xff] %v10991_v23  ;;  %v359_v34 = vadd.f32 %v358_v32, %v10899_v57  ;;  %v472_v35 = vadd.f32 %v471_v33, %v10903_v58 }
 0x14e   :  { %v362_v38 = vpop.f32.mrf.mxu0  ;;  %v475_v39 = vpop.f32.mrf.mxu1 }
 0x14f   :  { %v10997_v44 = vpack.c.bf16 %v359_v34, %v357_v26  ;;  %v10999_v45 = vpack.c.bf16 %v472_v35, %v470_v27  ;;  %v363_v46 = vadd.f32 %v362_v38, %v10891_v55  ;;  %v476_v47 = vadd.f32 %v475_v39, %v10895_v56  ;;  %v9416_v26 = vld [vmem:[#allocation12 + $0x80] ss:$16 sps:$4 sm:$0xff]   ;;  %v9419_v27 = vld [vmem:[#allocation12 + $0x88] ss:$16 sps:$4 sm:$0xff]   ;;  %v9424_v38 = vld [vmem:[#allocation12 + $0x64] ss:$16 sps:$4 sm:$0xff]  }
 0x150   :  { %v364_v63 = vpop.f32.mrf.mxu0  ;;  %v477_v1 = vpop.f32.mrf.mxu1  ;;  %2409 = vmatpush1.bf16.msra.mxu0 %v9416_v26  ;;  %2452 = vmatpush1.bf16.msra.mxu1 %v9419_v27  ;;  %v9427_v39 = vld [vmem:[#allocation12 + $0x6c] ss:$16 sps:$4 sm:$0xff]  }
 0x151   :  { %12588 = vst [vmem:[#allocation39_spill] sm:$0xff] %v10997_v44  ;;  %12589 = vst [vmem:[#allocation40_spill] sm:$0xff] %v10999_v45  ;;  %v365_v2 = vadd.f32 %v364_v63, %v10899_v57  ;;  %v478_v3 = vadd.f32 %v477_v1, %v10903_v58  ;;  %v9425_v63 = vld [vmem:[#allocation12 + $0x68] ss:$16 sps:$4 sm:$0xff]   ;;  %2410 = vmatprep.subr.bf16.mxu0 %v9424_v38  ;;  %2453 = vmatprep.subr.bf16.mxu1 %v9427_v39  ;;  %v9433_v26 = vld [vmem:[#allocation12 + $0x4c] ss:$16 sps:$4 sm:$0xff]  }
 0x152   :  { %v366_v10 = vpop.f32.mrf.mxu0  ;;  %v479_v11 = vpop.f32.mrf.mxu1 }
 0x153   :  { %v11005_v16 = vpack.c.bf16 %v365_v2, %v363_v46  ;;  %v11007_v17 = vpack.c.bf16 %v478_v3, %v476_v47  ;;  %v367_v18 = vadd.f32 %v366_v10, %v10891_v55  ;;  %v480_v19 = vadd.f32 %v479_v11, %v10895_v56 }
 0x154   :  { %v368_v28 = vpop.f32.mrf.mxu0  ;;  %v481_v29 = vpop.f32.mrf.mxu1  ;;  %2411 = vmatpush1.bf16.msra.mxu0 %v9422_v54  ;;  %2454 = vmatpush1.bf16.msra.mxu1 %v9425_v63  ;;  %v11048_v63 = vld [vmem:[#allocation12 + $0x24] ss:$16 sps:$4 sm:$0xff]  }
 0x155   :  { %12590 = vst [vmem:[#allocation41_spill] sm:$0xff] %v11005_v16  ;;  %12591 = vst [vmem:[#allocation42_spill] sm:$0xff] %v11007_v17  ;;  %v369_v32 = vadd.f32 %v368_v28, %v10899_v57  ;;  %v482_v33 = vadd.f32 %v481_v29, %v10903_v58  ;;  %2455 = vmatprep.subr.bf16.mxu1 %v9433_v26 }
 0x156   :  { %v372_v34 = vpop.f32.mrf.mxu0  ;;  %v485_v35 = vpop.f32.mrf.mxu1 }
 0x157   :  { %v11013_v42 = vpack.c.bf16 %v369_v32, %v367_v18  ;;  %v11015_v43 = vpack.c.bf16 %v482_v33, %v480_v19  ;;  %v373_v46 = vadd.f32 %v372_v34, %v10891_v55  ;;  %v486_v47 = vadd.f32 %v485_v35, %v10895_v56  ;;  %v9430_v19 = vld [vmem:[#allocation12 + $0x44] ss:$16 sps:$4 sm:$0xff]   ;;  %v9428_v33 = vld [vmem:[#allocation12 + $0x40] ss:$16 sps:$4 sm:$0xff]   ;;  %v9431_v34 = vld [vmem:[#allocation12 + $0x48] ss:$16 sps:$4 sm:$0xff]  }
 0x158   :  { %v374_v1 = vpop.f32.mrf.mxu0  ;;  %v487_v2 = vpop.f32.mrf.mxu1  ;;  %v11030_v18 = vrot.slane %v738_v48, %v173_v51  ;;  %2412 = vmatprep.subr.bf16.mxu0 %v9430_v19  ;;  %2456 = vmatpush1.bf16.msra.mxu1 %v9431_v34 }
 0x159   :  { %12592 = vst [vmem:[#allocation43_spill] sm:$0xff] %v11013_v42  ;;  %12593 = vst [vmem:[#allocation44_spill] sm:$0xff] %v11015_v43  ;;  %v375_v3 = vadd.f32 %v374_v1, %v10899_v57  ;;  %v488_v10 = vadd.f32 %v487_v2, %v10903_v58  ;;  %2413 = vmatpush1.bf16.msra.mxu0 %v9428_v33  ;;  %v11050_v1 = vld [vmem:[#allocation12 + $0x2c] ss:$16 sps:$4 sm:$0xff]  }
 0x15a   :  { %v376_v11 = vpop.f32.mrf.mxu0  ;;  %v489_v14 = vpop.f32.mrf.mxu1  ;;  %2414 = vmatprep.subr.bf16.mxu0 %v11048_v63  ;;  %2457 = vmatprep.subr.bf16.mxu1 %v11050_v1  ;;  %v11070_v33 = vld [vmem:[#allocation12 + $0xc] ss:$16 sps:$4 sm:$0xff]  }
 0x15b   :  { %v11032_v27 = vpack.c.bf16 %v375_v3, %v373_v46  ;;  %v11034_v28 = vpack.c.bf16 %v488_v10, %v486_v47  ;;  %v377_v29 = vadd.f32 %v376_v11, %v10891_v55  ;;  %v490_v32 = vadd.f32 %v489_v14, %v10895_v56  ;;  %v11058_v11 = vld [vmem:[#allocation12 + $0x20] ss:$16 sps:$4 sm:$0xff]  }
 0x15c   :  { %v378_v35 = vpop.f32.mrf.mxu0  ;;  %v491_v38 = vpop.f32.mrf.mxu1  ;;  %v11046_v46 = vrot.slane %v738_v48, %v177_v53  ;;  %2458 = vmatpush1.bf16.msra.mxu1 %v11060_v49 }
 0x15d   :  { %12594 = vst [vmem:[#allocation45_spill] sm:$0xff] %v11032_v27  ;;  %12595 = vst [vmem:[#allocation46_spill] sm:$0xff] %v11034_v28  ;;  %v379_v51 = vadd.f32 %v378_v35, %v10899_v57  ;;  %v492_v39 = vadd.f32 %v491_v38, %v10903_v58  ;;  %2415 = vmatpush1.bf16.msra.mxu0 %v11058_v11  ;;  %2459 = vmatprep.subr.bf16.mxu1 %v11070_v33 }
 0x15e   :  { %v878_v47 = vpop.f32.mrf.mxu0  ;;  %v991_v54 = vpop.f32.mrf.mxu1 }
 0x15f   :  { %v11052_v52 = vpack.c.bf16 %v379_v51, %v377_v29  ;;  %v11054_v2 = vpack.c.bf16 %v492_v39, %v490_v32  ;;  %v879_v3 = vadd.f32 %v878_v47, %v11026_v15  ;;  %v992_v10 = vadd.f32 %v991_v54, %v11030_v18  ;;  %v11068_v32 = vld [vmem:[#allocation12 + $0x4] ss:$16 sps:$4 sm:$0xff]   ;;  %v11078_v39 = vld [vmem:[#allocation12] ss:$16 sps:$4 sm:$0xff]   ;;  %v11080_v47 = vld [vmem:[#allocation12 + $0x8] ss:$16 sps:$4 sm:$0xff]  }
 0x160   :  { %v880_v53 = vpop.f32.mrf.mxu0  ;;  %v993_v48 = vpop.f32.mrf.mxu1  ;;  %2416 = vmatprep.subr.bf16.mxu0 %v11068_v32  ;;  %2460 = vmatpush1.bf16.msra.mxu1 %v11080_v47 }
 0x161   :  { %12596 = vst [vmem:[#allocation47_spill] sm:$0xff] %v11052_v52  ;;  %12597 = vst [vmem:[#allocation48_spill] sm:$0xff] %v11054_v2  ;;  %v881_v14 = vadd.f32 %v880_v53, %v11040_v50  ;;  %v994_v19 = vadd.f32 %v993_v48, %v11046_v46  ;;  %2417 = vmatpush1.bf16.msra.mxu0 %v11078_v39 }
 0x162   :  { %v882_v26 = vpop.f32.mrf.mxu0  ;;  %v995_v29 = vpop.f32.mrf.mxu1 }
 0x163   :  { %v11072_v34 = vpack.c.bf16 %v881_v14, %v879_v3  ;;  %v11074_v35 = vpack.c.bf16 %v994_v19, %v992_v10  ;;  %v883_v38 = vadd.f32 %v882_v26, %v11026_v15  ;;  %v996_v51 = vadd.f32 %v995_v29, %v11030_v18  ;;  %v11088_v19 = vld [vmem:[#allocation13 + $0xe4] ss:$16 sps:$4 sm:$0xff]   ;;  %v11090_v26 = vld [vmem:[#allocation13 + $0xec] ss:$16 sps:$4 sm:$0xff]  }
 0x164   :  { %v884_v54 = vpop.f32.mrf.mxu0  ;;  %v997_v53 = vpop.f32.mrf.mxu1  ;;  %2792 = vmatprep.subr.bf16.mxu0 %v11088_v19  ;;  %2835 = vmatprep.subr.bf16.mxu1 %v11090_v26 }
 0x165   :  { %12598 = vst [vmem:[#allocation49_spill] sm:$0xff] %v11072_v34  ;;  %12599 = vst [vmem:[#allocation50_spill] sm:$0xff] %v11074_v35  ;;  %v885_v48 = vadd.f32 %v884_v54, %v11040_v50  ;;  %v998_v3 = vadd.f32 %v997_v53, %v11046_v46 }
 0x166   :  { %v888_v10 = vpop.f32.mrf.mxu0  ;;  %v1001_v14 = vpop.f32.mrf.mxu1 }
 0x167   :  { %v11092_v29 = vpack.c.bf16 %v885_v48, %v883_v38  ;;  %v11094_v0 = vpack.c.bf16 %v998_v3, %v996_v51  ;;  %v889_v35 = vadd.f32 %v888_v10, %v11026_v15  ;;  %v1002_v54 = vadd.f32 %v1001_v14, %v11030_v18 }
 0x168   :  { %v890_v34 = vpop.f32.mrf.mxu0  ;;  %v1003_v53 = vpop.f32.mrf.mxu1 }
 0x169   :  { %12600 = vst [vmem:[#allocation51_spill] sm:$0xff] %v11092_v29  ;;  %12601 = vst [vmem:[#allocation52_spill] sm:$0xff] %v11094_v0  ;;  %v891_v2 = vadd.f32 %v890_v34, %v11040_v50  ;;  %v1004_v52 = vadd.f32 %v1003_v53, %v11046_v46 }
 0x16a   :  { %v892_v28 = vpop.f32.mrf.mxu0  ;;  %v1005_v27 = vpop.f32.mrf.mxu1 }
 0x16b   :  { %v11102_v38 = vpack.c.bf16 %v891_v2, %v889_v35  ;;  %v11104_v51 = vpack.c.bf16 %v1004_v52, %v1002_v54  ;;  %v893_v48 = vadd.f32 %v892_v28, %v11026_v15  ;;  %v1006_v3 = vadd.f32 %v1005_v27, %v11030_v18 }
 0x16c   :  { %v894_v10 = vpop.f32.mrf.mxu0  ;;  %v1007_v14 = vpop.f32.mrf.mxu1 }
 0x16d   :  { %12602 = vst [vmem:[#allocation53_spill] sm:$0xff] %v11102_v38  ;;  %12603 = vst [vmem:[#allocation54_spill] sm:$0xff] %v11104_v51  ;;  %v895_v0 = vadd.f32 %v894_v10, %v11040_v50  ;;  %v1008_v29 = vadd.f32 %v1007_v14, %v11046_v46 }
 0x16e   :  { %v898_v43 = vpop.f32.mrf.mxu0  ;;  %v1011_v34 = vpop.f32.mrf.mxu1 }
 0x16f   :  { %v11110_v42 = vpack.c.bf16 %v895_v0, %v893_v48  ;;  %v11112_v53 = vpack.c.bf16 %v1008_v29, %v1006_v3  ;;  %v899_v2 = vadd.f32 %v898_v43, %v11026_v15  ;;  %v1012_v52 = vadd.f32 %v1011_v34, %v11030_v18 }
 0x170   :  { %v900_v35 = vpop.f32.mrf.mxu0  ;;  %v1013_v28 = vpop.f32.mrf.mxu1 }
 0x171   :  { %12604 = vst [vmem:[#allocation55_spill] sm:$0xff] %v11110_v42  ;;  %12605 = vst [vmem:[#allocation56_spill] sm:$0xff] %v11112_v53  ;;  %v901_v27 = vadd.f32 %v900_v35, %v11040_v50  ;;  %v1014_v54 = vadd.f32 %v1013_v28, %v11046_v46 }
 0x172   :  { %v902_v51 = vpop.f32.mrf.mxu0  ;;  %v1015_v10 = vpop.f32.mrf.mxu1 }
 0x173   :  { %v11118_v38 = vpack.c.bf16 %v901_v27, %v899_v2  ;;  %v11120_v14 = vpack.c.bf16 %v1014_v54, %v1012_v52  ;;  %v903_v0 = vadd.f32 %v902_v51, %v11026_v15  ;;  %v1016_v29 = vadd.f32 %v1015_v10, %v11030_v18 }
 0x174   :  { %v904_v48 = vpop.f32.mrf.mxu0  ;;  %v1017_v43 = vpop.f32.mrf.mxu1 }
 0x175   :  { %12606 = vst [vmem:[#allocation57_spill] sm:$0xff] %v11118_v38  ;;  %12607 = vst [vmem:[#allocation58_spill] sm:$0xff] %v11120_v14  ;;  %v905_v3 = vadd.f32 %v904_v48, %v11040_v50  ;;  %v1018_v34 = vadd.f32 %v1017_v43, %v11046_v46 }
 0x176   :  { %v908_v53 = vpop.f32.mrf.mxu0  ;;  %v1021_v35 = vpop.f32.mrf.mxu1 }
 0x177   :  { %v11126_v42 = vpack.c.bf16 %v905_v3, %v903_v0  ;;  %v11128_v28 = vpack.c.bf16 %v1018_v34, %v1016_v29  ;;  %v909_v2 = vadd.f32 %v908_v53, %v11026_v15  ;;  %v1022_v52 = vadd.f32 %v1021_v35, %v11030_v18 }
 0x178   :  { %v910_v27 = vpop.f32.mrf.mxu0  ;;  %v1023_v51 = vpop.f32.mrf.mxu1 }
 0x179   :  { %12608 = vst [vmem:[#allocation59_spill] sm:$0xff] %v11126_v42  ;;  %12609 = vst [vmem:[#allocation60_spill] sm:$0xff] %v11128_v28  ;;  %v911_v54 = vadd.f32 %v910_v27, %v11040_v50  ;;  %v1024_v10 = vadd.f32 %v1023_v51, %v11046_v46 }
 0x17a   :  { %v912_v17 = vpop.f32.mrf.mxu0  ;;  %v1025_v48 = vpop.f32.mrf.mxu1 }
 0x17b   :  { %v11134_v16 = vpack.c.bf16 %v911_v54, %v909_v2  ;;  %v11136_v43 = vpack.c.bf16 %v1024_v10, %v1022_v52  ;;  %v913_v0 = vadd.f32 %v912_v17, %v11026_v15  ;;  %v1026_v29 = vadd.f32 %v1025_v48, %v11030_v18 }
 0x17c   :  { %v914_v3 = vpop.f32.mrf.mxu0  ;;  %v1027_v53 = vpop.f32.mrf.mxu1 }
 0x17d   :  { %12610 = vst [vmem:[#allocation61_spill] sm:$0xff] %v11134_v16  ;;  %12611 = vst [vmem:[#allocation62_spill] sm:$0xff] %v11136_v43  ;;  %v915_v34 = vadd.f32 %v914_v3, %v11040_v50  ;;  %v1028_v35 = vadd.f32 %v1027_v53, %v11046_v46 }
 0x17e   :  { %v918_v28 = vpop.f32.mrf.mxu0  ;;  %v1031_v27 = vpop.f32.mrf.mxu1 }
 0x17f   :  { %v11142_v42 = vpack.c.bf16 %v915_v34, %v913_v0  ;;  %v11144_v51 = vpack.c.bf16 %v1028_v35, %v1026_v29  ;;  %v919_v2 = vadd.f32 %v918_v28, %v11026_v15  ;;  %v1032_v52 = vadd.f32 %v1031_v27, %v11030_v18 }
 0x180   :  { %v920_v54 = vpop.f32.mrf.mxu0  ;;  %v1033_v17 = vpop.f32.mrf.mxu1 }
 0x181   :  { %12612 = vst [vmem:[#allocation63_spill] sm:$0xff] %v11142_v42  ;;  %12613 = vst [vmem:[#allocation64_spill] sm:$0xff] %v11144_v51  ;;  %v921_v10 = vadd.f32 %v920_v54, %v11040_v50  ;;  %v1034_v48 = vadd.f32 %v1033_v17, %v11046_v46 }
 0x182   :  { %v922_v14 = vpop.f32.mrf.mxu0  ;;  %v1035_v3 = vpop.f32.mrf.mxu1 }
 0x183   :  { %v11150_v38 = vpack.c.bf16 %v921_v10, %v919_v2  ;;  %v11152_v53 = vpack.c.bf16 %v1034_v48, %v1032_v52  ;;  %v923_v0 = vadd.f32 %v922_v14, %v11026_v15  ;;  %v1036_v29 = vadd.f32 %v1035_v3, %v11030_v18 }
 0x184   :  { %v924_v34 = vpop.f32.mrf.mxu0  ;;  %v1037_v28 = vpop.f32.mrf.mxu1 }
 0x185   :  { %12614 = vst [vmem:[#allocation65_spill] sm:$0xff] %v11150_v38  ;;  %12615 = vst [vmem:[#allocation66_spill] sm:$0xff] %v11152_v53  ;;  %v925_v35 = vadd.f32 %v924_v34, %v11040_v50  ;;  %v1038_v27 = vadd.f32 %v1037_v28, %v11046_v46 }
 0x186   :  { %v928_v45 = vpop.f32.mrf.mxu0  ;;  %v1041_v54 = vpop.f32.mrf.mxu1 }
 0x187   :  { %v11158_v44 = vpack.c.bf16 %v925_v35, %v923_v0  ;;  %v11160_v17 = vpack.c.bf16 %v1038_v27, %v1036_v29  ;;  %v929_v2 = vadd.f32 %v928_v45, %v11026_v15  ;;  %v1042_v52 = vadd.f32 %v1041_v54, %v11030_v18 }
 0x188   :  { %v930_v10 = vpop.f32.mrf.mxu0  ;;  %v1043_v14 = vpop.f32.mrf.mxu1 }
 0x189   :  { %12616 = vst [vmem:[#allocation67_spill] sm:$0xff] %v11158_v44  ;;  %12617 = vst [vmem:[#allocation68_spill] sm:$0xff] %v11160_v17  ;;  %v931_v48 = vadd.f32 %v930_v10, %v11040_v50  ;;  %v1044_v3 = vadd.f32 %v1043_v14, %v11046_v46  ;;  %v1423_v17 = vunpack.c.h.bf16 %v10913_v6 }
 0x18a   :  { %v932_v23 = vpop.f32.mrf.mxu0  ;;  %v1045_v34 = vpop.f32.mrf.mxu1 }
 0x18b   :  { %v11166_v22 = vpack.c.bf16 %v931_v48, %v929_v2  ;;  %v11168_v28 = vpack.c.bf16 %v1044_v3, %v1042_v52  ;;  %v933_v0 = vadd.f32 %v932_v23, %v11026_v15  ;;  %v1046_v29 = vadd.f32 %v1045_v34, %v11030_v18 }
 0x18c   :  { %v934_v35 = vpop.f32.mrf.mxu0  ;;  %v1047_v45 = vpop.f32.mrf.mxu1 }
 0x18d   :  { %12618 = vst [vmem:[#allocation69_spill] sm:$0xff] %v11166_v22  ;;  %12619 = vst [vmem:[#allocation70_spill] sm:$0xff] %v11168_v28  ;;  %v935_v27 = vadd.f32 %v934_v35, %v11040_v50  ;;  %v1048_v54 = vadd.f32 %v1047_v45, %v11046_v46  ;;  %v11344_v28 = vld [vmem:[#allocation13 + $0x28] ss:$16 sps:$4 sm:$0xff]   ;;  %v11350_v22 = vld [vmem:[#allocation13 + $0xc] ss:$16 sps:$4 sm:$0xff]  }
 0x18e   :  { %v938_v51 = vpop.f32.mrf.mxu0  ;;  %v1051_v10 = vpop.f32.mrf.mxu1 }
 0x18f   :  { %v11174_v42 = vpack.c.bf16 %v935_v27, %v933_v0  ;;  %v11176_v14 = vpack.c.bf16 %v1048_v54, %v1046_v29  ;;  %v939_v2 = vadd.f32 %v938_v51, %v11026_v15  ;;  %v1052_v52 = vadd.f32 %v1051_v10, %v11030_v18 }
 0x190   :  { %v940_v48 = vpop.f32.mrf.mxu0  ;;  %v1053_v23 = vpop.f32.mrf.mxu1 }
 0x191   :  { %12620 = vst [vmem:[#allocation71_spill] sm:$0xff] %v11174_v42  ;;  %12621 = vst [vmem:[#allocation72_spill] sm:$0xff] %v11176_v14  ;;  %v941_v3 = vadd.f32 %v940_v48, %v11040_v50  ;;  %v1054_v34 = vadd.f32 %v1053_v23, %v11046_v46  ;;  %v11342_v42 = vld [vmem:[#allocation13 + $0x20] ss:$16 sps:$4 sm:$0xff]  }
 0x192   :  { %v942_v43 = vpop.f32.mrf.mxu0  ;;  %v1055_v35 = vpop.f32.mrf.mxu1 }
 0x193   :  { %v11182_v16 = vpack.c.bf16 %v941_v3, %v939_v2  ;;  %v11184_v45 = vpack.c.bf16 %v1054_v34, %v1052_v52  ;;  %v943_v0 = vadd.f32 %v942_v43, %v11026_v15  ;;  %v1056_v29 = vadd.f32 %v1055_v35, %v11030_v18 }
 0x194   :  { %v944_v27 = vpop.f32.mrf.mxu0  ;;  %v1057_v51 = vpop.f32.mrf.mxu1  ;;  %v309_v43 = vadd.f32 %v10917_v8, %v10899_v57  ;;  %v422_v34 = vadd.f32 %v10919_v9, %v10903_v58  ;;  %v1422_v57 = vunpack.c.l.bf16 %v10913_v6  ;;  %v1424_v8 = vunpack.c.l.bf16 %v10915_v7 }
 0x195   :  { %v945_v54 = vadd.f32 %v944_v27, %v11040_v50  ;;  %v1058_v10 = vadd.f32 %v1057_v51, %v11046_v46  ;;  %v307_v51 = vadd.f32 %v10909_v4, %v10891_v55 }
 0x196   :  { %v11190_v62 = vpop.f32.mrf.mxu0  ;;  %v11192_v48 = vpop.f32.mrf.mxu1 }
 0x197   :  { %v11194_v23 = vpack.c.bf16 %v945_v54, %v943_v0  ;;  %v11196_v2 = vpack.c.bf16 %v1058_v10, %v1056_v29  ;;  %v420_v0 = vadd.f32 %v10911_v5, %v10895_v56  ;;  %v8987_v10 = vpack.c.bf16 %v309_v43, %v307_v51 }
 0x198   :  { %v950_v52 = vpop.f32.mrf.mxu0  ;;  %v1063_v3 = vpop.f32.mrf.mxu1 }
 0x199   :  { %v8988_v58 = vpack.c.bf16 %v422_v34, %v420_v0  ;;  %v1426_v53 = vunpack.c.l.bf16 %v8987_v10  ;;  %v1427_v13 = vunpack.c.h.bf16 %v8987_v10 }
 0x19a   :  { %v11202_v35 = vpop.f32.mrf.mxu0  ;;  %v11204_v27 = vpop.f32.mrf.mxu1 }
 0x19b   :  { %v1428_v25 = vunpack.c.l.bf16 %v8988_v58 }
 0x19c   :  { %v11210_v29 = vpop.f32.mrf.mxu0  ;;  %v11212_v54 = vpop.f32.mrf.mxu1 }
 0x19e   :  { %v1657_v9 = vpop.f32.mrf.mxu0  ;;  %v1700_v61 = vpop.f32.mrf.mxu1 }
 0x19f   :  { %v1709_v37 = vadd.f32 %v1657_v9, %v1422_v57  ;;  %v1711_v36 = vadd.f32 %v1700_v61, %v1424_v8 }
 0x1a0   :  { %v1659_v55 = vpop.f32.mrf.mxu0  ;;  %v1702_v4 = vpop.f32.mrf.mxu1 }
 0x1a1   :  { %v8280_v44 = vmul.f32 -1.442695, %v1709_v37  ;;  %v8282_v56 = vmul.f32 -1.442695, %v1711_v36  ;;  %v1710_v5 = vadd.f32 %v1659_v55, %v1423_v17  ;;  %v1425_v36 = vunpack.c.h.bf16 %v10915_v7 }
 0x1a2   :  { %v1661_v38 = vpop.f32.mrf.mxu0  ;;  %v1704_v43 = vpop.f32.mrf.mxu1  ;;  %v951_v7 = vadd.f32 %v950_v52, %v11040_v50  ;;  %v1068_v52 = vadd.f32 %v11212_v54, %v11046_v46 }
 0x1a3   :  { %9814 = vpow2.f32 %v8280_v44  ;;  %v8281_v51 = vmul.f32 -1.442695, %v1710_v5  ;;  %v1713_v24 = vadd.f32 %v1661_v38, %v1426_v53  ;;  %v1715_v34 = vadd.f32 %v1704_v43, %v1428_v25 }
 0x1a4   :  { %9816 = vpow2.f32 %v8282_v56  ;;  %v1663_v0 = vpop.f32.mrf.mxu0  ;;  %v1712_v37 = vadd.f32 %v1702_v4, %v1425_v36  ;;  %v1706_v17 = vpop.f32.mrf.mxu1  ;;  %v1429_v44 = vunpack.c.h.bf16 %v8988_v58  ;;  %v949_v43 = vadd.f32 %v11190_v62, %v11026_v15 }
 0x1a5   :  { %9818 = vpow2.f32 %v8281_v51  ;;  %v8284_v61 = vmul.f32 -1.442695, %v1713_v24  ;;  %v1714_v57 = vadd.f32 %v1663_v0, %v1427_v13  ;;  %v8286_v6 = vmul.f32 -1.442695, %v1715_v34 }
 0x1a6   :  { %v8283_v9 = vmul.f32 -1.442695, %v1712_v37  ;;  %v1716_v53 = vadd.f32 %v1706_v17, %v1429_v44  ;;  %v1064_v4 = vadd.f32 %v1063_v3, %v11046_v46  ;;  %v1062_v0 = vadd.f32 %v11192_v48, %v11030_v18 }
 0x1a7   :  { %9820 = vpow2.f32 %v8284_v61  ;;  %v8285_v8 = vmul.f32 -1.442695, %v1714_v57  ;;  %v955_v62 = vadd.f32 %v11210_v29, %v11040_v50  ;;  %v953_v3 = vadd.f32 %v11202_v35, %v11026_v15 }
 0x1a8   :  { %9822 = vpow2.f32 %v8286_v6  ;;  %v8287_v51 = vmul.f32 -1.442695, %v1716_v53  ;;  %v9045_v6 = vpack.c.bf16 %v951_v7, %v949_v43  ;;  %v1066_v48 = vadd.f32 %v11204_v27, %v11030_v18  ;;  %v1408_v7 = vld [vmem:[#allocation18] sm:$0xff] }
 0x1a9   :  { %9824 = vpow2.f32 %v8285_v8  ;;  %v11224_v8 = vpack.c.bf16 %v1064_v4, %v1062_v0  ;;  %v9047_v17 = vpack.c.bf16 %v955_v62, %v953_v3 }
 0x1aa   :  { %9826 = vpow2.f32 %v8283_v9  ;;  %v1811_v36 = vunpack.c.l.bf16 %v9045_v6  ;;  %v11235_v9 = vpack.c.bf16 %v1068_v52, %v1066_v48 }
 0x1ab   :  { %v1813_v37 = vunpack.c.l.bf16 %v11224_v8  ;;  %v1815_v27 = vunpack.c.l.bf16 %v9047_v17 }
 0x1b0   :  { %v9815_v55 = vpop.eup %9814 }
 0x1b1   :  { %v9817_v38 = vpop.eup %9816  ;;  %v1741_v56 = vadd.f32 1.0, %v9815_v55 }
 0x1b2   :  { %v9819_v10 = vpop.eup %9818  ;;  %v1743_v25 = vadd.f32 1.0, %v9817_v38  ;;  %v1812_v38 = vunpack.c.h.bf16 %v9045_v6 }
 0x1b3   :  { %v1742_v5 = vadd.f32 1.0, %v9819_v10 }
 0x1b4   :  { %v9821_v13 = vpop.eup %9820  ;;  %9828 = vrcp.f32 %v1743_v25 }
 0x1b5   :  { %v9823_v24 = vpop.eup %9822  ;;  %9830 = vrcp.f32 %v1742_v5  ;;  %v1745_v57 = vadd.f32 1.0, %v9821_v13  ;;  %v1817_v5 = vunpack.c.l.bf16 %v11235_v9 }
 0x1b6   :  { %v9825_v58 = vpop.eup %9824  ;;  %v1747_v34 = vadd.f32 1.0, %v9823_v24  ;;  %9832 = vrcp.f32 %v1741_v56 }
 0x1b7   :  { %v1746_v61 = vadd.f32 1.0, %v9825_v58  ;;  %v9827_v46 = vpop.eup %9826 }
 0x1b8   :  { %9834 = vrcp.f32 %v1747_v34  ;;  %v1744_v43 = vadd.f32 1.0, %v9827_v46 }
 0x1b9   :  { %9836 = vpow2.f32 %v8287_v51  ;;  %v1816_v51 = vunpack.c.h.bf16 %v9047_v17 }
 0x1ba   :  { %9838 = vrcp.f32 %v1746_v61 }
 0x1bb   :  { %9840 = vrcp.f32 %v1745_v57 }
 0x1be   :  { %v2046_v44 = vpop.f32.mrf.mxu0  ;;  %v2089_v55 = vpop.f32.mrf.mxu1 }
 0x1bf   :  { %v2098_v50 = vadd.f32 %v2046_v44, %v1811_v36  ;;  %v2100_v29 = vadd.f32 %v2089_v55, %v1813_v37 }
 0x1c0   :  { %v2048_v54 = vpop.f32.mrf.mxu0  ;;  %v2091_v53 = vpop.f32.mrf.mxu1 }
 0x1c1   :  { %v9829_v10 = vpop.eup %9828  ;;  %v8324_v15 = vmul.f32 -1.442695, %v2098_v50  ;;  %v8326_v35 = vmul.f32 -1.442695, %v2100_v29  ;;  %v2099_v25 = vadd.f32 %v2048_v54, %v1812_v38  ;;  %v1409_v50 = vld [vmem:[#allocation18 + $0x8] sm:$0xff] }
 0x1c2   :  { %v1765_v18 = vmul.f32 2.0, %v9829_v10  ;;  %v2050_v56 = vpop.f32.mrf.mxu0  ;;  %v2093_v13 = vpop.f32.mrf.mxu1 }
 0x1c3   :  { %v9831_v24 = vpop.eup %9830  ;;  %9842 = vpow2.f32 %v8324_v15  ;;  %v8325_v4 = vmul.f32 -1.442695, %v2099_v25  ;;  %v2102_v0 = vadd.f32 %v2050_v56, %v1815_v27  ;;  %v2104_v61 = vadd.f32 %v2093_v13, %v1817_v5  ;;  %v11238_v10 = vpop.permute.xlu0 %1312 }
 0x1c4   :  { %v9833_v58 = vpop.eup %9832  ;;  %v8288_v34 = vadd.f32 -1.0, %v1765_v18  ;;  %9844 = vpow2.f32 %v8326_v35  ;;  %v2052_v57 = vpop.f32.mrf.mxu0  ;;  %v1769_v36 = vmul.f32 %v9831_v24, %v1408_v7  ;;  %12622 = vst [vmem:[#allocation73_spill] sm:$0xff] %v11238_v10  ;;  %v1814_v18 = vunpack.c.h.bf16 %v11224_v8 }
 0x1c5   :  { %v9835_v6 = vpop.eup %9834  ;;  %9846 = vpow2.f32 %v8325_v4  ;;  %v2103_v62 = vadd.f32 %v2052_v57, %v1816_v51  ;;  %v8328_v37 = vmul.f32 -1.442695, %v2102_v0  ;;  %v8330_v55 = vmul.f32 -1.442695, %v2104_v61  ;;  %v2095_v4 = vpop.f32.mrf.mxu1 }
 0x1c6   :  { %v9837_v52 = vpop.eup %9836  ;;  %v1771_v3 = vmul.f32 %v9833_v58, %v8288_v34  ;;  %v1766_v48 = vmul.f32 2.0, %v9835_v6  ;;  %9848 = vrcp.f32 %v1744_v43  ;;  %v2101_v5 = vadd.f32 %v2091_v53, %v1814_v18 }
 0x1c7   :  { %v9839_v44 = vpop.eup %9838  ;;  %v8329_v29 = vmul.f32 -1.442695, %v2103_v62  ;;  %9850 = vpow2.f32 %v8328_v37  ;;  %v1748_v54 = vadd.f32 1.0, %v9837_v52  ;;  %v11244_v43 = vpop.permute.xlu0 %1317  ;;  %v1818_v34 = vunpack.c.h.bf16 %v11235_v9 }
 0x1c8   :  { %v8289_v17 = vadd.f32 -1.0, %v1766_v48  ;;  %v1773_v38 = vadd.f32 %v1771_v3, %v1769_v36  ;;  %v9841_v46 = vpop.eup %9840  ;;  %9852 = vpow2.f32 %v8330_v55  ;;  %v1770_v25 = vmul.f32 %v9839_v44, %v1409_v50  ;;  %12623 = vst [vmem:[#allocation74_spill] sm:$0xff] %v11244_v43 }
 0x1c9   :  { %v8327_v8 = vmul.f32 -1.442695, %v2101_v5  ;;  %v2105_v62 = vadd.f32 %v2095_v4, %v1818_v34 }
 0x1ca   :  { %v1772_v15 = vmul.f32 %v9841_v46, %v8289_v17  ;;  %9854 = vtanh.f32 %v1773_v38  ;;  %v1797_v35 = vsub.f32 %v1773_v38, %v1408_v7  ;;  %v10390_v38 = vld [vmem:[#allocation16] sm:$0xff] }
 0x1cb   :  { %9856 = vpow2.f32 %v8329_v29  ;;  %v8331_v36 = vmul.f32 -1.442695, %v2105_v62  ;;  %v11260_v62 = vld [vmem:[#allocation13 + $0xe8] ss:$16 sps:$4 sm:$0xff]  }
 0x1cc   :  { %v1799_v27 = vmul.f32 %v1797_v35, %v11238_v10  ;;  %v1774_v56 = vadd.f32 %v1772_v15, %v1770_v25  ;;  %9858 = vrcp.f32 %v1748_v54 }
 0x1ce   :  { %v11242_v13 = vadd.f32 %v1799_v27, %v1408_v7  ;;  %9860 = vtanh.f32 %v1774_v56  ;;  %v1798_v24 = vsub.f32 %v1774_v56, %v1409_v50  ;;  %v10391_v27 = vld [vmem:[#allocation16 + $0x8] sm:$0xff] }
 0x1d0   :  { %v9843_v51 = vpop.eup %9842  ;;  %v1800_v58 = vmul.f32 %v1798_v24, %v11244_v43 }
 0x1d1   :  { %v9845_v0 = vpop.eup %9844  ;;  %v2130_v52 = vadd.f32 1.0, %v9843_v51 }
 0x1d2   :  { %v9847_v61 = vpop.eup %9846  ;;  %v2132_v57 = vadd.f32 1.0, %v9845_v0  ;;  %v11248_v6 = vadd.f32 %v1800_v58, %v1409_v50 }
 0x1d3   :  { %v2131_v53 = vadd.f32 1.0, %v9847_v61  ;;  %v9849_v7 = vpop.eup %9848  ;;  %v1414_v61 = vld [vmem:[#allocation18 + $0x10] sm:$0xff] }
 0x1d4   :  { %9862 = vrcp.f32 %v2132_v57  ;;  %v9851_v3 = vpop.eup %9850  ;;  %v11258_v57 = vld [vmem:[#allocation13 + $0xe0] ss:$16 sps:$4 sm:$0xff]  }
 0x1d5   :  { %9864 = vpow2.f32 %v8327_v8  ;;  %v9853_v48 = vpop.eup %9852  ;;  %v2134_v29 = vadd.f32 1.0, %v9851_v3  ;;  %v11266_v3 = vld [vmem:[#allocation13 + $0xcc] ss:$16 sps:$4 sm:$0xff]  }
 0x1d6   :  { %9866 = vrcp.f32 %v2131_v53  ;;  %v2136_v44 = vadd.f32 1.0, %v9853_v48 }
 0x1d7   :  { %v9855_v37 = vpop.eup %9854  ;;  %9868 = vrcp.f32 %v2130_v52  ;;  %v11264_v52 = vld [vmem:[#allocation13 + $0xc4] ss:$16 sps:$4 sm:$0xff]  }
 0x1d8   :  { %v9857_v55 = vpop.eup %9856  ;;  %v1777_v9 = vmul.f32 %v9855_v37, %v9849_v7  ;;  %9870 = vrcp.f32 %v2136_v44 }
 0x1d9   :  { %v2135_v17 = vadd.f32 1.0, %v9857_v55  ;;  %v9859_v50 = vpop.eup %9858  ;;  %9872 = vpow2.f32 %v8331_v36 }
 0x1da   :  { %v1791_v46 = vsub.f32 %v1777_v9, %v10390_v38  ;;  %v1779_v35 = vmul.f32 %v1777_v9, %v11238_v10 }
 0x1db   :  { %v9861_v54 = vpop.eup %9860  ;;  %9874 = vrcp.f32 %v2135_v17  ;;  %v11270_v17 = vld [vmem:[#allocation13 + $0xc0] ss:$16 sps:$4 sm:$0xff]  }
 0x1dc   :  { %v1778_v15 = vmul.f32 %v9861_v54, %v9859_v50  ;;  %9876 = vrcp.f32 %v2134_v29  ;;  %v1793_v25 = vmul.f32 %v1791_v46, %v11238_v10  ;;  %v11272_v50 = vld [vmem:[#allocation13 + $0xc8] ss:$16 sps:$4 sm:$0xff]  }
 0x1dd   :  { %v1415_v54 = vld [vmem:[#allocation18 + $0x18] sm:$0xff] }
 0x1de   :  { %v1780_v18 = vmul.f32 %v1778_v15, %v11244_v43  ;;  %v1792_v56 = vsub.f32 %v1778_v15, %v10391_v27  ;;  %v11254_v34 = vadd.f32 %v10390_v38, %v1793_v25  ;;  %v11276_v15 = vld [vmem:[#allocation13 + $0xa4] ss:$16 sps:$4 sm:$0xff]  }
 0x1e0   :  { %v9084_v5 = vpack.c.bf16 %v1780_v18, %v1779_v35  ;;  %v1794_v24 = vmul.f32 %v1792_v56, %v11244_v43  ;;  %v11278_v35 = vld [vmem:[#allocation13 + $0xac] ss:$16 sps:$4 sm:$0xff]   ;;  %v12624_v18 = vmov 0  }
 0x1e1   :  { %v9863_v4 = vpop.eup %9862  ;;  %v11338_v43 = vld [vmem:[#allocation13 + $0x2c] ss:$16 sps:$4 sm:$0xff]  }
 0x1e2   :  { %v9865_v51 = vpop.eup %9864  ;;  %v2154_v58 = vmul.f32 2.0, %v9863_v4  ;;  %9085 = vst [vmem:[#allocation4] sm:$0xff] %v9084_v5   ;;  %v11256_v0 = vadd.f32 %v10391_v27, %v1794_v24  ;;  %v11282_v5 = vpop.permute.xlu1 %1382  ;;  %12630 = vst [vmem:[#allocation80_spill] sm:$0xff] %v11338_v43 }
 0x1e3   :  { %v9867_v8 = vpop.eup %9866  ;;  %v2133_v36 = vadd.f32 1.0, %v9865_v51  ;;  %12625 = vst [vmem:[#allocation75_spill] sm:$0xff] %v11282_v5 }
 0x1e4   :  { %v8332_v53 = vadd.f32 -1.0, %v2154_v58  ;;  %v2209_v7 = vpack.c.bf16 %v11256_v0, %v11254_v34  ;;  %v9869_v48 = vpop.eup %9868  ;;  %v2158_v55 = vmul.f32 %v9867_v8, %v1414_v61  ;;  %v11286_v58 = vld [vmem:[#allocation13 + $0xa0] ss:$16 sps:$4 sm:$0xff]   ;;  %v11288_v8 = vld [vmem:[#allocation13 + $0xa8] ss:$16 sps:$4 sm:$0xff]  }
 0x1e5   :  { %v9871_v37 = vpop.eup %9870  ;;  %9878 = vrcp.f32 %v2133_v36 }
 0x1e6   :  { %v2160_v44 = vmul.f32 %v9869_v48, %v8332_v53  ;;  %2435 = vmatmul.mubr.bf16.vlgmr.msra.gmra.mxu0 %v2209_v7  ;;  %2478 = vmatmul.mubr.bf16.vlgmr.msra.gmra.mxu1 %v2209_v7  ;;  %v9873_v9 = vpop.eup %9872  ;;  %v2155_v29 = vmul.f32 2.0, %v9871_v37  ;;  %v11293_v7 = vld [vmem:[#allocation13 + $0x84] ss:$16 sps:$4 sm:$0xff]   ;;  %v11295_v48 = vld [vmem:[#allocation13 + $0x8c] ss:$16 sps:$4 sm:$0xff]  }
 0x1e7   :  { %2793 = vmatpush1.bf16.msra.mxu0 %v11258_v57  ;;  %2836 = vmatpush1.bf16.msra.mxu1 %v11260_v62  ;;  %v2137_v56 = vadd.f32 1.0, %v9873_v9  ;;  %v11303_v9 = vld [vmem:[#allocation13 + $0x88] ss:$16 sps:$4 sm:$0xff]  }
 0x1e8   :  { %v9875_v38 = vpop.eup %9874  ;;  %v2162_v46 = vadd.f32 %v2160_v44, %v2158_v55  ;;  %2794 = vmatprep.subr.bf16.mxu0 %v11264_v52  ;;  %2837 = vmatprep.subr.bf16.mxu1 %v11266_v3  ;;  %v8333_v25 = vadd.f32 -1.0, %v2155_v29  ;;  %v11301_v55 = vld [vmem:[#allocation13 + $0x80] ss:$16 sps:$4 sm:$0xff]   ;;  %v11305_v29 = vpop.permute.xlu1 %1387 }
 0x1e9   :  { %2824 = vmatprep.mubr.bf16.mxu0 %v12624_v18  ;;  %2867 = vmatprep.mubr.bf16.mxu1 %v12624_v18  ;;  %v9877_v27 = vpop.eup %9876  ;;  %v2159_v51 = vmul.f32 %v9875_v38, %v1415_v54  ;;  %12626 = vst [vmem:[#allocation76_spill] sm:$0xff] %v11305_v29  ;;  %v11309_v38 = vld [vmem:[#allocation13 + $0x64] ss:$16 sps:$4 sm:$0xff]  }
 0x1ea   :  { %9880 = vtanh.f32 %v2162_v46  ;;  %v2187_v24 = vsub.f32 %v2162_v46, %v1414_v61  ;;  %v2161_v4 = vmul.f32 %v9877_v27, %v8333_v25  ;;  %v11318_v27 = vld [vmem:[#allocation13 + $0x60] ss:$16 sps:$4 sm:$0xff]  }
 0x1eb   :  { %2795 = vmatpush1.bf16.msra.mxu0 %v11270_v17  ;;  %2838 = vmatpush1.bf16.msra.mxu1 %v11272_v50  ;;  %9882 = vrcp.f32 %v2137_v56  ;;  %v11320_v56 = vld [vmem:[#allocation13 + $0x68] ss:$16 sps:$4 sm:$0xff]  }
 0x1ec   :  { %v2189_v53 = vmul.f32 %v2187_v24, %v11282_v5  ;;  %2796 = vmatprep.subr.bf16.mxu0 %v11276_v15  ;;  %2839 = vmatprep.subr.bf16.mxu1 %v11278_v35  ;;  %v2163_v36 = vadd.f32 %v2161_v4, %v2159_v51  ;;  %v11324_v24 = vld [vmem:[#allocation13 + $0x44] ss:$16 sps:$4 sm:$0xff]   ;;  %v11326_v4 = vld [vmem:[#allocation13 + $0x4c] ss:$16 sps:$4 sm:$0xff]  }
 0x1ee   :  { %v11297_v37 = vadd.f32 %v2189_v53, %v1414_v61  ;;  %9884 = vtanh.f32 %v2163_v36  ;;  %v2188_v44 = vsub.f32 %v2163_v36, %v1415_v54  ;;  %v11311_v61 = vld [vmem:[#allocation13 + $0x6c] ss:$16 sps:$4 sm:$0xff]   ;;  %v11332_v36 = vld [vmem:[#allocation13 + $0x48] ss:$16 sps:$4 sm:$0xff]  }
 0x1ef   :  { %2797 = vmatpush1.bf16.msra.mxu0 %v11286_v58  ;;  %2840 = vmatpush1.bf16.msra.mxu1 %v11288_v8  ;;  %12628 = vst [vmem:[#allocation78_spill] sm:$0xff] %v11332_v36 }
 0x1f0   :  { %2798 = vmatprep.subr.bf16.mxu0 %v11293_v7  ;;  %2841 = vmatprep.subr.bf16.mxu1 %v11295_v48  ;;  %v2190_v46 = vmul.f32 %v2188_v44, %v11305_v29 }
 0x1f2   :  { %v11314_v25 = vadd.f32 %v2190_v46, %v1415_v54  ;;  %v9879_v51 = vpop.eup %9878  ;;  %v11330_v54 = vld [vmem:[#allocation13 + $0x40] ss:$16 sps:$4 sm:$0xff]   ;;  %v11336_v46 = vld [vmem:[#allocation13 + $0x24] ss:$16 sps:$4 sm:$0xff]  }
 0x1f3   :  { %2799 = vmatpush1.bf16.msra.mxu0 %v11301_v55  ;;  %2842 = vmatpush1.bf16.msra.mxu1 %v11303_v9  ;;  %12627 = vst [vmem:[#allocation77_spill] sm:$0xff] %v11330_v54  ;;  %12629 = vst [vmem:[#allocation79_spill] sm:$0xff] %v11336_v46 }
 0x1f4   :  { %2800 = vmatprep.subr.bf16.mxu0 %v11309_v38  ;;  %2843 = vmatprep.subr.bf16.mxu1 %v11311_v61 }
 0x1f7   :  { %v9881_v53 = vpop.eup %9880  ;;  %2801 = vmatpush1.bf16.msra.mxu0 %v11318_v27  ;;  %2844 = vmatpush1.bf16.msra.mxu1 %v11320_v56 }
 0x1f8   :  { %v2166_v44 = vmul.f32 %v9881_v53, %v9879_v51  ;;  %2802 = vmatprep.subr.bf16.mxu0 %v11324_v24  ;;  %2845 = vmatprep.subr.bf16.mxu1 %v11326_v4  ;;  %v9883_v10 = vpop.eup %9882  ;;  %v11348_v53 = vld [vmem:[#allocation13 + $0x4] ss:$16 sps:$4 sm:$0xff]  }
 0x1f9   :  { %12631 = vst [vmem:[#allocation81_spill] sm:$0xff] %v11348_v53 }
 0x1fa   :  { %v2181_v14 = vsub.f32 %v2166_v44, %v10392_v12  ;;  %v2168_v59 = vmul.f32 %v2166_v44, %v11282_v5 }
 0x1fb   :  { %2803 = vmatpush1.bf16.msra.mxu0 %v11330_v54  ;;  %2846 = vmatpush1.bf16.msra.mxu1 %v11332_v36  ;;  %v9885_v51 = vpop.eup %9884  ;;  %v10393_v36 = vld [vmem:[#allocation16 + $0x18] sm:$0xff] }
 0x1fc   :  { %2804 = vmatprep.subr.bf16.mxu0 %v11336_v46  ;;  %2847 = vmatprep.subr.bf16.mxu1 %v11338_v43  ;;  %v2167_v60 = vmul.f32 %v9885_v51, %v9883_v10  ;;  %v2183_v41 = vmul.f32 %v2181_v14, %v11282_v5  ;;  %v11357_v46 = vld [vmem:[#allocation13] ss:$16 sps:$4 sm:$0xff]   ;;  %v11359_v43 = vld [vmem:[#allocation13 + $0x8] ss:$16 sps:$4 sm:$0xff]   ;;  %v10395_v5 = vld [vmem:[#allocation12 + $0xec] ss:$16 sps:$4 sm:$0xff]  }
 0x1fe   :  { %v2169_v40 = vmul.f32 %v2167_v60, %v11305_v29  ;;  %v2182_v54 = vsub.f32 %v2167_v60, %v10393_v36  ;;  %v11364_v14 = vadd.f32 %v10392_v12, %v2183_v41  ;;  %v10394_v60 = vld [vmem:[#allocation12 + $0xe4] ss:$16 sps:$4 sm:$0xff]   ;;  %v10397_v41 = vld [vmem:[#allocation12 + $0xe8] ss:$16 sps:$4 sm:$0xff]   ;;  %v10399_v12 = vld [vmem:[#allocation12 + $0xcc] ss:$16 sps:$4 sm:$0xff]  }
 0x1ff   :  { %2805 = vmatpush1.bf16.msra.mxu0 %v11342_v42  ;;  %2848 = vmatpush1.bf16.msra.mxu1 %v11344_v28 }
 0x200   :  { %2806 = vmatprep.subr.bf16.mxu0 %v11348_v53  ;;  %2849 = vmatprep.subr.bf16.mxu1 %v11350_v22  ;;  %v9089_v10 = vpack.c.bf16 %v2169_v40, %v2168_v59  ;;  %v2184_v44 = vmul.f32 %v2182_v54, %v11305_v29  ;;  %v10396_v40 = vld [vmem:[#allocation12 + $0xe0] ss:$16 sps:$4 sm:$0xff]   ;;  %v10398_v59 = vld [vmem:[#allocation12 + $0xc4] ss:$16 sps:$4 sm:$0xff]  }
 0x201   :  { %v10400_v54 = vld [vmem:[#allocation12 + $0xc0] ss:$16 sps:$4 sm:$0xff]  }
 0x202   :  { %9090 = vst [vmem:[#allocation5 + $0x38] sm:$0xff] %v9089_v10   ;;  %v11366_v51 = vadd.f32 %v10393_v36, %v2184_v44  ;;  %v10402_v36 = vld [vmem:[#allocation12 + $0xa4] ss:$16 sps:$4 sm:$0xff]   ;;  %v10403_v10 = vld [vmem:[#allocation12 + $0xac] ss:$16 sps:$4 sm:$0xff]  }
 0x203   :  { %2807 = vmatpush1.bf16.msra.mxu0 %v11357_v46  ;;  %2850 = vmatpush1.bf16.msra.mxu1 %v11359_v43  ;;  %v10405_v44 = vld [vmem:[#allocation12 + $0xa8] ss:$16 sps:$4 sm:$0xff]  }
 0x204   :  { %3182 = vmatprep.subr.bf16.mxu0 %v10394_v60  ;;  %3225 = vmatprep.subr.bf16.mxu1 %v10395_v5  ;;  %v2599_v53 = vpack.c.bf16 %v11366_v51, %v11364_v14  ;;  %v10401_v5 = vld [vmem:[#allocation12 + $0xc8] ss:$16 sps:$4 sm:$0xff]   ;;  %v10406_v60 = vld [vmem:[#allocation12 + $0x84] ss:$16 sps:$4 sm:$0xff]  }
 0x206   :  { %2825 = vmatmul.mubr.bf16.vlgmr.msra.gmra.mxu0 %v2599_v53  ;;  %2868 = vmatmul.mubr.bf16.vlgmr.msra.gmra.mxu1 %v2599_v53  ;;  %v10404_v53 = vld [vmem:[#allocation12 + $0xa0] ss:$16 sps:$4 sm:$0xff]  }
 0x207   :  { %3183 = vmatpush1.bf16.msra.mxu0 %v10396_v40  ;;  %3226 = vmatpush1.bf16.msra.mxu1 %v10397_v41  ;;  %v10407_v40 = vld [vmem:[#allocation12 + $0x8c] ss:$16 sps:$4 sm:$0xff]   ;;  %v10408_v41 = vld [vmem:[#allocation12 + $0x80] ss:$16 sps:$4 sm:$0xff]  }
 0x208   :  { %3184 = vmatprep.subr.bf16.mxu0 %v10398_v59  ;;  %3227 = vmatprep.subr.bf16.mxu1 %v10399_v12  ;;  %v10409_v59 = vld [vmem:[#allocation12 + $0x88] ss:$16 sps:$4 sm:$0xff]   ;;  %v10410_v12 = vld [vmem:[#allocation12 + $0x64] ss:$16 sps:$4 sm:$0xff]  }
 0x209   :  { %3214 = vmatprep.mubr.bf16.mxu0 %v12624_v18  ;;  %3257 = vmatprep.mubr.bf16.mxu1 %v12624_v18 }
 0x20b   :  { %3185 = vmatpush1.bf16.msra.mxu0 %v10400_v54  ;;  %3228 = vmatpush1.bf16.msra.mxu1 %v10401_v5  ;;  %v10411_v54 = vld [vmem:[#allocation12 + $0x6c] ss:$16 sps:$4 sm:$0xff]   ;;  %v10412_v5 = vld [vmem:[#allocation12 + $0x60] ss:$16 sps:$4 sm:$0xff]  }
 0x20c   :  { %3186 = vmatprep.subr.bf16.mxu0 %v10402_v36  ;;  %3229 = vmatprep.subr.bf16.mxu1 %v10403_v10  ;;  %v10413_v36 = vld [vmem:[#allocation12 + $0x68] ss:$16 sps:$4 sm:$0xff]   ;;  %v10414_v10 = vld [vmem:[#allocation12 + $0x44] ss:$16 sps:$4 sm:$0xff]  }
 0x20f   :  { %3187 = vmatpush1.bf16.msra.mxu0 %v10404_v53  ;;  %3230 = vmatpush1.bf16.msra.mxu1 %v10405_v44  ;;  %v10415_v53 = vld [vmem:[#allocation12 + $0x4c] ss:$16 sps:$4 sm:$0xff]   ;;  %v10416_v44 = vld [vmem:[#allocation12 + $0x40] ss:$16 sps:$4 sm:$0xff]  }
 0x210   :  { %3188 = vmatprep.subr.bf16.mxu0 %v10406_v60  ;;  %3231 = vmatprep.subr.bf16.mxu1 %v10407_v40  ;;  %v10417_v60 = vld [vmem:[#allocation12 + $0x48] ss:$16 sps:$4 sm:$0xff]  }
 0x213   :  { %3189 = vmatpush1.bf16.msra.mxu0 %v10408_v41  ;;  %3232 = vmatpush1.bf16.msra.mxu1 %v10409_v59 }
 0x214   :  { %3190 = vmatprep.subr.bf16.mxu0 %v10410_v12  ;;  %3233 = vmatprep.subr.bf16.mxu1 %v10411_v54 }
 0x217   :  { %3191 = vmatpush1.bf16.msra.mxu0 %v10412_v5  ;;  %3234 = vmatpush1.bf16.msra.mxu1 %v10413_v36 }
 0x218   :  { %3192 = vmatprep.subr.bf16.mxu0 %v10414_v10  ;;  %3235 = vmatprep.subr.bf16.mxu1 %v10415_v53  ;;  %v2206_v53 = vunpack.c.h.bf16 %v10933_v30 }
 0x21b   :  { %3193 = vmatpush1.bf16.msra.mxu0 %v10416_v44  ;;  %3236 = vmatpush1.bf16.msra.mxu1 %v10417_v60 }
 0x21c   :  { %3194 = vmatprep.subr.bf16.mxu0 %v11048_v63  ;;  %3237 = vmatprep.subr.bf16.mxu1 %v11050_v1  ;;  %v2201_v63 = vunpack.c.l.bf16 %v10925_v20  ;;  %v2203_v1 = vunpack.c.l.bf16 %v10927_v21 }
 0x21f   :  { %3195 = vmatpush1.bf16.msra.mxu0 %v11058_v11  ;;  %3238 = vmatpush1.bf16.msra.mxu1 %v11060_v49 }
 0x220   :  { %3196 = vmatprep.subr.bf16.mxu0 %v11068_v32  ;;  %3239 = vmatprep.subr.bf16.mxu1 %v11070_v33  ;;  %v2202_v32 = vunpack.c.h.bf16 %v10925_v20 }
 0x223   :  { %3197 = vmatpush1.bf16.msra.mxu0 %v11078_v39  ;;  %3240 = vmatpush1.bf16.msra.mxu1 %v11080_v47  ;;  %v2205_v47 = vunpack.c.l.bf16 %v10933_v30 }
 0x224   :  { %3572 = vmatprep.subr.bf16.mxu0 %v11088_v19  ;;  %3615 = vmatprep.subr.bf16.mxu1 %v11090_v26  ;;  %v2207_v26 = vunpack.c.l.bf16 %v10935_v31 }
 0x2a6   :  { %v2436_v40 = vpop.f32.mrf.mxu0  ;;  %v2479_v11 = vpop.f32.mrf.mxu1 }
 0x2a7   :  { %v2488_v41 = vadd.f32 %v2436_v40, %v2201_v63  ;;  %v2490_v49 = vadd.f32 %v2479_v11, %v2203_v1  ;;  %v2204_v11 = vunpack.c.h.bf16 %v10927_v21 }
 0x2a8   :  { %v2438_v59 = vpop.f32.mrf.mxu0  ;;  %v2481_v33 = vpop.f32.mrf.mxu1 }
 0x2a9   :  { %v8368_v12 = vmul.f32 -1.442695, %v2488_v41  ;;  %v8370_v39 = vmul.f32 -1.442695, %v2490_v49  ;;  %v2489_v54 = vadd.f32 %v2438_v59, %v2202_v32  ;;  %v2491_v41 = vadd.f32 %v2481_v33, %v2204_v11 }
 0x2aa   :  { %v2440_v19 = vpop.f32.mrf.mxu0  ;;  %v2483_v5 = vpop.f32.mrf.mxu1  ;;  %v2208_v32 = vunpack.c.h.bf16 %v10935_v31 }
 0x2ab   :  { %9886 = vpow2.f32 %v8368_v12  ;;  %v8369_v36 = vmul.f32 -1.442695, %v2489_v54  ;;  %v2492_v10 = vadd.f32 %v2440_v19, %v2205_v47  ;;  %v2494_v44 = vadd.f32 %v2483_v5, %v2207_v26 }
 0x2ac   :  { %9888 = vpow2.f32 %v8370_v39  ;;  %v2442_v60 = vpop.f32.mrf.mxu0  ;;  %v2485_v49 = vpop.f32.mrf.mxu1  ;;  %v8371_v12 = vmul.f32 -1.442695, %v2491_v41  ;;  %v2592_v41 = vunpack.c.h.bf16 %v11182_v16 }
 0x2ad   :  { %9890 = vpow2.f32 %v8369_v36  ;;  %v8372_v20 = vmul.f32 -1.442695, %v2492_v10  ;;  %v2493_v63 = vadd.f32 %v2442_v60, %v2206_v53  ;;  %v8374_v1 = vmul.f32 -1.442695, %v2494_v44 }
 0x2ae   :  { %v2495_v59 = vadd.f32 %v2485_v49, %v2208_v32  ;;  %v2591_v44 = vunpack.c.l.bf16 %v11182_v16  ;;  %v2593_v60 = vunpack.c.l.bf16 %v11184_v45 }
 0x2af   :  { %9892 = vpow2.f32 %v8372_v20  ;;  %v8373_v40 = vmul.f32 -1.442695, %v2493_v63 }
 0x2b0   :  { %9894 = vpow2.f32 %v8374_v1  ;;  %v8375_v19 = vmul.f32 -1.442695, %v2495_v59 }
 0x2b1   :  { %9896 = vpow2.f32 %v8373_v40 }
 0x2b2   :  { %9898 = vpow2.f32 %v8371_v12  ;;  %v2595_v12 = vunpack.c.l.bf16 %v11194_v23 }
 0x2b8   :  { %v9887_v30 = vpop.eup %9886 }
 0x2b9   :  { %v9889_v39 = vpop.eup %9888  ;;  %v2520_v26 = vadd.f32 1.0, %v9887_v30 }
 0x2ba   :  { %v9891_v54 = vpop.eup %9890  ;;  %v2522_v47 = vadd.f32 1.0, %v9889_v39 }
 0x2bb   :  { %v2521_v5 = vadd.f32 1.0, %v9891_v54 }
 0x2bc   :  { %v9893_v36 = vpop.eup %9892  ;;  %9900 = vrcp.f32 %v2522_v47 }
 0x2bd   :  { %v9895_v10 = vpop.eup %9894  ;;  %9902 = vrcp.f32 %v2521_v5  ;;  %v2524_v31 = vadd.f32 1.0, %v9893_v36 }
 0x2be   :  { %v9897_v21 = vpop.eup %9896  ;;  %v2526_v53 = vadd.f32 1.0, %v9895_v10  ;;  %9904 = vpow2.f32 %v8375_v19 }
 0x2bf   :  { %9906 = vrcp.f32 %v2520_v26  ;;  %v2525_v33 = vadd.f32 1.0, %v9897_v21  ;;  %v9899_v1 = vpop.eup %9898  ;;  %v2597_v21 = vunpack.c.l.bf16 %v11196_v2 }
 0x2c0   :  { %9908 = vrcp.f32 %v2526_v53  ;;  %v2523_v36 = vadd.f32 1.0, %v9899_v1 }
 0x2c1   :  { %9910 = vrcp.f32 %v2525_v33 }
 0x2c2   :  { %9912 = vrcp.f32 %v2524_v31 }
 0x2c6   :  { %v2826_v20 = vpop.f32.mrf.mxu0  ;;  %v2869_v63 = vpop.f32.mrf.mxu1 }
 0x2c7   :  { %v2878_v40 = vadd.f32 %v2826_v20, %v2591_v44  ;;  %v2880_v11 = vadd.f32 %v2869_v63, %v2593_v60  ;;  %v2596_v63 = vunpack.c.h.bf16 %v11194_v23 }
 0x2c8   :  { %v2828_v32 = vpop.f32.mrf.mxu0  ;;  %v2871_v59 = vpop.f32.mrf.mxu1 }
 0x2c9   :  { %v9901_v49 = vpop.eup %9900  ;;  %v8412_v54 = vmul.f32 -1.442695, %v2878_v40  ;;  %v8414_v47 = vmul.f32 -1.442695, %v2880_v11  ;;  %v2879_v19 = vadd.f32 %v2828_v32, %v2592_v41 }
 0x2ca   :  { %v9903_v30 = vpop.eup %9902  ;;  %v2544_v39 = vmul.f32 2.0, %v9901_v49  ;;  %v2830_v10 = vpop.f32.mrf.mxu0 }
 0x2cb   :  { %v9905_v26 = vpop.eup %9904  ;;  %v2548_v5 = vmul.f32 %v9903_v30, %v11242_v13  ;;  %v2873_v53 = vpop.f32.mrf.mxu1  ;;  %9914 = vpow2.f32 %v8412_v54  ;;  %v8413_v31 = vmul.f32 -1.442695, %v2879_v19  ;;  %v2882_v44 = vadd.f32 %v2830_v10, %v2595_v12 }
 0x2cc   :  { %v9907_v33 = vpop.eup %9906  ;;  %v8376_v16 = vadd.f32 -1.0, %v2544_v39  ;;  %9916 = vpow2.f32 %v8414_v47  ;;  %v2884_v20 = vadd.f32 %v2873_v53, %v2597_v21  ;;  %v2832_v40 = vpop.f32.mrf.mxu0  ;;  %v2527_v19 = vadd.f32 1.0, %v9905_v26 }
 0x2cd   :  { %v9909_v60 = vpop.eup %9908  ;;  %9918 = vpow2.f32 %v8413_v31  ;;  %v8416_v1 = vmul.f32 -1.442695, %v2882_v44  ;;  %v2883_v29 = vadd.f32 %v2832_v40, %v2596_v63  ;;  %v2594_v21 = vunpack.c.h.bf16 %v11184_v45  ;;  %v11402_v53 = vpop.permute.xlu0 %1322 }
 0x2ce   :  { %v9911_v11 = vpop.eup %9910  ;;  %v2550_v41 = vmul.f32 %v9907_v33, %v8376_v16  ;;  %v2545_v49 = vmul.f32 2.0, %v9909_v60  ;;  %9920 = vrcp.f32 %v2523_v36  ;;  %v8418_v30 = vmul.f32 -1.442695, %v2884_v20  ;;  %12632 = vst [vmem:[#allocation82_spill] sm:$0xff] %v11402_v53  ;;  %v2875_v31 = vpop.f32.mrf.mxu1 }
 0x2cf   :  { %v2549_v32 = vmul.f32 %v9911_v11, %v11248_v6  ;;  %9922 = vpow2.f32 %v8416_v1  ;;  %v9913_v12 = vpop.eup %9912  ;;  %v8417_v47 = vmul.f32 -1.442695, %v2883_v29  ;;  %v2881_v16 = vadd.f32 %v2871_v59, %v2594_v21  ;;  %v11409_v29 = vpop.permute.xlu1 %1327 }
 0x2d0   :  { %v2552_v39 = vadd.f32 %v2550_v41, %v2548_v5  ;;  %v8377_v54 = vadd.f32 -1.0, %v2545_v49  ;;  %9924 = vpow2.f32 %v8418_v30  ;;  %12633 = vst [vmem:[#allocation83_spill] sm:$0xff] %v11409_v29  ;;  %v2598_v60 = vunpack.c.h.bf16 %v11196_v2 }
 0x2d1   :  { %v8415_v45 = vmul.f32 -1.442695, %v2881_v16 }
 0x2d2   :  { %9926 = vtanh.f32 %v2552_v39  ;;  %v2577_v23 = vsub.f32 %v2552_v39, %v11242_v13  ;;  %v2551_v10 = vmul.f32 %v9913_v12, %v8377_v54  ;;  %v2885_v40 = vadd.f32 %v2875_v31, %v2598_v60 }
 0x2d3   :  { %9928 = vpow2.f32 %v8417_v47 }
 0x2d4   :  { %v2579_v36 = vmul.f32 %v2577_v23, %v11402_v53  ;;  %v2553_v33 = vadd.f32 %v2551_v10, %v2549_v32  ;;  %9930 = vrcp.f32 %v2527_v19  ;;  %v8419_v39 = vmul.f32 -1.442695, %v2885_v40 }
 0x2d6   :  { %9932 = vtanh.f32 %v2553_v33  ;;  %v2578_v5 = vsub.f32 %v2553_v33, %v11248_v6  ;;  %v11407_v26 = vadd.f32 %v2579_v36, %v11242_v13 }
 0x2d7   :  { %9934 = vpow2.f32 %v8415_v45 }
 0x2d8   :  { %v2580_v44 = vmul.f32 %v2578_v5, %v11409_v29  ;;  %v9915_v20 = vpop.eup %9914 }
 0x2d9   :  { %v9917_v63 = vpop.eup %9916  ;;  %v2910_v1 = vadd.f32 1.0, %v9915_v20 }
 0x2da   :  { %v11414_v59 = vadd.f32 %v2580_v44, %v11248_v6  ;;  %v9919_v11 = vpop.eup %9918  ;;  %v2912_v41 = vadd.f32 1.0, %v9917_v63 }
 0x2db   :  { %v9921_v49 = vpop.eup %9920  ;;  %v2911_v13 = vadd.f32 1.0, %v9919_v11 }
 0x2dc   :  { %v9923_v32 = vpop.eup %9922  ;;  %9936 = vrcp.f32 %v2912_v41 }
 0x2dd   :  { %v9925_v30 = vpop.eup %9924  ;;  %9938 = vrcp.f32 %v2911_v13  ;;  %v2914_v47 = vadd.f32 1.0, %v9923_v32 }
 0x2de   :  { %v2916_v12 = vadd.f32 1.0, %v9925_v30  ;;  %9940 = vrcp.f32 %v2910_v1 }
 0x2df   :  { %v9927_v54 = vpop.eup %9926 }
 0x2e0   :  { %v9929_v2 = vpop.eup %9928  ;;  %v2556_v19 = vmul.f32 %v9927_v54, %v9921_v49  ;;  %9942 = vrcp.f32 %v2916_v12 }
 0x2e1   :  { %v2915_v6 = vadd.f32 1.0, %v9929_v2  ;;  %v9931_v23 = vpop.eup %9930  ;;  %9944 = vpow2.f32 %v8419_v39 }
 0x2e2   :  { %v2571_v10 = vsub.f32 %v2556_v19, %v11254_v34  ;;  %v2558_v33 = vmul.f32 %v2556_v19, %v11402_v53 }
 0x2e3   :  { %v9933_v21 = vpop.eup %9932  ;;  %9946 = vrcp.f32 %v2915_v6 }
 0x2e4   :  { %v2557_v36 = vmul.f32 %v9933_v21, %v9931_v23  ;;  %9948 = vrcp.f32 %v2914_v47  ;;  %v2573_v31 = vmul.f32 %v2571_v10, %v11402_v53  ;;  %v9935_v60 = vpop.eup %9934 }
 0x2e5   :  { %v2913_v39 = vadd.f32 1.0, %v9935_v60  ;;  %v11512_v60 = vld [vmem:[#allocation12 + $0xc8] ss:$16 sps:$4 sm:$0xff]  }
 0x2e6   :  { %v2559_v16 = vmul.f32 %v2557_v36, %v11409_v29  ;;  %v2572_v5 = vsub.f32 %v2557_v36, %v11256_v0  ;;  %v11423_v63 = vadd.f32 %v2573_v31, %v11254_v34 }
 0x2e7   :  { %9950 = vrcp.f32 %v2913_v39  ;;  %v11542_v39 = vld [vmem:[#allocation12 + $0x64] ss:$16 sps:$4 sm:$0xff]  }
 0x2e8   :  { %v9094_v44 = vpack.c.bf16 %v2559_v16, %v2558_v33  ;;  %v2574_v45 = vmul.f32 %v2572_v5, %v11409_v29  ;;  %v12640_v33 = vld [vmem:[#allocation81_spill] sm:$0xff]  ;;  %v12653_v29 = vld [vmem:[#allocation28_spill] sm:$0xff] }
 0x2e9   :  { %v9937_v20 = vpop.eup %9936  ;;  %v2987_v53 = vunpack.c.l.bf16 %v12653_v29 }
 0x2ea   :  { %9095 = vst [vmem:[#allocation4 + $0x8] sm:$0xff] %v9094_v44   ;;  %v11426_v40 = vadd.f32 %v2574_v45, %v11256_v0  ;;  %v9939_v11 = vpop.eup %9938  ;;  %v2934_v41 = vmul.f32 2.0, %v9937_v20  ;;  %v11508_v44 = vld [vmem:[#allocation12 + $0xcc] ss:$16 sps:$4 sm:$0xff]   ;;  %v11510_v45 = vld [vmem:[#allocation12 + $0xc0] ss:$16 sps:$4 sm:$0xff]  }
 0x2eb   :  { %v2938_v49 = vmul.f32 %v9939_v11, %v11297_v37  ;;  %v9941_v13 = vpop.eup %9940  ;;  %v11518_v20 = vld [vmem:[#allocation12 + $0xa4] ss:$16 sps:$4 sm:$0xff]   ;;  %v11520_v11 = vld [vmem:[#allocation12 + $0xac] ss:$16 sps:$4 sm:$0xff]  }
 0x2ec   :  { %v2989_v1 = vpack.c.bf16 %v11426_v40, %v11423_v63  ;;  %v8420_v32 = vadd.f32 -1.0, %v2934_v41  ;;  %v11522_v41 = vld [vmem:[#allocation12 + $0xa0] ss:$16 sps:$4 sm:$0xff]  }
 0x2ed   :  { %v9943_v30 = vpop.eup %9942 }
 0x2ee   :  { %3215 = vmatmul.mubr.bf16.vlgmr.msra.gmra.mxu0 %v2989_v1  ;;  %3258 = vmatmul.mubr.bf16.vlgmr.msra.gmra.mxu1 %v2989_v1  ;;  %v9945_v54 = vpop.eup %9944  ;;  %v2940_v12 = vmul.f32 %v9941_v13, %v8420_v32  ;;  %v2935_v34 = vmul.f32 2.0, %v9943_v30  ;;  %v11530_v1 = vld [vmem:[#allocation12 + $0x84] ss:$16 sps:$4 sm:$0xff]   ;;  %v11532_v13 = vld [vmem:[#allocation12 + $0x8c] ss:$16 sps:$4 sm:$0xff]  }
 0x2ef   :  { %3573 = vmatpush1.bf16.msra.mxu0 %v11258_v57  ;;  %3616 = vmatpush1.bf16.msra.mxu1 %v11260_v62  ;;  %v2917_v23 = vadd.f32 1.0, %v9945_v54  ;;  %v11534_v32 = vld [vmem:[#allocation12 + $0x80] ss:$16 sps:$4 sm:$0xff]   ;;  %v11536_v30 = vld [vmem:[#allocation12 + $0x88] ss:$16 sps:$4 sm:$0xff]  }
 0x2f0   :  { %v9947_v0 = vpop.eup %9946  ;;  %3574 = vmatprep.subr.bf16.mxu0 %v11264_v52  ;;  %3617 = vmatprep.subr.bf16.mxu1 %v11266_v3  ;;  %v2942_v2 = vadd.f32 %v2940_v12, %v2938_v49  ;;  %v8421_v19 = vadd.f32 -1.0, %v2935_v34  ;;  %v11441_v52 = vpop.permute.xlu0 %1372  ;;  %v11524_v49 = vld [vmem:[#allocation12 + $0xa8] ss:$16 sps:$4 sm:$0xff]   ;;  %v11544_v54 = vld [vmem:[#allocation12 + $0x6c] ss:$16 sps:$4 sm:$0xff]  }
 0x2f1   :  { %v2939_v47 = vmul.f32 %v9947_v0, %v11314_v25  ;;  %3604 = vmatprep.mubr.bf16.mxu0 %v12624_v18  ;;  %3647 = vmatprep.mubr.bf16.mxu1 %v12624_v18  ;;  %v9949_v6 = vpop.eup %9948  ;;  %12634 = vst [vmem:[#allocation84_spill] sm:$0xff] %v11441_v52  ;;  %v11546_v12 = vld [vmem:[#allocation12 + $0x60] ss:$16 sps:$4 sm:$0xff]   ;;  %v11548_v34 = vld [vmem:[#allocation12 + $0x68] ss:$16 sps:$4 sm:$0xff]  }
 0x2f2   :  { %9952 = vtanh.f32 %v2942_v2  ;;  %v2967_v57 = vsub.f32 %v2942_v2, %v11297_v37  ;;  %v2941_v62 = vmul.f32 %v9949_v6, %v8421_v19  ;;  %v11554_v0 = vld [vmem:[#allocation12 + $0x44] ss:$16 sps:$4 sm:$0xff]   ;;  %v11556_v2 = vld [vmem:[#allocation12 + $0x4c] ss:$16 sps:$4 sm:$0xff]   ;;  %v11558_v19 = vld [vmem:[#allocation12 + $0x40] ss:$16 sps:$4 sm:$0xff]  }
 0x2f3   :  { %3575 = vmatpush1.bf16.msra.mxu0 %v11270_v17  ;;  %3618 = vmatpush1.bf16.msra.mxu1 %v11272_v50  ;;  %9954 = vrcp.f32 %v2917_v23  ;;  %v11452_v50 = vpop.permute.xlu1 %1377  ;;  %v11566_v6 = vld [vmem:[#allocation12 + $0x24] ss:$16 sps:$4 sm:$0xff]   ;;  %v11568_v23 = vld [vmem:[#allocation12 + $0x2c] ss:$16 sps:$4 sm:$0xff]  }
 0x2f4   :  { %3576 = vmatprep.subr.bf16.mxu0 %v11276_v15  ;;  %3619 = vmatprep.subr.bf16.mxu1 %v11278_v35  ;;  %v2969_v3 = vmul.f32 %v2967_v57, %v11441_v52  ;;  %v2943_v10 = vadd.f32 %v2941_v62, %v2939_v47  ;;  %12635 = vst [vmem:[#allocation85_spill] sm:$0xff] %v11452_v50  ;;  %v11560_v47 = vld [vmem:[#allocation12 + $0x48] ss:$16 sps:$4 sm:$0xff]   ;;  %v11570_v57 = vld [vmem:[#allocation12 + $0x20] ss:$16 sps:$4 sm:$0xff]  }
 0x2f5   :  { %v11572_v62 = vld [vmem:[#allocation12 + $0x28] ss:$16 sps:$4 sm:$0xff]  }
 0x2f6   :  { %9956 = vtanh.f32 %v2943_v10  ;;  %v2968_v21 = vsub.f32 %v2943_v10, %v11314_v25  ;;  %v11450_v17 = vadd.f32 %v2969_v3, %v11297_v37  ;;  %v12636_v37 = vld [vmem:[#allocation77_spill] sm:$0xff]  ;;  %v11580_v10 = vld [vmem:[#allocation12 + $0xc] ss:$16 sps:$4 sm:$0xff]  }
 0x2f7   :  { %3577 = vmatpush1.bf16.msra.mxu0 %v11286_v58  ;;  %3620 = vmatpush1.bf16.msra.mxu1 %v11288_v8  ;;  %v9951_v58 = vpop.eup %9950  ;;  %12641 = vst [vmem:[#allocation77_spill] sm:$0xff] %v11568_v23  ;;  %v11578_v3 = vld [vmem:[#allocation12 + $0x4] ss:$16 sps:$4 sm:$0xff]   ;;  %12645 = vst [vmem:[#allocation81_spill] sm:$0xff] %v11580_v10 }
 0x2f8   :  { %3578 = vmatprep.subr.bf16.mxu0 %v11293_v7  ;;  %3621 = vmatprep.subr.bf16.mxu1 %v11295_v48  ;;  %v2970_v15 = vmul.f32 %v2968_v21, %v11452_v50  ;;  %v11582_v21 = vld [vmem:[#allocation12] ss:$16 sps:$4 sm:$0xff]  }
 0x2f9   :  { %12646 = vst [vmem:[#allocation86_spill] sm:$0xff] %v11582_v21 }
 0x2fa   :  { %v11460_v35 = vadd.f32 %v2970_v15, %v11314_v25  ;;  %v12639_v25 = vld [vmem:[#allocation80_spill] sm:$0xff] }
 0x2fb   :  { %3579 = vmatpush1.bf16.msra.mxu0 %v11301_v55  ;;  %3622 = vmatpush1.bf16.msra.mxu1 %v11303_v9  ;;  %v12637_v55 = vld [vmem:[#allocation78_spill] sm:$0xff]  ;;  %12644 = vst [vmem:[#allocation80_spill] sm:$0xff] %v11578_v3 }
 0x2fc   :  { %3580 = vmatprep.subr.bf16.mxu0 %v11309_v38  ;;  %3623 = vmatprep.subr.bf16.mxu1 %v11311_v61  ;;  %v12638_v61 = vld [vmem:[#allocation79_spill] sm:$0xff]  ;;  %12642 = vst [vmem:[#allocation78_spill] sm:$0xff] %v11570_v57  ;;  %v11584_v15 = vld [vmem:[#allocation12 + $0x8] ss:$16 sps:$4 sm:$0xff]  }
 0x2fd   :  { %12643 = vst [vmem:[#allocation79_spill] sm:$0xff] %v11572_v62  ;;  %12647 = vst [vmem:[#allocation87_spill] sm:$0xff] %v11584_v15 }
 0x2ff   :  { %3581 = vmatpush1.bf16.msra.mxu0 %v11318_v27  ;;  %3624 = vmatpush1.bf16.msra.mxu1 %v11320_v56  ;;  %v9953_v8 = vpop.eup %9952 }
 0x300   :  { %3582 = vmatprep.subr.bf16.mxu0 %v11324_v24  ;;  %3625 = vmatprep.subr.bf16.mxu1 %v11326_v4  ;;  %v2946_v7 = vmul.f32 %v9953_v8, %v9951_v58  ;;  %v9955_v48 = vpop.eup %9954  ;;  %v11590_v58 = vld [vmem:[#allocation13 + $0xe4] ss:$16 sps:$4 sm:$0xff]   ;;  %v11592_v8 = vld [vmem:[#allocation13 + $0xec] ss:$16 sps:$4 sm:$0xff]  }
 0x301   :  { %12648 = vst [vmem:[#allocation88_spill] sm:$0xff] %v11590_v58  ;;  %12649 = vst [vmem:[#allocation89_spill] sm:$0xff] %v11592_v8 }
 0x302   :  { %v2961_v9 = vsub.f32 %v2946_v7, %v11364_v14  ;;  %v2948_v56 = vmul.f32 %v2946_v7, %v11441_v52  ;;  %v12650_v7 = vld [vmem:[#allocation25_spill] sm:$0xff] }
 0x303   :  { %3583 = vmatpush1.bf16.msra.mxu0 %v12636_v37  ;;  %3626 = vmatpush1.bf16.msra.mxu1 %v12637_v55  ;;  %v9957_v38 = vpop.eup %9956  ;;  %v12651_v37 = vld [vmem:[#allocation26_spill] sm:$0xff] }
 0x304   :  { %3584 = vmatprep.subr.bf16.mxu0 %v12638_v61  ;;  %3627 = vmatprep.subr.bf16.mxu1 %v12639_v25  ;;  %v2947_v27 = vmul.f32 %v9957_v38, %v9955_v48  ;;  %v2963_v36 = vmul.f32 %v2961_v9, %v11441_v52  ;;  %v2981_v48 = vunpack.c.l.bf16 %v12650_v7  ;;  %v2983_v55 = vunpack.c.l.bf16 %v12651_v37 }
 0x306   :  { %v2949_v24 = vmul.f32 %v2947_v27, %v11452_v50  ;;  %v2962_v4 = vsub.f32 %v2947_v27, %v11366_v51  ;;  %v2982_v27 = vunpack.c.h.bf16 %v12650_v7 }
 0x307   :  { %3585 = vmatpush1.bf16.msra.mxu0 %v11342_v42  ;;  %3628 = vmatpush1.bf16.msra.mxu1 %v11344_v28  ;;  %v11485_v42 = vadd.f32 %v2963_v36, %v11364_v14  ;;  %v11500_v14 = vld [vmem:[#allocation12 + $0xe8] ss:$16 sps:$4 sm:$0xff]  }
 0x308   :  { %3586 = vmatprep.subr.bf16.mxu0 %v12640_v33  ;;  %3629 = vmatprep.subr.bf16.mxu1 %v11350_v22  ;;  %v9099_v16 = vpack.c.bf16 %v2949_v24, %v2948_v56  ;;  %v2964_v5 = vmul.f32 %v2962_v4, %v11452_v50  ;;  %v11494_v22 = vld [vmem:[#allocation12 + $0xe4] ss:$16 sps:$4 sm:$0xff]  }
 0x30a   :  { %9100 = vst [vmem:[#allocation5 + $0x30] sm:$0xff] %v9099_v16   ;;  %v11488_v28 = vadd.f32 %v2964_v5, %v11366_v51  ;;  %v11506_v51 = vld [vmem:[#allocation12 + $0xc4] ss:$16 sps:$4 sm:$0xff]  }
 0x30b   :  { %3587 = vmatpush1.bf16.msra.mxu0 %v11357_v46  ;;  %3630 = vmatpush1.bf16.msra.mxu1 %v11359_v43  ;;  %v11496_v46 = vld [vmem:[#allocation12 + $0xec] ss:$16 sps:$4 sm:$0xff]   ;;  %v11498_v43 = vld [vmem:[#allocation12 + $0xe0] ss:$16 sps:$4 sm:$0xff]  }
 0x30c   :  { %v3379_v31 = vpack.c.bf16 %v11488_v28, %v11485_v42  ;;  %3962 = vmatprep.subr.bf16.mxu0 %v11494_v22  ;;  %4005 = vmatprep.subr.bf16.mxu1 %v11496_v46  ;;  %v12652_v16 = vld [vmem:[#allocation27_spill] sm:$0xff] }
 0x30d   :  { %v2985_v5 = vunpack.c.l.bf16 %v12652_v16 }
 0x30e   :  { %3605 = vmatmul.mubr.bf16.vlgmr.msra.gmra.mxu0 %v3379_v31  ;;  %3648 = vmatmul.mubr.bf16.vlgmr.msra.gmra.mxu1 %v3379_v31 }
 0x30f   :  { %3994 = vmatprep.mubr.bf16.mxu0 %v12624_v18  ;;  %4037 = vmatprep.mubr.bf16.mxu1 %v12624_v18 }
 0x310   :  { %3963 = vmatpush1.bf16.msra.mxu0 %v11498_v43  ;;  %4006 = vmatpush1.bf16.msra.mxu1 %v11500_v14 }
 0x311   :  { %3964 = vmatprep.subr.bf16.mxu0 %v11506_v51  ;;  %4007 = vmatprep.subr.bf16.mxu1 %v11508_v44 }
 0x314   :  { %3965 = vmatpush1.bf16.msra.mxu0 %v11510_v45  ;;  %4008 = vmatpush1.bf16.msra.mxu1 %v11512_v60 }
 0x315   :  { %3966 = vmatprep.subr.bf16.mxu0 %v11518_v20  ;;  %4009 = vmatprep.subr.bf16.mxu1 %v11520_v11 }
 0x318   :  { %3967 = vmatpush1.bf16.msra.mxu0 %v11522_v41  ;;  %4010 = vmatpush1.bf16.msra.mxu1 %v11524_v49 }
 0x319   :  { %3968 = vmatprep.subr.bf16.mxu0 %v11530_v1  ;;  %4011 = vmatprep.subr.bf16.mxu1 %v11532_v13 }
 0x31c   :  { %3969 = vmatpush1.bf16.msra.mxu0 %v11534_v32  ;;  %4012 = vmatpush1.bf16.msra.mxu1 %v11536_v30 }
 0x31d   :  { %3970 = vmatprep.subr.bf16.mxu0 %v11542_v39  ;;  %4013 = vmatprep.subr.bf16.mxu1 %v11544_v54 }
 0x320   :  { %3971 = vmatpush1.bf16.msra.mxu0 %v11546_v12  ;;  %4014 = vmatpush1.bf16.msra.mxu1 %v11548_v34 }
 0x321   :  { %3972 = vmatprep.subr.bf16.mxu0 %v11554_v0  ;;  %4015 = vmatprep.subr.bf16.mxu1 %v11556_v2 }
 0x324   :  { %3973 = vmatpush1.bf16.msra.mxu0 %v11558_v19  ;;  %4016 = vmatpush1.bf16.msra.mxu1 %v11560_v47 }
 0x325   :  { %3974 = vmatprep.subr.bf16.mxu0 %v11566_v6  ;;  %4017 = vmatprep.subr.bf16.mxu1 %v11568_v23 }
 0x328   :  { %3975 = vmatpush1.bf16.msra.mxu0 %v11570_v57  ;;  %4018 = vmatpush1.bf16.msra.mxu1 %v11572_v62 }
 0x329   :  { %3976 = vmatprep.subr.bf16.mxu0 %v11578_v3  ;;  %4019 = vmatprep.subr.bf16.mxu1 %v11580_v10 }
 0x32c   :  { %3977 = vmatpush1.bf16.msra.mxu0 %v11582_v21  ;;  %4020 = vmatpush1.bf16.msra.mxu1 %v11584_v15  ;;  %v12657_v21 = vld [vmem:[#allocation72_spill] sm:$0xff] }
 0x32d   :  { %4352 = vmatprep.subr.bf16.mxu0 %v11590_v58  ;;  %4395 = vmatprep.subr.bf16.mxu1 %v11592_v8  ;;  %v2986_v58 = vunpack.c.h.bf16 %v12652_v16 }
 0x3ae   :  { %v3216_v9 = vpop.f32.mrf.mxu0  ;;  %v3259_v38 = vpop.f32.mrf.mxu1 }
 0x3af   :  { %v3268_v61 = vadd.f32 %v3216_v9, %v2981_v48  ;;  %v3270_v25 = vadd.f32 %v3259_v38, %v2983_v55 }
 0x3b0   :  { %v3218_v56 = vpop.f32.mrf.mxu0  ;;  %v3261_v24 = vpop.f32.mrf.mxu1 }
 0x3b1   :  { %v8456_v4 = vmul.f32 -1.442695, %v3268_v61  ;;  %v8458_v36 = vmul.f32 -1.442695, %v3270_v25  ;;  %v3269_v33 = vadd.f32 %v3218_v56, %v2982_v27  ;;  %v2984_v25 = vunpack.c.h.bf16 %v12651_v37 }
 0x3b2   :  { %v3220_v31 = vpop.f32.mrf.mxu0  ;;  %v3263_v50 = vpop.f32.mrf.mxu1 }
 0x3b3   :  { %9958 = vpow2.f32 %v8456_v4  ;;  %v8457_v52 = vmul.f32 -1.442695, %v3269_v33  ;;  %v3272_v8 = vadd.f32 %v3220_v31, %v2985_v5  ;;  %v3274_v48 = vadd.f32 %v3263_v50, %v2987_v53 }
 0x3b4   :  { %9960 = vpow2.f32 %v8458_v36  ;;  %v3222_v55 = vpop.f32.mrf.mxu0  ;;  %v3271_v27 = vadd.f32 %v3261_v24, %v2984_v25  ;;  %v3265_v56 = vpop.f32.mrf.mxu1  ;;  %v2988_v4 = vunpack.c.h.bf16 %v12653_v29 }
 0x3b5   :  { %9962 = vpow2.f32 %v8457_v52  ;;  %v8460_v7 = vmul.f32 -1.442695, %v3272_v8  ;;  %v3273_v9 = vadd.f32 %v3222_v55, %v2986_v58  ;;  %v8462_v38 = vmul.f32 -1.442695, %v3274_v48 }
 0x3b6   :  { %v3275_v33 = vadd.f32 %v3265_v56, %v2988_v4  ;;  %v8459_v5 = vmul.f32 -1.442695, %v3271_v27 }
 0x3b7   :  { %9964 = vpow2.f32 %v8460_v7  ;;  %v8461_v61 = vmul.f32 -1.442695, %v3273_v9  ;;  %v12654_v7 = vld [vmem:[#allocation69_spill] sm:$0xff] }
 0x3b8   :  { %9966 = vpow2.f32 %v8462_v38  ;;  %v8463_v52 = vmul.f32 -1.442695, %v3275_v33  ;;  %v3371_v9 = vunpack.c.l.bf16 %v12654_v7  ;;  %v12655_v38 = vld [vmem:[#allocation70_spill] sm:$0xff] }
 0x3b9   :  { %9968 = vpow2.f32 %v8461_v61  ;;  %v3373_v61 = vunpack.c.l.bf16 %v12655_v38 }
 0x3ba   :  { %9970 = vpow2.f32 %v8459_v5  ;;  %v3372_v5 = vunpack.c.h.bf16 %v12654_v7 }
 0x3c0   :  { %v9959_v16 = vpop.eup %9958 }
 0x3c1   :  { %v9961_v36 = vpop.eup %9960  ;;  %v3300_v8 = vadd.f32 1.0, %v9959_v16 }
 0x3c2   :  { %v9963_v53 = vpop.eup %9962  ;;  %v3302_v50 = vadd.f32 1.0, %v9961_v36 }
 0x3c3   :  { %v3301_v58 = vadd.f32 1.0, %v9963_v53 }
 0x3c4   :  { %v9965_v31 = vpop.eup %9964  ;;  %9972 = vrcp.f32 %v3302_v50  ;;  %v12656_v50 = vld [vmem:[#allocation71_spill] sm:$0xff] }
 0x3c5   :  { %v9967_v48 = vpop.eup %9966  ;;  %9974 = vrcp.f32 %v3301_v58  ;;  %v3304_v29 = vadd.f32 1.0, %v9965_v31 }
 0x3c6   :  { %v9969_v37 = vpop.eup %9968  ;;  %v3306_v55 = vadd.f32 1.0, %v9967_v48  ;;  %9976 = vpow2.f32 %v8463_v52  ;;  %v3375_v52 = vunpack.c.l.bf16 %v12656_v50 }
 0x3c7   :  { %9978 = vrcp.f32 %v3300_v8  ;;  %v3305_v24 = vadd.f32 1.0, %v9969_v37  ;;  %v9971_v56 = vpop.eup %9970 }
 0x3c8   :  { %9980 = vrcp.f32 %v3306_v55 }
 0x3c9   :  { %9982 = vrcp.f32 %v3305_v24 }
 0x3ca   :  { %9984 = vrcp.f32 %v3304_v29  ;;  %v3303_v29 = vadd.f32 1.0, %v9971_v56 }
 0x3ce   :  { %v3606_v25 = vpop.f32.mrf.mxu0  ;;  %v3649_v27 = vpop.f32.mrf.mxu1 }
 0x3cf   :  { %v3658_v4 = vadd.f32 %v3606_v25, %v3371_v9  ;;  %v3660_v33 = vadd.f32 %v3649_v27, %v3373_v61  ;;  %v3377_v9 = vunpack.c.l.bf16 %v12657_v21 }
 0x3d0   :  { %v3608_v36 = vpop.f32.mrf.mxu0  ;;  %v3651_v53 = vpop.f32.mrf.mxu1 }
 0x3d1   :  { %v9973_v16 = vpop.eup %9972  ;;  %v8500_v31 = vmul.f32 -1.442695, %v3658_v4  ;;  %v8502_v48 = vmul.f32 -1.442695, %v3660_v33  ;;  %v3659_v37 = vadd.f32 %v3608_v36, %v3372_v5  ;;  %v3376_v4 = vunpack.c.h.bf16 %v12656_v50 }
 0x3d2   :  { %v9975_v8 = vpop.eup %9974  ;;  %v3324_v58 = vmul.f32 2.0, %v9973_v16  ;;  %v3610_v15 = vpop.f32.mrf.mxu0 }
 0x3d3   :  { %v9977_v55 = vpop.eup %9976  ;;  %v3328_v24 = vmul.f32 %v9975_v8, %v11407_v26  ;;  %v3653_v61 = vpop.f32.mrf.mxu1  ;;  %9986 = vpow2.f32 %v8500_v31  ;;  %v8501_v27 = vmul.f32 -1.442695, %v3659_v37  ;;  %v3662_v10 = vadd.f32 %v3610_v15, %v3375_v52 }
 0x3d4   :  { %v9979_v25 = vpop.eup %9978  ;;  %v8464_v7 = vadd.f32 -1.0, %v3324_v58  ;;  %9988 = vpow2.f32 %v8502_v48  ;;  %v3664_v62 = vadd.f32 %v3653_v61, %v3377_v9  ;;  %v3612_v33 = vpop.f32.mrf.mxu0  ;;  %v3307_v52 = vadd.f32 1.0, %v9977_v55 }
 0x3d5   :  { %v9981_v3 = vpop.eup %9980  ;;  %9990 = vpow2.f32 %v8501_v27  ;;  %v8504_v56 = vmul.f32 -1.442695, %v3662_v10  ;;  %v3663_v23 = vadd.f32 %v3612_v33, %v3376_v4  ;;  %v11614_v9 = vpop.permute.xlu0 %1332 }
 0x3d6   :  { %v9983_v5 = vpop.eup %9982  ;;  %v3330_v16 = vmul.f32 %v9979_v25, %v8464_v7  ;;  %v3325_v36 = vmul.f32 2.0, %v9981_v3  ;;  %9992 = vrcp.f32 %v3303_v29  ;;  %v8506_v57 = vmul.f32 -1.442695, %v3664_v62  ;;  %12658 = vst [vmem:[#allocation25_spill] sm:$0xff] %v11614_v9  ;;  %v3655_v55 = vpop.f32.mrf.mxu1 }
 0x3d7   :  { %v3329_v8 = vmul.f32 %v9983_v5, %v11414_v59  ;;  %9994 = vpow2.f32 %v8504_v56  ;;  %v9985_v15 = vpop.eup %9984  ;;  %v8505_v48 = vmul.f32 -1.442695, %v3663_v23  ;;  %v3374_v3 = vunpack.c.h.bf16 %v12655_v38  ;;  %v11621_v23 = vpop.permute.xlu1 %1337 }
 0x3d8   :  { %v3332_v58 = vadd.f32 %v3330_v16, %v3328_v24  ;;  %v8465_v31 = vadd.f32 -1.0, %v3325_v36  ;;  %9996 = vpow2.f32 %v8506_v57  ;;  %12659 = vst [vmem:[#allocation26_spill] sm:$0xff] %v11621_v23  ;;  %v3378_v25 = vunpack.c.h.bf16 %v12657_v21 }
 0x3d9   :  { %v3661_v29 = vadd.f32 %v3651_v53, %v3374_v3 }
 0x3da   :  { %9998 = vtanh.f32 %v3332_v58  ;;  %v3357_v50 = vsub.f32 %v3332_v58, %v11407_v26  ;;  %v3331_v37 = vmul.f32 %v9985_v15, %v8465_v31  ;;  %v3665_v4 = vadd.f32 %v3655_v55, %v3378_v25 }
 0x3db   :  { %10000 = vpow2.f32 %v8505_v48  ;;  %v8503_v38 = vmul.f32 -1.442695, %v3661_v29 }
 0x3dc   :  { %v3359_v10 = vmul.f32 %v3357_v50, %v11614_v9  ;;  %v3333_v62 = vadd.f32 %v3331_v37, %v3329_v8  ;;  %10002 = vrcp.f32 %v3307_v52  ;;  %v8507_v58 = vmul.f32 -1.442695, %v3665_v4 }
 0x3de   :  { %10004 = vtanh.f32 %v3333_v62  ;;  %v3358_v24 = vsub.f32 %v3333_v62, %v11414_v59  ;;  %v11619_v57 = vadd.f32 %v3359_v10, %v11407_v26 }
 0x3df   :  { %10006 = vpow2.f32 %v8503_v38 }
 0x3e0   :  { %v3360_v61 = vmul.f32 %v3358_v24, %v11621_v23  ;;  %v9987_v7 = vpop.eup %9986 }
 0x3e1   :  { %v9989_v27 = vpop.eup %9988  ;;  %v3690_v36 = vadd.f32 1.0, %v9987_v7 }
 0x3e2   :  { %v11626_v53 = vadd.f32 %v3360_v61, %v11414_v59  ;;  %v9991_v33 = vpop.eup %9990  ;;  %v3692_v5 = vadd.f32 1.0, %v9989_v27 }
 0x3e3   :  { %v9993_v16 = vpop.eup %9992  ;;  %v3691_v26 = vadd.f32 1.0, %v9991_v33 }
 0x3e4   :  { %v9995_v56 = vpop.eup %9994  ;;  %10008 = vrcp.f32 %v3692_v5 }
 0x3e5   :  { %v9997_v8 = vpop.eup %9996  ;;  %10010 = vrcp.f32 %v3691_v26  ;;  %v3694_v48 = vadd.f32 1.0, %v9995_v56 }
 0x3e6   :  { %v3696_v15 = vadd.f32 1.0, %v9997_v8  ;;  %10012 = vrcp.f32 %v3690_v36  ;;  %v11642_v36 = vld [vmem:[#allocation13 + $0xe8] ss:$16 sps:$4 sm:$0xff]   ;;  %v11647_v8 = vld [vmem:[#allocation13 + $0xc4] ss:$16 sps:$4 sm:$0xff]  }
 0x3e7   :  { %v9999_v31 = vpop.eup %9998 }
 0x3e8   :  { %v10001_v21 = vpop.eup %10000  ;;  %v3336_v52 = vmul.f32 %v9999_v31, %v9993_v16  ;;  %10014 = vrcp.f32 %v3696_v15  ;;  %v11640_v16 = vld [vmem:[#allocation13 + $0xe0] ss:$16 sps:$4 sm:$0xff]  }
 0x3e9   :  { %v3695_v59 = vadd.f32 1.0, %v10001_v21  ;;  %v10003_v50 = vpop.eup %10002  ;;  %10016 = vpow2.f32 %v8507_v58  ;;  %v11649_v58 = vld [vmem:[#allocation13 + $0xcc] ss:$16 sps:$4 sm:$0xff]  }
 0x3ea   :  { %v3351_v37 = vsub.f32 %v3336_v52, %v11423_v63  ;;  %v3338_v62 = vmul.f32 %v3336_v52, %v11614_v9 }
 0x3eb   :  { %v10005_v3 = vpop.eup %10004  ;;  %10018 = vrcp.f32 %v3695_v59  ;;  %v11653_v59 = vld [vmem:[#allocation13 + $0xc0] ss:$16 sps:$4 sm:$0xff]  }
 0x3ec   :  { %v3337_v10 = vmul.f32 %v10005_v3, %v10003_v50  ;;  %10020 = vrcp.f32 %v3694_v48  ;;  %v3353_v55 = vmul.f32 %v3351_v37, %v11614_v9  ;;  %v10007_v25 = vpop.eup %10006  ;;  %v11655_v50 = vld [vmem:[#allocation13 + $0xc8] ss:$16 sps:$4 sm:$0xff]   ;;  %v11659_v3 = vld [vmem:[#allocation13 + $0xa4] ss:$16 sps:$4 sm:$0xff]  }
 0x3ee   :  { %v3339_v29 = vmul.f32 %v3337_v10, %v11621_v23  ;;  %v3352_v24 = vsub.f32 %v3337_v10, %v11426_v40  ;;  %v11635_v27 = vadd.f32 %v3353_v55, %v11423_v63  ;;  %v11661_v10 = vld [vmem:[#allocation13 + $0xac] ss:$16 sps:$4 sm:$0xff]  }
 0x3f0   :  { %v9104_v61 = vpack.c.bf16 %v3339_v29, %v3338_v62  ;;  %v3354_v38 = vmul.f32 %v3352_v24, %v11621_v23 }
 0x3f1   :  { %v10009_v7 = vpop.eup %10008 }
 0x3f2   :  { %9105 = vst [vmem:[#allocation4 + $0x10] sm:$0xff] %v9104_v61   ;;  %v11638_v4 = vadd.f32 %v3354_v38, %v11426_v40  ;;  %v10011_v33 = vpop.eup %10010  ;;  %v3714_v5 = vmul.f32 2.0, %v10009_v7  ;;  %v3693_v40 = vadd.f32 1.0, %v10007_v25  ;;  %v11669_v7 = vld [vmem:[#allocation13 + $0xa0] ss:$16 sps:$4 sm:$0xff]  }
 0x3f3   :  { %v3718_v26 = vmul.f32 %v10011_v33, %v11450_v17  ;;  %v10013_v63 = vpop.eup %10012  ;;  %v11671_v33 = vld [vmem:[#allocation13 + $0xa8] ss:$16 sps:$4 sm:$0xff]  }
 0x3f4   :  { %v3769_v56 = vpack.c.bf16 %v11638_v4, %v11635_v27  ;;  %v8508_v31 = vadd.f32 -1.0, %v3714_v5  ;;  %10022 = vrcp.f32 %v3693_v40  ;;  %v11673_v5 = vpop.permute.xlu0 %1362  ;;  %v11685_v40 = vld [vmem:[#allocation13 + $0x80] ss:$16 sps:$4 sm:$0xff]  }
 0x3f5   :  { %v10015_v15 = vpop.eup %10014  ;;  %12660 = vst [vmem:[#allocation27_spill] sm:$0xff] %v11673_v5 }
 0x3f6   :  { %3995 = vmatmul.mubr.bf16.vlgmr.msra.gmra.mxu0 %v3769_v56  ;;  %4038 = vmatmul.mubr.bf16.vlgmr.msra.gmra.mxu1 %v3769_v56  ;;  %v10017_v21 = vpop.eup %10016  ;;  %v3720_v52 = vmul.f32 %v10013_v63, %v8508_v31  ;;  %v3715_v48 = vmul.f32 2.0, %v10015_v15  ;;  %v11679_v56 = vld [vmem:[#allocation13 + $0x8c] ss:$16 sps:$4 sm:$0xff]  }
 0x3f7   :  { %4353 = vmatpush1.bf16.msra.mxu0 %v11640_v16  ;;  %4396 = vmatpush1.bf16.msra.mxu1 %v11642_v36  ;;  %v3697_v61 = vadd.f32 1.0, %v10017_v21  ;;  %v11687_v21 = vld [vmem:[#allocation13 + $0x88] ss:$16 sps:$4 sm:$0xff]  }
 0x3f8   :  { %v10019_v37 = vpop.eup %10018  ;;  %4354 = vmatprep.subr.bf16.mxu0 %v11647_v8  ;;  %4397 = vmatprep.subr.bf16.mxu1 %v11649_v58  ;;  %v3722_v62 = vadd.f32 %v3720_v52, %v3718_v26  ;;  %v8509_v29 = vadd.f32 -1.0, %v3715_v48  ;;  %v11677_v26 = vld [vmem:[#allocation13 + $0x84] ss:$16 sps:$4 sm:$0xff]   ;;  %12661 = vst [vmem:[#allocation28_spill] sm:$0xff] %v11687_v21  ;;  %v11692_v48 = vpop.permute.xlu1 %1367 }
 0x3f9   :  { %v3719_v24 = vmul.f32 %v10019_v37, %v11460_v35  ;;  %4384 = vmatprep.mubr.bf16.mxu0 %v12624_v18  ;;  %4427 = vmatprep.mubr.bf16.mxu1 %v12624_v18  ;;  %v10021_v55 = vpop.eup %10020  ;;  %12662 = vst [vmem:[#allocation69_spill] sm:$0xff] %v11692_v48  ;;  %v11696_v37 = vld [vmem:[#allocation13 + $0x64] ss:$16 sps:$4 sm:$0xff]  }
 0x3fa   :  { %10024 = vtanh.f32 %v3722_v62  ;;  %v3747_v38 = vsub.f32 %v3722_v62, %v11450_v17  ;;  %v3721_v25 = vmul.f32 %v10021_v55, %v8509_v29  ;;  %12663 = vst [vmem:[#allocation70_spill] sm:$0xff] %v11696_v37  ;;  %v11698_v62 = vld [vmem:[#allocation13 + $0x6c] ss:$16 sps:$4 sm:$0xff]  }
 0x3fb   :  { %4355 = vmatpush1.bf16.msra.mxu0 %v11653_v59  ;;  %4398 = vmatpush1.bf16.msra.mxu1 %v11655_v50  ;;  %10026 = vrcp.f32 %v3697_v61  ;;  %12664 = vst [vmem:[#allocation71_spill] sm:$0xff] %v11698_v62  ;;  %v11712_v61 = vld [vmem:[#allocation13 + $0x44] ss:$16 sps:$4 sm:$0xff]  }
 0x3fc   :  { %4356 = vmatprep.subr.bf16.mxu0 %v11659_v3  ;;  %4399 = vmatprep.subr.bf16.mxu1 %v11661_v10  ;;  %v3749_v63 = vmul.f32 %v3747_v38, %v11673_v5  ;;  %v3723_v31 = vadd.f32 %v3721_v25, %v3719_v24  ;;  %v11703_v24 = vld [vmem:[#allocation13 + $0x60] ss:$16 sps:$4 sm:$0xff]   ;;  %12667 = vst [vmem:[#allocation91_spill] sm:$0xff] %v11712_v61  ;;  %v11714_v38 = vld [vmem:[#allocation13 + $0x4c] ss:$16 sps:$4 sm:$0xff]  }
 0x3fd   :  { %12665 = vst [vmem:[#allocation72_spill] sm:$0xff] %v11703_v24  ;;  %12668 = vst [vmem:[#allocation92_spill] sm:$0xff] %v11714_v38 }
 0x3fe   :  { %10028 = vtanh.f32 %v3723_v31  ;;  %v3748_v15 = vsub.f32 %v3723_v31, %v11460_v35  ;;  %v11690_v52 = vadd.f32 %v3749_v63, %v11450_v17  ;;  %v11705_v17 = vld [vmem:[#allocation13 + $0x68] ss:$16 sps:$4 sm:$0xff]   ;;  %v11718_v63 = vld [vmem:[#allocation13 + $0x40] ss:$16 sps:$4 sm:$0xff]  }
 0x3ff   :  { %4357 = vmatpush1.bf16.msra.mxu0 %v11669_v7  ;;  %4400 = vmatpush1.bf16.msra.mxu1 %v11671_v33  ;;  %12666 = vst [vmem:[#allocation90_spill] sm:$0xff] %v11705_v17  ;;  %12669 = vst [vmem:[#allocation93_spill] sm:$0xff] %v11718_v63  ;;  %v11720_v31 = vld [vmem:[#allocation13 + $0x48] ss:$16 sps:$4 sm:$0xff]  }
 0x400   :  { %4358 = vmatprep.subr.bf16.mxu0 %v11677_v26  ;;  %4401 = vmatprep.subr.bf16.mxu1 %v11679_v56  ;;  %v3750_v29 = vmul.f32 %v3748_v15, %v11692_v48  ;;  %12670 = vst [vmem:[#allocation94_spill] sm:$0xff] %v11720_v31 }
 0x401   :  { %v10023_v25 = vpop.eup %10022 }
 0x402   :  { %v11708_v55 = vadd.f32 %v3750_v29, %v11460_v35  ;;  %v11724_v35 = vld [vmem:[#allocation13 + $0x24] ss:$16 sps:$4 sm:$0xff]   ;;  %v11726_v29 = vld [vmem:[#allocation13 + $0x2c] ss:$16 sps:$4 sm:$0xff]  }
 0x403   :  { %4359 = vmatpush1.bf16.msra.mxu0 %v11685_v40  ;;  %4402 = vmatpush1.bf16.msra.mxu1 %v11687_v21  ;;  %12671 = vst [vmem:[#allocation95_spill] sm:$0xff] %v11724_v35  ;;  %12672 = vst [vmem:[#allocation96_spill] sm:$0xff] %v11726_v29 }
 0x404   :  { %4360 = vmatprep.subr.bf16.mxu0 %v11696_v37  ;;  %4403 = vmatprep.subr.bf16.mxu1 %v11698_v62 }
 0x407   :  { %4361 = vmatpush1.bf16.msra.mxu0 %v11703_v24  ;;  %4404 = vmatpush1.bf16.msra.mxu1 %v11705_v17  ;;  %v10025_v15 = vpop.eup %10024  ;;  %v11730_v17 = vld [vmem:[#allocation13 + $0x20] ss:$16 sps:$4 sm:$0xff]   ;;  %v11732_v24 = vld [vmem:[#allocation13 + $0x28] ss:$16 sps:$4 sm:$0xff]  }
 0x408   :  { %4362 = vmatprep.subr.bf16.mxu0 %v11712_v61  ;;  %4405 = vmatprep.subr.bf16.mxu1 %v11714_v38  ;;  %v3726_v23 = vmul.f32 %v10025_v15, %v10023_v25  ;;  %v10027_v9 = vpop.eup %10026  ;;  %12673 = vst [vmem:[#allocation97_spill] sm:$0xff] %v11732_v24  ;;  %v11737_v38 = vld [vmem:[#allocation13 + $0x4] ss:$16 sps:$4 sm:$0xff]   ;;  %v11739_v61 = vld [vmem:[#allocation13 + $0xc] ss:$16 sps:$4 sm:$0xff]  }
 0x40a   :  { %v3741_v62 = vsub.f32 %v3726_v23, %v11485_v42  ;;  %v3728_v15 = vmul.f32 %v3726_v23, %v11673_v5 }
 0x40b   :  { %4363 = vmatpush1.bf16.msra.mxu0 %v11718_v63  ;;  %4406 = vmatpush1.bf16.msra.mxu1 %v11720_v31  ;;  %v10029_v37 = vpop.eup %10028  ;;  %v11744_v31 = vld [vmem:[#allocation13] ss:$16 sps:$4 sm:$0xff]   ;;  %v11746_v63 = vld [vmem:[#allocation13 + $0x8] ss:$16 sps:$4 sm:$0xff]  }
 0x40c   :  { %4364 = vmatprep.subr.bf16.mxu0 %v11724_v35  ;;  %4407 = vmatprep.subr.bf16.mxu1 %v11726_v29  ;;  %v3727_v25 = vmul.f32 %v10029_v37, %v10027_v9  ;;  %v3743_v29 = vmul.f32 %v3741_v62, %v11673_v5 }
 0x40e   :  { %v3729_v21 = vmul.f32 %v3727_v25, %v11692_v48  ;;  %v3742_v35 = vsub.f32 %v3727_v25, %v11488_v28  ;;  %v11757_v37 = vadd.f32 %v3743_v29, %v11485_v42  ;;  %v12674_v42 = vld [vmem:[#allocation77_spill] sm:$0xff] }
 0x40f   :  { %4365 = vmatpush1.bf16.msra.mxu0 %v11730_v17  ;;  %4408 = vmatpush1.bf16.msra.mxu1 %v11732_v24 }
 0x410   :  { %4366 = vmatprep.subr.bf16.mxu0 %v11737_v38  ;;  %4409 = vmatprep.subr.bf16.mxu1 %v11739_v61  ;;  %v9109_v9 = vpack.c.bf16 %v3729_v21, %v3728_v15  ;;  %v3744_v23 = vmul.f32 %v3742_v35, %v11692_v48 }
 0x412   :  { %9110 = vst [vmem:[#allocation5 + $0x28] sm:$0xff] %v9109_v9   ;;  %v11760_v24 = vadd.f32 %v3744_v23, %v11488_v28  ;;  %v12675_v28 = vld [vmem:[#allocation78_spill] sm:$0xff] }
 0x413   :  { %4367 = vmatpush1.bf16.msra.mxu0 %v11744_v31  ;;  %4410 = vmatpush1.bf16.msra.mxu1 %v11746_v63 }
 0x414   :  { %4741 = vmatprep.subr.bf16.mxu0 %v11494_v22  ;;  %4784 = vmatprep.subr.bf16.mxu1 %v11496_v46  ;;  %v4159_v21 = vpack.c.bf16 %v11760_v24, %v11757_v37  ;;  %v12676_v22 = vld [vmem:[#allocation79_spill] sm:$0xff]  ;;  %v12677_v46 = vld [vmem:[#allocation80_spill] sm:$0xff] }
 0x416   :  { %4385 = vmatmul.mubr.bf16.vlgmr.msra.gmra.mxu0 %v4159_v21  ;;  %4428 = vmatmul.mubr.bf16.vlgmr.msra.gmra.mxu1 %v4159_v21 }
 0x417   :  { %4742 = vmatpush1.bf16.msra.mxu0 %v11498_v43  ;;  %4785 = vmatpush1.bf16.msra.mxu1 %v11500_v14  ;;  %v12678_v43 = vld [vmem:[#allocation81_spill] sm:$0xff]  ;;  %v12679_v14 = vld [vmem:[#allocation86_spill] sm:$0xff] }
 0x418   :  { %4743 = vmatprep.subr.bf16.mxu0 %v11506_v51  ;;  %4786 = vmatprep.subr.bf16.mxu1 %v11508_v44  ;;  %v12680_v51 = vld [vmem:[#allocation87_spill] sm:$0xff]  ;;  %v12681_v44 = vld [vmem:[#allocation88_spill] sm:$0xff] }
 0x419   :  { %4773 = vmatprep.mubr.bf16.mxu0 %v12624_v18  ;;  %4816 = vmatprep.mubr.bf16.mxu1 %v12624_v18 }
 0x41b   :  { %4744 = vmatpush1.bf16.msra.mxu0 %v11510_v45  ;;  %4787 = vmatpush1.bf16.msra.mxu1 %v11512_v60  ;;  %v12682_v45 = vld [vmem:[#allocation89_spill] sm:$0xff] }
 0x41c   :  { %4745 = vmatprep.subr.bf16.mxu0 %v11518_v20  ;;  %4788 = vmatprep.subr.bf16.mxu1 %v11520_v11  ;;  %v12683_v60 = vld [vmem:[#allocation29_spill] sm:$0xff]  ;;  %v12684_v11 = vld [vmem:[#allocation30_spill] sm:$0xff] }
 0x41d   :  { %v3761_v20 = vunpack.c.l.bf16 %v12683_v60 }
 0x41f   :  { %4746 = vmatpush1.bf16.msra.mxu0 %v11522_v41  ;;  %4789 = vmatpush1.bf16.msra.mxu1 %v11524_v49  ;;  %v3763_v41 = vunpack.c.l.bf16 %v12684_v11 }
 0x420   :  { %4747 = vmatprep.subr.bf16.mxu0 %v11530_v1  ;;  %4790 = vmatprep.subr.bf16.mxu1 %v11532_v13 }
 0x423   :  { %4748 = vmatpush1.bf16.msra.mxu0 %v11534_v32  ;;  %4791 = vmatpush1.bf16.msra.mxu1 %v11536_v30  ;;  %v3762_v30 = vunpack.c.h.bf16 %v12683_v60 }
 0x424   :  { %4749 = vmatprep.subr.bf16.mxu0 %v11542_v39  ;;  %4792 = vmatprep.subr.bf16.mxu1 %v11544_v54 }
 0x427   :  { %4750 = vmatpush1.bf16.msra.mxu0 %v11546_v12  ;;  %4793 = vmatpush1.bf16.msra.mxu1 %v11548_v34 }
 0x428   :  { %4751 = vmatprep.subr.bf16.mxu0 %v11554_v0  ;;  %4794 = vmatprep.subr.bf16.mxu1 %v11556_v2  ;;  %v12685_v2 = vld [vmem:[#allocation31_spill] sm:$0xff] }
 0x429   :  { %v3766_v15 = vunpack.c.h.bf16 %v12685_v2 }
 0x42b   :  { %4752 = vmatpush1.bf16.msra.mxu0 %v11558_v19  ;;  %4795 = vmatpush1.bf16.msra.mxu1 %v11560_v47  ;;  %v3765_v19 = vunpack.c.l.bf16 %v12685_v2 }
 0x42c   :  { %4753 = vmatprep.subr.bf16.mxu0 %v11566_v6  ;;  %4796 = vmatprep.subr.bf16.mxu1 %v12674_v42  ;;  %v12686_v6 = vld [vmem:[#allocation32_spill] sm:$0xff] }
 0x42d   :  { %v3767_v62 = vunpack.c.l.bf16 %v12686_v6 }
 0x42f   :  { %4754 = vmatpush1.bf16.msra.mxu0 %v12675_v28  ;;  %4797 = vmatpush1.bf16.msra.mxu1 %v12676_v22 }
 0x430   :  { %4755 = vmatprep.subr.bf16.mxu0 %v12677_v46  ;;  %4798 = vmatprep.subr.bf16.mxu1 %v12678_v43  ;;  %v3764_v46 = vunpack.c.h.bf16 %v12684_v11 }
 0x433   :  { %4756 = vmatpush1.bf16.msra.mxu0 %v12679_v14  ;;  %4799 = vmatpush1.bf16.msra.mxu1 %v12680_v51  ;;  %v3768_v51 = vunpack.c.h.bf16 %v12686_v6 }
 0x434   :  { %5130 = vmatprep.subr.bf16.mxu0 %v12681_v44  ;;  %5173 = vmatprep.subr.bf16.mxu1 %v12682_v45 }
 0x4b6   :  { %v3996_v49 = vpop.f32.mrf.mxu0  ;;  %v4039_v1 = vpop.f32.mrf.mxu1 }
 0x4b7   :  { %v4048_v13 = vadd.f32 %v3996_v49, %v3761_v20  ;;  %v4050_v32 = vadd.f32 %v4039_v1, %v3763_v41 }
 0x4b8   :  { %v3998_v39 = vpop.f32.mrf.mxu0  ;;  %v4041_v54 = vpop.f32.mrf.mxu1 }
 0x4b9   :  { %v8544_v12 = vmul.f32 -1.442695, %v4048_v13  ;;  %v8546_v34 = vmul.f32 -1.442695, %v4050_v32  ;;  %v4049_v0 = vadd.f32 %v3998_v39, %v3762_v30  ;;  %v4051_v43 = vadd.f32 %v4041_v54, %v3764_v46 }
 0x4ba   :  { %v4000_v47 = vpop.f32.mrf.mxu0  ;;  %v4043_v35 = vpop.f32.mrf.mxu1 }
 0x4bb   :  { %10030 = vpow2.f32 %v8544_v12  ;;  %v8545_v29 = vmul.f32 -1.442695, %v4049_v0  ;;  %v4052_v25 = vadd.f32 %v4000_v47, %v3765_v19  ;;  %v4054_v9 = vadd.f32 %v4043_v35, %v3767_v62  ;;  %v12687_v0 = vld [vmem:[#allocation65_spill] sm:$0xff]  ;;  %v12688_v19 = vld [vmem:[#allocation66_spill] sm:$0xff] }
 0x4bc   :  { %10032 = vpow2.f32 %v8546_v34  ;;  %v4002_v23 = vpop.f32.mrf.mxu0  ;;  %v4045_v14 = vpop.f32.mrf.mxu1  ;;  %v8547_v45 = vmul.f32 -1.442695, %v4051_v43  ;;  %v4151_v2 = vunpack.c.l.bf16 %v12687_v0  ;;  %v4153_v47 = vunpack.c.l.bf16 %v12688_v19 }
 0x4bd   :  { %10034 = vpow2.f32 %v8545_v29  ;;  %v8548_v21 = vmul.f32 -1.442695, %v4052_v25  ;;  %v4053_v42 = vadd.f32 %v4002_v23, %v3766_v15  ;;  %v8550_v28 = vmul.f32 -1.442695, %v4054_v9 }
 0x4be   :  { %v4055_v44 = vadd.f32 %v4045_v14, %v3768_v51  ;;  %v4152_v15 = vunpack.c.h.bf16 %v12687_v0 }
 0x4bf   :  { %10036 = vpow2.f32 %v8548_v21  ;;  %v8549_v22 = vmul.f32 -1.442695, %v4053_v42  ;;  %v12689_v42 = vld [vmem:[#allocation67_spill] sm:$0xff] }
 0x4c0   :  { %10038 = vpow2.f32 %v8550_v28  ;;  %v8551_v1 = vmul.f32 -1.442695, %v4055_v44  ;;  %v4155_v28 = vunpack.c.l.bf16 %v12689_v42 }
 0x4c1   :  { %10040 = vpow2.f32 %v8549_v22 }
 0x4c2   :  { %10042 = vpow2.f32 %v8547_v45 }
 0x4c8   :  { %v10031_v60 = vpop.eup %10030 }
 0x4c9   :  { %v10033_v20 = vpop.eup %10032  ;;  %v4080_v13 = vadd.f32 1.0, %v10031_v60 }
 0x4ca   :  { %v10035_v41 = vpop.eup %10034  ;;  %v4082_v49 = vadd.f32 1.0, %v10033_v20 }
 0x4cb   :  { %v4081_v32 = vadd.f32 1.0, %v10035_v41  ;;  %v12690_v41 = vld [vmem:[#allocation68_spill] sm:$0xff] }
 0x4cc   :  { %v10037_v30 = vpop.eup %10036  ;;  %10044 = vrcp.f32 %v4082_v49  ;;  %v4157_v49 = vunpack.c.l.bf16 %v12690_v41 }
 0x4cd   :  { %v10039_v39 = vpop.eup %10038  ;;  %10046 = vrcp.f32 %v4081_v32  ;;  %v4084_v34 = vadd.f32 1.0, %v10037_v30 }
 0x4ce   :  { %v10041_v11 = vpop.eup %10040  ;;  %v4086_v12 = vadd.f32 1.0, %v10039_v39  ;;  %10048 = vpow2.f32 %v8551_v1 }
 0x4cf   :  { %10050 = vrcp.f32 %v4080_v13  ;;  %v4085_v54 = vadd.f32 1.0, %v10041_v11  ;;  %v10043_v35 = vpop.eup %10042 }
 0x4d0   :  { %10052 = vrcp.f32 %v4086_v12  ;;  %v4083_v60 = vadd.f32 1.0, %v10043_v35 }
 0x4d1   :  { %10054 = vrcp.f32 %v4085_v54  ;;  %v4156_v54 = vunpack.c.h.bf16 %v12689_v42 }
 0x4d2   :  { %10056 = vrcp.f32 %v4084_v34 }
 0x4d6   :  { %v4386_v6 = vpop.f32.mrf.mxu0  ;;  %v4429_v62 = vpop.f32.mrf.mxu1 }
 0x4d7   :  { %v4438_v29 = vadd.f32 %v4386_v6, %v4151_v2  ;;  %v4440_v25 = vadd.f32 %v4429_v62, %v4153_v47 }
 0x4d8   :  { %v4388_v23 = vpop.f32.mrf.mxu0  ;;  %v4431_v21 = vpop.f32.mrf.mxu1 }
 0x4d9   :  { %v10045_v9 = vpop.eup %10044  ;;  %v8588_v43 = vmul.f32 -1.442695, %v4438_v29  ;;  %v8590_v14 = vmul.f32 -1.442695, %v4440_v25  ;;  %v4439_v51 = vadd.f32 %v4388_v23, %v4152_v15 }
 0x4da   :  { %v10047_v22 = vpop.eup %10046  ;;  %v4104_v46 = vmul.f32 2.0, %v10045_v9  ;;  %v4390_v20 = vpop.f32.mrf.mxu0 }
 0x4db   :  { %v10049_v44 = vpop.eup %10048  ;;  %v4108_v45 = vmul.f32 %v10047_v22, %v11619_v57  ;;  %v4433_v1 = vpop.f32.mrf.mxu1  ;;  %10058 = vpow2.f32 %v8588_v43  ;;  %v8589_v30 = vmul.f32 -1.442695, %v4439_v51  ;;  %v4442_v39 = vadd.f32 %v4390_v20, %v4155_v28 }
 0x4dc   :  { %v10051_v13 = vpop.eup %10050  ;;  %v8552_v32 = vadd.f32 -1.0, %v4104_v46  ;;  %10060 = vpow2.f32 %v8590_v14  ;;  %v4444_v12 = vadd.f32 %v4433_v1, %v4157_v49  ;;  %v4392_v34 = vpop.f32.mrf.mxu0  ;;  %v4087_v23 = vadd.f32 1.0, %v10049_v44 }
 0x4dd   :  { %v10053_v11 = vpop.eup %10052  ;;  %10062 = vpow2.f32 %v8589_v30  ;;  %v8592_v6 = vmul.f32 -1.442695, %v4442_v39  ;;  %v4443_v29 = vadd.f32 %v4392_v34, %v4156_v54  ;;  %v4154_v46 = vunpack.c.h.bf16 %v12688_v19  ;;  %v11818_v43 = vpop.permute.xlu0 %1342 }
 0x4de   :  { %v10055_v0 = vpop.eup %10054  ;;  %v4110_v2 = vmul.f32 %v10051_v13, %v8552_v32  ;;  %v4105_v47 = vmul.f32 2.0, %v10053_v11  ;;  %10064 = vrcp.f32 %v4083_v60  ;;  %v8594_v35 = vmul.f32 -1.442695, %v4444_v12  ;;  %v11825_v20 = vpop.permute.xlu1 %1347 }
 0x4df   :  { %v4109_v62 = vmul.f32 %v10055_v0, %v11626_v53  ;;  %10066 = vpow2.f32 %v8592_v6  ;;  %v10057_v9 = vpop.eup %10056  ;;  %v8593_v28 = vmul.f32 -1.442695, %v4443_v29  ;;  %v4441_v60 = vadd.f32 %v4431_v21, %v4154_v46  ;;  %v4435_v49 = vpop.f32.mrf.mxu1 }
 0x4e0   :  { %v4112_v25 = vadd.f32 %v4110_v2, %v4108_v45  ;;  %v8553_v15 = vadd.f32 -1.0, %v4105_v47  ;;  %10068 = vpow2.f32 %v8594_v35  ;;  %v4158_v13 = vunpack.c.h.bf16 %v12690_v41 }
 0x4e1   :  { %v8591_v19 = vmul.f32 -1.442695, %v4441_v60 }
 0x4e2   :  { %10070 = vtanh.f32 %v4112_v25  ;;  %v4137_v42 = vsub.f32 %v4112_v25, %v11619_v57  ;;  %v4111_v22 = vmul.f32 %v10057_v9, %v8553_v15  ;;  %v4445_v39 = vadd.f32 %v4435_v49, %v4158_v13 }
 0x4e3   :  { %10072 = vpow2.f32 %v8593_v28 }
 0x4e4   :  { %v4139_v14 = vmul.f32 %v4137_v42, %v11818_v43  ;;  %v4113_v51 = vadd.f32 %v4111_v22, %v4109_v62  ;;  %10074 = vrcp.f32 %v4087_v23  ;;  %v8595_v47 = vmul.f32 -1.442695, %v4445_v39 }
 0x4e6   :  { %10076 = vtanh.f32 %v4113_v51  ;;  %v4138_v45 = vsub.f32 %v4113_v51, %v11626_v53  ;;  %v11823_v44 = vadd.f32 %v4139_v14, %v11619_v57 }
 0x4e7   :  { %10078 = vpow2.f32 %v8591_v19 }
 0x4e8   :  { %v4140_v1 = vmul.f32 %v4138_v45, %v11825_v20  ;;  %v10059_v32 = vpop.eup %10058 }
 0x4e9   :  { %v10061_v30 = vpop.eup %10060  ;;  %v4470_v34 = vadd.f32 1.0, %v10059_v32 }
 0x4ea   :  { %v11830_v21 = vadd.f32 %v4140_v1, %v11626_v53  ;;  %v10063_v11 = vpop.eup %10062  ;;  %v4472_v12 = vadd.f32 1.0, %v10061_v30 }
 0x4eb   :  { %v10065_v54 = vpop.eup %10064  ;;  %v4471_v57 = vadd.f32 1.0, %v10063_v11 }
 0x4ec   :  { %v10067_v0 = vpop.eup %10066  ;;  %10080 = vrcp.f32 %v4472_v12 }
 0x4ed   :  { %v10069_v2 = vpop.eup %10068  ;;  %10082 = vrcp.f32 %v4471_v57  ;;  %v4474_v29 = vadd.f32 1.0, %v10067_v0 }
 0x4ee   :  { %v4476_v62 = vadd.f32 1.0, %v10069_v2  ;;  %10084 = vrcp.f32 %v4470_v34 }
 0x4ef   :  { %v10071_v6 = vpop.eup %10070 }
 0x4f0   :  { %v10073_v41 = vpop.eup %10072  ;;  %v4116_v35 = vmul.f32 %v10071_v6, %v10065_v54  ;;  %10086 = vrcp.f32 %v4476_v62 }
 0x4f1   :  { %v4475_v53 = vadd.f32 1.0, %v10073_v41  ;;  %v10075_v25 = vpop.eup %10074  ;;  %10088 = vpow2.f32 %v8595_v47 }
 0x4f2   :  { %v4131_v15 = vsub.f32 %v4116_v35, %v11635_v27  ;;  %v4118_v28 = vmul.f32 %v4116_v35, %v11818_v43 }
 0x4f3   :  { %v10077_v9 = vpop.eup %10076  ;;  %10090 = vrcp.f32 %v4475_v53  ;;  %v12694_v53 = vld [vmem:[#allocation72_spill] sm:$0xff] }
 0x4f4   :  { %v4117_v23 = vmul.f32 %v10077_v9, %v10075_v25  ;;  %10092 = vrcp.f32 %v4474_v29  ;;  %v4133_v46 = vmul.f32 %v4131_v15, %v11818_v43  ;;  %v10079_v60 = vpop.eup %10078  ;;  %v12695_v25 = vld [vmem:[#allocation90_spill] sm:$0xff]  ;;  %v12697_v15 = vld [vmem:[#allocation92_spill] sm:$0xff] }
 0x4f5   :  { %v4473_v54 = vadd.f32 1.0, %v10079_v60  ;;  %v12702_v60 = vld [vmem:[#allocation97_spill] sm:$0xff] }
 0x4f6   :  { %v4119_v42 = vmul.f32 %v4117_v23, %v11825_v20  ;;  %v4132_v22 = vsub.f32 %v4117_v23, %v11638_v4  ;;  %v11839_v49 = vadd.f32 %v4133_v46, %v11635_v27  ;;  %v12698_v23 = vld [vmem:[#allocation93_spill] sm:$0xff]  ;;  %v12701_v46 = vld [vmem:[#allocation96_spill] sm:$0xff] }
 0x4f7   :  { %10094 = vrcp.f32 %v4473_v54  ;;  %v11928_v54 = vld [vmem:[#allocation12 + $0xc8] ss:$16 sps:$4 sm:$0xff]  }
 0x4f8   :  { %v9114_v14 = vpack.c.bf16 %v4119_v42, %v4118_v28  ;;  %v4134_v51 = vmul.f32 %v4132_v22, %v11825_v20  ;;  %v12700_v22 = vld [vmem:[#allocation95_spill] sm:$0xff] }
 0x4f9   :  { %v10081_v45 = vpop.eup %10080 }
 0x4fa   :  { %9115 = vst [vmem:[#allocation4 + $0x18] sm:$0xff] %v9114_v14   ;;  %v11842_v1 = vadd.f32 %v4134_v51, %v11638_v4  ;;  %v10083_v19 = vpop.eup %10082  ;;  %v4494_v13 = vmul.f32 2.0, %v10081_v45 }
 0x4fb   :  { %v4498_v32 = vmul.f32 %v10083_v19, %v11690_v52  ;;  %v10085_v39 = vpop.eup %10084 }
 0x4fc   :  { %v4548_v30 = vpack.c.bf16 %v11842_v1, %v11839_v49  ;;  %v8596_v11 = vadd.f32 -1.0, %v4494_v13 }
 0x4fd   :  { %v10087_v12 = vpop.eup %10086 }
 0x4fe   :  { %4774 = vmatmul.mubr.bf16.vlgmr.msra.gmra.mxu0 %v4548_v30  ;;  %4817 = vmatmul.mubr.bf16.vlgmr.msra.gmra.mxu1 %v4548_v30  ;;  %v10089_v34 = vpop.eup %10088  ;;  %v4500_v57 = vmul.f32 %v10085_v39, %v8596_v11  ;;  %v4495_v27 = vmul.f32 2.0, %v10087_v12  ;;  %v11926_v12 = vld [vmem:[#allocation12 + $0xc0] ss:$16 sps:$4 sm:$0xff]  }
 0x4ff   :  { %5131 = vmatpush1.bf16.msra.mxu0 %v11640_v16  ;;  %5174 = vmatpush1.bf16.msra.mxu1 %v11642_v36  ;;  %v4477_v62 = vadd.f32 1.0, %v10089_v34  ;;  %v11934_v34 = vld [vmem:[#allocation12 + $0xa4] ss:$16 sps:$4 sm:$0xff]  }
 0x500   :  { %v10091_v4 = vpop.eup %10090  ;;  %5132 = vmatprep.subr.bf16.mxu0 %v11647_v8  ;;  %5175 = vmatprep.subr.bf16.mxu1 %v11649_v58  ;;  %v4502_v0 = vadd.f32 %v4500_v57, %v4498_v32  ;;  %v8597_v2 = vadd.f32 -1.0, %v4495_v27  ;;  %v11857_v8 = vpop.permute.xlu0 %1352  ;;  %v11936_v57 = vld [vmem:[#allocation12 + $0xac] ss:$16 sps:$4 sm:$0xff]   ;;  %v11938_v27 = vld [vmem:[#allocation12 + $0xa0] ss:$16 sps:$4 sm:$0xff]  }
 0x501   :  { %v4499_v47 = vmul.f32 %v10091_v4, %v11708_v55  ;;  %5162 = vmatprep.mubr.bf16.mxu0 %v12624_v18  ;;  %5205 = vmatprep.mubr.bf16.mxu1 %v12624_v18  ;;  %v10093_v6 = vpop.eup %10092  ;;  %v11940_v4 = vld [vmem:[#allocation12 + $0xa8] ss:$16 sps:$4 sm:$0xff]  }
 0x502   :  { %10096 = vtanh.f32 %v4502_v0  ;;  %v4527_v16 = vsub.f32 %v4502_v0, %v11690_v52  ;;  %v4501_v36 = vmul.f32 %v10093_v6, %v8597_v2  ;;  %v11946_v0 = vld [vmem:[#allocation12 + $0x84] ss:$16 sps:$4 sm:$0xff]   ;;  %v11948_v2 = vld [vmem:[#allocation12 + $0x8c] ss:$16 sps:$4 sm:$0xff]   ;;  %v11952_v6 = vld [vmem:[#allocation12 + $0x88] ss:$16 sps:$4 sm:$0xff]  }
 0x503   :  { %5133 = vmatpush1.bf16.msra.mxu0 %v11653_v59  ;;  %5176 = vmatpush1.bf16.msra.mxu1 %v11655_v50  ;;  %10098 = vrcp.f32 %v4477_v62  ;;  %v11868_v50 = vpop.permute.xlu1 %1357  ;;  %v11958_v62 = vld [vmem:[#allocation12 + $0x64] ss:$16 sps:$4 sm:$0xff]  }
 0x504   :  { %5134 = vmatprep.subr.bf16.mxu0 %v11659_v3  ;;  %5177 = vmatprep.subr.bf16.mxu1 %v11661_v10  ;;  %v4529_v58 = vmul.f32 %v4527_v16, %v11857_v8  ;;  %v4503_v41 = vadd.f32 %v4501_v36, %v4499_v47  ;;  %v12691_v10 = vld [vmem:[#allocation28_spill] sm:$0xff]  ;;  %v11950_v47 = vld [vmem:[#allocation12 + $0x80] ss:$16 sps:$4 sm:$0xff]  }
 0x505   :  { %v11960_v16 = vld [vmem:[#allocation12 + $0x6c] ss:$16 sps:$4 sm:$0xff]   ;;  %v11962_v36 = vld [vmem:[#allocation12 + $0x60] ss:$16 sps:$4 sm:$0xff]  }
 0x506   :  { %10100 = vtanh.f32 %v4503_v41  ;;  %v4528_v35 = vsub.f32 %v4503_v41, %v11708_v55  ;;  %v11866_v59 = vadd.f32 %v4529_v58, %v11690_v52  ;;  %v10095_v52 = vpop.eup %10094  ;;  %v11964_v58 = vld [vmem:[#allocation12 + $0x68] ss:$16 sps:$4 sm:$0xff]   ;;  %v11970_v41 = vld [vmem:[#allocation12 + $0x44] ss:$16 sps:$4 sm:$0xff]  }
 0x507   :  { %5135 = vmatpush1.bf16.msra.mxu0 %v11669_v7  ;;  %5178 = vmatpush1.bf16.msra.mxu1 %v11671_v33  ;;  %v12692_v7 = vld [vmem:[#allocation70_spill] sm:$0xff]  ;;  %v12693_v33 = vld [vmem:[#allocation71_spill] sm:$0xff] }
 0x508   :  { %5136 = vmatprep.subr.bf16.mxu0 %v11677_v26  ;;  %5179 = vmatprep.subr.bf16.mxu1 %v11679_v56  ;;  %v4530_v3 = vmul.f32 %v4528_v35, %v11868_v50  ;;  %v12696_v56 = vld [vmem:[#allocation91_spill] sm:$0xff]  ;;  %v11972_v35 = vld [vmem:[#allocation12 + $0x4c] ss:$16 sps:$4 sm:$0xff]  }
 0x509   :  { %12703 = vst [vmem:[#allocation77_spill] sm:$0xff] %v11972_v35 }
 0x50a   :  { %v11876_v29 = vadd.f32 %v4530_v3, %v11708_v55  ;;  %v12699_v55 = vld [vmem:[#allocation94_spill] sm:$0xff]  ;;  %v11974_v3 = vld [vmem:[#allocation12 + $0x40] ss:$16 sps:$4 sm:$0xff]  }
 0x50b   :  { %5137 = vmatpush1.bf16.msra.mxu0 %v11685_v40  ;;  %5180 = vmatpush1.bf16.msra.mxu1 %v12691_v10  ;;  %12704 = vst [vmem:[#allocation78_spill] sm:$0xff] %v11974_v3  ;;  %v11976_v10 = vld [vmem:[#allocation12 + $0x48] ss:$16 sps:$4 sm:$0xff]  }
 0x50c   :  { %5138 = vmatprep.subr.bf16.mxu0 %v12692_v7  ;;  %5181 = vmatprep.subr.bf16.mxu1 %v12693_v33  ;;  %12705 = vst [vmem:[#allocation79_spill] sm:$0xff] %v11976_v10  ;;  %v11982_v7 = vld [vmem:[#allocation12 + $0x24] ss:$16 sps:$4 sm:$0xff]   ;;  %v11984_v33 = vld [vmem:[#allocation12 + $0x2c] ss:$16 sps:$4 sm:$0xff]  }
 0x50d   :  { %12706 = vst [vmem:[#allocation80_spill] sm:$0xff] %v11982_v7  ;;  %12707 = vst [vmem:[#allocation81_spill] sm:$0xff] %v11984_v33 }
 0x50f   :  { %5139 = vmatpush1.bf16.msra.mxu0 %v12694_v53  ;;  %5182 = vmatpush1.bf16.msra.mxu1 %v12695_v25  ;;  %v10097_v26 = vpop.eup %10096  ;;  %v11988_v53 = vld [vmem:[#allocation12 + $0x28] ss:$16 sps:$4 sm:$0xff]   ;;  %v11994_v25 = vld [vmem:[#allocation12 + $0x4] ss:$16 sps:$4 sm:$0xff]  }
 0x510   :  { %5140 = vmatprep.subr.bf16.mxu0 %v12696_v56  ;;  %5183 = vmatprep.subr.bf16.mxu1 %v12697_v15  ;;  %v4506_v40 = vmul.f32 %v10097_v26, %v10095_v52  ;;  %v10099_v9 = vpop.eup %10098  ;;  %v11986_v52 = vld [vmem:[#allocation12 + $0x20] ss:$16 sps:$4 sm:$0xff]   ;;  %12709 = vst [vmem:[#allocation87_spill] sm:$0xff] %v11988_v53  ;;  %12710 = vst [vmem:[#allocation88_spill] sm:$0xff] %v11994_v25  ;;  %v11996_v26 = vld [vmem:[#allocation12 + $0xc] ss:$16 sps:$4 sm:$0xff]  }
 0x511   :  { %12708 = vst [vmem:[#allocation86_spill] sm:$0xff] %v11986_v52  ;;  %12711 = vst [vmem:[#allocation89_spill] sm:$0xff] %v11996_v26  ;;  %v11998_v56 = vld [vmem:[#allocation12] ss:$16 sps:$4 sm:$0xff]   ;;  %v12000_v15 = vld [vmem:[#allocation12 + $0x8] ss:$16 sps:$4 sm:$0xff]  }
 0x512   :  { %v4521_v28 = vsub.f32 %v4506_v40, %v11757_v37  ;;  %v4508_v51 = vmul.f32 %v4506_v40, %v11857_v8  ;;  %12712 = vst [vmem:[#allocation29_spill] sm:$0xff] %v11998_v56  ;;  %12713 = vst [vmem:[#allocation30_spill] sm:$0xff] %v12000_v15  ;;  %v12006_v40 = vld [vmem:[#allocation13 + $0xe4] ss:$16 sps:$4 sm:$0xff]  }
 0x513   :  { %5141 = vmatpush1.bf16.msra.mxu0 %v12698_v23  ;;  %5184 = vmatpush1.bf16.msra.mxu1 %v12699_v55  ;;  %v10101_v42 = vpop.eup %10100  ;;  %12714 = vst [vmem:[#allocation31_spill] sm:$0xff] %v12006_v40  ;;  %v12716_v23 = vld [vmem:[#allocation33_spill] sm:$0xff] }
 0x514   :  { %5142 = vmatprep.subr.bf16.mxu0 %v12700_v22  ;;  %5185 = vmatprep.subr.bf16.mxu1 %v12701_v46  ;;  %v4507_v14 = vmul.f32 %v10101_v42, %v10099_v9  ;;  %v4523_v13 = vmul.f32 %v4521_v28, %v11857_v8  ;;  %v12008_v9 = vld [vmem:[#allocation13 + $0xec] ss:$16 sps:$4 sm:$0xff]   ;;  %v4540_v55 = vunpack.c.l.bf16 %v12716_v23 }
 0x515   :  { %12715 = vst [vmem:[#allocation32_spill] sm:$0xff] %v12008_v9  ;;  %v12717_v28 = vld [vmem:[#allocation34_spill] sm:$0xff] }
 0x516   :  { %v4509_v45 = vmul.f32 %v4507_v14, %v11868_v50  ;;  %v4522_v19 = vsub.f32 %v4507_v14, %v11760_v24  ;;  %v4542_v42 = vunpack.c.l.bf16 %v12717_v28 }
 0x517   :  { %5143 = vmatpush1.bf16.msra.mxu0 %v11730_v17  ;;  %5186 = vmatpush1.bf16.msra.mxu1 %v12702_v60  ;;  %v11901_v17 = vadd.f32 %v4523_v13, %v11757_v37  ;;  %v11924_v37 = vld [vmem:[#allocation12 + $0xcc] ss:$16 sps:$4 sm:$0xff]   ;;  %v4541_v60 = vunpack.c.h.bf16 %v12716_v23 }
 0x518   :  { %5144 = vmatprep.subr.bf16.mxu0 %v11737_v38  ;;  %5187 = vmatprep.subr.bf16.mxu1 %v11739_v61  ;;  %v9119_v32 = vpack.c.bf16 %v4509_v45, %v4508_v51  ;;  %v4524_v30 = vmul.f32 %v4522_v19, %v11868_v50  ;;  %v11910_v61 = vld [vmem:[#allocation12 + $0xe4] ss:$16 sps:$4 sm:$0xff]   ;;  %v11912_v38 = vld [vmem:[#allocation12 + $0xec] ss:$16 sps:$4 sm:$0xff]  }
 0x51a   :  { %9120 = vst [vmem:[#allocation5 + $0x20] sm:$0xff] %v9119_v32   ;;  %v11904_v39 = vadd.f32 %v4524_v30, %v11760_v24  ;;  %v11922_v24 = vld [vmem:[#allocation12 + $0xc4] ss:$16 sps:$4 sm:$0xff]  }
 0x51b   :  { %5145 = vmatpush1.bf16.msra.mxu0 %v11744_v31  ;;  %5188 = vmatpush1.bf16.msra.mxu1 %v11746_v63  ;;  %v11914_v63 = vld [vmem:[#allocation12 + $0xe0] ss:$16 sps:$4 sm:$0xff]   ;;  %v11916_v31 = vld [vmem:[#allocation12 + $0xe8] ss:$16 sps:$4 sm:$0xff]  }
 0x51c   :  { %v4937_v11 = vpack.c.bf16 %v11904_v39, %v11901_v17  ;;  %5519 = vmatprep.subr.bf16.mxu0 %v11910_v61  ;;  %5562 = vmatprep.subr.bf16.mxu1 %v11912_v38 }
 0x51e   :  { %5163 = vmatmul.mubr.bf16.vlgmr.msra.gmra.mxu0 %v4937_v11  ;;  %5206 = vmatmul.mubr.bf16.vlgmr.msra.gmra.mxu1 %v4937_v11  ;;  %v12718_v11 = vld [vmem:[#allocation35_spill] sm:$0xff] }
 0x51f   :  { %5551 = vmatprep.mubr.bf16.mxu0 %v12624_v18  ;;  %5594 = vmatprep.mubr.bf16.mxu1 %v12624_v18  ;;  %v4544_v48 = vunpack.c.l.bf16 %v12718_v11 }
 0x520   :  { %5520 = vmatpush1.bf16.msra.mxu0 %v11914_v63  ;;  %5563 = vmatpush1.bf16.msra.mxu1 %v11916_v31 }
 0x521   :  { %5521 = vmatprep.subr.bf16.mxu0 %v11922_v24  ;;  %5564 = vmatprep.subr.bf16.mxu1 %v11924_v37 }
 0x524   :  { %5522 = vmatpush1.bf16.msra.mxu0 %v11926_v12  ;;  %5565 = vmatpush1.bf16.msra.mxu1 %v11928_v54 }
 0x525   :  { %5523 = vmatprep.subr.bf16.mxu0 %v11934_v34  ;;  %5566 = vmatprep.subr.bf16.mxu1 %v11936_v57 }
 0x528   :  { %5524 = vmatpush1.bf16.msra.mxu0 %v11938_v27  ;;  %5567 = vmatpush1.bf16.msra.mxu1 %v11940_v4 }
 0x529   :  { %5525 = vmatprep.subr.bf16.mxu0 %v11946_v0  ;;  %5568 = vmatprep.subr.bf16.mxu1 %v11948_v2 }
 0x52c   :  { %5526 = vmatpush1.bf16.msra.mxu0 %v11950_v47  ;;  %5569 = vmatpush1.bf16.msra.mxu1 %v11952_v6 }
 0x52d   :  { %5527 = vmatprep.subr.bf16.mxu0 %v11958_v62  ;;  %5570 = vmatprep.subr.bf16.mxu1 %v11960_v16 }
 0x530   :  { %5528 = vmatpush1.bf16.msra.mxu0 %v11962_v36  ;;  %5571 = vmatpush1.bf16.msra.mxu1 %v11964_v58 }
 0x531   :  { %5529 = vmatprep.subr.bf16.mxu0 %v11970_v41  ;;  %5572 = vmatprep.subr.bf16.mxu1 %v11972_v35 }
 0x534   :  { %5530 = vmatpush1.bf16.msra.mxu0 %v11974_v3  ;;  %5573 = vmatpush1.bf16.msra.mxu1 %v11976_v10 }
 0x535   :  { %5531 = vmatprep.subr.bf16.mxu0 %v11982_v7  ;;  %5574 = vmatprep.subr.bf16.mxu1 %v11984_v33 }
 0x538   :  { %5532 = vmatpush1.bf16.msra.mxu0 %v11986_v52  ;;  %5575 = vmatpush1.bf16.msra.mxu1 %v11988_v53  ;;  %v12723_v52 = vld [vmem:[#allocation64_spill] sm:$0xff] }
 0x539   :  { %5533 = vmatprep.subr.bf16.mxu0 %v11994_v25  ;;  %5576 = vmatprep.subr.bf16.mxu1 %v11996_v26  ;;  %v4545_v25 = vunpack.c.h.bf16 %v12718_v11 }
 0x53c   :  { %5534 = vmatpush1.bf16.msra.mxu0 %v11998_v56  ;;  %5577 = vmatpush1.bf16.msra.mxu1 %v12000_v15 }
 0x53d   :  { %5908 = vmatprep.subr.bf16.mxu0 %v12006_v40  ;;  %5951 = vmatprep.subr.bf16.mxu1 %v12008_v9  ;;  %v12719_v40 = vld [vmem:[#allocation36_spill] sm:$0xff] }
 0x53e   :  { %v4546_v9 = vunpack.c.l.bf16 %v12719_v40 }
 0x5be   :  { %v4775_v22 = vpop.f32.mrf.mxu0  ;;  %v4818_v46 = vpop.f32.mrf.mxu1 }
 0x5bf   :  { %v4827_v14 = vadd.f32 %v4775_v22, %v4540_v55  ;;  %v4829_v51 = vadd.f32 %v4818_v46, %v4542_v42 }
 0x5c0   :  { %v4777_v45 = vpop.f32.mrf.mxu0  ;;  %v4820_v19 = vpop.f32.mrf.mxu1 }
 0x5c1   :  { %v8632_v13 = vmul.f32 -1.442695, %v4827_v14  ;;  %v8634_v32 = vmul.f32 -1.442695, %v4829_v51  ;;  %v4828_v30 = vadd.f32 %v4777_v45, %v4541_v60  ;;  %v4543_v51 = vunpack.c.h.bf16 %v12717_v28 }
 0x5c2   :  { %v4779_v5 = vpop.f32.mrf.mxu0  ;;  %v4822_v15 = vpop.f32.mrf.mxu1 }
 0x5c3   :  { %10102 = vpow2.f32 %v8632_v13  ;;  %v8633_v56 = vmul.f32 -1.442695, %v4828_v30  ;;  %v4831_v26 = vadd.f32 %v4779_v5, %v4544_v48  ;;  %v4833_v55 = vadd.f32 %v4822_v15, %v4546_v9 }
 0x5c4   :  { %10104 = vpow2.f32 %v8634_v32  ;;  %v4781_v42 = vpop.f32.mrf.mxu0  ;;  %v4830_v60 = vadd.f32 %v4820_v19, %v4543_v51  ;;  %v4824_v45 = vpop.f32.mrf.mxu1  ;;  %v4547_v13 = vunpack.c.h.bf16 %v12719_v40 }
 0x5c5   :  { %10106 = vpow2.f32 %v8633_v56  ;;  %v8636_v23 = vmul.f32 -1.442695, %v4831_v26  ;;  %v4832_v22 = vadd.f32 %v4781_v42, %v4545_v25  ;;  %v8638_v46 = vmul.f32 -1.442695, %v4833_v55 }
 0x5c6   :  { %v4834_v5 = vadd.f32 %v4824_v45, %v4547_v13  ;;  %v8635_v48 = vmul.f32 -1.442695, %v4830_v60 }
 0x5c7   :  { %10108 = vpow2.f32 %v8636_v23  ;;  %v8637_v14 = vmul.f32 -1.442695, %v4832_v22  ;;  %v12720_v23 = vld [vmem:[#allocation61_spill] sm:$0xff] }
 0x5c8   :  { %10110 = vpow2.f32 %v8638_v46  ;;  %v8639_v56 = vmul.f32 -1.442695, %v4834_v5  ;;  %v4929_v22 = vunpack.c.l.bf16 %v12720_v23  ;;  %v12721_v46 = vld [vmem:[#allocation62_spill] sm:$0xff] }
 0x5c9   :  { %10112 = vpow2.f32 %v8637_v14  ;;  %v4931_v14 = vunpack.c.l.bf16 %v12721_v46 }
 0x5ca   :  { %10114 = vpow2.f32 %v8635_v48  ;;  %v4930_v48 = vunpack.c.h.bf16 %v12720_v23 }
 0x5d0   :  { %v10103_v30 = vpop.eup %10102 }
 0x5d1   :  { %v10105_v32 = vpop.eup %10104  ;;  %v4859_v26 = vadd.f32 1.0, %v10103_v30 }
 0x5d2   :  { %v10107_v15 = vpop.eup %10106  ;;  %v4861_v9 = vadd.f32 1.0, %v10105_v32 }
 0x5d3   :  { %v4860_v25 = vadd.f32 1.0, %v10107_v15 }
 0x5d4   :  { %v10109_v11 = vpop.eup %10108  ;;  %10116 = vrcp.f32 %v4861_v9  ;;  %v12722_v9 = vld [vmem:[#allocation63_spill] sm:$0xff] }
 0x5d5   :  { %v10111_v55 = vpop.eup %10110  ;;  %10118 = vrcp.f32 %v4860_v25  ;;  %v4863_v40 = vadd.f32 1.0, %v10109_v11 }
 0x5d6   :  { %v10113_v28 = vpop.eup %10112  ;;  %v4865_v42 = vadd.f32 1.0, %v10111_v55  ;;  %10120 = vpow2.f32 %v8639_v56  ;;  %v4933_v56 = vunpack.c.l.bf16 %v12722_v9 }
 0x5d7   :  { %10122 = vrcp.f32 %v4859_v26  ;;  %v4864_v19 = vadd.f32 1.0, %v10113_v28  ;;  %v10115_v45 = vpop.eup %10114 }
 0x5d8   :  { %10124 = vrcp.f32 %v4865_v42 }
 0x5d9   :  { %10126 = vrcp.f32 %v4864_v19 }
 0x5da   :  { %10128 = vrcp.f32 %v4863_v40  ;;  %v4862_v40 = vadd.f32 1.0, %v10115_v45 }
 0x5de   :  { %v5164_v51 = vpop.f32.mrf.mxu0  ;;  %v5207_v60 = vpop.f32.mrf.mxu1 }
 0x5df   :  { %v5216_v13 = vadd.f32 %v5164_v51, %v4929_v22  ;;  %v5218_v5 = vadd.f32 %v5207_v60, %v4931_v14  ;;  %v4935_v22 = vunpack.c.l.bf16 %v12723_v52 }
 0x5e0   :  { %v5166_v32 = vpop.f32.mrf.mxu0  ;;  %v5209_v15 = vpop.f32.mrf.mxu1 }
 0x5e1   :  { %v10117_v30 = vpop.eup %10116  ;;  %v8676_v11 = vmul.f32 -1.442695, %v5216_v13  ;;  %v8678_v55 = vmul.f32 -1.442695, %v5218_v5  ;;  %v5217_v28 = vadd.f32 %v5166_v32, %v4930_v48  ;;  %v4934_v13 = vunpack.c.h.bf16 %v12722_v9 }
 0x5e2   :  { %v10119_v26 = vpop.eup %10118  ;;  %v4883_v25 = vmul.f32 2.0, %v10117_v30  ;;  %v5168_v53 = vpop.f32.mrf.mxu0 }
 0x5e3   :  { %v10121_v42 = vpop.eup %10120  ;;  %v4887_v19 = vmul.f32 %v10119_v26, %v11823_v44  ;;  %v5211_v14 = vpop.f32.mrf.mxu1  ;;  %10130 = vpow2.f32 %v8676_v11  ;;  %v8677_v60 = vmul.f32 -1.442695, %v5217_v28  ;;  %v5220_v33 = vadd.f32 %v5168_v53, %v4933_v56 }
 0x5e4   :  { %v10123_v51 = vpop.eup %10122  ;;  %v8640_v23 = vadd.f32 -1.0, %v4883_v25  ;;  %10132 = vpow2.f32 %v8678_v55  ;;  %v5222_v10 = vadd.f32 %v5211_v14, %v4935_v22  ;;  %v5170_v5 = vpop.f32.mrf.mxu0  ;;  %v4866_v56 = vadd.f32 1.0, %v10121_v42 }
 0x5e5   :  { %v10125_v7 = vpop.eup %10124  ;;  %10134 = vpow2.f32 %v8677_v60  ;;  %v8680_v45 = vmul.f32 -1.442695, %v5220_v33  ;;  %v5221_v35 = vadd.f32 %v5170_v5, %v4934_v13  ;;  %v4936_v14 = vunpack.c.h.bf16 %v12723_v52 }
 0x5e6   :  { %v10127_v48 = vpop.eup %10126  ;;  %v4889_v30 = vmul.f32 %v10123_v51, %v8640_v23  ;;  %v4884_v32 = vmul.f32 2.0, %v10125_v7  ;;  %10136 = vrcp.f32 %v4862_v40  ;;  %v8682_v3 = vmul.f32 -1.442695, %v5222_v10 }
 0x5e7   :  { %v4888_v26 = vmul.f32 %v10127_v48, %v11830_v21  ;;  %10138 = vpow2.f32 %v8680_v45  ;;  %v10129_v53 = vpop.eup %10128  ;;  %v8681_v55 = vmul.f32 -1.442695, %v5221_v35  ;;  %v4932_v7 = vunpack.c.h.bf16 %v12721_v46 }
 0x5e8   :  { %v4891_v25 = vadd.f32 %v4889_v30, %v4887_v19  ;;  %v8641_v11 = vadd.f32 -1.0, %v4884_v32  ;;  %10140 = vpow2.f32 %v8682_v3  ;;  %v5213_v3 = vpop.f32.mrf.mxu1 }
 0x5e9   :  { %v5219_v22 = vadd.f32 %v5209_v15, %v4932_v7  ;;  %v5223_v23 = vadd.f32 %v5213_v3, %v4936_v14 }
 0x5ea   :  { %10142 = vtanh.f32 %v4891_v25  ;;  %v4916_v9 = vsub.f32 %v4891_v25, %v11823_v44  ;;  %v4890_v28 = vmul.f32 %v10129_v53, %v8641_v11 }
 0x5eb   :  { %10144 = vpow2.f32 %v8681_v55  ;;  %v8679_v42 = vmul.f32 -1.442695, %v5219_v22  ;;  %v8683_v45 = vmul.f32 -1.442695, %v5223_v23 }
 0x5ec   :  { %v4918_v33 = vmul.f32 %v4916_v9, %v11857_v8  ;;  %v4892_v40 = vadd.f32 %v4890_v28, %v4888_v26  ;;  %10146 = vrcp.f32 %v4866_v56 }
 0x5ee   :  { %10148 = vtanh.f32 %v4892_v40  ;;  %v4917_v10 = vsub.f32 %v4892_v40, %v11830_v21  ;;  %v12033_v19 = vadd.f32 %v4918_v33, %v11823_v44 }
 0x5ef   :  { %10150 = vpow2.f32 %v8679_v42 }
 0x5f0   :  { %v4919_v35 = vmul.f32 %v4917_v10, %v11868_v50  ;;  %v10131_v51 = vpop.eup %10130 }
 0x5f1   :  { %v10133_v46 = vpop.eup %10132  ;;  %v5248_v48 = vadd.f32 1.0, %v10131_v51 }
 0x5f2   :  { %v12038_v60 = vadd.f32 %v4919_v35, %v11830_v21  ;;  %v10135_v15 = vpop.eup %10134  ;;  %v5250_v13 = vadd.f32 1.0, %v10133_v46 }
 0x5f3   :  { %v10137_v5 = vpop.eup %10136  ;;  %v5249_v30 = vadd.f32 1.0, %v10135_v15  ;;  %v12052_v15 = vld [vmem:[#allocation13 + $0xe0] ss:$16 sps:$4 sm:$0xff]  }
 0x5f4   :  { %v10139_v44 = vpop.eup %10138  ;;  %10152 = vrcp.f32 %v5250_v13  ;;  %v12054_v13 = vld [vmem:[#allocation13 + $0xe8] ss:$16 sps:$4 sm:$0xff]  }
 0x5f5   :  { %v10141_v32 = vpop.eup %10140  ;;  %10154 = vrcp.f32 %v5249_v30  ;;  %v5252_v53 = vadd.f32 1.0, %v10139_v44 }
 0x5f6   :  { %v5254_v25 = vadd.f32 1.0, %v10141_v32  ;;  %10156 = vrcp.f32 %v5248_v48  ;;  %v12061_v48 = vld [vmem:[#allocation13 + $0xcc] ss:$16 sps:$4 sm:$0xff]  }
 0x5f7   :  { %v10143_v26 = vpop.eup %10142 }
 0x5f8   :  { %v10145_v52 = vpop.eup %10144  ;;  %v4895_v11 = vmul.f32 %v10143_v26, %v10137_v5  ;;  %10158 = vrcp.f32 %v5254_v25  ;;  %v12059_v5 = vld [vmem:[#allocation13 + $0xc4] ss:$16 sps:$4 sm:$0xff]   ;;  %v12065_v25 = vld [vmem:[#allocation13 + $0xc0] ss:$16 sps:$4 sm:$0xff]  }
 0x5f9   :  { %v5253_v21 = vadd.f32 1.0, %v10145_v52  ;;  %v10147_v56 = vpop.eup %10146  ;;  %10160 = vpow2.f32 %v8683_v45  ;;  %v12067_v52 = vld [vmem:[#allocation13 + $0xc8] ss:$16 sps:$4 sm:$0xff]  }
 0x5fa   :  { %v4910_v55 = vsub.f32 %v4895_v11, %v11839_v49  ;;  %v4897_v7 = vmul.f32 %v4895_v11, %v11857_v8 }
 0x5fb   :  { %v10149_v9 = vpop.eup %10148  ;;  %10162 = vrcp.f32 %v5253_v21  ;;  %v12073_v21 = vld [vmem:[#allocation13 + $0xac] ss:$16 sps:$4 sm:$0xff]  }
 0x5fc   :  { %v4896_v28 = vmul.f32 %v10149_v9, %v10147_v56  ;;  %10164 = vrcp.f32 %v5252_v53  ;;  %v4912_v22 = vmul.f32 %v4910_v55, %v11857_v8  ;;  %v10151_v35 = vpop.eup %10150  ;;  %v12071_v53 = vld [vmem:[#allocation13 + $0xa4] ss:$16 sps:$4 sm:$0xff]  }
 0x5fe   :  { %v4898_v33 = vmul.f32 %v4896_v28, %v11868_v50  ;;  %v4911_v40 = vsub.f32 %v4896_v28, %v11842_v1  ;;  %v12047_v14 = vadd.f32 %v4912_v22, %v11839_v49  ;;  %v12081_v22 = vld [vmem:[#allocation13 + $0xa0] ss:$16 sps:$4 sm:$0xff]  }
 0x600   :  { %v9124_v10 = vpack.c.bf16 %v4898_v33, %v4897_v7  ;;  %v4913_v3 = vmul.f32 %v4911_v40, %v11868_v50 }
 0x601   :  { %v10153_v42 = vpop.eup %10152 }
 0x602   :  { %9125 = vst [vmem:[#allocation4 + $0x20] sm:$0xff] %v9124_v10   ;;  %v12050_v51 = vadd.f32 %v4913_v3, %v11842_v1  ;;  %v10155_v46 = vpop.eup %10154  ;;  %v5272_v23 = vmul.f32 2.0, %v10153_v42  ;;  %v5251_v1 = vadd.f32 1.0, %v10151_v35  ;;  %v12083_v10 = vld [vmem:[#allocation13 + $0xa8] ss:$16 sps:$4 sm:$0xff]  }
 0x603   :  { %v5276_v8 = vmul.f32 %v10155_v46, %v11866_v59  ;;  %v10157_v49 = vpop.eup %10156  ;;  %v12087_v3 = vld [vmem:[#allocation13 + $0x84] ss:$16 sps:$4 sm:$0xff]   ;;  %v12089_v35 = vld [vmem:[#allocation13 + $0x8c] ss:$16 sps:$4 sm:$0xff]  }
 0x604   :  { %v5326_v50 = vpack.c.bf16 %v12050_v51, %v12047_v14  ;;  %v8684_v30 = vadd.f32 -1.0, %v5272_v23  ;;  %10166 = vrcp.f32 %v5251_v1 }
 0x605   :  { %v10159_v44 = vpop.eup %10158 }
 0x606   :  { %5552 = vmatmul.mubr.bf16.vlgmr.msra.gmra.mxu0 %v5326_v50  ;;  %5595 = vmatmul.mubr.bf16.vlgmr.msra.gmra.mxu1 %v5326_v50  ;;  %v10161_v32 = vpop.eup %10160  ;;  %v5278_v45 = vmul.f32 %v10157_v49, %v8684_v30  ;;  %v5273_v26 = vmul.f32 2.0, %v10159_v44  ;;  %v12097_v50 = vld [vmem:[#allocation13 + $0x88] ss:$16 sps:$4 sm:$0xff]   ;;  %v12104_v30 = vld [vmem:[#allocation13 + $0x64] ss:$16 sps:$4 sm:$0xff]  }
 0x607   :  { %5909 = vmatpush1.bf16.msra.mxu0 %v12052_v15  ;;  %5952 = vmatpush1.bf16.msra.mxu1 %v12054_v13  ;;  %v5255_v7 = vadd.f32 1.0, %v10161_v32  ;;  %v12106_v44 = vld [vmem:[#allocation13 + $0x6c] ss:$16 sps:$4 sm:$0xff]   ;;  %v12111_v32 = vld [vmem:[#allocation13 + $0x60] ss:$16 sps:$4 sm:$0xff]  }
 0x608   :  { %v10163_v11 = vpop.eup %10162  ;;  %5910 = vmatprep.subr.bf16.mxu0 %v12059_v5  ;;  %5953 = vmatprep.subr.bf16.mxu1 %v12061_v48  ;;  %v5280_v56 = vadd.f32 %v5278_v45, %v5276_v8  ;;  %v8685_v55 = vadd.f32 -1.0, %v5273_v26  ;;  %v12095_v8 = vld [vmem:[#allocation13 + $0x80] ss:$16 sps:$4 sm:$0xff]   ;;  %v12113_v45 = vld [vmem:[#allocation13 + $0x68] ss:$16 sps:$4 sm:$0xff]  }
 0x609   :  { %v5277_v9 = vmul.f32 %v10163_v11, %v11876_v29  ;;  %5940 = vmatprep.mubr.bf16.mxu0 %v12624_v18  ;;  %5983 = vmatprep.mubr.bf16.mxu1 %v12624_v18  ;;  %v10165_v28 = vpop.eup %10164  ;;  %12724 = vst [vmem:[#allocation65_spill] sm:$0xff] %v12113_v45  ;;  %v12120_v26 = vld [vmem:[#allocation13 + $0x44] ss:$16 sps:$4 sm:$0xff]   ;;  %v12122_v11 = vld [vmem:[#allocation13 + $0x4c] ss:$16 sps:$4 sm:$0xff]  }
 0x60a   :  { %10168 = vtanh.f32 %v5280_v56  ;;  %v5305_v33 = vsub.f32 %v5280_v56, %v11866_v59  ;;  %v5279_v40 = vmul.f32 %v10165_v28, %v8685_v55  ;;  %12725 = vst [vmem:[#allocation66_spill] sm:$0xff] %v12120_v26  ;;  %12726 = vst [vmem:[#allocation67_spill] sm:$0xff] %v12122_v11  ;;  %v12126_v55 = vld [vmem:[#allocation13 + $0x40] ss:$16 sps:$4 sm:$0xff]  }
 0x60b   :  { %5911 = vmatpush1.bf16.msra.mxu0 %v12065_v25  ;;  %5954 = vmatpush1.bf16.msra.mxu1 %v12067_v52  ;;  %10170 = vrcp.f32 %v5255_v7  ;;  %12727 = vst [vmem:[#allocation68_spill] sm:$0xff] %v12126_v55  ;;  %v12134_v7 = vld [vmem:[#allocation13 + $0x2c] ss:$16 sps:$4 sm:$0xff]  }
 0x60c   :  { %5912 = vmatprep.subr.bf16.mxu0 %v12071_v53  ;;  %5955 = vmatprep.subr.bf16.mxu1 %v12073_v21  ;;  %v5307_v42 = vmul.f32 %v5305_v33, %v11818_v43  ;;  %v5281_v46 = vadd.f32 %v5279_v40, %v5277_v9  ;;  %v12128_v9 = vld [vmem:[#allocation13 + $0x48] ss:$16 sps:$4 sm:$0xff]   ;;  %12730 = vst [vmem:[#allocation71_spill] sm:$0xff] %v12134_v7 }
 0x60d   :  { %12728 = vst [vmem:[#allocation28_spill] sm:$0xff] %v12128_v9 }
 0x60e   :  { %10172 = vtanh.f32 %v5281_v46  ;;  %v5306_v23 = vsub.f32 %v5281_v46, %v11876_v29  ;;  %v12100_v49 = vadd.f32 %v5307_v42, %v11866_v59  ;;  %v12138_v42 = vld [vmem:[#allocation13 + $0x20] ss:$16 sps:$4 sm:$0xff]   ;;  %v12140_v46 = vld [vmem:[#allocation13 + $0x28] ss:$16 sps:$4 sm:$0xff]  }
 0x60f   :  { %5913 = vmatpush1.bf16.msra.mxu0 %v12081_v22  ;;  %5956 = vmatpush1.bf16.msra.mxu1 %v12083_v10  ;;  %12731 = vst [vmem:[#allocation72_spill] sm:$0xff] %v12140_v46 }
 0x610   :  { %5914 = vmatprep.subr.bf16.mxu0 %v12087_v3  ;;  %5957 = vmatprep.subr.bf16.mxu1 %v12089_v35  ;;  %v5308_v1 = vmul.f32 %v5306_v23, %v11825_v20 }
 0x611   :  { %v10167_v56 = vpop.eup %10166 }
 0x612   :  { %v12116_v59 = vadd.f32 %v5308_v1, %v11876_v29  ;;  %v12132_v29 = vld [vmem:[#allocation13 + $0x24] ss:$16 sps:$4 sm:$0xff]  }
 0x613   :  { %5915 = vmatpush1.bf16.msra.mxu0 %v12095_v8  ;;  %5958 = vmatpush1.bf16.msra.mxu1 %v12097_v50  ;;  %12729 = vst [vmem:[#allocation70_spill] sm:$0xff] %v12132_v29 }
 0x614   :  { %5916 = vmatprep.subr.bf16.mxu0 %v12104_v30  ;;  %5959 = vmatprep.subr.bf16.mxu1 %v12106_v44 }
 0x617   :  { %5917 = vmatpush1.bf16.msra.mxu0 %v12111_v32  ;;  %5960 = vmatpush1.bf16.msra.mxu1 %v12113_v45  ;;  %v10169_v28 = vpop.eup %10168 }
 0x618   :  { %5918 = vmatprep.subr.bf16.mxu0 %v12120_v26  ;;  %5961 = vmatprep.subr.bf16.mxu1 %v12122_v11  ;;  %v5284_v33 = vmul.f32 %v10169_v28, %v10167_v56  ;;  %v10171_v40 = vpop.eup %10170  ;;  %v12145_v11 = vld [vmem:[#allocation13 + $0x4] ss:$16 sps:$4 sm:$0xff]   ;;  %v12147_v26 = vld [vmem:[#allocation13 + $0xc] ss:$16 sps:$4 sm:$0xff]  }
 0x61a   :  { %v5299_v23 = vsub.f32 %v5284_v33, %v11901_v17  ;;  %v5286_v28 = vmul.f32 %v5284_v33, %v11818_v43 }
 0x61b   :  { %5919 = vmatpush1.bf16.msra.mxu0 %v12126_v55  ;;  %5962 = vmatpush1.bf16.msra.mxu1 %v12128_v9  ;;  %v10173_v1 = vpop.eup %10172  ;;  %v12152_v9 = vld [vmem:[#allocation13] ss:$16 sps:$4 sm:$0xff]   ;;  %v12154_v55 = vld [vmem:[#allocation13 + $0x8] ss:$16 sps:$4 sm:$0xff]  }
 0x61c   :  { %5920 = vmatprep.subr.bf16.mxu0 %v12132_v29  ;;  %5963 = vmatprep.subr.bf16.mxu1 %v12134_v7  ;;  %v5285_v56 = vmul.f32 %v10173_v1, %v10171_v40  ;;  %v5301_v7 = vmul.f32 %v5299_v23, %v11818_v43  ;;  %v12747_v23 = vld [vmem:[#allocation39_spill] sm:$0xff] }
 0x61e   :  { %v5287_v45 = vmul.f32 %v5285_v56, %v11825_v20  ;;  %v5300_v29 = vsub.f32 %v5285_v56, %v11904_v39  ;;  %v12165_v1 = vadd.f32 %v5301_v7, %v11901_v17  ;;  %v12733_v17 = vld [vmem:[#allocation78_spill] sm:$0xff]  ;;  %v5322_v56 = vunpack.c.l.bf16 %v12747_v23 }
 0x61f   :  { %5921 = vmatpush1.bf16.msra.mxu0 %v12138_v42  ;;  %5964 = vmatpush1.bf16.msra.mxu1 %v12140_v46 }
 0x620   :  { %5922 = vmatprep.subr.bf16.mxu0 %v12145_v11  ;;  %5965 = vmatprep.subr.bf16.mxu1 %v12147_v26  ;;  %v9129_v40 = vpack.c.bf16 %v5287_v45, %v5286_v28  ;;  %v5302_v33 = vmul.f32 %v5300_v29, %v11825_v20  ;;  %v12732_v20 = vld [vmem:[#allocation77_spill] sm:$0xff] }
 0x622   :  { %9130 = vst [vmem:[#allocation5 + $0x18] sm:$0xff] %v9129_v40   ;;  %v12168_v46 = vadd.f32 %v5302_v33, %v11904_v39  ;;  %v12734_v39 = vld [vmem:[#allocation79_spill] sm:$0xff]  ;;  %v12748_v40 = vld [vmem:[#allocation40_spill] sm:$0xff] }
 0x623   :  { %5923 = vmatpush1.bf16.msra.mxu0 %v12152_v9  ;;  %5966 = vmatpush1.bf16.msra.mxu1 %v12154_v55  ;;  %v5324_v33 = vunpack.c.l.bf16 %v12748_v40 }
 0x624   :  { %6297 = vmatprep.subr.bf16.mxu0 %v11910_v61  ;;  %6340 = vmatprep.subr.bf16.mxu1 %v11912_v38  ;;  %v5715_v43 = vpack.c.bf16 %v12168_v46, %v12165_v1  ;;  %v12735_v61 = vld [vmem:[#allocation80_spill] sm:$0xff]  ;;  %v12736_v38 = vld [vmem:[#allocation81_spill] sm:$0xff] }
 0x626   :  { %5941 = vmatmul.mubr.bf16.vlgmr.msra.gmra.mxu0 %v5715_v43  ;;  %5984 = vmatmul.mubr.bf16.vlgmr.msra.gmra.mxu1 %v5715_v43 }
 0x627   :  { %6298 = vmatpush1.bf16.msra.mxu0 %v11914_v63  ;;  %6341 = vmatpush1.bf16.msra.mxu1 %v11916_v31  ;;  %v12737_v63 = vld [vmem:[#allocation86_spill] sm:$0xff]  ;;  %v12738_v31 = vld [vmem:[#allocation87_spill] sm:$0xff] }
 0x628   :  { %6299 = vmatprep.subr.bf16.mxu0 %v11922_v24  ;;  %6342 = vmatprep.subr.bf16.mxu1 %v11924_v37  ;;  %v12739_v24 = vld [vmem:[#allocation88_spill] sm:$0xff]  ;;  %v12740_v37 = vld [vmem:[#allocation89_spill] sm:$0xff] }
 0x629   :  { %6329 = vmatprep.mubr.bf16.mxu0 %v12624_v18  ;;  %6372 = vmatprep.mubr.bf16.mxu1 %v12624_v18 }
 0x62b   :  { %6300 = vmatpush1.bf16.msra.mxu0 %v11926_v12  ;;  %6343 = vmatpush1.bf16.msra.mxu1 %v11928_v54  ;;  %v12741_v12 = vld [vmem:[#allocation29_spill] sm:$0xff]  ;;  %v12742_v54 = vld [vmem:[#allocation30_spill] sm:$0xff] }
 0x62c   :  { %6301 = vmatprep.subr.bf16.mxu0 %v11934_v34  ;;  %6344 = vmatprep.subr.bf16.mxu1 %v11936_v57  ;;  %v12743_v34 = vld [vmem:[#allocation31_spill] sm:$0xff]  ;;  %v12744_v57 = vld [vmem:[#allocation32_spill] sm:$0xff] }
 0x62f   :  { %6302 = vmatpush1.bf16.msra.mxu0 %v11938_v27  ;;  %6345 = vmatpush1.bf16.msra.mxu1 %v11940_v4  ;;  %v12745_v27 = vld [vmem:[#allocation37_spill] sm:$0xff] }
 0x630   :  { %6303 = vmatprep.subr.bf16.mxu0 %v11946_v0  ;;  %6346 = vmatprep.subr.bf16.mxu1 %v11948_v2  ;;  %v5318_v4 = vunpack.c.l.bf16 %v12745_v27  ;;  %v12746_v0 = vld [vmem:[#allocation38_spill] sm:$0xff] }
 0x631   :  { %v5320_v2 = vunpack.c.l.bf16 %v12746_v0 }
 0x633   :  { %6304 = vmatpush1.bf16.msra.mxu0 %v11950_v47  ;;  %6347 = vmatpush1.bf16.msra.mxu1 %v11952_v6 }
 0x634   :  { %6305 = vmatprep.subr.bf16.mxu0 %v11958_v62  ;;  %6348 = vmatprep.subr.bf16.mxu1 %v11960_v16 }
 0x637   :  { %6306 = vmatpush1.bf16.msra.mxu0 %v11962_v36  ;;  %6349 = vmatpush1.bf16.msra.mxu1 %v11964_v58  ;;  %v5319_v36 = vunpack.c.h.bf16 %v12745_v27 }
 0x638   :  { %6307 = vmatprep.subr.bf16.mxu0 %v11970_v41  ;;  %6350 = vmatprep.subr.bf16.mxu1 %v12732_v20 }
 0x63b   :  { %6308 = vmatpush1.bf16.msra.mxu0 %v12733_v17  ;;  %6351 = vmatpush1.bf16.msra.mxu1 %v12734_v39  ;;  %v5323_v39 = vunpack.c.h.bf16 %v12747_v23 }
 0x63c   :  { %6309 = vmatprep.subr.bf16.mxu0 %v12735_v61  ;;  %6352 = vmatprep.subr.bf16.mxu1 %v12736_v38 }
 0x63f   :  { %6310 = vmatpush1.bf16.msra.mxu0 %v12737_v63  ;;  %6353 = vmatpush1.bf16.msra.mxu1 %v12738_v31 }
 0x640   :  { %6311 = vmatprep.subr.bf16.mxu0 %v12739_v24  ;;  %6354 = vmatprep.subr.bf16.mxu1 %v12740_v37 }
 0x643   :  { %6312 = vmatpush1.bf16.msra.mxu0 %v12741_v12  ;;  %6355 = vmatpush1.bf16.msra.mxu1 %v12742_v54  ;;  %v5321_v12 = vunpack.c.h.bf16 %v12746_v0 }
 0x644   :  { %6686 = vmatprep.subr.bf16.mxu0 %v12743_v34  ;;  %6729 = vmatprep.subr.bf16.mxu1 %v12744_v57  ;;  %v5325_v57 = vunpack.c.h.bf16 %v12748_v40  ;;  %v12750_v40 = vld [vmem:[#allocation58_spill] sm:$0xff] }
 0x6c6   :  { %v5553_v47 = vpop.f32.mrf.mxu0  ;;  %v5596_v6 = vpop.f32.mrf.mxu1 }
 0x6c7   :  { %v5605_v62 = vadd.f32 %v5553_v47, %v5318_v4  ;;  %v5607_v16 = vadd.f32 %v5596_v6, %v5320_v2 }
 0x6c8   :  { %v5555_v58 = vpop.f32.mrf.mxu0  ;;  %v5598_v41 = vpop.f32.mrf.mxu1 }
 0x6c9   :  { %v8720_v45 = vmul.f32 -1.442695, %v5605_v62  ;;  %v8722_v29 = vmul.f32 -1.442695, %v5607_v16  ;;  %v5606_v7 = vadd.f32 %v5555_v58, %v5319_v36  ;;  %v5608_v54 = vadd.f32 %v5598_v41, %v5321_v12 }
 0x6ca   :  { %v5557_v28 = vpop.f32.mrf.mxu0  ;;  %v5600_v43 = vpop.f32.mrf.mxu1 }
 0x6cb   :  { %10174 = vpow2.f32 %v8720_v45  ;;  %v8721_v20 = vmul.f32 -1.442695, %v5606_v7  ;;  %v5609_v17 = vadd.f32 %v5557_v28, %v5322_v56  ;;  %v5611_v61 = vadd.f32 %v5600_v43, %v5324_v33  ;;  %v12749_v56 = vld [vmem:[#allocation57_spill] sm:$0xff] }
 0x6cc   :  { %10176 = vpow2.f32 %v8722_v29  ;;  %v5559_v38 = vpop.f32.mrf.mxu0  ;;  %v5602_v34 = vpop.f32.mrf.mxu1  ;;  %v8723_v4 = vmul.f32 -1.442695, %v5608_v54  ;;  %v5707_v28 = vunpack.c.l.bf16 %v12749_v56  ;;  %v5709_v33 = vunpack.c.l.bf16 %v12750_v40 }
 0x6cd   :  { %10178 = vpow2.f32 %v8721_v20  ;;  %v8724_v63 = vmul.f32 -1.442695, %v5609_v17  ;;  %v5610_v31 = vadd.f32 %v5559_v38, %v5323_v39  ;;  %v8726_v24 = vmul.f32 -1.442695, %v5611_v61 }
 0x6ce   :  { %v5612_v27 = vadd.f32 %v5602_v34, %v5325_v57  ;;  %v5708_v38 = vunpack.c.h.bf16 %v12749_v56 }
 0x6cf   :  { %10180 = vpow2.f32 %v8724_v63  ;;  %v8725_v37 = vmul.f32 -1.442695, %v5610_v31 }
 0x6d0   :  { %10182 = vpow2.f32 %v8726_v24  ;;  %v8727_v16 = vmul.f32 -1.442695, %v5612_v27 }
 0x6d1   :  { %10184 = vpow2.f32 %v8725_v37  ;;  %v12751_v37 = vld [vmem:[#allocation59_spill] sm:$0xff] }
 0x6d2   :  { %10186 = vpow2.f32 %v8723_v4  ;;  %v5711_v12 = vunpack.c.l.bf16 %v12751_v37  ;;  %v5712_v56 = vunpack.c.h.bf16 %v12751_v37 }
 0x6d8   :  { %v10175_v2 = vpop.eup %10174 }
 0x6d9   :  { %v10177_v47 = vpop.eup %10176  ;;  %v5637_v36 = vadd.f32 1.0, %v10175_v2 }
 0x6da   :  { %v10179_v6 = vpop.eup %10178  ;;  %v5639_v62 = vadd.f32 1.0, %v10177_v47 }
 0x6db   :  { %v5638_v58 = vadd.f32 1.0, %v10179_v6 }
 0x6dc   :  { %v10181_v45 = vpop.eup %10180  ;;  %10188 = vrcp.f32 %v5639_v62 }
 0x6dd   :  { %v10183_v29 = vpop.eup %10182  ;;  %10190 = vrcp.f32 %v5638_v58  ;;  %v5641_v23 = vadd.f32 1.0, %v10181_v45 }
 0x6de   :  { %v10185_v0 = vpop.eup %10184  ;;  %v5643_v7 = vadd.f32 1.0, %v10183_v29  ;;  %10192 = vpow2.f32 %v8727_v16  ;;  %v12752_v16 = vld [vmem:[#allocation60_spill] sm:$0xff] }
 0x6df   :  { %10194 = vrcp.f32 %v5637_v36  ;;  %v5642_v41 = vadd.f32 1.0, %v10185_v0  ;;  %v10187_v17 = vpop.eup %10186  ;;  %v5713_v36 = vunpack.c.l.bf16 %v12752_v16 }
 0x6e0   :  { %10196 = vrcp.f32 %v5643_v7  ;;  %v5640_v6 = vadd.f32 1.0, %v10187_v17 }
 0x6e1   :  { %10198 = vrcp.f32 %v5642_v41 }
 0x6e2   :  { %10200 = vrcp.f32 %v5641_v23 }
 0x6e6   :  { %v5942_v43 = vpop.f32.mrf.mxu0  ;;  %v5985_v20 = vpop.f32.mrf.mxu1 }
 0x6e7   :  { %v5994_v39 = vadd.f32 %v5942_v43, %v5707_v28  ;;  %v5996_v61 = vadd.f32 %v5985_v20, %v5709_v33 }
 0x6e8   :  { %v5944_v31 = vpop.f32.mrf.mxu0  ;;  %v5987_v24 = vpop.f32.mrf.mxu1 }
 0x6e9   :  { %v10189_v63 = vpop.eup %10188  ;;  %v8764_v57 = vmul.f32 -1.442695, %v5994_v39  ;;  %v8766_v27 = vmul.f32 -1.442695, %v5996_v61  ;;  %v5995_v4 = vadd.f32 %v5944_v31, %v5708_v38 }
 0x6ea   :  { %v10191_v54 = vpop.eup %10190  ;;  %v5661_v34 = vmul.f32 2.0, %v10189_v63  ;;  %v5946_v62 = vpop.f32.mrf.mxu0 }
 0x6eb   :  { %v10193_v2 = vpop.eup %10192  ;;  %v5665_v47 = vmul.f32 %v10191_v54, %v12033_v19  ;;  %v5989_v58 = vpop.f32.mrf.mxu1  ;;  %10202 = vpow2.f32 %v8764_v57  ;;  %v8765_v0 = vmul.f32 -1.442695, %v5995_v4  ;;  %v5998_v7 = vadd.f32 %v5946_v62, %v5711_v12  ;;  %v12753_v4 = vld [vmem:[#allocation27_spill] sm:$0xff] }
 0x6ec   :  { %v10195_v45 = vpop.eup %10194  ;;  %v8728_v29 = vadd.f32 -1.0, %v5661_v34  ;;  %10204 = vpow2.f32 %v8766_v27  ;;  %v6000_v23 = vadd.f32 %v5989_v58, %v5713_v36  ;;  %v5948_v28 = vpop.f32.mrf.mxu0  ;;  %v5644_v54 = vadd.f32 1.0, %v10193_v2 }
 0x6ed   :  { %v10197_v41 = vpop.eup %10196  ;;  %10206 = vpow2.f32 %v8765_v0  ;;  %v8768_v17 = vmul.f32 -1.442695, %v5998_v7  ;;  %v5999_v38 = vadd.f32 %v5948_v28, %v5712_v56  ;;  %v5710_v27 = vunpack.c.h.bf16 %v12750_v40  ;;  %v5991_v2 = vpop.f32.mrf.mxu1 }
 0x6ee   :  { %v10199_v33 = vpop.eup %10198  ;;  %v5667_v43 = vmul.f32 %v10195_v45, %v8728_v29  ;;  %v5662_v20 = vmul.f32 2.0, %v10197_v41  ;;  %10208 = vrcp.f32 %v5640_v6  ;;  %v8770_v61 = vmul.f32 -1.442695, %v6000_v23  ;;  %v12754_v45 = vld [vmem:[#allocation69_spill] sm:$0xff] }
 0x6ef   :  { %v5666_v39 = vmul.f32 %v10199_v33, %v12038_v60  ;;  %10210 = vpow2.f32 %v8768_v17  ;;  %v10201_v12 = vpop.eup %10200  ;;  %v8769_v34 = vmul.f32 -1.442695, %v5999_v38  ;;  %v5997_v36 = vadd.f32 %v5987_v24, %v5710_v27 }
 0x6f0   :  { %v5669_v63 = vadd.f32 %v5667_v43, %v5665_v47  ;;  %v8729_v31 = vadd.f32 -1.0, %v5662_v20  ;;  %10212 = vpow2.f32 %v8770_v61  ;;  %v5714_v7 = vunpack.c.h.bf16 %v12752_v16 }
 0x6f1   :  { %v8767_v0 = vmul.f32 -1.442695, %v5997_v36 }
 0x6f2   :  { %10214 = vtanh.f32 %v5669_v63  ;;  %v5694_v37 = vsub.f32 %v5669_v63, %v12033_v19  ;;  %v5668_v57 = vmul.f32 %v10201_v12, %v8729_v31  ;;  %v6001_v23 = vadd.f32 %v5991_v2, %v5714_v7 }
 0x6f3   :  { %10216 = vpow2.f32 %v8769_v34 }
 0x6f4   :  { %v5696_v6 = vmul.f32 %v5694_v37, %v12753_v4  ;;  %v5670_v62 = vadd.f32 %v5668_v57, %v5666_v39  ;;  %10218 = vrcp.f32 %v5644_v54  ;;  %v8771_v39 = vmul.f32 -1.442695, %v6001_v23 }
 0x6f6   :  { %10220 = vtanh.f32 %v5670_v62  ;;  %v5695_v47 = vsub.f32 %v5670_v62, %v12038_v60  ;;  %v12229_v58 = vadd.f32 %v5696_v6, %v12033_v19 }
 0x6f7   :  { %10222 = vpow2.f32 %v8767_v0 }
 0x6f8   :  { %v5697_v29 = vmul.f32 %v5695_v47, %v12754_v45  ;;  %v10203_v41 = vpop.eup %10202 }
 0x6f9   :  { %v10205_v40 = vpop.eup %10204  ;;  %v6026_v43 = vadd.f32 1.0, %v10203_v41 }
 0x6fa   :  { %v12234_v56 = vadd.f32 %v5697_v29, %v12038_v60  ;;  %v10207_v24 = vpop.eup %10206  ;;  %v6028_v28 = vadd.f32 1.0, %v10205_v40 }
 0x6fb   :  { %v10209_v33 = vpop.eup %10208  ;;  %v6027_v20 = vadd.f32 1.0, %v10207_v24 }
 0x6fc   :  { %v10211_v19 = vpop.eup %10210  ;;  %10224 = vrcp.f32 %v6028_v28 }
 0x6fd   :  { %v10213_v17 = vpop.eup %10212  ;;  %10226 = vrcp.f32 %v6027_v20  ;;  %v6030_v31 = vadd.f32 1.0, %v10211_v19 }
 0x6fe   :  { %v6032_v38 = vadd.f32 1.0, %v10213_v17  ;;  %10228 = vrcp.f32 %v6026_v43 }
 0x6ff   :  { %v10215_v61 = vpop.eup %10214 }
 0x700   :  { %v10217_v16 = vpop.eup %10216  ;;  %v5673_v63 = vmul.f32 %v10215_v61, %v10209_v33  ;;  %10230 = vrcp.f32 %v6032_v38 }
 0x701   :  { %v6031_v60 = vadd.f32 1.0, %v10217_v16  ;;  %v10219_v12 = vpop.eup %10218  ;;  %10232 = vpow2.f32 %v8771_v39 }
 0x702   :  { %v5688_v54 = vsub.f32 %v5673_v63, %v12047_v14  ;;  %v5675_v57 = vmul.f32 %v5673_v63, %v12753_v4 }
 0x703   :  { %v10221_v34 = vpop.eup %10220  ;;  %10234 = vrcp.f32 %v6031_v60 }
 0x704   :  { %v5674_v37 = vmul.f32 %v10221_v34, %v10219_v12  ;;  %10236 = vrcp.f32 %v6030_v31  ;;  %v5690_v62 = vmul.f32 %v5688_v54, %v12753_v4  ;;  %v10223_v2 = vpop.eup %10222  ;;  %v12763_v12 = vld [vmem:[#allocation71_spill] sm:$0xff] }
 0x706   :  { %v5676_v27 = vmul.f32 %v5674_v37, %v12754_v45  ;;  %v5689_v6 = vsub.f32 %v5674_v37, %v12050_v51  ;;  %v12243_v0 = vadd.f32 %v5690_v62, %v12047_v14  ;;  %v12764_v37 = vld [vmem:[#allocation72_spill] sm:$0xff] }
 0x708   :  { %v9134_v36 = vpack.c.bf16 %v5676_v27, %v5675_v57  ;;  %v5691_v47 = vmul.f32 %v5689_v6, %v12754_v45  ;;  %v6029_v45 = vadd.f32 1.0, %v10223_v2  ;;  %v9689_v2 = vld [vmem:[#allocation12 + $0xe8] ss:$16 sps:$4 sm:$0xff]  }
 0x709   :  { %v10225_v29 = vpop.eup %10224 }
 0x70a   :  { %9135 = vst [vmem:[#allocation4 + $0x28] sm:$0xff] %v9134_v36   ;;  %v12246_v7 = vadd.f32 %v5691_v47, %v12050_v51  ;;  %v10227_v41 = vpop.eup %10226  ;;  %v6050_v40 = vmul.f32 2.0, %v10225_v29  ;;  %10238 = vrcp.f32 %v6029_v45  ;;  %v9695_v29 = vld [vmem:[#allocation12 + $0xc8] ss:$16 sps:$4 sm:$0xff]  }
 0x70b   :  { %v6054_v23 = vmul.f32 %v10227_v41, %v12100_v49  ;;  %v10229_v4 = vpop.eup %10228  ;;  %v9700_v41 = vld [vmem:[#allocation12 + $0xa4] ss:$16 sps:$4 sm:$0xff]   ;;  %v9707_v45 = vld [vmem:[#allocation12 + $0x88] ss:$16 sps:$4 sm:$0xff]  }
 0x70c   :  { %v6104_v24 = vpack.c.bf16 %v12246_v7, %v12243_v0  ;;  %v8772_v28 = vadd.f32 -1.0, %v6050_v40  ;;  %v9703_v40 = vld [vmem:[#allocation12 + $0xac] ss:$16 sps:$4 sm:$0xff]  }
 0x70d   :  { %v10231_v33 = vpop.eup %10230 }
 0x70e   :  { %6330 = vmatmul.mubr.bf16.vlgmr.msra.gmra.mxu0 %v6104_v24  ;;  %6373 = vmatmul.mubr.bf16.vlgmr.msra.gmra.mxu1 %v6104_v24  ;;  %v10233_v43 = vpop.eup %10232  ;;  %v6056_v20 = vmul.f32 %v10229_v4, %v8772_v28  ;;  %v6051_v14 = vmul.f32 2.0, %v10231_v33  ;;  %v9701_v24 = vld [vmem:[#allocation12 + $0xa8] ss:$16 sps:$4 sm:$0xff]   ;;  %v9706_v4 = vld [vmem:[#allocation12 + $0x84] ss:$16 sps:$4 sm:$0xff]  }
 0x70f   :  { %6687 = vmatpush1.bf16.msra.mxu0 %v12052_v15  ;;  %6730 = vmatpush1.bf16.msra.mxu1 %v12054_v13  ;;  %v6033_v38 = vadd.f32 1.0, %v10233_v43  ;;  %v9709_v28 = vld [vmem:[#allocation12 + $0x8c] ss:$16 sps:$4 sm:$0xff]   ;;  %v9704_v33 = vld [vmem:[#allocation12 + $0x80] ss:$16 sps:$4 sm:$0xff]  }
 0x710   :  { %v10235_v51 = vpop.eup %10234  ;;  %6688 = vmatprep.subr.bf16.mxu0 %v12059_v5  ;;  %6731 = vmatprep.subr.bf16.mxu1 %v12061_v48  ;;  %v6058_v19 = vadd.f32 %v6056_v20, %v6054_v23  ;;  %v8773_v17 = vadd.f32 -1.0, %v6051_v14  ;;  %v12755_v5 = vld [vmem:[#allocation25_spill] sm:$0xff]  ;;  %v9715_v20 = vld [vmem:[#allocation12 + $0x6c] ss:$16 sps:$4 sm:$0xff]  }
 0x711   :  { %v6055_v39 = vmul.f32 %v10235_v51, %v12116_v59  ;;  %6718 = vmatprep.mubr.bf16.mxu0 %v12624_v18  ;;  %6761 = vmatprep.mubr.bf16.mxu1 %v12624_v18  ;;  %v10237_v61 = vpop.eup %10236  ;;  %v9698_v23 = vld [vmem:[#allocation12 + $0xa0] ss:$16 sps:$4 sm:$0xff]   ;;  %v9712_v43 = vld [vmem:[#allocation12 + $0x64] ss:$16 sps:$4 sm:$0xff]   ;;  %v9713_v51 = vld [vmem:[#allocation12 + $0x68] ss:$16 sps:$4 sm:$0xff]  }
 0x712   :  { %10240 = vtanh.f32 %v6058_v19  ;;  %v6083_v15 = vsub.f32 %v6058_v19, %v12100_v49  ;;  %v6057_v13 = vmul.f32 %v10237_v61, %v8773_v17  ;;  %v9710_v14 = vld [vmem:[#allocation12 + $0x60] ss:$16 sps:$4 sm:$0xff]   ;;  %v9718_v19 = vld [vmem:[#allocation12 + $0x44] ss:$16 sps:$4 sm:$0xff]   ;;  %v9721_v17 = vld [vmem:[#allocation12 + $0x4c] ss:$16 sps:$4 sm:$0xff]  }
 0x713   :  { %6689 = vmatpush1.bf16.msra.mxu0 %v12065_v25  ;;  %6732 = vmatpush1.bf16.msra.mxu1 %v12067_v52  ;;  %10242 = vrcp.f32 %v6033_v38  ;;  %v12756_v25 = vld [vmem:[#allocation26_spill] sm:$0xff]  ;;  %v9724_v38 = vld [vmem:[#allocation12 + $0x24] ss:$16 sps:$4 sm:$0xff]  }
 0x714   :  { %6690 = vmatprep.subr.bf16.mxu0 %v12071_v53  ;;  %6733 = vmatprep.subr.bf16.mxu1 %v12073_v21  ;;  %v6085_v48 = vmul.f32 %v6083_v15, %v12755_v5  ;;  %v6059_v16 = vadd.f32 %v6057_v13, %v6055_v39  ;;  %v9716_v39 = vld [vmem:[#allocation12 + $0x40] ss:$16 sps:$4 sm:$0xff]   ;;  %v9719_v61 = vld [vmem:[#allocation12 + $0x48] ss:$16 sps:$4 sm:$0xff]   ;;  %v9727_v15 = vld [vmem:[#allocation12 + $0x2c] ss:$16 sps:$4 sm:$0xff]  }
 0x715   :  { %v9722_v13 = vld [vmem:[#allocation12 + $0x20] ss:$16 sps:$4 sm:$0xff]  }
 0x716   :  { %10244 = vtanh.f32 %v6059_v16  ;;  %v6084_v63 = vsub.f32 %v6059_v16, %v12116_v59  ;;  %v12268_v31 = vadd.f32 %v6085_v48, %v12100_v49  ;;  %v9730_v48 = vld [vmem:[#allocation12 + $0x4] ss:$16 sps:$4 sm:$0xff]   ;;  %v9733_v16 = vld [vmem:[#allocation12 + $0xc] ss:$16 sps:$4 sm:$0xff]  }
 0x717   :  { %6691 = vmatpush1.bf16.msra.mxu0 %v12081_v22  ;;  %6734 = vmatpush1.bf16.msra.mxu1 %v12083_v10  ;;  %v10239_v21 = vpop.eup %10238  ;;  %v12757_v22 = vld [vmem:[#allocation65_spill] sm:$0xff] }
 0x718   :  { %6692 = vmatprep.subr.bf16.mxu0 %v12087_v3  ;;  %6735 = vmatprep.subr.bf16.mxu1 %v12089_v35  ;;  %v6086_v52 = vmul.f32 %v6084_v63, %v12756_v25  ;;  %v12758_v3 = vld [vmem:[#allocation66_spill] sm:$0xff]  ;;  %v12759_v35 = vld [vmem:[#allocation67_spill] sm:$0xff] }
 0x719   :  { %v9728_v63 = vld [vmem:[#allocation12] ss:$16 sps:$4 sm:$0xff]  }
 0x71a   :  { %v12276_v53 = vadd.f32 %v6086_v52, %v12116_v59  ;;  %v12761_v59 = vld [vmem:[#allocation28_spill] sm:$0xff]  ;;  %v9736_v52 = vld [vmem:[#allocation13 + $0xe4] ss:$16 sps:$4 sm:$0xff]  }
 0x71b   :  { %6693 = vmatpush1.bf16.msra.mxu0 %v12095_v8  ;;  %6736 = vmatpush1.bf16.msra.mxu1 %v12097_v50  ;;  %v12760_v50 = vld [vmem:[#allocation68_spill] sm:$0xff] }
 0x71c   :  { %6694 = vmatprep.subr.bf16.mxu0 %v12104_v30  ;;  %6737 = vmatprep.subr.bf16.mxu1 %v12106_v44  ;;  %v12762_v44 = vld [vmem:[#allocation70_spill] sm:$0xff] }
 0x71f   :  { %6695 = vmatpush1.bf16.msra.mxu0 %v12111_v32  ;;  %6738 = vmatpush1.bf16.msra.mxu1 %v12757_v22  ;;  %v10241_v10 = vpop.eup %10240  ;;  %v12765_v22 = vld [vmem:[#allocation41_spill] sm:$0xff] }
 0x720   :  { %6696 = vmatprep.subr.bf16.mxu0 %v12758_v3  ;;  %6739 = vmatprep.subr.bf16.mxu1 %v12759_v35  ;;  %v6062_v8 = vmul.f32 %v10241_v10, %v10239_v21  ;;  %v10243_v49 = vpop.eup %10242  ;;  %v9739_v21 = vld [vmem:[#allocation13 + $0xec] ss:$16 sps:$4 sm:$0xff]   ;;  %v6096_v10 = vunpack.c.l.bf16 %v12765_v22 }
 0x721   :  { %v12766_v3 = vld [vmem:[#allocation42_spill] sm:$0xff] }
 0x722   :  { %v6077_v30 = vsub.f32 %v6062_v8, %v12165_v1  ;;  %v6064_v54 = vmul.f32 %v6062_v8, %v12755_v5  ;;  %v6098_v35 = vunpack.c.l.bf16 %v12766_v3 }
 0x723   :  { %6697 = vmatpush1.bf16.msra.mxu0 %v12760_v50  ;;  %6740 = vmatpush1.bf16.msra.mxu1 %v12761_v59  ;;  %v10245_v60 = vpop.eup %10244 }
 0x724   :  { %6698 = vmatprep.subr.bf16.mxu0 %v12762_v44  ;;  %6741 = vmatprep.subr.bf16.mxu1 %v12763_v12  ;;  %v6063_v32 = vmul.f32 %v10245_v60, %v10243_v49  ;;  %v6079_v27 = vmul.f32 %v6077_v30, %v12755_v5  ;;  %v9725_v5 = vld [vmem:[#allocation12 + $0x28] ss:$16 sps:$4 sm:$0xff]   ;;  %v6097_v30 = vunpack.c.h.bf16 %v12765_v22 }
 0x726   :  { %v6065_v34 = vmul.f32 %v6063_v32, %v12756_v25  ;;  %v6078_v57 = vsub.f32 %v6063_v32, %v12168_v46 }
 0x727   :  { %6699 = vmatpush1.bf16.msra.mxu0 %v12138_v42  ;;  %6742 = vmatpush1.bf16.msra.mxu1 %v12764_v37  ;;  %v12301_v42 = vadd.f32 %v6079_v27, %v12165_v1  ;;  %v9692_v1 = vld [vmem:[#allocation12 + $0xc0] ss:$16 sps:$4 sm:$0xff]   ;;  %v12768_v27 = vld [vmem:[#allocation44_spill] sm:$0xff] }
 0x728   :  { %6700 = vmatprep.subr.bf16.mxu0 %v12145_v11  ;;  %6743 = vmatprep.subr.bf16.mxu1 %v12147_v26  ;;  %v9139_v6 = vpack.c.bf16 %v6065_v34, %v6064_v54  ;;  %v6080_v62 = vmul.f32 %v6078_v57, %v12756_v25  ;;  %v9688_v26 = vld [vmem:[#allocation12 + $0xe4] ss:$16 sps:$4 sm:$0xff]   ;;  %v9691_v11 = vld [vmem:[#allocation12 + $0xec] ss:$16 sps:$4 sm:$0xff]   ;;  %v9731_v25 = vld [vmem:[#allocation12 + $0x8] ss:$16 sps:$4 sm:$0xff]  }
 0x729   :  { %v12767_v34 = vld [vmem:[#allocation43_spill] sm:$0xff] }
 0x72a   :  { %9140 = vst [vmem:[#allocation5 + $0x10] sm:$0xff] %v9139_v6   ;;  %v12304_v36 = vadd.f32 %v6080_v62, %v12168_v46  ;;  %v9697_v46 = vld [vmem:[#allocation12 + $0xcc] ss:$16 sps:$4 sm:$0xff]   ;;  %v6100_v37 = vunpack.c.l.bf16 %v12767_v34  ;;  %v6102_v6 = vunpack.c.l.bf16 %v12768_v27 }
 0x72b   :  { %6701 = vmatpush1.bf16.msra.mxu0 %v12152_v9  ;;  %6744 = vmatpush1.bf16.msra.mxu1 %v12154_v55  ;;  %v9686_v9 = vld [vmem:[#allocation12 + $0xe0] ss:$16 sps:$4 sm:$0xff]   ;;  %v9694_v55 = vld [vmem:[#allocation12 + $0xc4] ss:$16 sps:$4 sm:$0xff]  }
 0x72c   :  { %v6493_v47 = vpack.c.bf16 %v12304_v36, %v12301_v42  ;;  %7075 = vmatprep.subr.bf16.mxu0 %v9688_v26  ;;  %7118 = vmatprep.subr.bf16.mxu1 %v9691_v11  ;;  %v6101_v11 = vunpack.c.h.bf16 %v12767_v34 }
 0x72e   :  { %6719 = vmatmul.mubr.bf16.vlgmr.msra.gmra.mxu0 %v6493_v47  ;;  %6762 = vmatmul.mubr.bf16.vlgmr.msra.gmra.mxu1 %v6493_v47 }
 0x72f   :  { %7107 = vmatprep.mubr.bf16.mxu0 %v12624_v18  ;;  %7150 = vmatprep.mubr.bf16.mxu1 %v12624_v18 }
 0x730   :  { %7076 = vmatpush1.bf16.msra.mxu0 %v9686_v9  ;;  %7119 = vmatpush1.bf16.msra.mxu1 %v9689_v2 }
 0x731   :  { %7077 = vmatprep.subr.bf16.mxu0 %v9694_v55  ;;  %7120 = vmatprep.subr.bf16.mxu1 %v9697_v46 }
 0x734   :  { %7078 = vmatpush1.bf16.msra.mxu0 %v9692_v1  ;;  %7121 = vmatpush1.bf16.msra.mxu1 %v9695_v29 }
 0x735   :  { %7079 = vmatprep.subr.bf16.mxu0 %v9700_v41  ;;  %7122 = vmatprep.subr.bf16.mxu1 %v9703_v40  ;;  %v6099_v41 = vunpack.c.h.bf16 %v12766_v3 }
 0x738   :  { %7080 = vmatpush1.bf16.msra.mxu0 %v9698_v23  ;;  %7123 = vmatpush1.bf16.msra.mxu1 %v9701_v24  ;;  %v6103_v24 = vunpack.c.h.bf16 %v12768_v27  ;;  %v12772_v27 = vld [vmem:[#allocation56_spill] sm:$0xff] }
 0x739   :  { %7081 = vmatprep.subr.bf16.mxu0 %v9706_v4  ;;  %7124 = vmatprep.subr.bf16.mxu1 %v9709_v28 }
 0x73c   :  { %7082 = vmatpush1.bf16.msra.mxu0 %v9704_v33  ;;  %7125 = vmatpush1.bf16.msra.mxu1 %v9707_v45 }
 0x73d   :  { %7083 = vmatprep.subr.bf16.mxu0 %v9712_v43  ;;  %7126 = vmatprep.subr.bf16.mxu1 %v9715_v20 }
 0x740   :  { %7084 = vmatpush1.bf16.msra.mxu0 %v9710_v14  ;;  %7127 = vmatpush1.bf16.msra.mxu1 %v9713_v51 }
 0x741   :  { %7085 = vmatprep.subr.bf16.mxu0 %v9718_v19  ;;  %7128 = vmatprep.subr.bf16.mxu1 %v9721_v17 }
 0x744   :  { %7086 = vmatpush1.bf16.msra.mxu0 %v9716_v39  ;;  %7129 = vmatpush1.bf16.msra.mxu1 %v9719_v61 }
 0x745   :  { %7087 = vmatprep.subr.bf16.mxu0 %v9724_v38  ;;  %7130 = vmatprep.subr.bf16.mxu1 %v9727_v15 }
 0x748   :  { %7088 = vmatpush1.bf16.msra.mxu0 %v9722_v13  ;;  %7131 = vmatpush1.bf16.msra.mxu1 %v9725_v5  ;;  %v12769_v5 = vld [vmem:[#allocation53_spill] sm:$0xff] }
 0x749   :  { %7089 = vmatprep.subr.bf16.mxu0 %v9730_v48  ;;  %7132 = vmatprep.subr.bf16.mxu1 %v9733_v16  ;;  %v6485_v48 = vunpack.c.l.bf16 %v12769_v5  ;;  %v12770_v16 = vld [vmem:[#allocation54_spill] sm:$0xff]  ;;  %v6486_v3 = vunpack.c.h.bf16 %v12769_v5 }
 0x74c   :  { %7090 = vmatpush1.bf16.msra.mxu0 %v9728_v63  ;;  %7133 = vmatpush1.bf16.msra.mxu1 %v9731_v25  ;;  %v6487_v63 = vunpack.c.l.bf16 %v12770_v16 }
 0x74d   :  { %7451 = vmatprep.subr.bf16.mxu0 %v9736_v52  ;;  %7494 = vmatprep.subr.bf16.mxu1 %v9739_v21 }
 0x7ce   :  { %v6331_v8 = vpop.f32.mrf.mxu0  ;;  %v6374_v49 = vpop.f32.mrf.mxu1 }
 0x7cf   :  { %v6383_v50 = vadd.f32 %v6331_v8, %v6096_v10  ;;  %v6385_v59 = vadd.f32 %v6374_v49, %v6098_v35 }
 0x7d0   :  { %v6333_v60 = vpop.f32.mrf.mxu0  ;;  %v6376_v44 = vpop.f32.mrf.mxu1 }
 0x7d1   :  { %v8808_v12 = vmul.f32 -1.442695, %v6383_v50  ;;  %v8810_v32 = vmul.f32 -1.442695, %v6385_v59  ;;  %v6384_v54 = vadd.f32 %v6333_v60, %v6097_v30  ;;  %v6386_v40 = vadd.f32 %v6376_v44, %v6099_v41  ;;  %v12771_v50 = vld [vmem:[#allocation55_spill] sm:$0xff] }
 0x7d2   :  { %v6335_v57 = vpop.f32.mrf.mxu0  ;;  %v6378_v62 = vpop.f32.mrf.mxu1  ;;  %v6489_v59 = vunpack.c.l.bf16 %v12771_v50 }
 0x7d3   :  { %10246 = vpow2.f32 %v8808_v12  ;;  %v8809_v47 = vmul.f32 -1.442695, %v6384_v54  ;;  %v6387_v26 = vadd.f32 %v6335_v57, %v6100_v37  ;;  %v6389_v9 = vadd.f32 %v6378_v62, %v6102_v6 }
 0x7d4   :  { %10248 = vpow2.f32 %v8810_v32  ;;  %v6337_v2 = vpop.f32.mrf.mxu0  ;;  %v6380_v23 = vpop.f32.mrf.mxu1  ;;  %v8811_v28 = vmul.f32 -1.442695, %v6386_v40  ;;  %v6491_v6 = vunpack.c.l.bf16 %v12772_v27 }
 0x7d5   :  { %10250 = vpow2.f32 %v8809_v47  ;;  %v8812_v55 = vmul.f32 -1.442695, %v6387_v26  ;;  %v6388_v46 = vadd.f32 %v6337_v2, %v6101_v11  ;;  %v8814_v1 = vmul.f32 -1.442695, %v6389_v9 }
 0x7d6   :  { %v6390_v4 = vadd.f32 %v6380_v23, %v6103_v24 }
 0x7d7   :  { %10252 = vpow2.f32 %v8812_v55  ;;  %v8813_v29 = vmul.f32 -1.442695, %v6388_v46  ;;  %v6490_v46 = vunpack.c.h.bf16 %v12771_v50 }
 0x7d8   :  { %10254 = vpow2.f32 %v8814_v1  ;;  %v8815_v14 = vmul.f32 -1.442695, %v6390_v4 }
 0x7d9   :  { %10256 = vpow2.f32 %v8813_v29 }
 0x7da   :  { %10258 = vpow2.f32 %v8811_v28 }
 0x7e0   :  { %v10247_v33 = vpop.eup %10246 }
 0x7e1   :  { %v10249_v45 = vpop.eup %10248  ;;  %v6415_v51 = vadd.f32 1.0, %v10247_v33 }
 0x7e2   :  { %v10251_v43 = vpop.eup %10250  ;;  %v6417_v20 = vadd.f32 1.0, %v10249_v45 }
 0x7e3   :  { %v6416_v19 = vadd.f32 1.0, %v10251_v43 }
 0x7e4   :  { %v10253_v17 = vpop.eup %10252  ;;  %10260 = vrcp.f32 %v6417_v20 }
 0x7e5   :  { %v10255_v39 = vpop.eup %10254  ;;  %10262 = vrcp.f32 %v6416_v19  ;;  %v6419_v13 = vadd.f32 1.0, %v10253_v17  ;;  %v6488_v17 = vunpack.c.h.bf16 %v12770_v16 }
 0x7e6   :  { %v10257_v61 = vpop.eup %10256  ;;  %v6421_v38 = vadd.f32 1.0, %v10255_v39  ;;  %10264 = vpow2.f32 %v8815_v14 }
 0x7e7   :  { %10266 = vrcp.f32 %v6415_v51  ;;  %v6420_v15 = vadd.f32 1.0, %v10257_v61  ;;  %v10259_v21 = vpop.eup %10258 }
 0x7e8   :  { %10268 = vrcp.f32 %v6421_v38  ;;  %v6418_v37 = vadd.f32 1.0, %v10259_v21  ;;  %v12773_v38 = vld [vmem:[#allocation84_spill] sm:$0xff] }
 0x7e9   :  { %10270 = vrcp.f32 %v6420_v15 }
 0x7ea   :  { %10272 = vrcp.f32 %v6419_v13 }
 0x7ee   :  { %v6720_v25 = vpop.f32.mrf.mxu0  ;;  %v6763_v52 = vpop.f32.mrf.mxu1 }
 0x7ef   :  { %v6772_v22 = vadd.f32 %v6720_v25, %v6485_v48  ;;  %v6774_v10 = vadd.f32 %v6763_v52, %v6487_v63  ;;  %v6492_v25 = vunpack.c.h.bf16 %v12772_v27  ;;  %v12774_v52 = vld [vmem:[#allocation85_spill] sm:$0xff] }
 0x7f0   :  { %v6722_v8 = vpop.f32.mrf.mxu0  ;;  %v6765_v49 = vpop.f32.mrf.mxu1 }
 0x7f1   :  { %v10261_v35 = vpop.eup %10260  ;;  %v8852_v44 = vmul.f32 -1.442695, %v6772_v22  ;;  %v8854_v12 = vmul.f32 -1.442695, %v6774_v10  ;;  %v6773_v32 = vadd.f32 %v6722_v8, %v6486_v3  ;;  %v6775_v61 = vadd.f32 %v6765_v49, %v6488_v17 }
 0x7f2   :  { %v10263_v30 = vpop.eup %10262  ;;  %v6439_v60 = vmul.f32 2.0, %v10261_v35  ;;  %v6724_v57 = vpop.f32.mrf.mxu0 }
 0x7f3   :  { %v10265_v54 = vpop.eup %10264  ;;  %v6443_v34 = vmul.f32 %v10263_v30, %v12229_v58  ;;  %v6767_v62 = vpop.f32.mrf.mxu1  ;;  %10274 = vpow2.f32 %v8852_v44  ;;  %v8853_v11 = vmul.f32 -1.442695, %v6773_v32  ;;  %v6776_v9 = vadd.f32 %v6724_v57, %v6489_v59 }
 0x7f4   :  { %v10267_v47 = vpop.eup %10266  ;;  %v8816_v26 = vadd.f32 -1.0, %v6439_v60  ;;  %10276 = vpow2.f32 %v8854_v12  ;;  %v6778_v55 = vadd.f32 %v6767_v62, %v6491_v6  ;;  %v6726_v1 = vpop.f32.mrf.mxu0  ;;  %v6422_v20 = vadd.f32 1.0, %v10265_v54 }
 0x7f5   :  { %v10269_v2 = vpop.eup %10268  ;;  %10278 = vpow2.f32 %v8853_v11  ;;  %v8856_v23 = vmul.f32 -1.442695, %v6776_v9  ;;  %v6777_v28 = vadd.f32 %v6726_v1, %v6490_v46  ;;  %v6769_v48 = vpop.f32.mrf.mxu1  ;;  %v8855_v63 = vmul.f32 -1.442695, %v6775_v61 }
 0x7f6   :  { %v10271_v29 = vpop.eup %10270  ;;  %v6445_v41 = vmul.f32 %v10267_v47, %v8816_v26  ;;  %v6440_v40 = vmul.f32 2.0, %v10269_v2  ;;  %10280 = vrcp.f32 %v6418_v37  ;;  %v8858_v4 = vmul.f32 -1.442695, %v6778_v55 }
 0x7f7   :  { %v6444_v24 = vmul.f32 %v10271_v29, %v12234_v56  ;;  %10282 = vpow2.f32 %v8856_v23  ;;  %v10273_v43 = vpop.eup %10272  ;;  %v8857_v14 = vmul.f32 -1.442695, %v6777_v28  ;;  %v6779_v10 = vadd.f32 %v6769_v48, %v6492_v25  ;;  %v9734_v23 = vld [vmem:[#allocation13 + $0xe0] ss:$16 sps:$4 sm:$0xff]  }
 0x7f8   :  { %v6447_v33 = vadd.f32 %v6445_v41, %v6443_v34  ;;  %v8817_v45 = vadd.f32 -1.0, %v6440_v40  ;;  %10284 = vpow2.f32 %v8858_v4 }
 0x7f9   :  { %v8859_v60 = vmul.f32 -1.442695, %v6779_v10  ;;  %v9749_v10 = vld [vmem:[#allocation13 + $0xa8] ss:$16 sps:$4 sm:$0xff]  }
 0x7fa   :  { %10286 = vtanh.f32 %v6447_v33  ;;  %v6472_v51 = vsub.f32 %v6447_v33, %v12229_v58  ;;  %v6446_v19 = vmul.f32 %v10273_v43, %v8817_v45  ;;  %v9742_v33 = vld [vmem:[#allocation13 + $0xc4] ss:$16 sps:$4 sm:$0xff]   ;;  %v9745_v45 = vld [vmem:[#allocation13 + $0xcc] ss:$16 sps:$4 sm:$0xff]  }
 0x7fb   :  { %10288 = vpow2.f32 %v8857_v14 }
 0x7fc   :  { %v6448_v39 = vadd.f32 %v6446_v19, %v6444_v24  ;;  %v6474_v15 = vmul.f32 %v6472_v51, %v12773_v38  ;;  %10290 = vrcp.f32 %v6422_v20  ;;  %v9737_v24 = vld [vmem:[#allocation13 + $0xe8] ss:$16 sps:$4 sm:$0xff]  }
 0x7fe   :  { %10292 = vtanh.f32 %v6448_v39  ;;  %v6473_v13 = vsub.f32 %v6448_v39, %v12234_v56  ;;  %v12331_v5 = vadd.f32 %v6474_v15, %v12229_v58  ;;  %v9743_v39 = vld [vmem:[#allocation13 + $0xc8] ss:$16 sps:$4 sm:$0xff]   ;;  %v9751_v15 = vld [vmem:[#allocation13 + $0xac] ss:$16 sps:$4 sm:$0xff]  }
 0x7ff   :  { %10294 = vpow2.f32 %v8855_v63 }
 0x800   :  { %v6475_v21 = vmul.f32 %v6473_v13, %v12774_v52  ;;  %v10275_v22 = vpop.eup %10274 }
 0x801   :  { %v10277_v16 = vpop.eup %10276  ;;  %v6804_v50 = vadd.f32 1.0, %v10275_v22 }
 0x802   :  { %v12336_v3 = vadd.f32 %v6475_v21, %v12234_v56  ;;  %v10279_v35 = vpop.eup %10278  ;;  %v6806_v8 = vadd.f32 1.0, %v10277_v16  ;;  %v9746_v16 = vld [vmem:[#allocation13 + $0xa0] ss:$16 sps:$4 sm:$0xff]  }
 0x803   :  { %v10281_v49 = vpop.eup %10280  ;;  %v6805_v59 = vadd.f32 1.0, %v10279_v35  ;;  %v9754_v35 = vld [vmem:[#allocation13 + $0x84] ss:$16 sps:$4 sm:$0xff]  }
 0x804   :  { %v10283_v58 = vpop.eup %10282  ;;  %10296 = vrcp.f32 %v6806_v8  ;;  %v9757_v8 = vld [vmem:[#allocation13 + $0x8c] ss:$16 sps:$4 sm:$0xff]  }
 0x805   :  { %v10285_v30 = vpop.eup %10284  ;;  %10298 = vrcp.f32 %v6805_v59  ;;  %v6808_v34 = vadd.f32 1.0, %v10283_v58  ;;  %v9752_v58 = vld [vmem:[#allocation13 + $0x80] ss:$16 sps:$4 sm:$0xff]  }
 0x806   :  { %v6810_v12 = vadd.f32 1.0, %v10285_v30  ;;  %10300 = vrcp.f32 %v6804_v50  ;;  %v12775_v50 = vld [vmem:[#allocation82_spill] sm:$0xff] }
 0x807   :  { %v10287_v44 = vpop.eup %10286  ;;  %v9755_v30 = vld [vmem:[#allocation13 + $0x88] ss:$16 sps:$4 sm:$0xff]  }
 0x808   :  { %v10289_v32 = vpop.eup %10288  ;;  %v6451_v54 = vmul.f32 %v10287_v44, %v10281_v49  ;;  %10302 = vrcp.f32 %v6810_v12  ;;  %v9760_v44 = vld [vmem:[#allocation13 + $0x64] ss:$16 sps:$4 sm:$0xff]   ;;  %v9763_v12 = vld [vmem:[#allocation13 + $0x6c] ss:$16 sps:$4 sm:$0xff]  }
 0x809   :  { %v6809_v56 = vadd.f32 1.0, %v10289_v32  ;;  %v10291_v37 = vpop.eup %10290  ;;  %10304 = vpow2.f32 %v8859_v60  ;;  %v12776_v32 = vld [vmem:[#allocation83_spill] sm:$0xff] }
 0x80a   :  { %v6466_v57 = vsub.f32 %v6451_v54, %v12243_v0  ;;  %v6453_v62 = vmul.f32 %v6451_v54, %v12773_v38 }
 0x80b   :  { %v10293_v27 = vpop.eup %10292  ;;  %10306 = vrcp.f32 %v6809_v56  ;;  %v9761_v56 = vld [vmem:[#allocation13 + $0x68] ss:$16 sps:$4 sm:$0xff]  }
 0x80c   :  { %v6452_v6 = vmul.f32 %v10293_v27, %v10291_v37  ;;  %10308 = vrcp.f32 %v6808_v34  ;;  %v6468_v11 = vmul.f32 %v6466_v57, %v12773_v38  ;;  %v10295_v55 = vpop.eup %10294  ;;  %v9748_v38 = vld [vmem:[#allocation13 + $0xa4] ss:$16 sps:$4 sm:$0xff]   ;;  %v9758_v34 = vld [vmem:[#allocation13 + $0x60] ss:$16 sps:$4 sm:$0xff]   ;;  %v9769_v27 = vld [vmem:[#allocation13 + $0x4c] ss:$16 sps:$4 sm:$0xff]  }
 0x80d   :  { %v6807_v51 = vadd.f32 1.0, %v10295_v55  ;;  %v9766_v57 = vld [vmem:[#allocation13 + $0x44] ss:$16 sps:$4 sm:$0xff]   ;;  %v9773_v55 = vld [vmem:[#allocation13 + $0x28] ss:$16 sps:$4 sm:$0xff]  }
 0x80e   :  { %v6454_v47 = vmul.f32 %v6452_v6, %v12774_v52  ;;  %v6467_v26 = vsub.f32 %v6452_v6, %v12246_v7  ;;  %v6470_v1 = vadd.f32 %v6468_v11, %v12243_v0  ;;  %v9775_v11 = vld [vmem:[#allocation13 + $0x2c] ss:$16 sps:$4 sm:$0xff]  }
 0x80f   :  { %10310 = vrcp.f32 %v6807_v51 }
 0x810   :  { %v9144_v9 = vpack.c.bf16 %v6454_v47, %v6453_v62  ;;  %v6469_v2 = vmul.f32 %v6467_v26, %v12774_v52  ;;  %v9767_v62 = vld [vmem:[#allocation13 + $0x48] ss:$16 sps:$4 sm:$0xff]   ;;  %v9772_v26 = vld [vmem:[#allocation13 + $0x24] ss:$16 sps:$4 sm:$0xff]  }
 0x811   :  { %v10297_v46 = vpop.eup %10296 }
 0x812   :  { %9145 = vst [vmem:[#allocation4 + $0x30] sm:$0xff] %v9144_v9   ;;  %v6471_v29 = vadd.f32 %v6469_v2, %v12246_v7  ;;  %v10299_v41 = vpop.eup %10298  ;;  %v6828_v40 = vmul.f32 2.0, %v10297_v46  ;;  %v9740_v7 = vld [vmem:[#allocation13 + $0xc0] ss:$16 sps:$4 sm:$0xff]  }
 0x813   :  { %v6832_v4 = vmul.f32 %v10299_v41, %v12268_v31  ;;  %v10301_v43 = vpop.eup %10300  ;;  %v9781_v41 = vld [vmem:[#allocation13 + $0xc] ss:$16 sps:$4 sm:$0xff]  }
 0x814   :  { %v6882_v28 = vpack.c.bf16 %v6471_v29, %v6470_v1  ;;  %v8860_v20 = vadd.f32 -1.0, %v6828_v40  ;;  %v9778_v29 = vld [vmem:[#allocation13 + $0x4] ss:$16 sps:$4 sm:$0xff]  }
 0x815   :  { %v10303_v14 = vpop.eup %10302 }
 0x816   :  { %7108 = vmatmul.mubr.bf16.vlgmr.msra.gmra.mxu0 %v6882_v28  ;;  %7151 = vmatmul.mubr.bf16.vlgmr.msra.gmra.mxu1 %v6882_v28  ;;  %v10305_v19 = vpop.eup %10304  ;;  %v6834_v17 = vmul.f32 %v10301_v43, %v8860_v20  ;;  %v6829_v0 = vmul.f32 2.0, %v10303_v14  ;;  %v9779_v28 = vld [vmem:[#allocation13 + $0x8] ss:$16 sps:$4 sm:$0xff]  }
 0x817   :  { %7452 = vmatpush1.bf16.msra.mxu0 %v9734_v23  ;;  %7495 = vmatpush1.bf16.msra.mxu1 %v9737_v24  ;;  %v6811_v52 = vadd.f32 1.0, %v10305_v19  ;;  %v9782_v43 = vld [vmem:[%s12451_s8 + $0x38] sm:$0xff]  }
 0x818   :  { %v10307_v61 = vpop.eup %10306  ;;  %7453 = vmatprep.subr.bf16.mxu0 %v9742_v33  ;;  %7496 = vmatprep.subr.bf16.mxu1 %v9745_v45  ;;  %v6836_v13 = vadd.f32 %v6834_v17, %v6832_v4  ;;  %v8861_v48 = vadd.f32 -1.0, %v6829_v0  ;;  %v9776_v4 = vld [vmem:[#allocation13] ss:$16 sps:$4 sm:$0xff]  }
 0x819   :  { %v6833_v63 = vmul.f32 %v10307_v61, %v12276_v53  ;;  %7483 = vmatprep.mubr.bf16.mxu0 %v12624_v18  ;;  %7526 = vmatprep.mubr.bf16.mxu1 %v12624_v18  ;;  %v10309_v25 = vpop.eup %10308  ;;  %v9784_v0 = vld [vmem:[%s12451_s8 + $0x30] sm:$0xff]  }
 0x81a   :  { %10312 = vtanh.f32 %v6836_v13  ;;  %v6861_v21 = vsub.f32 %v6836_v13, %v12268_v31  ;;  %v6835_v22 = vmul.f32 %v10309_v25, %v8861_v48  ;;  %v9788_v61 = vld [vmem:[%s12451_s8 + $0x10] sm:$0xff]   ;;  %v9791_v13 = vld [vmem:[#allocation4 + $0x8] sm:$0xff]   ;;  %v9794_v25 = vld [vmem:[#allocation4 + $0x20] sm:$0xff]  }
 0x81b   :  { %7454 = vmatpush1.bf16.msra.mxu0 %v9740_v7  ;;  %7497 = vmatpush1.bf16.msra.mxu1 %v9743_v39  ;;  %10314 = vrcp.f32 %v6811_v52  ;;  %v9783_v7 = vld [vmem:[#allocation4] sm:$0xff]   ;;  %v9785_v39 = vld [vmem:[%s12451_s8 + $0x28] sm:$0xff]   ;;  %v9792_v48 = vld [vmem:[#allocation4 + $0x10] sm:$0xff]  }
 0x81c   :  { %7455 = vmatprep.subr.bf16.mxu0 %v9748_v38  ;;  %7498 = vmatprep.subr.bf16.mxu1 %v9751_v15  ;;  %v6837_v49 = vadd.f32 %v6835_v22, %v6833_v63  ;;  %v6863_v59 = vmul.f32 %v6861_v21, %v12775_v50  ;;  %v10311_v6 = vpop.eup %10310  ;;  %v9789_v38 = vld [vmem:[%s12451_s8 + $0x8] sm:$0xff]   ;;  %v9790_v15 = vld [vmem:[%s12451_s8] sm:$0xff]   ;;  %v9793_v63 = vld [vmem:[#allocation4 + $0x18] sm:$0xff]  }
 0x81d   :  { %v9795_v52 = vld [vmem:[#allocation4 + $0x28] sm:$0xff]   ;;  %v9796_v21 = vld [vmem:[#allocation4 + $0x30] sm:$0xff]   ;;  %v9797_v22 = vld [vmem:[#allocation15 + $0x38] sm:$0xff]  }
 0x81e   :  { %10316 = vtanh.f32 %v6837_v49  ;;  %v6862_v18 = vsub.f32 %v6837_v49, %v12276_v53  ;;  %v12354_v60 = vadd.f32 %v6863_v59, %v12268_v31  ;;  %v9764_v31 = vld [vmem:[#allocation13 + $0x40] ss:$16 sps:$4 sm:$0xff]  }
 0x81f   :  { %7456 = vmatpush1.bf16.msra.mxu0 %v9746_v16  ;;  %7499 = vmatpush1.bf16.msra.mxu1 %v9749_v10  ;;  %v9799_v16 = vld [vmem:[#allocation15 + $0x30] sm:$0xff]   ;;  %v9800_v10 = vld [vmem:[#allocation15 + $0x28] sm:$0xff]   ;;  %v9805_v59 = vld [vmem:[#allocation15] sm:$0xff]  }
 0x820   :  { %7457 = vmatprep.subr.bf16.mxu0 %v9754_v35  ;;  %7500 = vmatprep.subr.bf16.mxu1 %v9757_v8  ;;  %v6864_v54 = vmul.f32 %v6862_v18, %v12776_v32  ;;  %v9801_v35 = vld [vmem:[#allocation15 + $0x20] sm:$0xff]   ;;  %v9802_v8 = vld [vmem:[#allocation15 + $0x18] sm:$0xff]   ;;  %v9803_v49 = vld [vmem:[#allocation15 + $0x10] sm:$0xff]  }
 0x821   :  { %v12777_v18 = vld [vmem:[#allocation45_spill] sm:$0xff] }
 0x822   :  { %v12358_v37 = vadd.f32 %v6864_v54, %v12276_v53  ;;  %v9770_v53 = vld [vmem:[#allocation13 + $0x20] ss:$16 sps:$4 sm:$0xff]  }
 0x823   :  { %7458 = vmatpush1.bf16.msra.mxu0 %v9752_v58  ;;  %7501 = vmatpush1.bf16.msra.mxu1 %v9755_v30  ;;  %v6874_v58 = vunpack.c.l.bf16 %v12777_v18  ;;  %v12778_v30 = vld [vmem:[#allocation46_spill] sm:$0xff] }
 0x824   :  { %7459 = vmatprep.subr.bf16.mxu0 %v9760_v44  ;;  %7502 = vmatprep.subr.bf16.mxu1 %v9763_v12  ;;  %v6876_v44 = vunpack.c.l.bf16 %v12778_v30 }
 0x827   :  { %7460 = vmatpush1.bf16.msra.mxu0 %v9758_v34  ;;  %7503 = vmatpush1.bf16.msra.mxu1 %v9761_v56  ;;  %v10313_v47 = vpop.eup %10312  ;;  %v6875_v56 = vunpack.c.h.bf16 %v12777_v18 }
 0x828   :  { %7461 = vmatprep.subr.bf16.mxu0 %v9766_v57  ;;  %7504 = vmatprep.subr.bf16.mxu1 %v9769_v27  ;;  %v6840_v9 = vmul.f32 %v10313_v47, %v10311_v6  ;;  %v10315_v2 = vpop.eup %10314  ;;  %v12779_v47 = vld [vmem:[#allocation47_spill] sm:$0xff] }
 0x82a   :  { %v6855_v46 = vsub.f32 %v6840_v9, %v12301_v42  ;;  %v6842_v23 = vmul.f32 %v6840_v9, %v12775_v50  ;;  %v12780_v9 = vld [vmem:[#allocation48_spill] sm:$0xff] }
 0x82b   :  { %7462 = vmatpush1.bf16.msra.mxu0 %v9764_v31  ;;  %7505 = vmatpush1.bf16.msra.mxu1 %v9767_v62  ;;  %v10317_v1 = vpop.eup %10316 }
 0x82c   :  { %7463 = vmatprep.subr.bf16.mxu0 %v9772_v26  ;;  %7506 = vmatprep.subr.bf16.mxu1 %v9775_v11  ;;  %v6841_v40 = vmul.f32 %v10317_v1, %v10315_v2  ;;  %v6857_v45 = vmul.f32 %v6855_v46, %v12775_v50  ;;  %v9804_v50 = vld [vmem:[#allocation15 + $0x8] sm:$0xff]   ;;  %v6878_v26 = vunpack.c.l.bf16 %v12779_v47  ;;  %v6880_v2 = vunpack.c.l.bf16 %v12780_v9 }
 0x82d   :  { %v6879_v1 = vunpack.c.h.bf16 %v12779_v47 }
 0x82e   :  { %v6843_v24 = vmul.f32 %v6841_v40, %v12776_v32  ;;  %v6856_v33 = vsub.f32 %v6841_v40, %v12304_v36  ;;  %v6859_v51 = vadd.f32 %v6857_v45, %v12301_v42  ;;  %v9786_v42 = vld [vmem:[%s12451_s8 + $0x20] sm:$0xff]  }
 0x82f   :  { %7464 = vmatpush1.bf16.msra.mxu0 %v9770_v53  ;;  %7507 = vmatpush1.bf16.msra.mxu1 %v9773_v55 }
 0x830   :  { %7465 = vmatprep.subr.bf16.mxu0 %v9778_v29  ;;  %7508 = vmatprep.subr.bf16.mxu1 %v9781_v41  ;;  %v9149_v20 = vpack.c.bf16 %v6843_v24, %v6842_v23  ;;  %v6858_v14 = vmul.f32 %v6856_v33, %v12776_v32 }
 0x832   :  { %9150 = vst [vmem:[#allocation5 + $0x8] sm:$0xff] %v9149_v20   ;;  %v6860_v19 = vadd.f32 %v6858_v14, %v12304_v36  ;;  %v9787_v36 = vld [vmem:[%s12451_s8 + $0x18] sm:$0xff]  }
 0x833   :  { %7466 = vmatpush1.bf16.msra.mxu0 %v9776_v4  ;;  %7509 = vmatpush1.bf16.msra.mxu1 %v9779_v28  ;;  %v6877_v28 = vunpack.c.h.bf16 %v12778_v30 }
 0x834   :  { %9225 = vmatprep.subr.bf16.mxu1 %v9782_v43  ;;  %v7258_v17 = vpack.c.bf16 %v6860_v19, %v6859_v51  ;;  %9193 = vmatprep.subr.bf16.mxu0 %v9797_v22 }
 0x836   :  { %7484 = vmatmul.mubr.bf16.vlgmr.msra.gmra.mxu0 %v7258_v17  ;;  %7527 = vmatmul.mubr.bf16.vlgmr.msra.gmra.mxu1 %v7258_v17 }
 0x837   :  { %9226 = vmatpush3.bf16.msra.mxu1 %v9782_v43  ;;  %9241 = vmatprep.mubr.bf16.mxu1 %v9783_v7  ;;  %v6881_v43 = vunpack.c.h.bf16 %v12780_v9 }
 0x838   :  { %9227 = vmatprep.subr.bf16.mxu1 %v9784_v0  ;;  %9194 = vmatpush3.bf16.msra.mxu0 %v9797_v22 }
 0x839   :  { %9195 = vmatprep.subr.bf16.mxu0 %v9799_v16 }
 0x83b   :  { %9228 = vmatpush3.bf16.msra.mxu1 %v9784_v0 }
 0x83c   :  { %9229 = vmatprep.subr.bf16.mxu1 %v9785_v39  ;;  %9196 = vmatpush3.bf16.msra.mxu0 %v9799_v16 }
 0x83d   :  { %9197 = vmatprep.subr.bf16.mxu0 %v9800_v10 }
 0x83f   :  { %9230 = vmatpush3.bf16.msra.mxu1 %v9785_v39 }
 0x840   :  { %9231 = vmatprep.subr.bf16.mxu1 %v9786_v42  ;;  %9198 = vmatpush3.bf16.msra.mxu0 %v9800_v10 }
 0x841   :  { %9199 = vmatprep.subr.bf16.mxu0 %v9801_v35 }
 0x843   :  { %9232 = vmatpush3.bf16.msra.mxu1 %v9786_v42 }
 0x844   :  { %9233 = vmatprep.subr.bf16.mxu1 %v9787_v36  ;;  %9200 = vmatpush3.bf16.msra.mxu0 %v9801_v35 }
 0x845   :  { %9201 = vmatprep.subr.bf16.mxu0 %v9802_v8 }
 0x847   :  { %9234 = vmatpush3.bf16.msra.mxu1 %v9787_v36 }
 0x848   :  { %9235 = vmatprep.subr.bf16.mxu1 %v9788_v61  ;;  %9202 = vmatpush3.bf16.msra.mxu0 %v9802_v8 }
 0x849   :  { %9203 = vmatprep.subr.bf16.mxu0 %v9803_v49 }
 0x84b   :  { %9236 = vmatpush3.bf16.msra.mxu1 %v9788_v61 }
 0x84c   :  { %9237 = vmatprep.subr.bf16.mxu1 %v9789_v38  ;;  %9204 = vmatpush3.bf16.msra.mxu0 %v9803_v49 }
 0x84d   :  { %9205 = vmatprep.subr.bf16.mxu0 %v9804_v50 }
 0x84f   :  { %9238 = vmatpush3.bf16.msra.mxu1 %v9789_v38 }
 0x850   :  { %9239 = vmatprep.subr.bf16.mxu1 %v9790_v15  ;;  %9206 = vmatpush3.bf16.msra.mxu0 %v9804_v50 }
 0x851   :  { %9207 = vmatprep.subr.bf16.mxu0 %v9805_v59 }
 0x853   :  { %9240 = vmatpush3.bf16.msra.mxu1 %v9790_v15 }
 0x854   :  { %9208 = vmatpush3.bf16.msra.mxu0 %v9805_v59 }
 0x856   :  { %9242 = vmatmul.mubr.bf16.vlgmr.msra.gmra.mxu1 %v9791_v13 }
 0x857   :  { %9245 = vmatprep.mubr.bf16.mxu1 %v9792_v48 }
 0x85e   :  { %9246 = vmatmul.mubr.bf16.gmra.mxu1 %v9793_v63  ;;  %v12781_v63 = vld [vmem:[#allocation49_spill] sm:$0xff] }
 0x85f   :  { %9249 = vmatprep.mubr.bf16.mxu1 %v9794_v25  ;;  %v7250_v25 = vunpack.c.l.bf16 %v12781_v63  ;;  %v7251_v49 = vunpack.c.h.bf16 %v12781_v63 }
 0x866   :  { %9250 = vmatmul.mubr.bf16.gmra.mxu1 %v9795_v52  ;;  %v12782_v52 = vld [vmem:[#allocation50_spill] sm:$0xff] }
 0x867   :  { %9253 = vmatprep.mubr.bf16.mxu1 %v9796_v21  ;;  %v7252_v21 = vunpack.c.l.bf16 %v12782_v52 }
 0x8d6   :  { %v7109_v12 = vpop.f32.mrf.mxu0  ;;  %v7152_v32 = vpop.f32.mrf.mxu1 }
 0x8d7   :  { %v7161_v54 = vadd.f32 %v7109_v12, %v6874_v58  ;;  %v7163_v34 = vadd.f32 %v7152_v32, %v6876_v44  ;;  %v12783_v58 = vld [vmem:[#allocation51_spill] sm:$0xff] }
 0x8d8   :  { %v7111_v57 = vpop.f32.mrf.mxu0  ;;  %v7154_v27 = vpop.f32.mrf.mxu1  ;;  %v7254_v30 = vunpack.c.l.bf16 %v12783_v58 }
 0x8d9   :  { %v8896_v6 = vmul.f32 -1.442695, %v7161_v54  ;;  %v8898_v31 = vmul.f32 -1.442695, %v7163_v34  ;;  %v7162_v62 = vadd.f32 %v7111_v57, %v6875_v56  ;;  %v7164_v33 = vadd.f32 %v7154_v27, %v6877_v28 }
 0x8da   :  { %v7113_v11 = vpop.f32.mrf.mxu0  ;;  %v7156_v53 = vpop.f32.mrf.mxu1 }
 0x8db   :  { %10318 = vpow2.f32 %v8896_v6  ;;  %v8897_v55 = vmul.f32 -1.442695, %v7162_v62  ;;  %v7165_v46 = vadd.f32 %v7113_v11, %v6878_v26  ;;  %v7167_v29 = vadd.f32 %v7156_v53, %v6880_v2 }
 0x8dc   :  { %10320 = vpow2.f32 %v8898_v31  ;;  %v7115_v41 = vpop.f32.mrf.mxu0  ;;  %v7158_v45 = vpop.f32.mrf.mxu1  ;;  %v8899_v14 = vmul.f32 -1.442695, %v7164_v33  ;;  %v12784_v31 = vld [vmem:[#allocation52_spill] sm:$0xff] }
 0x8dd   :  { %10322 = vpow2.f32 %v8897_v55  ;;  %v8900_v40 = vmul.f32 -1.442695, %v7165_v46  ;;  %v7166_v23 = vadd.f32 %v7115_v41, %v6879_v1  ;;  %v8902_v24 = vmul.f32 -1.442695, %v7167_v29 }
 0x8de   :  { %v7168_v20 = vadd.f32 %v7158_v45, %v6881_v43  ;;  %v7256_v62 = vunpack.c.l.bf16 %v12784_v31  ;;  %v7255_v46 = vunpack.c.h.bf16 %v12783_v58 }
 0x8df   :  { %10324 = vpow2.f32 %v8900_v40  ;;  %v8901_v4 = vmul.f32 -1.442695, %v7166_v23 }
 0x8e0   :  { %10326 = vpow2.f32 %v8902_v24  ;;  %v8903_v7 = vmul.f32 -1.442695, %v7168_v20 }
 0x8e1   :  { %10328 = vpow2.f32 %v8901_v4 }
 0x8e2   :  { %10330 = vpow2.f32 %v8899_v14 }
 0x8e8   :  { %v10319_v51 = vpop.eup %10318 }
 0x8e9   :  { %v10321_v19 = vpop.eup %10320  ;;  %v7193_v39 = vadd.f32 1.0, %v10319_v51  ;;  %v7253_v51 = vunpack.c.h.bf16 %v12782_v52 }
 0x8ea   :  { %v10323_v17 = vpop.eup %10322  ;;  %v7195_v0 = vadd.f32 1.0, %v10321_v19 }
 0x8eb   :  { %v7194_v42 = vadd.f32 1.0, %v10323_v17 }
 0x8ec   :  { %v10325_v36 = vpop.eup %10324  ;;  %10332 = vrcp.f32 %v7195_v0 }
 0x8ed   :  { %v10327_v61 = vpop.eup %10326  ;;  %10334 = vrcp.f32 %v7194_v42  ;;  %v7197_v48 = vadd.f32 1.0, %v10325_v36 }
 0x8ee   :  { %v10329_v38 = vpop.eup %10328  ;;  %v7199_v15 = vadd.f32 1.0, %v10327_v61  ;;  %10336 = vpow2.f32 %v8903_v7  ;;  %v7257_v7 = vunpack.c.h.bf16 %v12784_v31 }
 0x8ef   :  { %10338 = vrcp.f32 %v7193_v39  ;;  %v7198_v13 = vadd.f32 1.0, %v10329_v38  ;;  %v10331_v10 = vpop.eup %10330 }
 0x8f0   :  { %10340 = vrcp.f32 %v7199_v15  ;;  %v7196_v27 = vadd.f32 1.0, %v10331_v10 }
 0x8f1   :  { %10342 = vrcp.f32 %v7198_v13 }
 0x8f2   :  { %10344 = vrcp.f32 %v7197_v48 }
 0x8f6   :  { %v7485_v22 = vpop.f32.mrf.mxu0  ;;  %v7528_v16 = vpop.f32.mrf.mxu1 }
 0x8f7   :  { %v7537_v35 = vadd.f32 %v7485_v22, %v7250_v25  ;;  %v7539_v8 = vadd.f32 %v7528_v16, %v7252_v21 }
 0x8f8   :  { %v7487_v59 = vpop.f32.mrf.mxu0  ;;  %v7530_v18 = vpop.f32.mrf.mxu1 }
 0x8f9   :  { %v10333_v50 = vpop.eup %10332  ;;  %v8940_v32 = vmul.f32 -1.442695, %v7537_v35  ;;  %v8942_v54 = vmul.f32 -1.442695, %v7539_v8  ;;  %v7538_v34 = vadd.f32 %v7487_v59, %v7251_v49  ;;  %v7540_v17 = vadd.f32 %v7530_v18, %v7253_v51  ;;  %v12785_v18 = vld [vmem:[#allocation75_spill] sm:$0xff]  ;;  %v9807_v51 = vld [vmem:[#allocation5 + $0x8] sm:$0xff]  }
 0x8fa   :  { %v10335_v44 = vpop.eup %10334  ;;  %v7217_v12 = vmul.f32 2.0, %v10333_v50  ;;  %v7489_v6 = vpop.f32.mrf.mxu0 }
 0x8fb   :  { %v10337_v56 = vpop.eup %10336  ;;  %v7221_v57 = vmul.f32 %v10335_v44, %v12331_v5  ;;  %v7532_v47 = vpop.f32.mrf.mxu1  ;;  %10346 = vpow2.f32 %v8940_v32  ;;  %v8941_v9 = vmul.f32 -1.442695, %v7538_v34  ;;  %v7541_v2 = vadd.f32 %v7489_v6, %v7254_v30  ;;  %v12786_v30 = vld [vmem:[#allocation76_spill] sm:$0xff] }
 0x8fc   :  { %v10339_v26 = vpop.eup %10338  ;;  %v8904_v11 = vadd.f32 -1.0, %v7217_v12  ;;  %10348 = vpow2.f32 %v8942_v54  ;;  %v7543_v55 = vadd.f32 %v7532_v47, %v7256_v62  ;;  %v7491_v1 = vpop.f32.mrf.mxu0  ;;  %v7200_v43 = vadd.f32 1.0, %v10337_v56 }
 0x8fd   :  { %v10341_v53 = vpop.eup %10340  ;;  %10350 = vpow2.f32 %v8941_v9  ;;  %v8944_v5 = vmul.f32 -1.442695, %v7541_v2  ;;  %v7542_v4 = vadd.f32 %v7491_v1, %v7255_v46  ;;  %v7534_v0 = vpop.f32.mrf.mxu1 }
 0x8fe   :  { %v10343_v29 = vpop.eup %10342  ;;  %v7223_v41 = vmul.f32 %v10339_v26, %v8904_v11  ;;  %v7218_v40 = vmul.f32 2.0, %v10341_v53  ;;  %10352 = vrcp.f32 %v7196_v27  ;;  %v8946_v24 = vmul.f32 -1.442695, %v7543_v55 }
 0x8ff   :  { %v7222_v23 = vmul.f32 %v10343_v29, %v12336_v3  ;;  %10354 = vpow2.f32 %v8944_v5  ;;  %v10345_v45 = vpop.eup %10344  ;;  %v8945_v20 = vmul.f32 -1.442695, %v7542_v4  ;;  %v8943_v3 = vmul.f32 -1.442695, %v7540_v17  ;;  %v9809_v17 = vld [vmem:[#allocation5 + $0x18] sm:$0xff]  }
 0x900   :  { %v7225_v28 = vadd.f32 %v7223_v41, %v7221_v57  ;;  %v8905_v33 = vadd.f32 -1.0, %v7218_v40  ;;  %10356 = vpow2.f32 %v8946_v24  ;;  %v7544_v36 = vadd.f32 %v7534_v0, %v7257_v7  ;;  %v9810_v0 = vld [vmem:[#allocation5 + $0x20] sm:$0xff]   ;;  %v9812_v7 = vld [vmem:[#allocation5 + $0x30] sm:$0xff]  }
 0x902   :  { %10358 = vtanh.f32 %v7225_v28  ;;  %v7224_v14 = vmul.f32 %v10345_v45, %v8905_v33  ;;  %v8947_v52 = vmul.f32 -1.442695, %v7544_v36  ;;  %v12787_v33 = vld [vmem:[#allocation73_spill] sm:$0xff] }
 0x903   :  { %10360 = vpow2.f32 %v8945_v20 }
 0x904   :  { %v7226_v19 = vadd.f32 %v7224_v14, %v7222_v23  ;;  %10362 = vrcp.f32 %v7200_v43  ;;  %v12788_v43 = vld [vmem:[#allocation74_spill] sm:$0xff] }
 0x906   :  { %10364 = vtanh.f32 %v7226_v19  ;;  %v9808_v19 = vld [vmem:[#allocation5 + $0x10] sm:$0xff]  }
 0x907   :  { %10366 = vpow2.f32 %v8943_v3  ;;  %v9811_v3 = vld [vmem:[#allocation5 + $0x28] sm:$0xff]  }
 0x908   :  { %v10347_v39 = vpop.eup %10346 }
 0x909   :  { %v10349_v42 = vpop.eup %10348  ;;  %v7569_v13 = vadd.f32 1.0, %v10347_v39  ;;  %v9813_v39 = vld [vmem:[#allocation5 + $0x38] sm:$0xff]  }
 0x90a   :  { %v10351_v61 = vpop.eup %10350  ;;  %v7571_v38 = vadd.f32 1.0, %v10349_v42 }
 0x90b   :  { %v10353_v15 = vpop.eup %10352  ;;  %v7570_v48 = vadd.f32 1.0, %v10351_v61 }
 0x90c   :  { %v10355_v63 = vpop.eup %10354  ;;  %10368 = vrcp.f32 %v7571_v38 }
 0x90d   :  { %v10357_v25 = vpop.eup %10356  ;;  %10370 = vrcp.f32 %v7570_v48  ;;  %v7573_v35 = vadd.f32 1.0, %v10355_v63 }
 0x90e   :  { %v7575_v22 = vadd.f32 1.0, %v10357_v25  ;;  %10372 = vrcp.f32 %v7569_v13 }
 0x90f   :  { %v10359_v21 = vpop.eup %10358 }
 0x910   :  { %v10361_v16 = vpop.eup %10360  ;;  %v7229_v10 = vmul.f32 %v10359_v21, %v10353_v15  ;;  %10374 = vrcp.f32 %v7575_v22 }
 0x911   :  { %v7574_v8 = vadd.f32 1.0, %v10361_v16  ;;  %v10363_v49 = vpop.eup %10362  ;;  %10376 = vpow2.f32 %v8947_v52  ;;  %v12419_v52 = vld [vmem:[%s12453_s10] ss:$0 sm:$0xff]  ;;  %s10602_s10 = smov [#allocation19]  }
 0x912   :  { %v7231_v58 = vmul.f32 %v7229_v10, %v12785_v18  ;;  %s8113_s22 = sshll.u32 %s10602_s10, 4  ;;  %s8114_s22 = int_to_ptr.vmem [resolvable:$true] %s8113_s22 }
 0x913   :  { %v10365_v50 = vpop.eup %10364  ;;  %10378 = vrcp.f32 %v7574_v8  ;;  %s10558_s24 = scalar_lea.vmem %s8114_s22, 2048  ;;  %p10563_p8 = scmp.lt.s32.totalorder %s8114_s22, %s8114_s22 }
 0x914   :  { %v7230_v59 = vmul.f32 %v10365_v50, %v10363_v49  ;;  %10380 = vrcp.f32 %v7573_v35  ;;  %v10367_v32 = vpop.eup %10366  ;;  %p10559_p7 = scmp.ne.s32.totalorder %s8114_s22, %s10558_s24  ;;  %p10564_p9 = scmp.lt.s32.totalorder %s10558_s24, %s10558_s24 }
 0x915   :  { %v7572_v62 = vadd.f32 1.0, %v10367_v32 }
 0x916   :  { %v7232_v44 = vmul.f32 %v7230_v59, %v12786_v30  ;;  %v9243_v42 = vpop.f32.mrf.mxu1  ;;  %p10565_p10 = por %p10564_p9, %p10563_p8 }
 0x917   :  { %10382 = vrcp.f32 %v7572_v62 }
 0x918   :  { %v9154_v12 = vpack.c.bf16 %v7232_v44, %v7231_v58  ;;  %v8006_v36 = vpop.f32.mrf.mxu1  ;;  %p10566_p11 = pnand %p10565_p10, %p10559_p7 }
 0x919   :  { %v10369_v54 = vpop.eup %10368 }
 0x91a   :  { %9155 = vst [vmem:[#allocation4 + $0x38] sm:$0xff] %v9154_v12   ;;  %v10371_v34 = vpop.eup %10370  ;;  %v7593_v56 = vmul.f32 2.0, %v10369_v54  ;;  %v9244_v61 = vpop.f32.mrf.mxu1 }
 0x91b   :  { %v7597_v57 = vmul.f32 %v10371_v34, %v12354_v60  ;;  %v10373_v27 = vpop.eup %10372 }
 0x91c   :  { %v8948_v6 = vadd.f32 -1.0, %v7593_v56  ;;  %v8009_v38 = vpop.f32.mrf.mxu1 }
 0x91d   :  { %v10375_v31 = vpop.eup %10374 }
 0x91e   :  { %v10377_v47 = vpop.eup %10376  ;;  %v7599_v26 = vmul.f32 %v10373_v27, %v8948_v6  ;;  %v7594_v11 = vmul.f32 2.0, %v10375_v31  ;;  %v9247_v15 = vpop.f32.mrf.mxu1 }
 0x91f   :  { %v7576_v29 = vadd.f32 1.0, %v10377_v47 }
 0x920   :  { %v10379_v9 = vpop.eup %10378  ;;  %v7601_v2 = vadd.f32 %v7599_v26, %v7597_v57  ;;  %v8949_v53 = vadd.f32 -1.0, %v7594_v11  ;;  %v8022_v13 = vpop.f32.mrf.mxu1 }
 0x921   :  { %v7598_v55 = vmul.f32 %v10379_v9, %v12358_v37  ;;  %v9798_v46 = vld [vmem:[#allocation4 + $0x38] sm:$0xff]   ;;  %v10381_v1 = vpop.eup %10380 }
 0x922   :  { %10384 = vtanh.f32 %v7601_v2  ;;  %v7600_v41 = vmul.f32 %v10381_v1, %v8949_v53  ;;  %9254 = vmatmul.mubr.bf16.gmra.mxu1 %v9798_v46  ;;  %v9248_v48 = vpop.f32.mrf.mxu1 }
 0x923   :  { %10386 = vrcp.f32 %v7576_v29 }
 0x924   :  { %v7602_v60 = vadd.f32 %v7600_v41, %v7598_v55  ;;  %v10383_v40 = vpop.eup %10382  ;;  %v8025_v63 = vpop.f32.mrf.mxu1 }
 0x926   :  { %10388 = vtanh.f32 %v7602_v60  ;;  %v9251_v35 = vpop.f32.mrf.mxu1 }
 0x928   :  { %v8038_v30 = vpop.f32.mrf.mxu1 }
 0x92a   :  { %v9252_v57 = vpop.f32.mrf.mxu1 }
 0x92c   :  { %v8041_v11 = vpop.f32.mrf.mxu1 }
 0x92f   :  { %v10385_v5 = vpop.eup %10384 }
 0x930   :  { %v7605_v23 = vmul.f32 %v10385_v5, %v10383_v40  ;;  %v10387_v24 = vpop.eup %10386 }
 0x932   :  { %v7607_v45 = vmul.f32 %v7605_v23, %v12787_v33 }
 0x933   :  { %v10389_v4 = vpop.eup %10388 }
 0x934   :  { %v7606_v28 = vmul.f32 %v10389_v4, %v10387_v24 }
 0x936   :  { %v7608_v37 = vmul.f32 %v7606_v28, %v12788_v43 }
 0x938   :  { %v9159_v20 = vpack.c.bf16 %v7608_v37, %v7607_v45 }
 0x93a   :  { %9160 = vst [vmem:[#allocation5] sm:$0xff] %v9159_v20  }
 0x941   :  { %v9806_v14 = vld [vmem:[#allocation5] sm:$0xff]  }
 0x942   :  { %9209 = vmatprep.mubr.bf16.mxu0 %v9806_v14 }
 0x943   :  { %9210 = vmatmul.mubr.bf16.vlgmr.msra.gmra.mxu0 %v9807_v51 }
 0x944   :  { %9213 = vmatprep.mubr.bf16.mxu0 %v9808_v19 }
 0x94b   :  { %9214 = vmatmul.mubr.bf16.gmra.mxu0 %v9809_v17 }
 0x94c   :  { %9217 = vmatprep.mubr.bf16.mxu0 %v9810_v0 }
 0x953   :  { %9218 = vmatmul.mubr.bf16.gmra.mxu0 %v9811_v3 }
 0x954   :  { %9221 = vmatprep.mubr.bf16.mxu0 %v9812_v7 }
 0x95b   :  { %9222 = vmatmul.mubr.bf16.gmra.mxu0 %v9813_v39 }
 0x9e2   :  { %v9255_v55 = vpop.f32.mrf.mxu1 }
 0x9e4   :  { %v8054_v5 = vpop.f32.mrf.mxu1 }
 0x9e6   :  { %v9256_v43 = vpop.f32.mrf.mxu1 }
 0x9e8   :  { %v8057_v0 = vpop.f32.mrf.mxu1 }
 0xa03   :  { %v9211_v25 = vpop.f32.mrf.mxu0 }
 0xa04   :  { %v8015_v21 = vadd.f32 %v9243_v42, %v9211_v25 }
 0xa05   :  { %v7813_v22 = vpop.f32.mrf.mxu0 }
 0xa06   :  { %v8078_v16 = vadd.f32 %v12419_v52, %v8015_v21  ;;  %v8007_v10 = vadd.f32 %v8006_v36, %v7813_v22 }
 0xa07   :  { %v9212_v8 = vpop.f32.mrf.mxu0 }
 0xa08   :  { %8094 = vst [vmem:[#allocation19 + $0x10] sm:$0xff] %v8078_v16  ;;  %v8076_v49 = vadd.f32 %v12419_v52, %v8007_v10  ;;  %v8018_v50 = vadd.f32 %v9244_v61, %v9212_v8 }
 0xa09   :  { %v7816_v59 = vpop.f32.mrf.mxu0 }
 0xa0a   :  { %8092 = vst [vmem:[#allocation19] sm:$0xff] %v8076_v49  ;;  %v8079_v18 = vadd.f32 %v12419_v52, %v8018_v50  ;;  %v8010_v58 = vadd.f32 %v8009_v38, %v7816_v59 }
 0xa0b   :  { %v9215_v44 = vpop.f32.mrf.mxu0 }
 0xa0c   :  { %8095 = vst [vmem:[#allocation19 + $0x18] sm:$0xff] %v8079_v18  ;;  %v8077_v12 = vadd.f32 %v12419_v52, %v8010_v58  ;;  %v8031_v32 = vadd.f32 %v9247_v15, %v9215_v44 }
 0xa0d   :  { %v7829_v54 = vpop.f32.mrf.mxu0 }
 0xa0e   :  { %8093 = vst [vmem:[#allocation19 + $0x8] sm:$0xff] %v8077_v12  ;;  %v8082_v34 = vadd.f32 %v12419_v52, %v8031_v32  ;;  %v8023_v56 = vadd.f32 %v8022_v13, %v7829_v54 }
 0xa0f   :  { %v9216_v27 = vpop.f32.mrf.mxu0 }
 0xa10   :  { %8098 = vst [vmem:[#allocation19 + $0x30] sm:$0xff] %v8082_v34  ;;  %v8080_v6 = vadd.f32 %v12419_v52, %v8023_v56  ;;  %v8034_v31 = vadd.f32 %v9248_v48, %v9216_v27 }
 0xa11   :  { %v7832_v62 = vpop.f32.mrf.mxu0 }
 0xa12   :  { %8096 = vst [vmem:[#allocation19 + $0x20] sm:$0xff] %v8080_v6  ;;  %v8083_v47 = vadd.f32 %v12419_v52, %v8034_v31  ;;  %v8026_v26 = vadd.f32 %v8025_v63, %v7832_v62 }
 0xa13   :  { %v9219_v9 = vpop.f32.mrf.mxu0 }
 0xa14   :  { %8099 = vst [vmem:[#allocation19 + $0x38] sm:$0xff] %v8083_v47  ;;  %v8081_v2 = vadd.f32 %v12419_v52, %v8026_v26  ;;  %v8047_v53 = vadd.f32 %v9251_v35, %v9219_v9 }
 0xa15   :  { %v7845_v46 = vpop.f32.mrf.mxu0 }
 0xa16   :  { %8097 = vst [vmem:[#allocation19 + $0x28] sm:$0xff] %v8081_v2  ;;  %v8086_v1 = vadd.f32 %v12419_v52, %v8047_v53  ;;  %v8039_v29 = vadd.f32 %v8038_v30, %v7845_v46 }
 0xa17   :  { %v9220_v41 = vpop.f32.mrf.mxu0 }
 0xa18   :  { %8102 = vst [vmem:[#allocation19 + $0x50] sm:$0xff] %v8086_v1  ;;  %v8084_v60 = vadd.f32 %v12419_v52, %v8039_v29  ;;  %v8050_v40 = vadd.f32 %v9252_v57, %v9220_v41 }
 0xa19   :  { %v7848_v23 = vpop.f32.mrf.mxu0 }
 0xa1a   :  { %8100 = vst [vmem:[#allocation19 + $0x40] sm:$0xff] %v8084_v60  ;;  %v8087_v24 = vadd.f32 %v12419_v52, %v8050_v40  ;;  %v8042_v4 = vadd.f32 %v8041_v11, %v7848_v23 }
 0xa1b   :  { %v9223_v28 = vpop.f32.mrf.mxu0 }
 0xa1c   :  { %8103 = vst [vmem:[#allocation19 + $0x58] sm:$0xff] %v8087_v24  ;;  %v8085_v33 = vadd.f32 %v12419_v52, %v8042_v4  ;;  %v8063_v45 = vadd.f32 %v9255_v55, %v9223_v28 }
 0xa1d   :  { %v7861_v37 = vpop.f32.mrf.mxu0 }
 0xa1e   :  { %8101 = vst [vmem:[#allocation19 + $0x48] sm:$0xff] %v8085_v33  ;;  %v8090_v20 = vadd.f32 %v12419_v52, %v8063_v45  ;;  %v8055_v14 = vadd.f32 %v8054_v5, %v7861_v37 }
 0xa1f   :  { %v9224_v51 = vpop.f32.mrf.mxu0 }
 0xa20   :  { %8106 = vst [vmem:[#allocation19 + $0x70] sm:$0xff] %v8090_v20  ;;  %v8088_v19 = vadd.f32 %v12419_v52, %v8055_v14  ;;  %v8066_v17 = vadd.f32 %v9256_v43, %v9224_v51 }
 0xa21   :  { %v7864_v3 = vpop.f32.mrf.mxu0 }
 0xa22   :  { %8104 = vst [vmem:[#allocation19 + $0x60] sm:$0xff] %v8088_v19  ;;  %v8091_v7 = vadd.f32 %v12419_v52, %v8066_v17  ;;  %v8058_v39 = vadd.f32 %v8057_v0, %v7864_v3 }
 0xa24   :  { %8107 = vst [vmem:[#allocation19 + $0x78] sm:$0xff] %v8091_v7  ;;  %v8089_v42 = vadd.f32 %v12419_v52, %v8058_v39 }
 0xa26   :  { %8105 = vst [vmem:[#allocation19 + $0x68] sm:$0xff] %v8089_v42 }
 0xa27   :  { %10569 = shalt.err (!%p10566_p11)
}
 0xa28   :  { %8119 = dma.vmem_to_hbm [thread:$0]  %s8114_s22, 2048, %s12456_s13, [#allocation9], %s10593_s3, %s10593_s3, %s10594_s23  }
 0xa29   :  { %10586 = dma.done.wait [#allocation9], 2048  }
 0xa2a   :  { %10587 = vsyncadd [#allocation9], 4294965248 }
 0xa2b   :  { %8123 = vsyncpa [#allocation8], 1 }
 0xa2c   :  { %8124 = vsyncpa [#allocation11], 1 }
 0xa2d   :  { %8125 = vsyncpa [#allocation14], 1 }
 0xa2e   :  { %8126 = vsyncpa [#allocation17], 1 }
 0xa2f   :  { %8127 = vsyncpa [#allocation9], 1 }

</bundles_post_ra>
